<compile_context>
chip_gen: v5e
topology: v5e:2x2
jax: 0.10.0
libtpu: 0.0.40
codegen_flags: <defaults>
</compile_context>

<pallas_src>
import math
import functools

import jax
import jax.numpy as jnp
from jax.experimental import pallas as pl
from jax.experimental.pallas import tpu as pltpu

_LOG2PI = float(math.log(2.0 * math.pi))
_CPARAMS = pltpu.CompilerParams(
    dimension_semantics=("parallel",),
    vmem_limit_bytes=32 * 1024 * 1024,
)


# ----------------------------------------------------------------------------
# Pallas kernels
# ----------------------------------------------------------------------------
def _apply_act(y, act):
    if act == "relu":
        return jnp.maximum(y, 0.0)
    if act == "lrelu":
        return jnp.where(y > 0.0, y, 0.2 * y)
    return y


def _make_taps(H, W, nine):
    """3x3-conv tap contraction on a VMEM-resident slab (bf16 in, f32 acc)."""
    HW = H * W

    def taps(x_ref, w_ref):
        if nine:                                   # single (HW,9C)@(9C,Co) dot
            return jnp.dot(x_ref[0], w_ref[...],
                           preferred_element_type=jnp.float32)
        acc = jnp.dot(x_ref[0, 0:HW, :], w_ref[0],
                      preferred_element_type=jnp.float32)
        for dy in (1, 2):                          # static, unrolled; W>=16 so
            acc = acc + jnp.dot(                   # offsets are 16-row aligned
                x_ref[0, dy * W:dy * W + HW, :], w_ref[dy],
                preferred_element_type=jnp.float32)
        return acc

    return taps


def _make_conv_kernel(H, W, nine, act, fuse_1x1):
    """Same-pad 3x3 conv (bf16 MXU dots, f32 acc), optional fused trailing
    1x1 conv on the VMEM-resident tile; bf16 output."""
    taps = _make_taps(H, W, nine)
    if fuse_1x1:
        def kernel(x_ref, w_ref, b_ref, w2_ref, b2_ref, o_ref):
            y = _apply_act(taps(x_ref, w_ref) + b_ref[...], act)
            y = jnp.dot(y.astype(jnp.bfloat16), w2_ref[...],
                        preferred_element_type=jnp.float32) + b2_ref[...]
            o_ref[0] = _apply_act(y, act).astype(jnp.bfloat16)
    else:
        def kernel(x_ref, w_ref, b_ref, o_ref):
            o_ref[0] = _apply_act(taps(x_ref, w_ref) + b_ref[...],
                                  act).astype(jnp.bfloat16)
    return kernel


def _make_coupling_kernel(H, W, nine, with_matmul):
    """Fused coupling: f() final 3x3 conv (shift & raw-scale halves as two
    tap-dot groups) + optional folded ActNorm∘inv-1x1 matmul + affine +
    per-batch sum(log scale) logdet partial (never written at full size)."""
    taps = _make_taps(H, W, nine)

    if with_matmul:
        def kernel(h_ref, ws_ref, wr_ref, bs_ref, br_ref,
                   z_ref, wp_ref, bp_ref, o_ref, ld_ref):
            shift = taps(h_ref, ws_ref) + bs_ref[...]
            raw = taps(h_ref, wr_ref) + br_ref[...]
            y = jnp.dot(z_ref[0].astype(jnp.bfloat16), wp_ref[...],
                        preferred_element_type=jnp.float32) + bp_ref[...]
            s = jax.nn.sigmoid(raw + 2.0) + 1e-4
            o_ref[0] = (y + shift) * s
            ld_ref[0] = jnp.sum(jnp.log(s), axis=0, keepdims=True)
    else:
        def kernel(h_ref, ws_ref, wr_ref, bs_ref, br_ref,
                   z_ref, o_ref, ld_ref):
            shift = taps(h_ref, ws_ref) + bs_ref[...]
            raw = taps(h_ref, wr_ref) + br_ref[...]
            s = jax.nn.sigmoid(raw + 2.0) + 1e-4
            o_ref[0] = (z_ref[0] + shift) * s
            ld_ref[0] = jnp.sum(jnp.log(s), axis=0, keepdims=True)
    return kernel


# ----------------------------------------------------------------------------
# Pallas wrappers (grid over batch, whole image per block, NHWC, bf16 slabs)
# ----------------------------------------------------------------------------
def _conv_slab(x_bf16, H, W, nine):
    """Build the bf16 im2col slab in XLA: 9-tap (B,HW,9C) when `nine`, else
    the 3-dx slab (B,(H+2)*W,3C) with the dy taps taken in-kernel."""
    B, C = x_bf16.shape[0], x_bf16.shape[-1]
    xp = jnp.pad(x_bf16, ((0, 0), (1, 1), (1, 1), (0, 0)))
    if nine:
        slab = jnp.concatenate(
            [xp[:, dy:dy + H, dx:dx + W, :]
             for dy in range(3) for dx in range(3)], axis=-1)
        return slab.reshape(B, H * W, 9 * C)
    slab = jnp.concatenate([xp[:, :, dx:dx + W, :] for dx in range(3)], axis=-1)
    return slab.reshape(B, (H + 2) * W, 3 * C)


def conv3x3(x, cp, act=None, cp2=None):
    """Same-padded 3x3 conv with prepacked bf16 weights (cp={"w","b"}),
    optionally fused with a trailing 1x1 conv (cp2). NHWC in, bf16 NHWC out."""
    B, H, W, C = x.shape
    Cout = cp["w"].shape[-1]
    HW = H * W
    nine = (9 * C <= 128) or (W < 16)
    slab = _conv_slab(x.astype(jnp.bfloat16), H, W, nine)
    rows = slab.shape[1]
    if nine:
        wk = cp["w"].reshape(9 * C, Cout)
        w_spec = pl.BlockSpec((9 * C, Cout), lambda i: (0, 0))
    else:
        wk = cp["w"]
        w_spec = pl.BlockSpec((3, 3 * C, Cout), lambda i: (0, 0, 0))

    in_specs = [pl.BlockSpec((1, rows, slab.shape[-1]), lambda i: (i, 0, 0)),
                w_spec,
                pl.BlockSpec((1, Cout), lambda i: (0, 0))]
    args = [slab, wk, cp["b"]]
    out_ch = Cout
    if cp2 is not None:
        C2 = cp2["w"].shape[-1]
        in_specs += [pl.BlockSpec((Cout, C2), lambda i: (0, 0)),
                     pl.BlockSpec((1, C2), lambda i: (0, 0))]
        args += [cp2["w"], cp2["b"]]
        out_ch = C2

    out = pl.pallas_call(
        _make_conv_kernel(H, W, nine, act, cp2 is not None),
        out_shape=jax.ShapeDtypeStruct((B, HW, out_ch), jnp.bfloat16),
        grid=(B,),
        in_specs=in_specs,
        out_specs=pl.BlockSpec((1, HW, out_ch), lambda i: (i, 0, 0)),
        compiler_params=_CPARAMS,
    )(*args)
    return out.reshape(B, H, W, out_ch)


def pallas_coupling(h, fp, z, wp=None, bp=None):
    """Fused coupling on a per-image block:
        shift, raw = conv3x3(h) with split prepacked halves
        y = z @ W' + b'  (folded ActNorm∘inv-1x1, bf16 MXU)  if wp given else z
        z_out = (y + shift) * (sigmoid(raw+2)+eps)
    plus the per-batch sum(log scale) logdet partial. z stays f32 end-to-end."""
    B, H, W, hidden = h.shape
    C = z.shape[-1]
    HW = H * W
    nine = (9 * hidden <= 128) or (W < 16)
    slab = _conv_slab(h.astype(jnp.bfloat16), H, W, nine)
    rows = slab.shape[1]
    if nine:
        ws = fp["ws"].reshape(9 * hidden, C)
        wr = fp["wr"].reshape(9 * hidden, C)
        w_spec = pl.BlockSpec((9 * hidden, C), lambda i: (0, 0))
    else:
        ws, wr = fp["ws"], fp["wr"]
        w_spec = pl.BlockSpec((3, 3 * hidden, C), lambda i: (0, 0, 0))

    zf = z.reshape(B, HW, C).astype(jnp.float32)
    in_specs = [pl.BlockSpec((1, rows, slab.shape[-1]), lambda i: (i, 0, 0)),
                w_spec, w_spec,
                pl.BlockSpec((1, C), lambda i: (0, 0)),
                pl.BlockSpec((1, C), lambda i: (0, 0)),
                pl.BlockSpec((1, HW, C), lambda i: (i, 0, 0))]
    args = [slab, ws, wr, fp["bs"], fp["br"], zf]
    with_mm = wp is not None
    if with_mm:
        in_specs += [pl.BlockSpec((C, C), lambda i: (0, 0)),
                     pl.BlockSpec((1, C), lambda i: (0, 0))]
        args += [wp, bp]

    out, ld = pl.pallas_call(
        _make_coupling_kernel(H, W, nine, with_mm),
        out_shape=(jax.ShapeDtypeStruct((B, HW, C), jnp.float32),
                   jax.ShapeDtypeStruct((B, 1, C), jnp.float32)),
        grid=(B,),
        in_specs=in_specs,
        out_specs=(pl.BlockSpec((1, HW, C), lambda i: (i, 0, 0)),
                   pl.BlockSpec((1, 1, C), lambda i: (i, 0, 0))),
        compiler_params=_CPARAMS,
    )(*args)
    return out.reshape(B, H, W, C), jnp.sum(ld, axis=(1, 2))


# ----------------------------------------------------------------------------
# Glue: NHWC helpers, RRDB encoder, flow plumbing (plain JAX, small tensors)
# ----------------------------------------------------------------------------
def upsample2(x):                               # NHWC nearest-neighbor x2
    return jnp.repeat(jnp.repeat(x, 2, axis=1), 2, axis=2)


def squeeze2d(x, factor=2):                     # NHWC, glow (c, fy, fx) order
    B, H, W, C = x.shape
    x = x.reshape(B, H // factor, factor, W // factor, factor, C)
    x = x.transpose(0, 1, 3, 5, 2, 4)
    return x.reshape(B, H // factor, W // factor, C * factor * factor)


def rrdb_forward(lr, p):
    """Simplified RRDBNet encoder returning the rrdbResults feature dict."""
    fea = conv3x3(lr, p["cf"])
    x1 = conv3x3(fea, p["d1"], act="lrelu")
    x2 = conv3x3(jnp.concatenate([fea, x1], -1), p["d2"], act="lrelu")
    x3 = conv3x3(jnp.concatenate([fea, x1, x2], -1), p["fuse"])
    block = fea + 0.2 * x3
    trunk = conv3x3(block, p["trunk"])
    fea = fea + trunk
    up2 = conv3x3(upsample2(fea), p["up2"], act="lrelu")
    up4 = conv3x3(upsample2(up2), p["up4"], act="lrelu")
    hr = conv3x3(up4, p["hr"], act="lrelu")
    out = conv3x3(hr, p["last"])
    return {"last_lr_fea": fea, "fea_up1": fea, "fea_up2": up2,
            "fea_up4": up4, "out": out}


def flow_step(z, ft, p, logdet):
    """ActNorm -> inv1x1 -> feature-conditional affine -> self affine.
    ActNorm is folded into the 1x1 at prepare time; each affine coupling is a
    single fused Pallas kernel (f() final conv + matmul + affine + logdet)."""
    B, H, W, Cz = z.shape
    M = H * W

    # Feature-conditional coupling + folded ActNorm∘inv1x1 (one fused kernel).
    h = conv3x3(ft, p["fFeat"]["c1"], act="relu", cp2=p["fFeat"]["c2"])
    z, ld1 = pallas_coupling(h, p["fFeat"], z, wp=p["wp"], bp=p["bp"])
    logdet = logdet + float(M) * p["logabsdet"] + ld1

    # Self-conditional affine: (z1, ft) parameterizes the affine on z2.
    Ch = Cz // 2
    z1, z2 = z[..., :Ch], z[..., Ch:]
    h2 = conv3x3(jnp.concatenate([z1.astype(jnp.bfloat16), ft], axis=-1),
                 p["fAff"]["c1"], act="relu", cp2=p["fAff"]["c2"])
    z2, ld2 = pallas_coupling(h2, p["fAff"], z2)
    logdet = logdet + ld2
    z = jnp.concatenate([z1, z2], axis=-1)
    return z, logdet


_FT_KEYS = ("fea_up2", "fea_up1")               # level 1: HR/2, level 2: HR/4


@functools.partial(jax.jit, static_argnames=("quant", "add_gt_noise"))
def srflownet_normal_flow(gt, lr, params, noise_key, quant=255.0,
                          add_gt_noise=True):
    """SRFlowNet.forward(gt, lr, reverse=False) -> (z, nll, logdet). NCHW I/O.
    `params` must be the output of prepare_params()."""
    B, C, H, W = gt.shape
    gt_nhwc = jnp.transpose(gt, (0, 2, 3, 1)).astype(jnp.float32)
    lr_nhwc = jnp.transpose(lr, (0, 2, 3, 1)).astype(jnp.float32)

    lr_enc = rrdb_forward(lr_nhwc, params["rrdb"])

    logdet = jnp.zeros((B,), jnp.float32)
    pixels = float(H * W)                       # thops.pixels(gt) = H*W
    z = gt_nhwc
    if add_gt_noise:
        z = z + (jax.random.uniform(noise_key, z.shape, jnp.float32) - 0.5) / quant
        logdet = logdet + float(-math.log(quant) * pixels)

    for lvl, level in enumerate(params["flow"]):
        z = squeeze2d(z, 2)
        ft = lr_enc[_FT_KEYS[lvl]]
        for step in level["steps"]:
            z, logdet = flow_step(z, ft, step, logdet)

    logp = jnp.sum(-0.5 * (z * z + _LOG2PI), axis=(1, 2, 3))   # GaussianDiag.logp
    objective = logdet + logp
    nll = -objective / float(math.log(2.0) * pixels)
    return jnp.transpose(z, (0, 3, 1, 2)), nll, logdet


# ----------------------------------------------------------------------------
# One-time weight prepacking (outside the jitted forward)
# ----------------------------------------------------------------------------
def _pack_conv3(w, b):
    """OIHW 3x3 conv weight -> (3, 3*Cin, Cout) bf16 tap matrix + (1,Cout) f32."""
    Cout, Cin = w.shape[0], w.shape[1]
    wpk = jnp.transpose(w, (2, 3, 1, 0)).reshape(3, 3 * Cin, Cout).astype(jnp.bfloat16)
    return {"w": wpk, "b": b.reshape(1, Cout).astype(jnp.float32)}


def _pack_conv1(w, b):
    Cout = w.shape[0]
    return {"w": w[:, :, 0, 0].T.astype(jnp.bfloat16),
            "b": b.reshape(1, Cout).astype(jnp.float32)}


def _pack_fnet(f, half):
    """f() stack: conv3x3 -> relu -> conv1x1 -> relu -> conv3x3; the final
    conv's output channels are split into contiguous shift / raw halves."""
    ws = _pack_conv3(f["w3"][:half], f["b3"][:half])
    wr = _pack_conv3(f["w3"][half:], f["b3"][half:])
    return {"c1": _pack_conv3(f["w1"], f["b1"]),
            "c2": _pack_conv1(f["w2"], f["b2"]),
            "ws": ws["w"], "bs": ws["b"],
            "wr": wr["w"], "br": wr["b"]}


def prepare_params(raw):
    """One-time packing: bf16 tap matrices, ActNorm folded into the inv-1x1
    (exact in f32), slogdet precomputed.  Run once, outside the jit."""
    rrdb = {k: _pack_conv3(raw["rrdb"][k + "_w"], raw["rrdb"][k + "_b"])
            for k in ("cf", "d1", "d2", "fuse", "trunk",
                      "up2", "up4", "hr", "last")}
    flow = []
    for level in raw["flow"]:
        steps = []
        for s in level["steps"]:
            Cz = s["w_inv"].shape[0]
            scale_an = jnp.exp(s["an_logs"].reshape(Cz))
            #   (z + b_an) * e^logs @ W == z @ (diag(e^logs) W) + (b_an*e^logs) @ W
            wp = scale_an[:, None] * s["w_inv"]
            bp = (s["an_bias"].reshape(Cz) * scale_an) @ s["w_inv"]
            # log|det wp| = sum(logs) + log|det W|; the sign is discarded on
            # purpose (Glow's logdet uses log|det| only).
            logabsdet = jnp.linalg.slogdet(wp)[1].astype(jnp.float32)
            steps.append({
                "wp": wp.astype(jnp.bfloat16),
                "bp": bp.reshape(1, Cz).astype(jnp.float32),
                "logabsdet": logabsdet,
                "fFeat": _pack_fnet(s["fFeat"], Cz),
                "fAff": _pack_fnet(s["fAff"], Cz // 2),
            })
        flow.append({"steps": steps})
    return {"rrdb": rrdb, "flow": flow}


# ----------------------------------------------------------------------------
# Deterministic parameter initialization (synthetic, no checkpoint load)
# ----------------------------------------------------------------------------
def init_params(key, nf=8, gc=8, hidden=16, K=2):
    keys = iter(jax.random.split(key, 256))

    def nrm(shape, s=0.1):
        return s * jax.random.normal(next(keys), shape, jnp.float32)

    rrdb = {
        "cf_w": nrm((nf, 3, 3, 3)), "cf_b": jnp.zeros((nf,), jnp.float32),
        "d1_w": nrm((gc, nf, 3, 3)), "d1_b": jnp.zeros((gc,), jnp.float32),
        "d2_w": nrm((gc, nf + gc, 3, 3)), "d2_b": jnp.zeros((gc,), jnp.float32),
        "fuse_w": nrm((nf, nf + 2 * gc, 3, 3)), "fuse_b": jnp.zeros((nf,), jnp.float32),
        "trunk_w": nrm((nf, nf, 3, 3)), "trunk_b": jnp.zeros((nf,), jnp.float32),
        "up2_w": nrm((nf, nf, 3, 3)), "up2_b": jnp.zeros((nf,), jnp.float32),
        "up4_w": nrm((nf, nf, 3, 3)), "up4_b": jnp.zeros((nf,), jnp.float32),
        "hr_w": nrm((nf, nf, 3, 3)), "hr_b": jnp.zeros((nf,), jnp.float32),
        "last_w": nrm((3, nf, 3, 3)), "last_b": jnp.zeros((3,), jnp.float32),
    }

    flow = []
    C = 3
    for _level in range(2):
        C = C * 4
        steps = []
        for _ in range(K):
            w_inv, _ = jnp.linalg.qr(
                jax.random.normal(next(keys), (C, C), jnp.float32))
            steps.append({
                "an_bias": nrm((1, C), 0.05),
                "an_logs": nrm((1, C), 0.05),
                "w_inv": w_inv,
                "fFeat": {
                    "w1": nrm((hidden, nf, 3, 3)), "b1": jnp.zeros((hidden,), jnp.float32),
                    "w2": nrm((hidden, hidden, 1, 1)), "b2": jnp.zeros((hidden,), jnp.float32),
                    "w3": nrm((2 * C, hidden, 3, 3), 0.05), "b3": jnp.zeros((2 * C,), jnp.float32),
                },
                "fAff": {
                    "w1": nrm((hidden, C // 2 + nf, 3, 3)), "b1": jnp.zeros((hidden,), jnp.float32),
                    "w2": nrm((hidden, hidden, 1, 1)), "b2": jnp.zeros((hidden,), jnp.float32),
                    "w3": nrm((C, hidden, 3, 3), 0.05), "b3": jnp.zeros((C,), jnp.float32),
                },
            })
        flow.append({"steps": steps})

    return {"rrdb": rrdb, "flow": flow}


# ----------------------------------------------------------------------------
if __name__ == "__main__":
    key = jax.random.PRNGKey(0)
    k_param, k_gt, k_lr, k_noise = jax.random.split(key, 4)

    params = prepare_params(init_params(k_param))
    gt = jax.random.uniform(k_gt, (2, 3, 32, 32), jnp.float32)   # HR image
    lr = jax.random.uniform(k_lr, (2, 3, 8, 8), jnp.float32)     # LR image (scale=4)

    z, nll, logdet = srflownet_normal_flow(gt, lr, params, k_noise)
    jax.block_until_ready((z, nll, logdet))

    assert z.shape == (2, 48, 8, 8)
    assert nll.shape == (2,) and logdet.shape == (2,)
    assert bool(jnp.isfinite(nll).all()) and bool(jnp.isfinite(logdet).all())
    print("KERNEL_OK")
</pallas_src>

<mosaic_0001>
module attributes {stable_mosaic.version = 11 : i64} {
  func.func @kernel(%arg0: i32, %arg1: memref<1x64x27xbf16, #tpu.memory_space<vmem>>, %arg2: memref<27x8xbf16, #tpu.memory_space<vmem>>, %arg3: memref<1x8xf32, #tpu.memory_space<vmem>>, %arg4: memref<1x64x8xbf16, #tpu.memory_space<vmem>>) attributes {dimension_semantics = [#tpu.dimension_semantics<parallel>], iteration_bounds = array<i64: 2>, scalar_prefetch = 0 : i64, scratch_operands = 0 : i64, tpu.core_type = #tpu.core_type<tc>, window_params = [{transform_indices = @transform_0, window_bounds = array<i64: 1, 64, 27>}, {pipeline_mode = #tpu.pipeline_mode<synchronous>, transform_indices = @transform_1, window_bounds = array<i64: 27, 8>}, {pipeline_mode = #tpu.pipeline_mode<synchronous>, transform_indices = @transform_2, window_bounds = array<i64: 1, 8>}, {transform_indices = @transform_3, window_bounds = array<i64: 1, 64, 8>}]} {
    %c0 = arith.constant 0 : index
    %c0_0 = arith.constant 0 : index
    %c0_1 = arith.constant 0 : index
    %0 = vector.load %arg1[%c0, %c0_0, %c0_1] : memref<1x64x27xbf16, #tpu.memory_space<vmem>>, vector<1x64x27xbf16>
    %1 = vector.shape_cast %0 : vector<1x64x27xbf16> to vector<64x27xbf16>
    %c0_2 = arith.constant 0 : index
    %c0_3 = arith.constant 0 : index
    %2 = vector.load %arg2[%c0_2, %c0_3] : memref<27x8xbf16, #tpu.memory_space<vmem>>, vector<27x8xbf16>
    %cst = arith.constant dense<0.000000e+00> : vector<64x8xf32>
    %3 = tpu.matmul %1, %2, %cst {dimension_numbers = #tpu.dot_dimension_numbers<[1], [0], [0], [1], [0, 0, 1, 1], [], []>} : vector<64x27xbf16>, vector<27x8xbf16>, vector<64x8xf32> -> vector<64x8xf32>
    %c0_4 = arith.constant 0 : index
    %c0_5 = arith.constant 0 : index
    %4 = vector.load %arg3[%c0_4, %c0_5] : memref<1x8xf32, #tpu.memory_space<vmem>>, vector<1x8xf32>
    %5 = vector.broadcast %4 : vector<1x8xf32> to vector<64x8xf32>
    %6 = arith.addf %3, %5 : vector<64x8xf32>
    %7 = arith.truncf %6 : vector<64x8xf32> to vector<64x8xbf16>
    %c0_6 = arith.constant 0 : index
    %c0_7 = arith.constant 0 : index
    %c0_8 = arith.constant 0 : index
    %8 = vector.load %arg4[%c0_6, %c0_7, %c0_8] : memref<1x64x8xbf16, #tpu.memory_space<vmem>>, vector<1x64x8xbf16>
    %9 = vector.shape_cast %8 : vector<1x64x8xbf16> to vector<64x8xbf16>
    %10 = vector.shape_cast %7 : vector<64x8xbf16> to vector<1x64x8xbf16>
    tpu.vector_store %arg4[%c0_6, %c0_7, %c0_8], %10 {strides = array<i32>} : memref<1x64x8xbf16, #tpu.memory_space<vmem>>, vector<1x64x8xbf16>,
    return
  }
  func.func @transform_0(%arg0: i32) -> (i32, i32, i32) {
    %c0_i32 = arith.constant 0 : i32
    %c0_i32_0 = arith.constant 0 : i32
    %c0_i32_1 = arith.constant 0 : i32
    return %arg0, %c0_i32, %c0_i32_0 : i32, i32, i32
  }
  func.func @transform_1(%arg0: i32) -> (i32, i32) {
    %c0_i32 = arith.constant 0 : i32
    %c0_i32_0 = arith.constant 0 : i32
    %c0_i32_1 = arith.constant 0 : i32
    return %c0_i32, %c0_i32_0 : i32, i32
  }
  func.func @transform_2(%arg0: i32) -> (i32, i32) {
    %c0_i32 = arith.constant 0 : i32
    %c0_i32_0 = arith.constant 0 : i32
    %c0_i32_1 = arith.constant 0 : i32
    return %c0_i32, %c0_i32_0 : i32, i32
  }
  func.func @transform_3(%arg0: i32) -> (i32, i32, i32) {
    %c0_i32 = arith.constant 0 : i32
    %c0_i32_0 = arith.constant 0 : i32
    %c0_i32_1 = arith.constant 0 : i32
    return %arg0, %c0_i32, %c0_i32_0 : i32, i32, i32
  }
}

module attributes {stable_mosaic.version = 11 : i64} {
  func.func @kernel(%arg0: i32, %arg1: memref<1x64x72xbf16, #tpu.memory_space<vmem>>, %arg2: memref<72x8xbf16, #tpu.memory_space<vmem>>, %arg3: memref<1x8xf32, #tpu.memory_space<vmem>>, %arg4: memref<1x64x8xbf16, #tpu.memory_space<vmem>>) attributes {dimension_semantics = [#tpu.dimension_semantics<parallel>], iteration_bounds = array<i64: 2>, scalar_prefetch = 0 : i64, scratch_operands = 0 : i64, tpu.core_type = #tpu.core_type<tc>, window_params = [{transform_indices = @transform_0, window_bounds = array<i64: 1, 64, 72>}, {pipeline_mode = #tpu.pipeline_mode<synchronous>, transform_indices = @transform_1, window_bounds = array<i64: 72, 8>}, {pipeline_mode = #tpu.pipeline_mode<synchronous>, transform_indices = @transform_2, window_bounds = array<i64: 1, 8>}, {transform_indices = @transform_3, window_bounds = array<i64: 1, 64, 8>}]} {
    %c0 = arith.constant 0 : index
    %c0_0 = arith.constant 0 : index
    %c0_1 = arith.constant 0 : index
    %0 = vector.load %arg1[%c0, %c0_0, %c0_1] : memref<1x64x72xbf16, #tpu.memory_space<vmem>>, vector<1x64x72xbf16>
    %1 = vector.shape_cast %0 : vector<1x64x72xbf16> to vector<64x72xbf16>
    %c0_2 = arith.constant 0 : index
    %c0_3 = arith.constant 0 : index
    %2 = vector.load %arg2[%c0_2, %c0_3] : memref<72x8xbf16, #tpu.memory_space<vmem>>, vector<72x8xbf16>
    %cst = arith.constant dense<0.000000e+00> : vector<64x8xf32>
    %3 = tpu.matmul %1, %2, %cst {dimension_numbers = #tpu.dot_dimension_numbers<[1], [0], [0], [1], [0, 0, 1, 1], [], []>} : vector<64x72xbf16>, vector<72x8xbf16>, vector<64x8xf32> -> vector<64x8xf32>
    %c0_4 = arith.constant 0 : index
    %c0_5 = arith.constant 0 : index
    %4 = vector.load %arg3[%c0_4, %c0_5] : memref<1x8xf32, #tpu.memory_space<vmem>>, vector<1x8xf32>
    %5 = vector.broadcast %4 : vector<1x8xf32> to vector<64x8xf32>
    %6 = arith.addf %3, %5 : vector<64x8xf32>
    %cst_6 = arith.constant 0.000000e+00 : f32
    %7 = vector.broadcast %cst_6 : f32 to vector<64x8xf32>
    %8 = arith.cmpf ogt, %6, %7 : vector<64x8xf32>
    %cst_7 = arith.constant 2.000000e-01 : f32
    %9 = vector.broadcast %cst_7 : f32 to vector<64x8xf32>
    %10 = arith.mulf %9, %6 : vector<64x8xf32>
    %11 = arith.select %8, %6, %10 : vector<64x8xi1>, vector<64x8xf32>
    %12 = arith.truncf %11 : vector<64x8xf32> to vector<64x8xbf16>
    %c0_8 = arith.constant 0 : index
    %c0_9 = arith.constant 0 : index
    %c0_10 = arith.constant 0 : index
    %13 = vector.load %arg4[%c0_8, %c0_9, %c0_10] : memref<1x64x8xbf16, #tpu.memory_space<vmem>>, vector<1x64x8xbf16>
    %14 = vector.shape_cast %13 : vector<1x64x8xbf16> to vector<64x8xbf16>
    %15 = vector.shape_cast %12 : vector<64x8xbf16> to vector<1x64x8xbf16>
    tpu.vector_store %arg4[%c0_8, %c0_9, %c0_10], %15 {strides = array<i32>} : memref<1x64x8xbf16, #tpu.memory_space<vmem>>, vector<1x64x8xbf16>,
    return
  }
  func.func @transform_0(%arg0: i32) -> (i32, i32, i32) {
    %c0_i32 = arith.constant 0 : i32
    %c0_i32_0 = arith.constant 0 : i32
    %c0_i32_1 = arith.constant 0 : i32
    return %arg0, %c0_i32, %c0_i32_0 : i32, i32, i32
  }
  func.func @transform_1(%arg0: i32) -> (i32, i32) {
    %c0_i32 = arith.constant 0 : i32
    %c0_i32_0 = arith.constant 0 : i32
    %c0_i32_1 = arith.constant 0 : i32
    return %c0_i32, %c0_i32_0 : i32, i32
  }
  func.func @transform_2(%arg0: i32) -> (i32, i32) {
    %c0_i32 = arith.constant 0 : i32
    %c0_i32_0 = arith.constant 0 : i32
    %c0_i32_1 = arith.constant 0 : i32
    return %c0_i32, %c0_i32_0 : i32, i32
  }
  func.func @transform_3(%arg0: i32) -> (i32, i32, i32) {
    %c0_i32 = arith.constant 0 : i32
    %c0_i32_0 = arith.constant 0 : i32
    %c0_i32_1 = arith.constant 0 : i32
    return %arg0, %c0_i32, %c0_i32_0 : i32, i32, i32
  }
}

module attributes {stable_mosaic.version = 11 : i64} {
  func.func @kernel(%arg0: i32, %arg1: memref<1x64x144xbf16, #tpu.memory_space<vmem>>, %arg2: memref<144x8xbf16, #tpu.memory_space<vmem>>, %arg3: memref<1x8xf32, #tpu.memory_space<vmem>>, %arg4: memref<1x64x8xbf16, #tpu.memory_space<vmem>>) attributes {dimension_semantics = [#tpu.dimension_semantics<parallel>], iteration_bounds = array<i64: 2>, scalar_prefetch = 0 : i64, scratch_operands = 0 : i64, tpu.core_type = #tpu.core_type<tc>, window_params = [{transform_indices = @transform_0, window_bounds = array<i64: 1, 64, 144>}, {pipeline_mode = #tpu.pipeline_mode<synchronous>, transform_indices = @transform_1, window_bounds = array<i64: 144, 8>}, {pipeline_mode = #tpu.pipeline_mode<synchronous>, transform_indices = @transform_2, window_bounds = array<i64: 1, 8>}, {transform_indices = @transform_3, window_bounds = array<i64: 1, 64, 8>}]} {
    %c0 = arith.constant 0 : index
    %c0_0 = arith.constant 0 : index
    %c0_1 = arith.constant 0 : index
    %0 = vector.load %arg1[%c0, %c0_0, %c0_1] : memref<1x64x144xbf16, #tpu.memory_space<vmem>>, vector<1x64x144xbf16>
    %1 = vector.shape_cast %0 : vector<1x64x144xbf16> to vector<64x144xbf16>
    %c0_2 = arith.constant 0 : index
    %c0_3 = arith.constant 0 : index
    %2 = vector.load %arg2[%c0_2, %c0_3] : memref<144x8xbf16, #tpu.memory_space<vmem>>, vector<144x8xbf16>
    %cst = arith.constant dense<0.000000e+00> : vector<64x8xf32>
    %3 = tpu.matmul %1, %2, %cst {dimension_numbers = #tpu.dot_dimension_numbers<[1], [0], [0], [1], [0, 0, 1, 1], [], []>} : vector<64x144xbf16>, vector<144x8xbf16>, vector<64x8xf32> -> vector<64x8xf32>
    %c0_4 = arith.constant 0 : index
    %c0_5 = arith.constant 0 : index
    %4 = vector.load %arg3[%c0_4, %c0_5] : memref<1x8xf32, #tpu.memory_space<vmem>>, vector<1x8xf32>
    %5 = vector.broadcast %4 : vector<1x8xf32> to vector<64x8xf32>
    %6 = arith.addf %3, %5 : vector<64x8xf32>
    %cst_6 = arith.constant 0.000000e+00 : f32
    %7 = vector.broadcast %cst_6 : f32 to vector<64x8xf32>
    %8 = arith.cmpf ogt, %6, %7 : vector<64x8xf32>
    %cst_7 = arith.constant 2.000000e-01 : f32
    %9 = vector.broadcast %cst_7 : f32 to vector<64x8xf32>
    %10 = arith.mulf %9, %6 : vector<64x8xf32>
    %11 = arith.select %8, %6, %10 : vector<64x8xi1>, vector<64x8xf32>
    %12 = arith.truncf %11 : vector<64x8xf32> to vector<64x8xbf16>
    %c0_8 = arith.constant 0 : index
    %c0_9 = arith.constant 0 : index
    %c0_10 = arith.constant 0 : index
    %13 = vector.load %arg4[%c0_8, %c0_9, %c0_10] : memref<1x64x8xbf16, #tpu.memory_space<vmem>>, vector<1x64x8xbf16>
    %14 = vector.shape_cast %13 : vector<1x64x8xbf16> to vector<64x8xbf16>
    %15 = vector.shape_cast %12 : vector<64x8xbf16> to vector<1x64x8xbf16>
    tpu.vector_store %arg4[%c0_8, %c0_9, %c0_10], %15 {strides = array<i32>} : memref<1x64x8xbf16, #tpu.memory_space<vmem>>, vector<1x64x8xbf16>,
    return
  }
  func.func @transform_0(%arg0: i32) -> (i32, i32, i32) {
    %c0_i32 = arith.constant 0 : i32
    %c0_i32_0 = arith.constant 0 : i32
    %c0_i32_1 = arith.constant 0 : i32
    return %arg0, %c0_i32, %c0_i32_0 : i32, i32, i32
  }
  func.func @transform_1(%arg0: i32) -> (i32, i32) {
    %c0_i32 = arith.constant 0 : i32
    %c0_i32_0 = arith.constant 0 : i32
    %c0_i32_1 = arith.constant 0 : i32
    return %c0_i32, %c0_i32_0 : i32, i32
  }
  func.func @transform_2(%arg0: i32) -> (i32, i32) {
    %c0_i32 = arith.constant 0 : i32
    %c0_i32_0 = arith.constant 0 : i32
    %c0_i32_1 = arith.constant 0 : i32
    return %c0_i32, %c0_i32_0 : i32, i32
  }
  func.func @transform_3(%arg0: i32) -> (i32, i32, i32) {
    %c0_i32 = arith.constant 0 : i32
    %c0_i32_0 = arith.constant 0 : i32
    %c0_i32_1 = arith.constant 0 : i32
    return %arg0, %c0_i32, %c0_i32_0 : i32, i32, i32
  }
}

module attributes {stable_mosaic.version = 11 : i64} {
  func.func @kernel(%arg0: i32, %arg1: memref<1x64x216xbf16, #tpu.memory_space<vmem>>, %arg2: memref<216x8xbf16, #tpu.memory_space<vmem>>, %arg3: memref<1x8xf32, #tpu.memory_space<vmem>>, %arg4: memref<1x64x8xbf16, #tpu.memory_space<vmem>>) attributes {dimension_semantics = [#tpu.dimension_semantics<parallel>], iteration_bounds = array<i64: 2>, scalar_prefetch = 0 : i64, scratch_operands = 0 : i64, tpu.core_type = #tpu.core_type<tc>, window_params = [{transform_indices = @transform_0, window_bounds = array<i64: 1, 64, 216>}, {pipeline_mode = #tpu.pipeline_mode<synchronous>, transform_indices = @transform_1, window_bounds = array<i64: 216, 8>}, {pipeline_mode = #tpu.pipeline_mode<synchronous>, transform_indices = @transform_2, window_bounds = array<i64: 1, 8>}, {transform_indices = @transform_3, window_bounds = array<i64: 1, 64, 8>}]} {
    %c0 = arith.constant 0 : index
    %c0_0 = arith.constant 0 : index
    %c0_1 = arith.constant 0 : index
    %0 = vector.load %arg1[%c0, %c0_0, %c0_1] : memref<1x64x216xbf16, #tpu.memory_space<vmem>>, vector<1x64x216xbf16>
    %1 = vector.shape_cast %0 : vector<1x64x216xbf16> to vector<64x216xbf16>
    %c0_2 = arith.constant 0 : index
    %c0_3 = arith.constant 0 : index
    %2 = vector.load %arg2[%c0_2, %c0_3] : memref<216x8xbf16, #tpu.memory_space<vmem>>, vector<216x8xbf16>
    %cst = arith.constant dense<0.000000e+00> : vector<64x8xf32>
    %3 = tpu.matmul %1, %2, %cst {dimension_numbers = #tpu.dot_dimension_numbers<[1], [0], [0], [1], [0, 0, 1, 1], [], []>} : vector<64x216xbf16>, vector<216x8xbf16>, vector<64x8xf32> -> vector<64x8xf32>
    %c0_4 = arith.constant 0 : index
    %c0_5 = arith.constant 0 : index
    %4 = vector.load %arg3[%c0_4, %c0_5] : memref<1x8xf32, #tpu.memory_space<vmem>>, vector<1x8xf32>
    %5 = vector.broadcast %4 : vector<1x8xf32> to vector<64x8xf32>
    %6 = arith.addf %3, %5 : vector<64x8xf32>
    %7 = arith.truncf %6 : vector<64x8xf32> to vector<64x8xbf16>
    %c0_6 = arith.constant 0 : index
    %c0_7 = arith.constant 0 : index
    %c0_8 = arith.constant 0 : index
    %8 = vector.load %arg4[%c0_6, %c0_7, %c0_8] : memref<1x64x8xbf16, #tpu.memory_space<vmem>>, vector<1x64x8xbf16>
    %9 = vector.shape_cast %8 : vector<1x64x8xbf16> to vector<64x8xbf16>
    %10 = vector.shape_cast %7 : vector<64x8xbf16> to vector<1x64x8xbf16>
    tpu.vector_store %arg4[%c0_6, %c0_7, %c0_8], %10 {strides = array<i32>} : memref<1x64x8xbf16, #tpu.memory_space<vmem>>, vector<1x64x8xbf16>,
    return
  }
  func.func @transform_0(%arg0: i32) -> (i32, i32, i32) {
    %c0_i32 = arith.constant 0 : i32
    %c0_i32_0 = arith.constant 0 : i32
    %c0_i32_1 = arith.constant 0 : i32
    return %arg0, %c0_i32, %c0_i32_0 : i32, i32, i32
  }
  func.func @transform_1(%arg0: i32) -> (i32, i32) {
    %c0_i32 = arith.constant 0 : i32
    %c0_i32_0 = arith.constant 0 : i32
    %c0_i32_1 = arith.constant 0 : i32
    return %c0_i32, %c0_i32_0 : i32, i32
  }
  func.func @transform_2(%arg0: i32) -> (i32, i32) {
    %c0_i32 = arith.constant 0 : i32
    %c0_i32_0 = arith.constant 0 : i32
    %c0_i32_1 = arith.constant 0 : i32
    return %c0_i32, %c0_i32_0 : i32, i32
  }
  func.func @transform_3(%arg0: i32) -> (i32, i32, i32) {
    %c0_i32 = arith.constant 0 : i32
    %c0_i32_0 = arith.constant 0 : i32
    %c0_i32_1 = arith.constant 0 : i32
    return %arg0, %c0_i32, %c0_i32_0 : i32, i32, i32
  }
}

module attributes {stable_mosaic.version = 11 : i64} {
  func.func @kernel(%arg0: i32, %arg1: memref<1x64x72xbf16, #tpu.memory_space<vmem>>, %arg2: memref<72x8xbf16, #tpu.memory_space<vmem>>, %arg3: memref<1x8xf32, #tpu.memory_space<vmem>>, %arg4: memref<1x64x8xbf16, #tpu.memory_space<vmem>>) attributes {dimension_semantics = [#tpu.dimension_semantics<parallel>], iteration_bounds = array<i64: 2>, scalar_prefetch = 0 : i64, scratch_operands = 0 : i64, tpu.core_type = #tpu.core_type<tc>, window_params = [{transform_indices = @transform_0, window_bounds = array<i64: 1, 64, 72>}, {pipeline_mode = #tpu.pipeline_mode<synchronous>, transform_indices = @transform_1, window_bounds = array<i64: 72, 8>}, {pipeline_mode = #tpu.pipeline_mode<synchronous>, transform_indices = @transform_2, window_bounds = array<i64: 1, 8>}, {transform_indices = @transform_3, window_bounds = array<i64: 1, 64, 8>}]} {
    %c0 = arith.constant 0 : index
    %c0_0 = arith.constant 0 : index
    %c0_1 = arith.constant 0 : index
    %0 = vector.load %arg1[%c0, %c0_0, %c0_1] : memref<1x64x72xbf16, #tpu.memory_space<vmem>>, vector<1x64x72xbf16>
    %1 = vector.shape_cast %0 : vector<1x64x72xbf16> to vector<64x72xbf16>
    %c0_2 = arith.constant 0 : index
    %c0_3 = arith.constant 0 : index
    %2 = vector.load %arg2[%c0_2, %c0_3] : memref<72x8xbf16, #tpu.memory_space<vmem>>, vector<72x8xbf16>
    %cst = arith.constant dense<0.000000e+00> : vector<64x8xf32>
    %3 = tpu.matmul %1, %2, %cst {dimension_numbers = #tpu.dot_dimension_numbers<[1], [0], [0], [1], [0, 0, 1, 1], [], []>} : vector<64x72xbf16>, vector<72x8xbf16>, vector<64x8xf32> -> vector<64x8xf32>
    %c0_4 = arith.constant 0 : index
    %c0_5 = arith.constant 0 : index
    %4 = vector.load %arg3[%c0_4, %c0_5] : memref<1x8xf32, #tpu.memory_space<vmem>>, vector<1x8xf32>
    %5 = vector.broadcast %4 : vector<1x8xf32> to vector<64x8xf32>
    %6 = arith.addf %3, %5 : vector<64x8xf32>
    %7 = arith.truncf %6 : vector<64x8xf32> to vector<64x8xbf16>
    %c0_6 = arith.constant 0 : index
    %c0_7 = arith.constant 0 : index
    %c0_8 = arith.constant 0 : index
    %8 = vector.load %arg4[%c0_6, %c0_7, %c0_8] : memref<1x64x8xbf16, #tpu.memory_space<vmem>>, vector<1x64x8xbf16>
    %9 = vector.shape_cast %8 : vector<1x64x8xbf16> to vector<64x8xbf16>
    %10 = vector.shape_cast %7 : vector<64x8xbf16> to vector<1x64x8xbf16>
    tpu.vector_store %arg4[%c0_6, %c0_7, %c0_8], %10 {strides = array<i32>} : memref<1x64x8xbf16, #tpu.memory_space<vmem>>, vector<1x64x8xbf16>,
    return
  }
  func.func @transform_0(%arg0: i32) -> (i32, i32, i32) {
    %c0_i32 = arith.constant 0 : i32
    %c0_i32_0 = arith.constant 0 : i32
    %c0_i32_1 = arith.constant 0 : i32
    return %arg0, %c0_i32, %c0_i32_0 : i32, i32, i32
  }
  func.func @transform_1(%arg0: i32) -> (i32, i32) {
    %c0_i32 = arith.constant 0 : i32
    %c0_i32_0 = arith.constant 0 : i32
    %c0_i32_1 = arith.constant 0 : i32
    return %c0_i32, %c0_i32_0 : i32, i32
  }
  func.func @transform_2(%arg0: i32) -> (i32, i32) {
    %c0_i32 = arith.constant 0 : i32
    %c0_i32_0 = arith.constant 0 : i32
    %c0_i32_1 = arith.constant 0 : i32
    return %c0_i32, %c0_i32_0 : i32, i32
  }
  func.func @transform_3(%arg0: i32) -> (i32, i32, i32) {
    %c0_i32 = arith.constant 0 : i32
    %c0_i32_0 = arith.constant 0 : i32
    %c0_i32_1 = arith.constant 0 : i32
    return %arg0, %c0_i32, %c0_i32_0 : i32, i32, i32
  }
}

module attributes {stable_mosaic.version = 11 : i64} {
  func.func @kernel(%arg0: i32, %arg1: memref<1x256x72xbf16, #tpu.memory_space<vmem>>, %arg2: memref<72x8xbf16, #tpu.memory_space<vmem>>, %arg3: memref<1x8xf32, #tpu.memory_space<vmem>>, %arg4: memref<1x256x8xbf16, #tpu.memory_space<vmem>>) attributes {dimension_semantics = [#tpu.dimension_semantics<parallel>], iteration_bounds = array<i64: 2>, scalar_prefetch = 0 : i64, scratch_operands = 0 : i64, tpu.core_type = #tpu.core_type<tc>, window_params = [{transform_indices = @transform_0, window_bounds = array<i64: 1, 256, 72>}, {pipeline_mode = #tpu.pipeline_mode<synchronous>, transform_indices = @transform_1, window_bounds = array<i64: 72, 8>}, {pipeline_mode = #tpu.pipeline_mode<synchronous>, transform_indices = @transform_2, window_bounds = array<i64: 1, 8>}, {transform_indices = @transform_3, window_bounds = array<i64: 1, 256, 8>}]} {
    %c0 = arith.constant 0 : index
    %c0_0 = arith.constant 0 : index
    %c0_1 = arith.constant 0 : index
    %0 = vector.load %arg1[%c0, %c0_0, %c0_1] : memref<1x256x72xbf16, #tpu.memory_space<vmem>>, vector<1x256x72xbf16>
    %1 = vector.shape_cast %0 : vector<1x256x72xbf16> to vector<256x72xbf16>
    %c0_2 = arith.constant 0 : index
    %c0_3 = arith.constant 0 : index
    %2 = vector.load %arg2[%c0_2, %c0_3] : memref<72x8xbf16, #tpu.memory_space<vmem>>, vector<72x8xbf16>
    %cst = arith.constant dense<0.000000e+00> : vector<256x8xf32>
    %3 = tpu.matmul %1, %2, %cst {dimension_numbers = #tpu.dot_dimension_numbers<[1], [0], [0], [1], [0, 0, 1, 1], [], []>} : vector<256x72xbf16>, vector<72x8xbf16>, vector<256x8xf32> -> vector<256x8xf32>
    %c0_4 = arith.constant 0 : index
    %c0_5 = arith.constant 0 : index
    %4 = vector.load %arg3[%c0_4, %c0_5] : memref<1x8xf32, #tpu.memory_space<vmem>>, vector<1x8xf32>
    %5 = vector.broadcast %4 : vector<1x8xf32> to vector<256x8xf32>
    %6 = arith.addf %3, %5 : vector<256x8xf32>
    %cst_6 = arith.constant 0.000000e+00 : f32
    %7 = vector.broadcast %cst_6 : f32 to vector<256x8xf32>
    %8 = arith.cmpf ogt, %6, %7 : vector<256x8xf32>
    %cst_7 = arith.constant 2.000000e-01 : f32
    %9 = vector.broadcast %cst_7 : f32 to vector<256x8xf32>
    %10 = arith.mulf %9, %6 : vector<256x8xf32>
    %11 = arith.select %8, %6, %10 : vector<256x8xi1>, vector<256x8xf32>
    %12 = arith.truncf %11 : vector<256x8xf32> to vector<256x8xbf16>
    %c0_8 = arith.constant 0 : index
    %c0_9 = arith.constant 0 : index
    %c0_10 = arith.constant 0 : index
    %13 = vector.load %arg4[%c0_8, %c0_9, %c0_10] : memref<1x256x8xbf16, #tpu.memory_space<vmem>>, vector<1x256x8xbf16>
    %14 = vector.shape_cast %13 : vector<1x256x8xbf16> to vector<256x8xbf16>
    %15 = vector.shape_cast %12 : vector<256x8xbf16> to vector<1x256x8xbf16>
    tpu.vector_store %arg4[%c0_8, %c0_9, %c0_10], %15 {strides = array<i32>} : memref<1x256x8xbf16, #tpu.memory_space<vmem>>, vector<1x256x8xbf16>,
    return
  }
  func.func @transform_0(%arg0: i32) -> (i32, i32, i32) {
    %c0_i32 = arith.constant 0 : i32
    %c0_i32_0 = arith.constant 0 : i32
    %c0_i32_1 = arith.constant 0 : i32
    return %arg0, %c0_i32, %c0_i32_0 : i32, i32, i32
  }
  func.func @transform_1(%arg0: i32) -> (i32, i32) {
    %c0_i32 = arith.constant 0 : i32
    %c0_i32_0 = arith.constant 0 : i32
    %c0_i32_1 = arith.constant 0 : i32
    return %c0_i32, %c0_i32_0 : i32, i32
  }
  func.func @transform_2(%arg0: i32) -> (i32, i32) {
    %c0_i32 = arith.constant 0 : i32
    %c0_i32_0 = arith.constant 0 : i32
    %c0_i32_1 = arith.constant 0 : i32
    return %c0_i32, %c0_i32_0 : i32, i32
  }
  func.func @transform_3(%arg0: i32) -> (i32, i32, i32) {
    %c0_i32 = arith.constant 0 : i32
    %c0_i32_0 = arith.constant 0 : i32
    %c0_i32_1 = arith.constant 0 : i32
    return %arg0, %c0_i32, %c0_i32_0 : i32, i32, i32
  }
}

module attributes {stable_mosaic.version = 11 : i64} {
  func.func @kernel(%arg0: i32, %arg1: memref<1x256x72xbf16, #tpu.memory_space<vmem>>, %arg2: memref<72x16xbf16, #tpu.memory_space<vmem>>, %arg3: memref<1x16xf32, #tpu.memory_space<vmem>>, %arg4: memref<16x16xbf16, #tpu.memory_space<vmem>>, %arg5: memref<1x16xf32, #tpu.memory_space<vmem>>, %arg6: memref<1x256x16xbf16, #tpu.memory_space<vmem>>) attributes {dimension_semantics = [#tpu.dimension_semantics<parallel>], iteration_bounds = array<i64: 2>, scalar_prefetch = 0 : i64, scratch_operands = 0 : i64, tpu.core_type = #tpu.core_type<tc>, window_params = [{transform_indices = @transform_0, window_bounds = array<i64: 1, 256, 72>}, {pipeline_mode = #tpu.pipeline_mode<synchronous>, transform_indices = @transform_1, window_bounds = array<i64: 72, 16>}, {pipeline_mode = #tpu.pipeline_mode<synchronous>, transform_indices = @transform_2, window_bounds = array<i64: 1, 16>}, {pipeline_mode = #tpu.pipeline_mode<synchronous>, transform_indices = @transform_3, window_bounds = array<i64: 16, 16>}, {pipeline_mode = #tpu.pipeline_mode<synchronous>, transform_indices = @transform_4, window_bounds = array<i64: 1, 16>}, {transform_indices = @transform_5, window_bounds = array<i64: 1, 256, 16>}]} {
    %c0 = arith.constant 0 : index
    %c0_0 = arith.constant 0 : index
    %c0_1 = arith.constant 0 : index
    %0 = vector.load %arg1[%c0, %c0_0, %c0_1] : memref<1x256x72xbf16, #tpu.memory_space<vmem>>, vector<1x256x72xbf16>
    %1 = vector.shape_cast %0 : vector<1x256x72xbf16> to vector<256x72xbf16>
    %c0_2 = arith.constant 0 : index
    %c0_3 = arith.constant 0 : index
    %2 = vector.load %arg2[%c0_2, %c0_3] : memref<72x16xbf16, #tpu.memory_space<vmem>>, vector<72x16xbf16>
    %cst = arith.constant dense<0.000000e+00> : vector<256x16xf32>
    %3 = tpu.matmul %1, %2, %cst {dimension_numbers = #tpu.dot_dimension_numbers<[1], [0], [0], [1], [0, 0, 1, 1], [], []>} : vector<256x72xbf16>, vector<72x16xbf16>, vector<256x16xf32> -> vector<256x16xf32>
    %c0_4 = arith.constant 0 : index
    %c0_5 = arith.constant 0 : index
    %4 = vector.load %arg3[%c0_4, %c0_5] : memref<1x16xf32, #tpu.memory_space<vmem>>, vector<1x16xf32>
    %5 = vector.broadcast %4 : vector<1x16xf32> to vector<256x16xf32>
    %6 = arith.addf %3, %5 : vector<256x16xf32>
    %cst_6 = arith.constant 0.000000e+00 : f32
    %7 = vector.broadcast %cst_6 : f32 to vector<256x16xf32>
    %8 = arith.maximumf %6, %7 : vector<256x16xf32>
    %9 = arith.truncf %8 : vector<256x16xf32> to vector<256x16xbf16>
    %c0_7 = arith.constant 0 : index
    %c0_8 = arith.constant 0 : index
    %10 = vector.load %arg4[%c0_7, %c0_8] : memref<16x16xbf16, #tpu.memory_space<vmem>>, vector<16x16xbf16>
    %cst_9 = arith.constant dense<0.000000e+00> : vector<256x16xf32>
    %11 = tpu.matmul %9, %10, %cst_9 {dimension_numbers = #tpu.dot_dimension_numbers<[1], [0], [0], [1], [0, 0, 1, 1], [], []>} : vector<256x16xbf16>, vector<16x16xbf16>, vector<256x16xf32> -> vector<256x16xf32>
    %c0_10 = arith.constant 0 : index
    %c0_11 = arith.constant 0 : index
    %12 = vector.load %arg5[%c0_10, %c0_11] : memref<1x16xf32, #tpu.memory_space<vmem>>, vector<1x16xf32>
    %13 = vector.broadcast %12 : vector<1x16xf32> to vector<256x16xf32>
    %14 = arith.addf %11, %13 : vector<256x16xf32>
    %cst_12 = arith.constant 0.000000e+00 : f32
    %15 = vector.broadcast %cst_12 : f32 to vector<256x16xf32>
    %16 = arith.maximumf %14, %15 : vector<256x16xf32>
    %17 = arith.truncf %16 : vector<256x16xf32> to vector<256x16xbf16>
    %c0_13 = arith.constant 0 : index
    %c0_14 = arith.constant 0 : index
    %c0_15 = arith.constant 0 : index
    %18 = vector.load %arg6[%c0_13, %c0_14, %c0_15] : memref<1x256x16xbf16, #tpu.memory_space<vmem>>, vector<1x256x16xbf16>
    %19 = vector.shape_cast %18 : vector<1x256x16xbf16> to vector<256x16xbf16>
    %20 = vector.shape_cast %17 : vector<256x16xbf16> to vector<1x256x16xbf16>
    tpu.vector_store %arg6[%c0_13, %c0_14, %c0_15], %20 {strides = array<i32>} : memref<1x256x16xbf16, #tpu.memory_space<vmem>>, vector<1x256x16xbf16>,
    return
  }
  func.func @transform_0(%arg0: i32) -> (i32, i32, i32) {
    %c0_i32 = arith.constant 0 : i32
    %c0_i32_0 = arith.constant 0 : i32
    %c0_i32_1 = arith.constant 0 : i32
    return %arg0, %c0_i32, %c0_i32_0 : i32, i32, i32
  }
  func.func @transform_1(%arg0: i32) -> (i32, i32) {
    %c0_i32 = arith.constant 0 : i32
    %c0_i32_0 = arith.constant 0 : i32
    %c0_i32_1 = arith.constant 0 : i32
    return %c0_i32, %c0_i32_0 : i32, i32
  }
  func.func @transform_2(%arg0: i32) -> (i32, i32) {
    %c0_i32 = arith.constant 0 : i32
    %c0_i32_0 = arith.constant 0 : i32
    %c0_i32_1 = arith.constant 0 : i32
    return %c0_i32, %c0_i32_0 : i32, i32
  }
  func.func @transform_3(%arg0: i32) -> (i32, i32) {
    %c0_i32 = arith.constant 0 : i32
    %c0_i32_0 = arith.constant 0 : i32
    %c0_i32_1 = arith.constant 0 : i32
    return %c0_i32, %c0_i32_0 : i32, i32
  }
  func.func @transform_4(%arg0: i32) -> (i32, i32) {
    %c0_i32 = arith.constant 0 : i32
    %c0_i32_0 = arith.constant 0 : i32
    %c0_i32_1 = arith.constant 0 : i32
    return %c0_i32, %c0_i32_0 : i32, i32
  }
  func.func @transform_5(%arg0: i32) -> (i32, i32, i32) {
    %c0_i32 = arith.constant 0 : i32
    %c0_i32_0 = arith.constant 0 : i32
    %c0_i32_1 = arith.constant 0 : i32
    return %arg0, %c0_i32, %c0_i32_0 : i32, i32, i32
  }
}

module attributes {stable_mosaic.version = 11 : i64} {
  func.func @kernel(%arg0: i32, %arg1: memref<1x288x48xbf16, #tpu.memory_space<vmem>>, %arg2: memref<3x48x12xbf16, #tpu.memory_space<vmem>>, %arg3: memref<3x48x12xbf16, #tpu.memory_space<vmem>>, %arg4: memref<1x12xf32, #tpu.memory_space<vmem>>, %arg5: memref<1x12xf32, #tpu.memory_space<vmem>>, %arg6: memref<1x256x12xf32, #tpu.memory_space<vmem>>, %arg7: memref<12x12xbf16, #tpu.memory_space<vmem>>, %arg8: memref<1x12xf32, #tpu.memory_space<vmem>>, %arg9: memref<1x256x12xf32, #tpu.memory_space<vmem>>, %arg10: memref<1x1x12xf32, #tpu.memory_space<vmem>>) attributes {dimension_semantics = [#tpu.dimension_semantics<parallel>], iteration_bounds = array<i64: 2>, scalar_prefetch = 0 : i64, scratch_operands = 0 : i64, tpu.core_type = #tpu.core_type<tc>, window_params = [{transform_indices = @transform_0, window_bounds = array<i64: 1, 288, 48>}, {pipeline_mode = #tpu.pipeline_mode<synchronous>, transform_indices = @transform_1, window_bounds = array<i64: 3, 48, 12>}, {pipeline_mode = #tpu.pipeline_mode<synchronous>, transform_indices = @transform_2, window_bounds = array<i64: 3, 48, 12>}, {pipeline_mode = #tpu.pipeline_mode<synchronous>, transform_indices = @transform_3, window_bounds = array<i64: 1, 12>}, {pipeline_mode = #tpu.pipeline_mode<synchronous>, transform_indices = @transform_4, window_bounds = array<i64: 1, 12>}, {transform_indices = @transform_5, window_bounds = array<i64: 1, 256, 12>}, {pipeline_mode = #tpu.pipeline_mode<synchronous>, transform_indices = @transform_6, window_bounds = array<i64: 12, 12>}, {pipeline_mode = #tpu.pipeline_mode<synchronous>, transform_indices = @transform_7, window_bounds = array<i64: 1, 12>}, {transform_indices = @transform_8, window_bounds = array<i64: 1, 256, 12>}, {transform_indices = @transform_9, window_bounds = array<i64: 1, 1, 12>}]} {
    %c0 = arith.constant 0 : index
    %c0_0 = arith.constant 0 : index
    %c0_1 = arith.constant 0 : index
    %0 = vector.load %arg1[%c0, %c0_0, %c0_1] : memref<1x288x48xbf16, #tpu.memory_space<vmem>>, vector<1x256x48xbf16>
    %1 = vector.shape_cast %0 : vector<1x256x48xbf16> to vector<256x48xbf16>
    %c0_2 = arith.constant 0 : index
    %c0_3 = arith.constant 0 : index
    %c0_4 = arith.constant 0 : index
    %2 = vector.load %arg2[%c0_2, %c0_3, %c0_4] : memref<3x48x12xbf16, #tpu.memory_space<vmem>>, vector<1x48x12xbf16>
    %3 = vector.shape_cast %2 : vector<1x48x12xbf16> to vector<48x12xbf16>
    %cst = arith.constant dense<0.000000e+00> : vector<256x12xf32>
    %4 = tpu.matmul %1, %3, %cst {dimension_numbers = #tpu.dot_dimension_numbers<[1], [0], [0], [1], [0, 0, 1, 1], [], []>} : vector<256x48xbf16>, vector<48x12xbf16>, vector<256x12xf32> -> vector<256x12xf32>
    %c0_5 = arith.constant 0 : index
    %c16 = arith.constant 16 : index
    %c0_6 = arith.constant 0 : index
    %5 = vector.load %arg1[%c0_5, %c16, %c0_6] : memref<1x288x48xbf16, #tpu.memory_space<vmem>>, vector<1x256x48xbf16>
    %6 = vector.shape_cast %5 : vector<1x256x48xbf16> to vector<256x48xbf16>
    %c1 = arith.constant 1 : index
    %c0_7 = arith.constant 0 : index
    %c0_8 = arith.constant 0 : index
    %7 = vector.load %arg2[%c1, %c0_7, %c0_8] : memref<3x48x12xbf16, #tpu.memory_space<vmem>>, vector<1x48x12xbf16>
    %8 = vector.shape_cast %7 : vector<1x48x12xbf16> to vector<48x12xbf16>
    %cst_9 = arith.constant dense<0.000000e+00> : vector<256x12xf32>
    %9 = tpu.matmul %6, %8, %cst_9 {dimension_numbers = #tpu.dot_dimension_numbers<[1], [0], [0], [1], [0, 0, 1, 1], [], []>} : vector<256x48xbf16>, vector<48x12xbf16>, vector<256x12xf32> -> vector<256x12xf32>
    %10 = arith.addf %4, %9 : vector<256x12xf32>
    %c0_10 = arith.constant 0 : index
    %c32 = arith.constant 32 : index
    %c0_11 = arith.constant 0 : index
    %11 = vector.load %arg1[%c0_10, %c32, %c0_11] : memref<1x288x48xbf16, #tpu.memory_space<vmem>>, vector<1x256x48xbf16>
    %12 = vector.shape_cast %11 : vector<1x256x48xbf16> to vector<256x48xbf16>
    %c2 = arith.constant 2 : index
    %c0_12 = arith.constant 0 : index
    %c0_13 = arith.constant 0 : index
    %13 = vector.load %arg2[%c2, %c0_12, %c0_13] : memref<3x48x12xbf16, #tpu.memory_space<vmem>>, vector<1x48x12xbf16>
    %14 = vector.shape_cast %13 : vector<1x48x12xbf16> to vector<48x12xbf16>
    %cst_14 = arith.constant dense<0.000000e+00> : vector<256x12xf32>
    %15 = tpu.matmul %12, %14, %cst_14 {dimension_numbers = #tpu.dot_dimension_numbers<[1], [0], [0], [1], [0, 0, 1, 1], [], []>} : vector<256x48xbf16>, vector<48x12xbf16>, vector<256x12xf32> -> vector<256x12xf32>
    %16 = arith.addf %10, %15 : vector<256x12xf32>
    %c0_15 = arith.constant 0 : index
    %c0_16 = arith.constant 0 : index
    %17 = vector.load %arg4[%c0_15, %c0_16] : memref<1x12xf32, #tpu.memory_space<vmem>>, vector<1x12xf32>
    %18 = vector.broadcast %17 : vector<1x12xf32> to vector<256x12xf32>
    %19 = arith.addf %16, %18 : vector<256x12xf32>
    %c0_17 = arith.constant 0 : index
    %c0_18 = arith.constant 0 : index
    %c0_19 = arith.constant 0 : index
    %20 = vector.load %arg1[%c0_17, %c0_18, %c0_19] : memref<1x288x48xbf16, #tpu.memory_space<vmem>>, vector<1x256x48xbf16>
    %21 = vector.shape_cast %20 : vector<1x256x48xbf16> to vector<256x48xbf16>
    %c0_20 = arith.constant 0 : index
    %c0_21 = arith.constant 0 : index
    %c0_22 = arith.constant 0 : index
    %22 = vector.load %arg3[%c0_20, %c0_21, %c0_22] : memref<3x48x12xbf16, #tpu.memory_space<vmem>>, vector<1x48x12xbf16>
    %23 = vector.shape_cast %22 : vector<1x48x12xbf16> to vector<48x12xbf16>
    %cst_23 = arith.constant dense<0.000000e+00> : vector<256x12xf32>
    %24 = tpu.matmul %21, %23, %cst_23 {dimension_numbers = #tpu.dot_dimension_numbers<[1], [0], [0], [1], [0, 0, 1, 1], [], []>} : vector<256x48xbf16>, vector<48x12xbf16>, vector<256x12xf32> -> vector<256x12xf32>
    %c0_24 = arith.constant 0 : index
    %c16_25 = arith.constant 16 : index
    %c0_26 = arith.constant 0 : index
    %25 = vector.load %arg1[%c0_24, %c16_25, %c0_26] : memref<1x288x48xbf16, #tpu.memory_space<vmem>>, vector<1x256x48xbf16>
    %26 = vector.shape_cast %25 : vector<1x256x48xbf16> to vector<256x48xbf16>
    %c1_27 = arith.constant 1 : index
    %c0_28 = arith.constant 0 : index
    %c0_29 = arith.constant 0 : index
    %27 = vector.load %arg3[%c1_27, %c0_28, %c0_29] : memref<3x48x12xbf16, #tpu.memory_space<vmem>>, vector<1x48x12xbf16>
    %28 = vector.shape_cast %27 : vector<1x48x12xbf16> to vector<48x12xbf16>
    %cst_30 = arith.constant dense<0.000000e+00> : vector<256x12xf32>
    %29 = tpu.matmul %26, %28, %cst_30 {dimension_numbers = #tpu.dot_dimension_numbers<[1], [0], [0], [1], [0, 0, 1, 1], [], []>} : vector<256x48xbf16>, vector<48x12xbf16>, vector<256x12xf32> -> vector<256x12xf32>
    %30 = arith.addf %24, %29 : vector<256x12xf32>
    %c0_31 = arith.constant 0 : index
    %c32_32 = arith.constant 32 : index
    %c0_33 = arith.constant 0 : index
    %31 = vector.load %arg1[%c0_31, %c32_32, %c0_33] : memref<1x288x48xbf16, #tpu.memory_space<vmem>>, vector<1x256x48xbf16>
    %32 = vector.shape_cast %31 : vector<1x256x48xbf16> to vector<256x48xbf16>
    %c2_34 = arith.constant 2 : index
    %c0_35 = arith.constant 0 : index
    %c0_36 = arith.constant 0 : index
    %33 = vector.load %arg3[%c2_34, %c0_35, %c0_36] : memref<3x48x12xbf16, #tpu.memory_space<vmem>>, vector<1x48x12xbf16>
    %34 = vector.shape_cast %33 : vector<1x48x12xbf16> to vector<48x12xbf16>
    %cst_37 = arith.constant dense<0.000000e+00> : vector<256x12xf32>
    %35 = tpu.matmul %32, %34, %cst_37 {dimension_numbers = #tpu.dot_dimension_numbers<[1], [0], [0], [1], [0, 0, 1, 1], [], []>} : vector<256x48xbf16>, vector<48x12xbf16>, vector<256x12xf32> -> vector<256x12xf32>
    %36 = arith.addf %30, %35 : vector<256x12xf32>
    %c0_38 = arith.constant 0 : index
    %c0_39 = arith.constant 0 : index
    %37 = vector.load %arg5[%c0_38, %c0_39] : memref<1x12xf32, #tpu.memory_space<vmem>>, vector<1x12xf32>
    %38 = vector.broadcast %37 : vector<1x12xf32> to vector<256x12xf32>
    %39 = arith.addf %36, %38 : vector<256x12xf32>
    %c0_40 = arith.constant 0 : index
    %c0_41 = arith.constant 0 : index
    %c0_42 = arith.constant 0 : index
    %40 = vector.load %arg6[%c0_40, %c0_41, %c0_42] : memref<1x256x12xf32, #tpu.memory_space<vmem>>, vector<1x256x12xf32>
    %41 = vector.shape_cast %40 : vector<1x256x12xf32> to vector<256x12xf32>
    %42 = arith.truncf %41 : vector<256x12xf32> to vector<256x12xbf16>
    %c0_43 = arith.constant 0 : index
    %c0_44 = arith.constant 0 : index
    %43 = vector.load %arg7[%c0_43, %c0_44] : memref<12x12xbf16, #tpu.memory_space<vmem>>, vector<12x12xbf16>
    %cst_45 = arith.constant dense<0.000000e+00> : vector<256x12xf32>
    %44 = tpu.matmul %42, %43, %cst_45 {dimension_numbers = #tpu.dot_dimension_numbers<[1], [0], [0], [1], [0, 0, 1, 1], [], []>} : vector<256x12xbf16>, vector<12x12xbf16>, vector<256x12xf32> -> vector<256x12xf32>
    %c0_46 = arith.constant 0 : index
    %c0_47 = arith.constant 0 : index
    %45 = vector.load %arg8[%c0_46, %c0_47] : memref<1x12xf32, #tpu.memory_space<vmem>>, vector<1x12xf32>
    %46 = vector.broadcast %45 : vector<1x12xf32> to vector<256x12xf32>
    %47 = arith.addf %44, %46 : vector<256x12xf32>
    %cst_48 = arith.constant 2.000000e+00 : f32
    %48 = vector.broadcast %cst_48 : f32 to vector<256x12xf32>
    %49 = arith.addf %39, %48 : vector<256x12xf32>
    %50 = arith.negf %49 : vector<256x12xf32>
    %51 = math.exp %50 : vector<256x12xf32>
    %cst_49 = arith.constant 1.000000e+00 : f32
    %52 = vector.broadcast %cst_49 : f32 to vector<256x12xf32>
    %53 = arith.addf %52, %51 : vector<256x12xf32>
    %54 = arith.divf %52, %53 : vector<256x12xf32>
    %cst_50 = arith.constant 9.99999974E-5 : f32
    %55 = vector.broadcast %cst_50 : f32 to vector<256x12xf32>
    %56 = arith.addf %54, %55 : vector<256x12xf32>
    %57 = arith.addf %47, %19 : vector<256x12xf32>
    %58 = arith.mulf %57, %56 : vector<256x12xf32>
    %c0_51 = arith.constant 0 : index
    %c0_52 = arith.constant 0 : index
    %c0_53 = arith.constant 0 : index
    %59 = vector.load %arg9[%c0_51, %c0_52, %c0_53] : memref<1x256x12xf32, #tpu.memory_space<vmem>>, vector<1x256x12xf32>
    %60 = vector.shape_cast %59 : vector<1x256x12xf32> to vector<256x12xf32>
    %61 = vector.shape_cast %58 : vector<256x12xf32> to vector<1x256x12xf32>
    tpu.vector_store %arg9[%c0_51, %c0_52, %c0_53], %61 {strides = array<i32>} : memref<1x256x12xf32, #tpu.memory_space<vmem>>, vector<1x256x12xf32>,
    %62 = math.log %56 : vector<256x12xf32>
    %cst_54 = arith.constant dense<0.000000e+00> : vector<12xf32>
    %63 = vector.multi_reduction <add>, %62, %cst_54 [0] : vector<256x12xf32> to vector<12xf32>
    %64 = vector.shape_cast %63 : vector<12xf32> to vector<1x12xf32>
    %c0_55 = arith.constant 0 : index
    %c0_56 = arith.constant 0 : index
    %c0_57 = arith.constant 0 : index
    %65 = vector.load %arg10[%c0_55, %c0_56, %c0_57] : memref<1x1x12xf32, #tpu.memory_space<vmem>>, vector<1x1x12xf32>
    %66 = vector.shape_cast %65 : vector<1x1x12xf32> to vector<1x12xf32>
    %67 = vector.shape_cast %64 : vector<1x12xf32> to vector<1x1x12xf32>
    tpu.vector_store %arg10[%c0_55, %c0_56, %c0_57], %67 {strides = array<i32>} : memref<1x1x12xf32, #tpu.memory_space<vmem>>, vector<1x1x12xf32>,
    return
  }
  func.func @transform_0(%arg0: i32) -> (i32, i32, i32) {
    %c0_i32 = arith.constant 0 : i32
    %c0_i32_0 = arith.constant 0 : i32
    %c0_i32_1 = arith.constant 0 : i32
    return %arg0, %c0_i32, %c0_i32_0 : i32, i32, i32
  }
  func.func @transform_1(%arg0: i32) -> (i32, i32, i32) {
    %c0_i32 = arith.constant 0 : i32
    %c0_i32_0 = arith.constant 0 : i32
    %c0_i32_1 = arith.constant 0 : i32
    %c0_i32_2 = arith.constant 0 : i32
    return %c0_i32, %c0_i32_0, %c0_i32_1 : i32, i32, i32
  }
  func.func @transform_2(%arg0: i32) -> (i32, i32, i32) {
    %c0_i32 = arith.constant 0 : i32
    %c0_i32_0 = arith.constant 0 : i32
    %c0_i32_1 = arith.constant 0 : i32
    %c0_i32_2 = arith.constant 0 : i32
    return %c0_i32, %c0_i32_0, %c0_i32_1 : i32, i32, i32
  }
  func.func @transform_3(%arg0: i32) -> (i32, i32) {
    %c0_i32 = arith.constant 0 : i32
    %c0_i32_0 = arith.constant 0 : i32
    %c0_i32_1 = arith.constant 0 : i32
    return %c0_i32, %c0_i32_0 : i32, i32
  }
  func.func @transform_4(%arg0: i32) -> (i32, i32) {
    %c0_i32 = arith.constant 0 : i32
    %c0_i32_0 = arith.constant 0 : i32
    %c0_i32_1 = arith.constant 0 : i32
    return %c0_i32, %c0_i32_0 : i32, i32
  }
  func.func @transform_5(%arg0: i32) -> (i32, i32, i32) {
    %c0_i32 = arith.constant 0 : i32
    %c0_i32_0 = arith.constant 0 : i32
    %c0_i32_1 = arith.constant 0 : i32
    return %arg0, %c0_i32, %c0_i32_0 : i32, i32, i32
  }
  func.func @transform_6(%arg0: i32) -> (i32, i32) {
    %c0_i32 = arith.constant 0 : i32
    %c0_i32_0 = arith.constant 0 : i32
    %c0_i32_1 = arith.constant 0 : i32
    return %c0_i32, %c0_i32_0 : i32, i32
  }
  func.func @transform_7(%arg0: i32) -> (i32, i32) {
    %c0_i32 = arith.constant 0 : i32
    %c0_i32_0 = arith.constant 0 : i32
    %c0_i32_1 = arith.constant 0 : i32
    return %c0_i32, %c0_i32_0 : i32, i32
  }
  func.func @transform_8(%arg0: i32) -> (i32, i32, i32) {
    %c0_i32 = arith.constant 0 : i32
    %c0_i32_0 = arith.constant 0 : i32
    %c0_i32_1 = arith.constant 0 : i32
    return %arg0, %c0_i32, %c0_i32_0 : i32, i32, i32
  }
  func.func @transform_9(%arg0: i32) -> (i32, i32, i32) {
    %c0_i32 = arith.constant 0 : i32
    %c0_i32_0 = arith.constant 0 : i32
    %c0_i32_1 = arith.constant 0 : i32
    return %arg0, %c0_i32, %c0_i32_0 : i32, i32, i32
  }
}

module attributes {stable_mosaic.version = 11 : i64} {
  func.func @kernel(%arg0: i32, %arg1: memref<1x256x126xbf16, #tpu.memory_space<vmem>>, %arg2: memref<126x16xbf16, #tpu.memory_space<vmem>>, %arg3: memref<1x16xf32, #tpu.memory_space<vmem>>, %arg4: memref<16x16xbf16, #tpu.memory_space<vmem>>, %arg5: memref<1x16xf32, #tpu.memory_space<vmem>>, %arg6: memref<1x256x16xbf16, #tpu.memory_space<vmem>>) attributes {dimension_semantics = [#tpu.dimension_semantics<parallel>], iteration_bounds = array<i64: 2>, scalar_prefetch = 0 : i64, scratch_operands = 0 : i64, tpu.core_type = #tpu.core_type<tc>, window_params = [{transform_indices = @transform_0, window_bounds = array<i64: 1, 256, 126>}, {pipeline_mode = #tpu.pipeline_mode<synchronous>, transform_indices = @transform_1, window_bounds = array<i64: 126, 16>}, {pipeline_mode = #tpu.pipeline_mode<synchronous>, transform_indices = @transform_2, window_bounds = array<i64: 1, 16>}, {pipeline_mode = #tpu.pipeline_mode<synchronous>, transform_indices = @transform_3, window_bounds = array<i64: 16, 16>}, {pipeline_mode = #tpu.pipeline_mode<synchronous>, transform_indices = @transform_4, window_bounds = array<i64: 1, 16>}, {transform_indices = @transform_5, window_bounds = array<i64: 1, 256, 16>}]} {
    %c0 = arith.constant 0 : index
    %c0_0 = arith.constant 0 : index
    %c0_1 = arith.constant 0 : index
    %0 = vector.load %arg1[%c0, %c0_0, %c0_1] : memref<1x256x126xbf16, #tpu.memory_space<vmem>>, vector<1x256x126xbf16>
    %1 = vector.shape_cast %0 : vector<1x256x126xbf16> to vector<256x126xbf16>
    %c0_2 = arith.constant 0 : index
    %c0_3 = arith.constant 0 : index
    %2 = vector.load %arg2[%c0_2, %c0_3] : memref<126x16xbf16, #tpu.memory_space<vmem>>, vector<126x16xbf16>
    %cst = arith.constant dense<0.000000e+00> : vector<256x16xf32>
    %3 = tpu.matmul %1, %2, %cst {dimension_numbers = #tpu.dot_dimension_numbers<[1], [0], [0], [1], [0, 0, 1, 1], [], []>} : vector<256x126xbf16>, vector<126x16xbf16>, vector<256x16xf32> -> vector<256x16xf32>
    %c0_4 = arith.constant 0 : index
    %c0_5 = arith.constant 0 : index
    %4 = vector.load %arg3[%c0_4, %c0_5] : memref<1x16xf32, #tpu.memory_space<vmem>>, vector<1x16xf32>
    %5 = vector.broadcast %4 : vector<1x16xf32> to vector<256x16xf32>
    %6 = arith.addf %3, %5 : vector<256x16xf32>
    %cst_6 = arith.constant 0.000000e+00 : f32
    %7 = vector.broadcast %cst_6 : f32 to vector<256x16xf32>
    %8 = arith.maximumf %6, %7 : vector<256x16xf32>
    %9 = arith.truncf %8 : vector<256x16xf32> to vector<256x16xbf16>
    %c0_7 = arith.constant 0 : index
    %c0_8 = arith.constant 0 : index
    %10 = vector.load %arg4[%c0_7, %c0_8] : memref<16x16xbf16, #tpu.memory_space<vmem>>, vector<16x16xbf16>
    %cst_9 = arith.constant dense<0.000000e+00> : vector<256x16xf32>
    %11 = tpu.matmul %9, %10, %cst_9 {dimension_numbers = #tpu.dot_dimension_numbers<[1], [0], [0], [1], [0, 0, 1, 1], [], []>} : vector<256x16xbf16>, vector<16x16xbf16>, vector<256x16xf32> -> vector<256x16xf32>
    %c0_10 = arith.constant 0 : index
    %c0_11 = arith.constant 0 : index
    %12 = vector.load %arg5[%c0_10, %c0_11] : memref<1x16xf32, #tpu.memory_space<vmem>>, vector<1x16xf32>
    %13 = vector.broadcast %12 : vector<1x16xf32> to vector<256x16xf32>
    %14 = arith.addf %11, %13 : vector<256x16xf32>
    %cst_12 = arith.constant 0.000000e+00 : f32
    %15 = vector.broadcast %cst_12 : f32 to vector<256x16xf32>
    %16 = arith.maximumf %14, %15 : vector<256x16xf32>
    %17 = arith.truncf %16 : vector<256x16xf32> to vector<256x16xbf16>
    %c0_13 = arith.constant 0 : index
    %c0_14 = arith.constant 0 : index
    %c0_15 = arith.constant 0 : index
    %18 = vector.load %arg6[%c0_13, %c0_14, %c0_15] : memref<1x256x16xbf16, #tpu.memory_space<vmem>>, vector<1x256x16xbf16>
    %19 = vector.shape_cast %18 : vector<1x256x16xbf16> to vector<256x16xbf16>
    %20 = vector.shape_cast %17 : vector<256x16xbf16> to vector<1x256x16xbf16>
    tpu.vector_store %arg6[%c0_13, %c0_14, %c0_15], %20 {strides = array<i32>} : memref<1x256x16xbf16, #tpu.memory_space<vmem>>, vector<1x256x16xbf16>,
    return
  }
  func.func @transform_0(%arg0: i32) -> (i32, i32, i32) {
    %c0_i32 = arith.constant 0 : i32
    %c0_i32_0 = arith.constant 0 : i32
    %c0_i32_1 = arith.constant 0 : i32
    return %arg0, %c0_i32, %c0_i32_0 : i32, i32, i32
  }
  func.func @transform_1(%arg0: i32) -> (i32, i32) {
    %c0_i32 = arith.constant 0 : i32
    %c0_i32_0 = arith.constant 0 : i32
    %c0_i32_1 = arith.constant 0 : i32
    return %c0_i32, %c0_i32_0 : i32, i32
  }
  func.func @transform_2(%arg0: i32) -> (i32, i32) {
    %c0_i32 = arith.constant 0 : i32
    %c0_i32_0 = arith.constant 0 : i32
    %c0_i32_1 = arith.constant 0 : i32
    return %c0_i32, %c0_i32_0 : i32, i32
  }
  func.func @transform_3(%arg0: i32) -> (i32, i32) {
    %c0_i32 = arith.constant 0 : i32
    %c0_i32_0 = arith.constant 0 : i32
    %c0_i32_1 = arith.constant 0 : i32
    return %c0_i32, %c0_i32_0 : i32, i32
  }
  func.func @transform_4(%arg0: i32) -> (i32, i32) {
    %c0_i32 = arith.constant 0 : i32
    %c0_i32_0 = arith.constant 0 : i32
    %c0_i32_1 = arith.constant 0 : i32
    return %c0_i32, %c0_i32_0 : i32, i32
  }
  func.func @transform_5(%arg0: i32) -> (i32, i32, i32) {
    %c0_i32 = arith.constant 0 : i32
    %c0_i32_0 = arith.constant 0 : i32
    %c0_i32_1 = arith.constant 0 : i32
    return %arg0, %c0_i32, %c0_i32_0 : i32, i32, i32
  }
}

module attributes {stable_mosaic.version = 11 : i64} {
  func.func @kernel(%arg0: i32, %arg1: memref<1x288x48xbf16, #tpu.memory_space<vmem>>, %arg2: memref<3x48x6xbf16, #tpu.memory_space<vmem>>, %arg3: memref<3x48x6xbf16, #tpu.memory_space<vmem>>, %arg4: memref<1x6xf32, #tpu.memory_space<vmem>>, %arg5: memref<1x6xf32, #tpu.memory_space<vmem>>, %arg6: memref<1x256x6xf32, #tpu.memory_space<vmem>>, %arg7: memref<1x256x6xf32, #tpu.memory_space<vmem>>, %arg8: memref<1x1x6xf32, #tpu.memory_space<vmem>>) attributes {dimension_semantics = [#tpu.dimension_semantics<parallel>], iteration_bounds = array<i64: 2>, scalar_prefetch = 0 : i64, scratch_operands = 0 : i64, tpu.core_type = #tpu.core_type<tc>, window_params = [{transform_indices = @transform_0, window_bounds = array<i64: 1, 288, 48>}, {pipeline_mode = #tpu.pipeline_mode<synchronous>, transform_indices = @transform_1, window_bounds = array<i64: 3, 48, 6>}, {pipeline_mode = #tpu.pipeline_mode<synchronous>, transform_indices = @transform_2, window_bounds = array<i64: 3, 48, 6>}, {pipeline_mode = #tpu.pipeline_mode<synchronous>, transform_indices = @transform_3, window_bounds = array<i64: 1, 6>}, {pipeline_mode = #tpu.pipeline_mode<synchronous>, transform_indices = @transform_4, window_bounds = array<i64: 1, 6>}, {transform_indices = @transform_5, window_bounds = array<i64: 1, 256, 6>}, {transform_indices = @transform_6, window_bounds = array<i64: 1, 256, 6>}, {transform_indices = @transform_7, window_bounds = array<i64: 1, 1, 6>}]} {
    %c0 = arith.constant 0 : index
    %c0_0 = arith.constant 0 : index
    %c0_1 = arith.constant 0 : index
    %0 = vector.load %arg1[%c0, %c0_0, %c0_1] : memref<1x288x48xbf16, #tpu.memory_space<vmem>>, vector<1x256x48xbf16>
    %1 = vector.shape_cast %0 : vector<1x256x48xbf16> to vector<256x48xbf16>
    %c0_2 = arith.constant 0 : index
    %c0_3 = arith.constant 0 : index
    %c0_4 = arith.constant 0 : index
    %2 = vector.load %arg2[%c0_2, %c0_3, %c0_4] : memref<3x48x6xbf16, #tpu.memory_space<vmem>>, vector<1x48x6xbf16>
    %3 = vector.shape_cast %2 : vector<1x48x6xbf16> to vector<48x6xbf16>
    %cst = arith.constant dense<0.000000e+00> : vector<256x6xf32>
    %4 = tpu.matmul %1, %3, %cst {dimension_numbers = #tpu.dot_dimension_numbers<[1], [0], [0], [1], [0, 0, 1, 1], [], []>} : vector<256x48xbf16>, vector<48x6xbf16>, vector<256x6xf32> -> vector<256x6xf32>
    %c0_5 = arith.constant 0 : index
    %c16 = arith.constant 16 : index
    %c0_6 = arith.constant 0 : index
    %5 = vector.load %arg1[%c0_5, %c16, %c0_6] : memref<1x288x48xbf16, #tpu.memory_space<vmem>>, vector<1x256x48xbf16>
    %6 = vector.shape_cast %5 : vector<1x256x48xbf16> to vector<256x48xbf16>
    %c1 = arith.constant 1 : index
    %c0_7 = arith.constant 0 : index
    %c0_8 = arith.constant 0 : index
    %7 = vector.load %arg2[%c1, %c0_7, %c0_8] : memref<3x48x6xbf16, #tpu.memory_space<vmem>>, vector<1x48x6xbf16>
    %8 = vector.shape_cast %7 : vector<1x48x6xbf16> to vector<48x6xbf16>
    %cst_9 = arith.constant dense<0.000000e+00> : vector<256x6xf32>
    %9 = tpu.matmul %6, %8, %cst_9 {dimension_numbers = #tpu.dot_dimension_numbers<[1], [0], [0], [1], [0, 0, 1, 1], [], []>} : vector<256x48xbf16>, vector<48x6xbf16>, vector<256x6xf32> -> vector<256x6xf32>
    %10 = arith.addf %4, %9 : vector<256x6xf32>
    %c0_10 = arith.constant 0 : index
    %c32 = arith.constant 32 : index
    %c0_11 = arith.constant 0 : index
    %11 = vector.load %arg1[%c0_10, %c32, %c0_11] : memref<1x288x48xbf16, #tpu.memory_space<vmem>>, vector<1x256x48xbf16>
    %12 = vector.shape_cast %11 : vector<1x256x48xbf16> to vector<256x48xbf16>
    %c2 = arith.constant 2 : index
    %c0_12 = arith.constant 0 : index
    %c0_13 = arith.constant 0 : index
    %13 = vector.load %arg2[%c2, %c0_12, %c0_13] : memref<3x48x6xbf16, #tpu.memory_space<vmem>>, vector<1x48x6xbf16>
    %14 = vector.shape_cast %13 : vector<1x48x6xbf16> to vector<48x6xbf16>
    %cst_14 = arith.constant dense<0.000000e+00> : vector<256x6xf32>
    %15 = tpu.matmul %12, %14, %cst_14 {dimension_numbers = #tpu.dot_dimension_numbers<[1], [0], [0], [1], [0, 0, 1, 1], [], []>} : vector<256x48xbf16>, vector<48x6xbf16>, vector<256x6xf32> -> vector<256x6xf32>
    %16 = arith.addf %10, %15 : vector<256x6xf32>
    %c0_15 = arith.constant 0 : index
    %c0_16 = arith.constant 0 : index
    %17 = vector.load %arg4[%c0_15, %c0_16] : memref<1x6xf32, #tpu.memory_space<vmem>>, vector<1x6xf32>
    %18 = vector.broadcast %17 : vector<1x6xf32> to vector<256x6xf32>
    %19 = arith.addf %16, %18 : vector<256x6xf32>
    %c0_17 = arith.constant 0 : index
    %c0_18 = arith.constant 0 : index
    %c0_19 = arith.constant 0 : index
    %20 = vector.load %arg1[%c0_17, %c0_18, %c0_19] : memref<1x288x48xbf16, #tpu.memory_space<vmem>>, vector<1x256x48xbf16>
    %21 = vector.shape_cast %20 : vector<1x256x48xbf16> to vector<256x48xbf16>
    %c0_20 = arith.constant 0 : index
    %c0_21 = arith.constant 0 : index
    %c0_22 = arith.constant 0 : index
    %22 = vector.load %arg3[%c0_20, %c0_21, %c0_22] : memref<3x48x6xbf16, #tpu.memory_space<vmem>>, vector<1x48x6xbf16>
    %23 = vector.shape_cast %22 : vector<1x48x6xbf16> to vector<48x6xbf16>
    %cst_23 = arith.constant dense<0.000000e+00> : vector<256x6xf32>
    %24 = tpu.matmul %21, %23, %cst_23 {dimension_numbers = #tpu.dot_dimension_numbers<[1], [0], [0], [1], [0, 0, 1, 1], [], []>} : vector<256x48xbf16>, vector<48x6xbf16>, vector<256x6xf32> -> vector<256x6xf32>
    %c0_24 = arith.constant 0 : index
    %c16_25 = arith.constant 16 : index
    %c0_26 = arith.constant 0 : index
    %25 = vector.load %arg1[%c0_24, %c16_25, %c0_26] : memref<1x288x48xbf16, #tpu.memory_space<vmem>>, vector<1x256x48xbf16>
    %26 = vector.shape_cast %25 : vector<1x256x48xbf16> to vector<256x48xbf16>
    %c1_27 = arith.constant 1 : index
    %c0_28 = arith.constant 0 : index
    %c0_29 = arith.constant 0 : index
    %27 = vector.load %arg3[%c1_27, %c0_28, %c0_29] : memref<3x48x6xbf16, #tpu.memory_space<vmem>>, vector<1x48x6xbf16>
    %28 = vector.shape_cast %27 : vector<1x48x6xbf16> to vector<48x6xbf16>
    %cst_30 = arith.constant dense<0.000000e+00> : vector<256x6xf32>
    %29 = tpu.matmul %26, %28, %cst_30 {dimension_numbers = #tpu.dot_dimension_numbers<[1], [0], [0], [1], [0, 0, 1, 1], [], []>} : vector<256x48xbf16>, vector<48x6xbf16>, vector<256x6xf32> -> vector<256x6xf32>
    %30 = arith.addf %24, %29 : vector<256x6xf32>
    %c0_31 = arith.constant 0 : index
    %c32_32 = arith.constant 32 : index
    %c0_33 = arith.constant 0 : index
    %31 = vector.load %arg1[%c0_31, %c32_32, %c0_33] : memref<1x288x48xbf16, #tpu.memory_space<vmem>>, vector<1x256x48xbf16>
    %32 = vector.shape_cast %31 : vector<1x256x48xbf16> to vector<256x48xbf16>
    %c2_34 = arith.constant 2 : index
    %c0_35 = arith.constant 0 : index
    %c0_36 = arith.constant 0 : index
    %33 = vector.load %arg3[%c2_34, %c0_35, %c0_36] : memref<3x48x6xbf16, #tpu.memory_space<vmem>>, vector<1x48x6xbf16>
    %34 = vector.shape_cast %33 : vector<1x48x6xbf16> to vector<48x6xbf16>
    %cst_37 = arith.constant dense<0.000000e+00> : vector<256x6xf32>
    %35 = tpu.matmul %32, %34, %cst_37 {dimension_numbers = #tpu.dot_dimension_numbers<[1], [0], [0], [1], [0, 0, 1, 1], [], []>} : vector<256x48xbf16>, vector<48x6xbf16>, vector<256x6xf32> -> vector<256x6xf32>
    %36 = arith.addf %30, %35 : vector<256x6xf32>
    %c0_38 = arith.constant 0 : index
    %c0_39 = arith.constant 0 : index
    %37 = vector.load %arg5[%c0_38, %c0_39] : memref<1x6xf32, #tpu.memory_space<vmem>>, vector<1x6xf32>
    %38 = vector.broadcast %37 : vector<1x6xf32> to vector<256x6xf32>
    %39 = arith.addf %36, %38 : vector<256x6xf32>
    %cst_40 = arith.constant 2.000000e+00 : f32
    %40 = vector.broadcast %cst_40 : f32 to vector<256x6xf32>
    %41 = arith.addf %39, %40 : vector<256x6xf32>
    %42 = arith.negf %41 : vector<256x6xf32>
    %43 = math.exp %42 : vector<256x6xf32>
    %cst_41 = arith.constant 1.000000e+00 : f32
    %44 = vector.broadcast %cst_41 : f32 to vector<256x6xf32>
    %45 = arith.addf %44, %43 : vector<256x6xf32>
    %46 = arith.divf %44, %45 : vector<256x6xf32>
    %cst_42 = arith.constant 9.99999974E-5 : f32
    %47 = vector.broadcast %cst_42 : f32 to vector<256x6xf32>
    %48 = arith.addf %46, %47 : vector<256x6xf32>
    %c0_43 = arith.constant 0 : index
    %c0_44 = arith.constant 0 : index
    %c0_45 = arith.constant 0 : index
    %49 = vector.load %arg6[%c0_43, %c0_44, %c0_45] : memref<1x256x6xf32, #tpu.memory_space<vmem>>, vector<1x256x6xf32>
    %50 = vector.shape_cast %49 : vector<1x256x6xf32> to vector<256x6xf32>
    %51 = arith.addf %50, %19 : vector<256x6xf32>
    %52 = arith.mulf %51, %48 : vector<256x6xf32>
    %c0_46 = arith.constant 0 : index
    %c0_47 = arith.constant 0 : index
    %c0_48 = arith.constant 0 : index
    %53 = vector.load %arg7[%c0_46, %c0_47, %c0_48] : memref<1x256x6xf32, #tpu.memory_space<vmem>>, vector<1x256x6xf32>
    %54 = vector.shape_cast %53 : vector<1x256x6xf32> to vector<256x6xf32>
    %55 = vector.shape_cast %52 : vector<256x6xf32> to vector<1x256x6xf32>
    tpu.vector_store %arg7[%c0_46, %c0_47, %c0_48], %55 {strides = array<i32>} : memref<1x256x6xf32, #tpu.memory_space<vmem>>, vector<1x256x6xf32>,
    %56 = math.log %48 : vector<256x6xf32>
    %cst_49 = arith.constant dense<0.000000e+00> : vector<6xf32>
    %57 = vector.multi_reduction <add>, %56, %cst_49 [0] : vector<256x6xf32> to vector<6xf32>
    %58 = vector.shape_cast %57 : vector<6xf32> to vector<1x6xf32>
    %c0_50 = arith.constant 0 : index
    %c0_51 = arith.constant 0 : index
    %c0_52 = arith.constant 0 : index
    %59 = vector.load %arg8[%c0_50, %c0_51, %c0_52] : memref<1x1x6xf32, #tpu.memory_space<vmem>>, vector<1x1x6xf32>
    %60 = vector.shape_cast %59 : vector<1x1x6xf32> to vector<1x6xf32>
    %61 = vector.shape_cast %58 : vector<1x6xf32> to vector<1x1x6xf32>
    tpu.vector_store %arg8[%c0_50, %c0_51, %c0_52], %61 {strides = array<i32>} : memref<1x1x6xf32, #tpu.memory_space<vmem>>, vector<1x1x6xf32>,
    return
  }
  func.func @transform_0(%arg0: i32) -> (i32, i32, i32) {
    %c0_i32 = arith.constant 0 : i32
    %c0_i32_0 = arith.constant 0 : i32
    %c0_i32_1 = arith.constant 0 : i32
    return %arg0, %c0_i32, %c0_i32_0 : i32, i32, i32
  }
  func.func @transform_1(%arg0: i32) -> (i32, i32, i32) {
    %c0_i32 = arith.constant 0 : i32
    %c0_i32_0 = arith.constant 0 : i32
    %c0_i32_1 = arith.constant 0 : i32
    %c0_i32_2 = arith.constant 0 : i32
    return %c0_i32, %c0_i32_0, %c0_i32_1 : i32, i32, i32
  }
  func.func @transform_2(%arg0: i32) -> (i32, i32, i32) {
    %c0_i32 = arith.constant 0 : i32
    %c0_i32_0 = arith.constant 0 : i32
    %c0_i32_1 = arith.constant 0 : i32
    %c0_i32_2 = arith.constant 0 : i32
    return %c0_i32, %c0_i32_0, %c0_i32_1 : i32, i32, i32
  }
  func.func @transform_3(%arg0: i32) -> (i32, i32) {
    %c0_i32 = arith.constant 0 : i32
    %c0_i32_0 = arith.constant 0 : i32
    %c0_i32_1 = arith.constant 0 : i32
    return %c0_i32, %c0_i32_0 : i32, i32
  }
  func.func @transform_4(%arg0: i32) -> (i32, i32) {
    %c0_i32 = arith.constant 0 : i32
    %c0_i32_0 = arith.constant 0 : i32
    %c0_i32_1 = arith.constant 0 : i32
    return %c0_i32, %c0_i32_0 : i32, i32
  }
  func.func @transform_5(%arg0: i32) -> (i32, i32, i32) {
    %c0_i32 = arith.constant 0 : i32
    %c0_i32_0 = arith.constant 0 : i32
    %c0_i32_1 = arith.constant 0 : i32
    return %arg0, %c0_i32, %c0_i32_0 : i32, i32, i32
  }
  func.func @transform_6(%arg0: i32) -> (i32, i32, i32) {
    %c0_i32 = arith.constant 0 : i32
    %c0_i32_0 = arith.constant 0 : i32
    %c0_i32_1 = arith.constant 0 : i32
    return %arg0, %c0_i32, %c0_i32_0 : i32, i32, i32
  }
  func.func @transform_7(%arg0: i32) -> (i32, i32, i32) {
    %c0_i32 = arith.constant 0 : i32
    %c0_i32_0 = arith.constant 0 : i32
    %c0_i32_1 = arith.constant 0 : i32
    return %arg0, %c0_i32, %c0_i32_0 : i32, i32, i32
  }
}

module attributes {stable_mosaic.version = 11 : i64} {
  func.func @kernel(%arg0: i32, %arg1: memref<1x64x72xbf16, #tpu.memory_space<vmem>>, %arg2: memref<72x16xbf16, #tpu.memory_space<vmem>>, %arg3: memref<1x16xf32, #tpu.memory_space<vmem>>, %arg4: memref<16x16xbf16, #tpu.memory_space<vmem>>, %arg5: memref<1x16xf32, #tpu.memory_space<vmem>>, %arg6: memref<1x64x16xbf16, #tpu.memory_space<vmem>>) attributes {dimension_semantics = [#tpu.dimension_semantics<parallel>], iteration_bounds = array<i64: 2>, scalar_prefetch = 0 : i64, scratch_operands = 0 : i64, tpu.core_type = #tpu.core_type<tc>, window_params = [{transform_indices = @transform_0, window_bounds = array<i64: 1, 64, 72>}, {pipeline_mode = #tpu.pipeline_mode<synchronous>, transform_indices = @transform_1, window_bounds = array<i64: 72, 16>}, {pipeline_mode = #tpu.pipeline_mode<synchronous>, transform_indices = @transform_2, window_bounds = array<i64: 1, 16>}, {pipeline_mode = #tpu.pipeline_mode<synchronous>, transform_indices = @transform_3, window_bounds = array<i64: 16, 16>}, {pipeline_mode = #tpu.pipeline_mode<synchronous>, transform_indices = @transform_4, window_bounds = array<i64: 1, 16>}, {transform_indices = @transform_5, window_bounds = array<i64: 1, 64, 16>}]} {
    %c0 = arith.constant 0 : index
    %c0_0 = arith.constant 0 : index
    %c0_1 = arith.constant 0 : index
    %0 = vector.load %arg1[%c0, %c0_0, %c0_1] : memref<1x64x72xbf16, #tpu.memory_space<vmem>>, vector<1x64x72xbf16>
    %1 = vector.shape_cast %0 : vector<1x64x72xbf16> to vector<64x72xbf16>
    %c0_2 = arith.constant 0 : index
    %c0_3 = arith.constant 0 : index
    %2 = vector.load %arg2[%c0_2, %c0_3] : memref<72x16xbf16, #tpu.memory_space<vmem>>, vector<72x16xbf16>
    %cst = arith.constant dense<0.000000e+00> : vector<64x16xf32>
    %3 = tpu.matmul %1, %2, %cst {dimension_numbers = #tpu.dot_dimension_numbers<[1], [0], [0], [1], [0, 0, 1, 1], [], []>} : vector<64x72xbf16>, vector<72x16xbf16>, vector<64x16xf32> -> vector<64x16xf32>
    %c0_4 = arith.constant 0 : index
    %c0_5 = arith.constant 0 : index
    %4 = vector.load %arg3[%c0_4, %c0_5] : memref<1x16xf32, #tpu.memory_space<vmem>>, vector<1x16xf32>
    %5 = vector.broadcast %4 : vector<1x16xf32> to vector<64x16xf32>
    %6 = arith.addf %3, %5 : vector<64x16xf32>
    %cst_6 = arith.constant 0.000000e+00 : f32
    %7 = vector.broadcast %cst_6 : f32 to vector<64x16xf32>
    %8 = arith.maximumf %6, %7 : vector<64x16xf32>
    %9 = arith.truncf %8 : vector<64x16xf32> to vector<64x16xbf16>
    %c0_7 = arith.constant 0 : index
    %c0_8 = arith.constant 0 : index
    %10 = vector.load %arg4[%c0_7, %c0_8] : memref<16x16xbf16, #tpu.memory_space<vmem>>, vector<16x16xbf16>
    %cst_9 = arith.constant dense<0.000000e+00> : vector<64x16xf32>
    %11 = tpu.matmul %9, %10, %cst_9 {dimension_numbers = #tpu.dot_dimension_numbers<[1], [0], [0], [1], [0, 0, 1, 1], [], []>} : vector<64x16xbf16>, vector<16x16xbf16>, vector<64x16xf32> -> vector<64x16xf32>
    %c0_10 = arith.constant 0 : index
    %c0_11 = arith.constant 0 : index
    %12 = vector.load %arg5[%c0_10, %c0_11] : memref<1x16xf32, #tpu.memory_space<vmem>>, vector<1x16xf32>
    %13 = vector.broadcast %12 : vector<1x16xf32> to vector<64x16xf32>
    %14 = arith.addf %11, %13 : vector<64x16xf32>
    %cst_12 = arith.constant 0.000000e+00 : f32
    %15 = vector.broadcast %cst_12 : f32 to vector<64x16xf32>
    %16 = arith.maximumf %14, %15 : vector<64x16xf32>
    %17 = arith.truncf %16 : vector<64x16xf32> to vector<64x16xbf16>
    %c0_13 = arith.constant 0 : index
    %c0_14 = arith.constant 0 : index
    %c0_15 = arith.constant 0 : index
    %18 = vector.load %arg6[%c0_13, %c0_14, %c0_15] : memref<1x64x16xbf16, #tpu.memory_space<vmem>>, vector<1x64x16xbf16>
    %19 = vector.shape_cast %18 : vector<1x64x16xbf16> to vector<64x16xbf16>
    %20 = vector.shape_cast %17 : vector<64x16xbf16> to vector<1x64x16xbf16>
    tpu.vector_store %arg6[%c0_13, %c0_14, %c0_15], %20 {strides = array<i32>} : memref<1x64x16xbf16, #tpu.memory_space<vmem>>, vector<1x64x16xbf16>,
    return
  }
  func.func @transform_0(%arg0: i32) -> (i32, i32, i32) {
    %c0_i32 = arith.constant 0 : i32
    %c0_i32_0 = arith.constant 0 : i32
    %c0_i32_1 = arith.constant 0 : i32
    return %arg0, %c0_i32, %c0_i32_0 : i32, i32, i32
  }
  func.func @transform_1(%arg0: i32) -> (i32, i32) {
    %c0_i32 = arith.constant 0 : i32
    %c0_i32_0 = arith.constant 0 : i32
    %c0_i32_1 = arith.constant 0 : i32
    return %c0_i32, %c0_i32_0 : i32, i32
  }
  func.func @transform_2(%arg0: i32) -> (i32, i32) {
    %c0_i32 = arith.constant 0 : i32
    %c0_i32_0 = arith.constant 0 : i32
    %c0_i32_1 = arith.constant 0 : i32
    return %c0_i32, %c0_i32_0 : i32, i32
  }
  func.func @transform_3(%arg0: i32) -> (i32, i32) {
    %c0_i32 = arith.constant 0 : i32
    %c0_i32_0 = arith.constant 0 : i32
    %c0_i32_1 = arith.constant 0 : i32
    return %c0_i32, %c0_i32_0 : i32, i32
  }
  func.func @transform_4(%arg0: i32) -> (i32, i32) {
    %c0_i32 = arith.constant 0 : i32
    %c0_i32_0 = arith.constant 0 : i32
    %c0_i32_1 = arith.constant 0 : i32
    return %c0_i32, %c0_i32_0 : i32, i32
  }
  func.func @transform_5(%arg0: i32) -> (i32, i32, i32) {
    %c0_i32 = arith.constant 0 : i32
    %c0_i32_0 = arith.constant 0 : i32
    %c0_i32_1 = arith.constant 0 : i32
    return %arg0, %c0_i32, %c0_i32_0 : i32, i32, i32
  }
}

module attributes {stable_mosaic.version = 11 : i64} {
  func.func @kernel(%arg0: i32, %arg1: memref<1x64x144xbf16, #tpu.memory_space<vmem>>, %arg2: memref<144x48xbf16, #tpu.memory_space<vmem>>, %arg3: memref<144x48xbf16, #tpu.memory_space<vmem>>, %arg4: memref<1x48xf32, #tpu.memory_space<vmem>>, %arg5: memref<1x48xf32, #tpu.memory_space<vmem>>, %arg6: memref<1x64x48xf32, #tpu.memory_space<vmem>>, %arg7: memref<48x48xbf16, #tpu.memory_space<vmem>>, %arg8: memref<1x48xf32, #tpu.memory_space<vmem>>, %arg9: memref<1x64x48xf32, #tpu.memory_space<vmem>>, %arg10: memref<1x1x48xf32, #tpu.memory_space<vmem>>) attributes {dimension_semantics = [#tpu.dimension_semantics<parallel>], iteration_bounds = array<i64: 2>, scalar_prefetch = 0 : i64, scratch_operands = 0 : i64, tpu.core_type = #tpu.core_type<tc>, window_params = [{transform_indices = @transform_0, window_bounds = array<i64: 1, 64, 144>}, {pipeline_mode = #tpu.pipeline_mode<synchronous>, transform_indices = @transform_1, window_bounds = array<i64: 144, 48>}, {pipeline_mode = #tpu.pipeline_mode<synchronous>, transform_indices = @transform_2, window_bounds = array<i64: 144, 48>}, {pipeline_mode = #tpu.pipeline_mode<synchronous>, transform_indices = @transform_3, window_bounds = array<i64: 1, 48>}, {pipeline_mode = #tpu.pipeline_mode<synchronous>, transform_indices = @transform_4, window_bounds = array<i64: 1, 48>}, {transform_indices = @transform_5, window_bounds = array<i64: 1, 64, 48>}, {pipeline_mode = #tpu.pipeline_mode<synchronous>, transform_indices = @transform_6, window_bounds = array<i64: 48, 48>}, {pipeline_mode = #tpu.pipeline_mode<synchronous>, transform_indices = @transform_7, window_bounds = array<i64: 1, 48>}, {transform_indices = @transform_8, window_bounds = array<i64: 1, 64, 48>}, {transform_indices = @transform_9, window_bounds = array<i64: 1, 1, 48>}]} {
    %c0 = arith.constant 0 : index
    %c0_0 = arith.constant 0 : index
    %c0_1 = arith.constant 0 : index
    %0 = vector.load %arg1[%c0, %c0_0, %c0_1] : memref<1x64x144xbf16, #tpu.memory_space<vmem>>, vector<1x64x144xbf16>
    %1 = vector.shape_cast %0 : vector<1x64x144xbf16> to vector<64x144xbf16>
    %c0_2 = arith.constant 0 : index
    %c0_3 = arith.constant 0 : index
    %2 = vector.load %arg2[%c0_2, %c0_3] : memref<144x48xbf16, #tpu.memory_space<vmem>>, vector<144x48xbf16>
    %cst = arith.constant dense<0.000000e+00> : vector<64x48xf32>
    %3 = tpu.matmul %1, %2, %cst {dimension_numbers = #tpu.dot_dimension_numbers<[1], [0], [0], [1], [0, 0, 1, 1], [], []>} : vector<64x144xbf16>, vector<144x48xbf16>, vector<64x48xf32> -> vector<64x48xf32>
    %c0_4 = arith.constant 0 : index
    %c0_5 = arith.constant 0 : index
    %4 = vector.load %arg4[%c0_4, %c0_5] : memref<1x48xf32, #tpu.memory_space<vmem>>, vector<1x48xf32>
    %5 = vector.broadcast %4 : vector<1x48xf32> to vector<64x48xf32>
    %6 = arith.addf %3, %5 : vector<64x48xf32>
    %c0_6 = arith.constant 0 : index
    %c0_7 = arith.constant 0 : index
    %c0_8 = arith.constant 0 : index
    %7 = vector.load %arg1[%c0_6, %c0_7, %c0_8] : memref<1x64x144xbf16, #tpu.memory_space<vmem>>, vector<1x64x144xbf16>
    %8 = vector.shape_cast %7 : vector<1x64x144xbf16> to vector<64x144xbf16>
    %c0_9 = arith.constant 0 : index
    %c0_10 = arith.constant 0 : index
    %9 = vector.load %arg3[%c0_9, %c0_10] : memref<144x48xbf16, #tpu.memory_space<vmem>>, vector<144x48xbf16>
    %cst_11 = arith.constant dense<0.000000e+00> : vector<64x48xf32>
    %10 = tpu.matmul %8, %9, %cst_11 {dimension_numbers = #tpu.dot_dimension_numbers<[1], [0], [0], [1], [0, 0, 1, 1], [], []>} : vector<64x144xbf16>, vector<144x48xbf16>, vector<64x48xf32> -> vector<64x48xf32>
    %c0_12 = arith.constant 0 : index
    %c0_13 = arith.constant 0 : index
    %11 = vector.load %arg5[%c0_12, %c0_13] : memref<1x48xf32, #tpu.memory_space<vmem>>, vector<1x48xf32>
    %12 = vector.broadcast %11 : vector<1x48xf32> to vector<64x48xf32>
    %13 = arith.addf %10, %12 : vector<64x48xf32>
    %c0_14 = arith.constant 0 : index
    %c0_15 = arith.constant 0 : index
    %c0_16 = arith.constant 0 : index
    %14 = vector.load %arg6[%c0_14, %c0_15, %c0_16] : memref<1x64x48xf32, #tpu.memory_space<vmem>>, vector<1x64x48xf32>
    %15 = vector.shape_cast %14 : vector<1x64x48xf32> to vector<64x48xf32>
    %16 = arith.truncf %15 : vector<64x48xf32> to vector<64x48xbf16>
    %c0_17 = arith.constant 0 : index
    %c0_18 = arith.constant 0 : index
    %17 = vector.load %arg7[%c0_17, %c0_18] : memref<48x48xbf16, #tpu.memory_space<vmem>>, vector<48x48xbf16>
    %cst_19 = arith.constant dense<0.000000e+00> : vector<64x48xf32>
    %18 = tpu.matmul %16, %17, %cst_19 {dimension_numbers = #tpu.dot_dimension_numbers<[1], [0], [0], [1], [0, 0, 1, 1], [], []>} : vector<64x48xbf16>, vector<48x48xbf16>, vector<64x48xf32> -> vector<64x48xf32>
    %c0_20 = arith.constant 0 : index
    %c0_21 = arith.constant 0 : index
    %19 = vector.load %arg8[%c0_20, %c0_21] : memref<1x48xf32, #tpu.memory_space<vmem>>, vector<1x48xf32>
    %20 = vector.broadcast %19 : vector<1x48xf32> to vector<64x48xf32>
    %21 = arith.addf %18, %20 : vector<64x48xf32>
    %cst_22 = arith.constant 2.000000e+00 : f32
    %22 = vector.broadcast %cst_22 : f32 to vector<64x48xf32>
    %23 = arith.addf %13, %22 : vector<64x48xf32>
    %24 = arith.negf %23 : vector<64x48xf32>
    %25 = math.exp %24 : vector<64x48xf32>
    %cst_23 = arith.constant 1.000000e+00 : f32
    %26 = vector.broadcast %cst_23 : f32 to vector<64x48xf32>
    %27 = arith.addf %26, %25 : vector<64x48xf32>
    %28 = arith.divf %26, %27 : vector<64x48xf32>
    %cst_24 = arith.constant 9.99999974E-5 : f32
    %29 = vector.broadcast %cst_24 : f32 to vector<64x48xf32>
    %30 = arith.addf %28, %29 : vector<64x48xf32>
    %31 = arith.addf %21, %6 : vector<64x48xf32>
    %32 = arith.mulf %31, %30 : vector<64x48xf32>
    %c0_25 = arith.constant 0 : index
    %c0_26 = arith.constant 0 : index
    %c0_27 = arith.constant 0 : index
    %33 = vector.load %arg9[%c0_25, %c0_26, %c0_27] : memref<1x64x48xf32, #tpu.memory_space<vmem>>, vector<1x64x48xf32>
    %34 = vector.shape_cast %33 : vector<1x64x48xf32> to vector<64x48xf32>
    %35 = vector.shape_cast %32 : vector<64x48xf32> to vector<1x64x48xf32>
    tpu.vector_store %arg9[%c0_25, %c0_26, %c0_27], %35 {strides = array<i32>} : memref<1x64x48xf32, #tpu.memory_space<vmem>>, vector<1x64x48xf32>,
    %36 = math.log %30 : vector<64x48xf32>
    %cst_28 = arith.constant dense<0.000000e+00> : vector<48xf32>
    %37 = vector.multi_reduction <add>, %36, %cst_28 [0] : vector<64x48xf32> to vector<48xf32>
    %38 = vector.shape_cast %37 : vector<48xf32> to vector<1x48xf32>
    %c0_29 = arith.constant 0 : index
    %c0_30 = arith.constant 0 : index
    %c0_31 = arith.constant 0 : index
    %39 = vector.load %arg10[%c0_29, %c0_30, %c0_31] : memref<1x1x48xf32, #tpu.memory_space<vmem>>, vector<1x1x48xf32>
    %40 = vector.shape_cast %39 : vector<1x1x48xf32> to vector<1x48xf32>
    %41 = vector.shape_cast %38 : vector<1x48xf32> to vector<1x1x48xf32>
    tpu.vector_store %arg10[%c0_29, %c0_30, %c0_31], %41 {strides = array<i32>} : memref<1x1x48xf32, #tpu.memory_space<vmem>>, vector<1x1x48xf32>,
    return
  }
  func.func @transform_0(%arg0: i32) -> (i32, i32, i32) {
    %c0_i32 = arith.constant 0 : i32
    %c0_i32_0 = arith.constant 0 : i32
    %c0_i32_1 = arith.constant 0 : i32
    return %arg0, %c0_i32, %c0_i32_0 : i32, i32, i32
  }
  func.func @transform_1(%arg0: i32) -> (i32, i32) {
    %c0_i32 = arith.constant 0 : i32
    %c0_i32_0 = arith.constant 0 : i32
    %c0_i32_1 = arith.constant 0 : i32
    return %c0_i32, %c0_i32_0 : i32, i32
  }
  func.func @transform_2(%arg0: i32) -> (i32, i32) {
    %c0_i32 = arith.constant 0 : i32
    %c0_i32_0 = arith.constant 0 : i32
    %c0_i32_1 = arith.constant 0 : i32
    return %c0_i32, %c0_i32_0 : i32, i32
  }
  func.func @transform_3(%arg0: i32) -> (i32, i32) {
    %c0_i32 = arith.constant 0 : i32
    %c0_i32_0 = arith.constant 0 : i32
    %c0_i32_1 = arith.constant 0 : i32
    return %c0_i32, %c0_i32_0 : i32, i32
  }
  func.func @transform_4(%arg0: i32) -> (i32, i32) {
    %c0_i32 = arith.constant 0 : i32
    %c0_i32_0 = arith.constant 0 : i32
    %c0_i32_1 = arith.constant 0 : i32
    return %c0_i32, %c0_i32_0 : i32, i32
  }
  func.func @transform_5(%arg0: i32) -> (i32, i32, i32) {
    %c0_i32 = arith.constant 0 : i32
    %c0_i32_0 = arith.constant 0 : i32
    %c0_i32_1 = arith.constant 0 : i32
    return %arg0, %c0_i32, %c0_i32_0 : i32, i32, i32
  }
  func.func @transform_6(%arg0: i32) -> (i32, i32) {
    %c0_i32 = arith.constant 0 : i32
    %c0_i32_0 = arith.constant 0 : i32
    %c0_i32_1 = arith.constant 0 : i32
    return %c0_i32, %c0_i32_0 : i32, i32
  }
  func.func @transform_7(%arg0: i32) -> (i32, i32) {
    %c0_i32 = arith.constant 0 : i32
    %c0_i32_0 = arith.constant 0 : i32
    %c0_i32_1 = arith.constant 0 : i32
    return %c0_i32, %c0_i32_0 : i32, i32
  }
  func.func @transform_8(%arg0: i32) -> (i32, i32, i32) {
    %c0_i32 = arith.constant 0 : i32
    %c0_i32_0 = arith.constant 0 : i32
    %c0_i32_1 = arith.constant 0 : i32
    return %arg0, %c0_i32, %c0_i32_0 : i32, i32, i32
  }
  func.func @transform_9(%arg0: i32) -> (i32, i32, i32) {
    %c0_i32 = arith.constant 0 : i32
    %c0_i32_0 = arith.constant 0 : i32
    %c0_i32_1 = arith.constant 0 : i32
    return %arg0, %c0_i32, %c0_i32_0 : i32, i32, i32
  }
}

module attributes {stable_mosaic.version = 11 : i64} {
  func.func @kernel(%arg0: i32, %arg1: memref<1x64x288xbf16, #tpu.memory_space<vmem>>, %arg2: memref<288x16xbf16, #tpu.memory_space<vmem>>, %arg3: memref<1x16xf32, #tpu.memory_space<vmem>>, %arg4: memref<16x16xbf16, #tpu.memory_space<vmem>>, %arg5: memref<1x16xf32, #tpu.memory_space<vmem>>, %arg6: memref<1x64x16xbf16, #tpu.memory_space<vmem>>) attributes {dimension_semantics = [#tpu.dimension_semantics<parallel>], iteration_bounds = array<i64: 2>, scalar_prefetch = 0 : i64, scratch_operands = 0 : i64, tpu.core_type = #tpu.core_type<tc>, window_params = [{transform_indices = @transform_0, window_bounds = array<i64: 1, 64, 288>}, {pipeline_mode = #tpu.pipeline_mode<synchronous>, transform_indices = @transform_1, window_bounds = array<i64: 288, 16>}, {pipeline_mode = #tpu.pipeline_mode<synchronous>, transform_indices = @transform_2, window_bounds = array<i64: 1, 16>}, {pipeline_mode = #tpu.pipeline_mode<synchronous>, transform_indices = @transform_3, window_bounds = array<i64: 16, 16>}, {pipeline_mode = #tpu.pipeline_mode<synchronous>, transform_indices = @transform_4, window_bounds = array<i64: 1, 16>}, {transform_indices = @transform_5, window_bounds = array<i64: 1, 64, 16>}]} {
    %c0 = arith.constant 0 : index
    %c0_0 = arith.constant 0 : index
    %c0_1 = arith.constant 0 : index
    %0 = vector.load %arg1[%c0, %c0_0, %c0_1] : memref<1x64x288xbf16, #tpu.memory_space<vmem>>, vector<1x64x288xbf16>
    %1 = vector.shape_cast %0 : vector<1x64x288xbf16> to vector<64x288xbf16>
    %c0_2 = arith.constant 0 : index
    %c0_3 = arith.constant 0 : index
    %2 = vector.load %arg2[%c0_2, %c0_3] : memref<288x16xbf16, #tpu.memory_space<vmem>>, vector<288x16xbf16>
    %cst = arith.constant dense<0.000000e+00> : vector<64x16xf32>
    %3 = tpu.matmul %1, %2, %cst {dimension_numbers = #tpu.dot_dimension_numbers<[1], [0], [0], [1], [0, 0, 1, 1], [], []>} : vector<64x288xbf16>, vector<288x16xbf16>, vector<64x16xf32> -> vector<64x16xf32>
    %c0_4 = arith.constant 0 : index
    %c0_5 = arith.constant 0 : index
    %4 = vector.load %arg3[%c0_4, %c0_5] : memref<1x16xf32, #tpu.memory_space<vmem>>, vector<1x16xf32>
    %5 = vector.broadcast %4 : vector<1x16xf32> to vector<64x16xf32>
    %6 = arith.addf %3, %5 : vector<64x16xf32>
    %cst_6 = arith.constant 0.000000e+00 : f32
    %7 = vector.broadcast %cst_6 : f32 to vector<64x16xf32>
    %8 = arith.maximumf %6, %7 : vector<64x16xf32>
    %9 = arith.truncf %8 : vector<64x16xf32> to vector<64x16xbf16>
    %c0_7 = arith.constant 0 : index
    %c0_8 = arith.constant 0 : index
    %10 = vector.load %arg4[%c0_7, %c0_8] : memref<16x16xbf16, #tpu.memory_space<vmem>>, vector<16x16xbf16>
    %cst_9 = arith.constant dense<0.000000e+00> : vector<64x16xf32>
    %11 = tpu.matmul %9, %10, %cst_9 {dimension_numbers = #tpu.dot_dimension_numbers<[1], [0], [0], [1], [0, 0, 1, 1], [], []>} : vector<64x16xbf16>, vector<16x16xbf16>, vector<64x16xf32> -> vector<64x16xf32>
    %c0_10 = arith.constant 0 : index
    %c0_11 = arith.constant 0 : index
    %12 = vector.load %arg5[%c0_10, %c0_11] : memref<1x16xf32, #tpu.memory_space<vmem>>, vector<1x16xf32>
    %13 = vector.broadcast %12 : vector<1x16xf32> to vector<64x16xf32>
    %14 = arith.addf %11, %13 : vector<64x16xf32>
    %cst_12 = arith.constant 0.000000e+00 : f32
    %15 = vector.broadcast %cst_12 : f32 to vector<64x16xf32>
    %16 = arith.maximumf %14, %15 : vector<64x16xf32>
    %17 = arith.truncf %16 : vector<64x16xf32> to vector<64x16xbf16>
    %c0_13 = arith.constant 0 : index
    %c0_14 = arith.constant 0 : index
    %c0_15 = arith.constant 0 : index
    %18 = vector.load %arg6[%c0_13, %c0_14, %c0_15] : memref<1x64x16xbf16, #tpu.memory_space<vmem>>, vector<1x64x16xbf16>
    %19 = vector.shape_cast %18 : vector<1x64x16xbf16> to vector<64x16xbf16>
    %20 = vector.shape_cast %17 : vector<64x16xbf16> to vector<1x64x16xbf16>
    tpu.vector_store %arg6[%c0_13, %c0_14, %c0_15], %20 {strides = array<i32>} : memref<1x64x16xbf16, #tpu.memory_space<vmem>>, vector<1x64x16xbf16>,
    return
  }
  func.func @transform_0(%arg0: i32) -> (i32, i32, i32) {
    %c0_i32 = arith.constant 0 : i32
    %c0_i32_0 = arith.constant 0 : i32
    %c0_i32_1 = arith.constant 0 : i32
    return %arg0, %c0_i32, %c0_i32_0 : i32, i32, i32
  }
  func.func @transform_1(%arg0: i32) -> (i32, i32) {
    %c0_i32 = arith.constant 0 : i32
    %c0_i32_0 = arith.constant 0 : i32
    %c0_i32_1 = arith.constant 0 : i32
    return %c0_i32, %c0_i32_0 : i32, i32
  }
  func.func @transform_2(%arg0: i32) -> (i32, i32) {
    %c0_i32 = arith.constant 0 : i32
    %c0_i32_0 = arith.constant 0 : i32
    %c0_i32_1 = arith.constant 0 : i32
    return %c0_i32, %c0_i32_0 : i32, i32
  }
  func.func @transform_3(%arg0: i32) -> (i32, i32) {
    %c0_i32 = arith.constant 0 : i32
    %c0_i32_0 = arith.constant 0 : i32
    %c0_i32_1 = arith.constant 0 : i32
    return %c0_i32, %c0_i32_0 : i32, i32
  }
  func.func @transform_4(%arg0: i32) -> (i32, i32) {
    %c0_i32 = arith.constant 0 : i32
    %c0_i32_0 = arith.constant 0 : i32
    %c0_i32_1 = arith.constant 0 : i32
    return %c0_i32, %c0_i32_0 : i32, i32
  }
  func.func @transform_5(%arg0: i32) -> (i32, i32, i32) {
    %c0_i32 = arith.constant 0 : i32
    %c0_i32_0 = arith.constant 0 : i32
    %c0_i32_1 = arith.constant 0 : i32
    return %arg0, %c0_i32, %c0_i32_0 : i32, i32, i32
  }
}

module attributes {stable_mosaic.version = 11 : i64} {
  func.func @kernel(%arg0: i32, %arg1: memref<1x64x144xbf16, #tpu.memory_space<vmem>>, %arg2: memref<144x24xbf16, #tpu.memory_space<vmem>>, %arg3: memref<144x24xbf16, #tpu.memory_space<vmem>>, %arg4: memref<1x24xf32, #tpu.memory_space<vmem>>, %arg5: memref<1x24xf32, #tpu.memory_space<vmem>>, %arg6: memref<1x64x24xf32, #tpu.memory_space<vmem>>, %arg7: memref<1x64x24xf32, #tpu.memory_space<vmem>>, %arg8: memref<1x1x24xf32, #tpu.memory_space<vmem>>) attributes {dimension_semantics = [#tpu.dimension_semantics<parallel>], iteration_bounds = array<i64: 2>, scalar_prefetch = 0 : i64, scratch_operands = 0 : i64, tpu.core_type = #tpu.core_type<tc>, window_params = [{transform_indices = @transform_0, window_bounds = array<i64: 1, 64, 144>}, {pipeline_mode = #tpu.pipeline_mode<synchronous>, transform_indices = @transform_1, window_bounds = array<i64: 144, 24>}, {pipeline_mode = #tpu.pipeline_mode<synchronous>, transform_indices = @transform_2, window_bounds = array<i64: 144, 24>}, {pipeline_mode = #tpu.pipeline_mode<synchronous>, transform_indices = @transform_3, window_bounds = array<i64: 1, 24>}, {pipeline_mode = #tpu.pipeline_mode<synchronous>, transform_indices = @transform_4, window_bounds = array<i64: 1, 24>}, {transform_indices = @transform_5, window_bounds = array<i64: 1, 64, 24>}, {transform_indices = @transform_6, window_bounds = array<i64: 1, 64, 24>}, {transform_indices = @transform_7, window_bounds = array<i64: 1, 1, 24>}]} {
    %c0 = arith.constant 0 : index
    %c0_0 = arith.constant 0 : index
    %c0_1 = arith.constant 0 : index
    %0 = vector.load %arg1[%c0, %c0_0, %c0_1] : memref<1x64x144xbf16, #tpu.memory_space<vmem>>, vector<1x64x144xbf16>
    %1 = vector.shape_cast %0 : vector<1x64x144xbf16> to vector<64x144xbf16>
    %c0_2 = arith.constant 0 : index
    %c0_3 = arith.constant 0 : index
    %2 = vector.load %arg2[%c0_2, %c0_3] : memref<144x24xbf16, #tpu.memory_space<vmem>>, vector<144x24xbf16>
    %cst = arith.constant dense<0.000000e+00> : vector<64x24xf32>
    %3 = tpu.matmul %1, %2, %cst {dimension_numbers = #tpu.dot_dimension_numbers<[1], [0], [0], [1], [0, 0, 1, 1], [], []>} : vector<64x144xbf16>, vector<144x24xbf16>, vector<64x24xf32> -> vector<64x24xf32>
    %c0_4 = arith.constant 0 : index
    %c0_5 = arith.constant 0 : index
    %4 = vector.load %arg4[%c0_4, %c0_5] : memref<1x24xf32, #tpu.memory_space<vmem>>, vector<1x24xf32>
    %5 = vector.broadcast %4 : vector<1x24xf32> to vector<64x24xf32>
    %6 = arith.addf %3, %5 : vector<64x24xf32>
    %c0_6 = arith.constant 0 : index
    %c0_7 = arith.constant 0 : index
    %c0_8 = arith.constant 0 : index
    %7 = vector.load %arg1[%c0_6, %c0_7, %c0_8] : memref<1x64x144xbf16, #tpu.memory_space<vmem>>, vector<1x64x144xbf16>
    %8 = vector.shape_cast %7 : vector<1x64x144xbf16> to vector<64x144xbf16>
    %c0_9 = arith.constant 0 : index
    %c0_10 = arith.constant 0 : index
    %9 = vector.load %arg3[%c0_9, %c0_10] : memref<144x24xbf16, #tpu.memory_space<vmem>>, vector<144x24xbf16>
    %cst_11 = arith.constant dense<0.000000e+00> : vector<64x24xf32>
    %10 = tpu.matmul %8, %9, %cst_11 {dimension_numbers = #tpu.dot_dimension_numbers<[1], [0], [0], [1], [0, 0, 1, 1], [], []>} : vector<64x144xbf16>, vector<144x24xbf16>, vector<64x24xf32> -> vector<64x24xf32>
    %c0_12 = arith.constant 0 : index
    %c0_13 = arith.constant 0 : index
    %11 = vector.load %arg5[%c0_12, %c0_13] : memref<1x24xf32, #tpu.memory_space<vmem>>, vector<1x24xf32>
    %12 = vector.broadcast %11 : vector<1x24xf32> to vector<64x24xf32>
    %13 = arith.addf %10, %12 : vector<64x24xf32>
    %cst_14 = arith.constant 2.000000e+00 : f32
    %14 = vector.broadcast %cst_14 : f32 to vector<64x24xf32>
    %15 = arith.addf %13, %14 : vector<64x24xf32>
    %16 = arith.negf %15 : vector<64x24xf32>
    %17 = math.exp %16 : vector<64x24xf32>
    %cst_15 = arith.constant 1.000000e+00 : f32
    %18 = vector.broadcast %cst_15 : f32 to vector<64x24xf32>
    %19 = arith.addf %18, %17 : vector<64x24xf32>
    %20 = arith.divf %18, %19 : vector<64x24xf32>
    %cst_16 = arith.constant 9.99999974E-5 : f32
    %21 = vector.broadcast %cst_16 : f32 to vector<64x24xf32>
    %22 = arith.addf %20, %21 : vector<64x24xf32>
    %c0_17 = arith.constant 0 : index
    %c0_18 = arith.constant 0 : index
    %c0_19 = arith.constant 0 : index
    %23 = vector.load %arg6[%c0_17, %c0_18, %c0_19] : memref<1x64x24xf32, #tpu.memory_space<vmem>>, vector<1x64x24xf32>
    %24 = vector.shape_cast %23 : vector<1x64x24xf32> to vector<64x24xf32>
    %25 = arith.addf %24, %6 : vector<64x24xf32>
    %26 = arith.mulf %25, %22 : vector<64x24xf32>
    %c0_20 = arith.constant 0 : index
    %c0_21 = arith.constant 0 : index
    %c0_22 = arith.constant 0 : index
    %27 = vector.load %arg7[%c0_20, %c0_21, %c0_22] : memref<1x64x24xf32, #tpu.memory_space<vmem>>, vector<1x64x24xf32>
    %28 = vector.shape_cast %27 : vector<1x64x24xf32> to vector<64x24xf32>
    %29 = vector.shape_cast %26 : vector<64x24xf32> to vector<1x64x24xf32>
    tpu.vector_store %arg7[%c0_20, %c0_21, %c0_22], %29 {strides = array<i32>} : memref<1x64x24xf32, #tpu.memory_space<vmem>>, vector<1x64x24xf32>,
    %30 = math.log %22 : vector<64x24xf32>
    %cst_23 = arith.constant dense<0.000000e+00> : vector<24xf32>
    %31 = vector.multi_reduction <add>, %30, %cst_23 [0] : vector<64x24xf32> to vector<24xf32>
    %32 = vector.shape_cast %31 : vector<24xf32> to vector<1x24xf32>
    %c0_24 = arith.constant 0 : index
    %c0_25 = arith.constant 0 : index
    %c0_26 = arith.constant 0 : index
    %33 = vector.load %arg8[%c0_24, %c0_25, %c0_26] : memref<1x1x24xf32, #tpu.memory_space<vmem>>, vector<1x1x24xf32>
    %34 = vector.shape_cast %33 : vector<1x1x24xf32> to vector<1x24xf32>
    %35 = vector.shape_cast %32 : vector<1x24xf32> to vector<1x1x24xf32>
    tpu.vector_store %arg8[%c0_24, %c0_25, %c0_26], %35 {strides = array<i32>} : memref<1x1x24xf32, #tpu.memory_space<vmem>>, vector<1x1x24xf32>,
    return
  }
  func.func @transform_0(%arg0: i32) -> (i32, i32, i32) {
    %c0_i32 = arith.constant 0 : i32
    %c0_i32_0 = arith.constant 0 : i32
    %c0_i32_1 = arith.constant 0 : i32
    return %arg0, %c0_i32, %c0_i32_0 : i32, i32, i32
  }
  func.func @transform_1(%arg0: i32) -> (i32, i32) {
    %c0_i32 = arith.constant 0 : i32
    %c0_i32_0 = arith.constant 0 : i32
    %c0_i32_1 = arith.constant 0 : i32
    return %c0_i32, %c0_i32_0 : i32, i32
  }
  func.func @transform_2(%arg0: i32) -> (i32, i32) {
    %c0_i32 = arith.constant 0 : i32
    %c0_i32_0 = arith.constant 0 : i32
    %c0_i32_1 = arith.constant 0 : i32
    return %c0_i32, %c0_i32_0 : i32, i32
  }
  func.func @transform_3(%arg0: i32) -> (i32, i32) {
    %c0_i32 = arith.constant 0 : i32
    %c0_i32_0 = arith.constant 0 : i32
    %c0_i32_1 = arith.constant 0 : i32
    return %c0_i32, %c0_i32_0 : i32, i32
  }
  func.func @transform_4(%arg0: i32) -> (i32, i32) {
    %c0_i32 = arith.constant 0 : i32
    %c0_i32_0 = arith.constant 0 : i32
    %c0_i32_1 = arith.constant 0 : i32
    return %c0_i32, %c0_i32_0 : i32, i32
  }
  func.func @transform_5(%arg0: i32) -> (i32, i32, i32) {
    %c0_i32 = arith.constant 0 : i32
    %c0_i32_0 = arith.constant 0 : i32
    %c0_i32_1 = arith.constant 0 : i32
    return %arg0, %c0_i32, %c0_i32_0 : i32, i32, i32
  }
  func.func @transform_6(%arg0: i32) -> (i32, i32, i32) {
    %c0_i32 = arith.constant 0 : i32
    %c0_i32_0 = arith.constant 0 : i32
    %c0_i32_1 = arith.constant 0 : i32
    return %arg0, %c0_i32, %c0_i32_0 : i32, i32, i32
  }
  func.func @transform_7(%arg0: i32) -> (i32, i32, i32) {
    %c0_i32 = arith.constant 0 : i32
    %c0_i32_0 = arith.constant 0 : i32
    %c0_i32_1 = arith.constant 0 : i32
    return %arg0, %c0_i32, %c0_i32_0 : i32, i32, i32
  }
}

</mosaic_0001>

<bundles_post_ra>
// kernel: srflownet_normal_flow.22
= control target key start
LH: loop header
LB: loop body
LE: loop exit
PB: predicated region body
PF: predicated region fallthrough
CT: control target
= control target key end

     0   :  { %8 = vsyncpa [#allocation3], 0  ;;  %s507_s12 = smov 0   ;;  %s547_s0 = inlined_call_operand.vmem [shape: bf16[2,64,27], index: 0, kind: input, shape index: {}]   ;;  %s548_s1 = inlined_call_operand.vmem [shape: bf16[27,8], index: 1, kind: input, shape index: {}]   ;;  %s549_s2 = inlined_call_operand.hbm [shape: f32[1,8], index: 2, kind: input, shape index: {}]   ;;  %s550_s3 = inlined_call_operand.vmem [shape: bf16[2,64,8], index: 3, kind: output, shape index: {}]  }
   0x1 LB: > { %s367_s13 = sadd.s32 4294967295, %s483_s12   ;;  %p369_p0 = scmp.ge.s32.totalorder %s483_s12, 1  ;;  %s483_s12 = sphi %s507_s12, %s14_s12  }
   0x2   : > { %p113_p1 = scmp.lt.s32.totalorder %s483_s12, 3  ;;  %s128_s16 = sshll.u32 %s549_s2, 4  ;;  %s129_s16 = int_to_ptr.hbm [resolvable:$true] %s128_s16 }
   0x3   : > { %p430_p3 = scmp.eq.s32.totalorder %s367_s13, 0  ;;  %s485_s17 = smov [#allocation2]  }
   0x4   : > { %p114_p2 = pnand %p369_p0, %p113_p1  ;;  %s130_s18 = sshll.u32 %s485_s17, 4  ;;  %s131_s18 = int_to_ptr.vmem [resolvable:$true] %s130_s18 }
   0x6   : > { %p426_p4 = pneg %p114_p2  ;;  %151 = sbr.rel (%p114_p2) target bundleno = 172 (0xac), region = 32 }
   0x8   : > { %p427_p5 = pnand %p430_p3, %p426_p4 }
   0xa   : > { %429 = dma.hbm_to_vmem [thread:$0]  (!%p427_p5), %s129_s16, 16, %s131_s18, [#allocation3]  }
   0xb   : > { %478 = dma.done.wait (%p430_p3), [#allocation3], 16  }
   0xc   : > { %480 = vsyncadd (%p430_p3), [#allocation3], 4294967280  ;;  %vm247_vm0 = vcmask 1044480   ;;  %p176_p6 = scmp.lt.s32.totalorder %s367_s13, 1  ;;  %vm248_vm1 = vcmask 1045504   ;;  %v486_v0 = vmov 65535  }
   0xd   : > { %v249_v1 = vsel %vm247_vm0, 4294967295, %v486_v0  ;;  %v400_v2 = vld [vmem:[%s548_s1 + $0x8] sm:$0xf]  ;;  %v415_v3 = vld [vmem:[%s548_s1 + $0x8] sm:$0x30]  ;;  %v414_v7 = vld [vmem:[%s548_s1] sm:$0xff] }
   0xe   : > { %s552_s13 = smov (!%p176_p6, %s367_s13), 1  ;;  %v250_v4 = vsel %vm248_vm1, %v249_v1, 0  ;;  %v401_v5 = vor.u32 %v415_v3, %v400_v2  ;;  %vm234_vm2 = vcmask 220160   ;;  %v442_v12 = vld [vmem:[#allocation2] ss:$0 sm:$0xff]  ;;  %vm291_vm3 = vcmask 60416  }
   0xf   : > { %s408_s23 = sshll.u32 %s552_s13, 5 }
  0x10   : > { %v252_v6 = vand.u32 %v401_v5, %v250_v4  ;;  %s180_s28 = scalar_lea.vmem %s547_s0, %s408_s23  ;;  %s185_s4 = scalar_lea.vmem %s550_s3, %s408_s23 }
  0x11   : > { %v410_v8 = vld [vmem:[%s180_s28] sm:$0xff]  ;;  %v411_v9 = vld [vmem:[%s180_s28 + $0x8] sm:$0xff]  ;;  %v412_v10 = vld [vmem:[%s180_s28 + $0x10] sm:$0xff] }
  0x12   : > { %260 = vmatpush.bf16.msra.mxu0 %v252_v6  ;;  %416 = vmatpush.bf16.msra.mxu1 %v252_v6  ;;  %v413_v11 = vld [vmem:[%s180_s28 + $0x18] sm:$0xff] }
  0x13   : > { %417 = vmatpush.bf16.msra.mxu2 %v252_v6  ;;  %418 = vmatpush.bf16.msra.mxu3 %v252_v6 }
  0x16   : > { %261 = vmatpush.bf16.msra.mxu0 %v414_v7  ;;  %419 = vmatpush.bf16.msra.mxu1 %v414_v7 }
  0x17   : > { %420 = vmatpush.bf16.msra.mxu2 %v414_v7  ;;  %421 = vmatpush.bf16.msra.mxu3 %v414_v7 }
  0x19   : > { %402 = vmatmul.msk.bf16.vlgmr.msra.gmra.mxu0 %vm234_vm2, %v410_v8  ;;  %403 = vmatmul.msk.bf16.vlgmr.msra.gmra.mxu1 %vm234_vm2, %v411_v9 }
  0x1a   : > { %404 = vmatmul.msk.bf16.vlgmr.msra.gmra.mxu2 %vm234_vm2, %v412_v10  ;;  %405 = vmatmul.msk.bf16.vlgmr.msra.gmra.mxu3 %vm234_vm2, %v413_v11 }
  0x96   : > { %v263_v13 = vpop.f32.mrf.mxu0  ;;  %v268_v14 = vpop.f32.mrf.mxu1 }
  0x97   : > { %v264_v15 = vadd.f32 %v442_v12, %v263_v13  ;;  %v269_v16 = vadd.f32 %v442_v12, %v268_v14 }
  0x99   : > { %v283_v17 = vpack.c.bf16 %v264_v15, %v264_v15  ;;  %v285_v18 = vpack.c.bf16 %v269_v16, %v269_v16 }
  0x9b   : > { %292 = vst.msk [vmem:[%s185_s4] sm:$0xf] %vm291_vm3, %v283_v17 }
  0x9c   : > { %294 = vst.msk [vmem:[%s185_s4 + $0x8] sm:$0xf] %vm291_vm3, %v285_v18 }
  0x9d   : > { %v273_v19 = vpop.f32.mrf.mxu2  ;;  %v278_v20 = vpop.f32.mrf.mxu3 }
  0x9e   : > { %v274_v21 = vadd.f32 %v442_v12, %v273_v19  ;;  %v279_v22 = vadd.f32 %v442_v12, %v278_v20  ;;  %v265_v23 = vpop.f32.mrf.mxu0  ;;  %v270_v24 = vpop.f32.mrf.mxu1 }
  0x9f   : > { %v266_v25 = vadd.f32 %v442_v12, %v265_v23  ;;  %v271_v26 = vadd.f32 %v442_v12, %v270_v24 }
  0xa0   : > { %v287_v27 = vpack.c.bf16 %v274_v21, %v274_v21  ;;  %v289_v28 = vpack.c.bf16 %v279_v22, %v279_v22 }
  0xa1   : > { %v284_v29 = vpack.c.bf16 %v266_v25, %v266_v25  ;;  %v286_v30 = vpack.c.bf16 %v271_v26, %v271_v26 }
  0xa2   : > { %296 = vst.msk [vmem:[%s185_s4 + $0x10] sm:$0xf] %vm291_vm3, %v287_v27 }
  0xa3   : > { %298 = vst.msk [vmem:[%s185_s4 + $0x18] sm:$0xf] %vm291_vm3, %v289_v28 }
  0xa4   : > { %293 = vst.msk [vmem:[%s185_s4 + $0x4] sm:$0xf] %vm291_vm3, %v284_v29 }
  0xa5   : > { %295 = vst.msk [vmem:[%s185_s4 + $0xc] sm:$0xf] %vm291_vm3, %v286_v30  ;;  %v275_v31 = vpop.f32.mrf.mxu2  ;;  %v280_v32 = vpop.f32.mrf.mxu3 }
  0xa6   : > { %v276_v33 = vadd.f32 %v442_v12, %v275_v31  ;;  %v281_v34 = vadd.f32 %v442_v12, %v280_v32 }
  0xa8   : > { %v288_v35 = vpack.c.bf16 %v276_v33, %v276_v33  ;;  %v290_v36 = vpack.c.bf16 %v281_v34, %v281_v34 }
  0xaa   : > { %297 = vst.msk [vmem:[%s185_s4 + $0x14] sm:$0xf] %vm291_vm3, %v288_v35 }
  0xab   : > { %299 = vst.msk [vmem:[%s185_s4 + $0x1c] sm:$0xf] %vm291_vm3, %v290_v36 }
  0xac PF: > { %s14_s12 = sadd.s32 1, %s483_s12  }
  0xad   : > { %p11_p7 = scmp.ge.s32.totalorder %s14_s12, 4  }
  0xaf   :  { %13 = sbr.rel (!%p11_p7) target bundleno = 1 (0x1), region = 67 }
  0xb4   :  { %321 = vsyncpa [#allocation3], 1 }
  0xb5   :  { %323 = vsyncpa [#allocation3 + $0x1], 1 }

// kernel: srflownet_normal_flow.23
= control target key start
LH: loop header
LB: loop body
LE: loop exit
PB: predicated region body
PF: predicated region fallthrough
CT: control target
= control target key end

     0   :  { %s491_s12 = smov 0   ;;  %s551_s0 = inlined_call_operand.vmem [shape: bf16[2,64,72], index: 0, kind: input, shape index: {}]   ;;  %s552_s1 = inlined_call_operand.vmem [shape: bf16[72,8], index: 1, kind: input, shape index: {}]   ;;  %s553_s2 = inlined_call_operand.vmem [shape: f32[1,8], index: 2, kind: input, shape index: {}]   ;;  %s554_s3 = inlined_call_operand.vmem [shape: bf16[2,64,8], index: 3, kind: output, shape index: {}]  }
   0x1 LB: > { %s382_s13 = sadd.s32 4294967295, %s469_s12   ;;  %p386_p0 = scmp.ge.s32.totalorder %s469_s12, 1  ;;  %s469_s12 = sphi %s491_s12, %s13_s12  }
   0x2   : > { %p137_p1 = scmp.lt.s32.totalorder %s469_s12, 3 }
   0x4   : > { %p138_p2 = pnand %p386_p0, %p137_p1 }
   0x5   : > { %p161_p3 = scmp.lt.s32.totalorder (!%p138_p2), %s382_s13, 1 }
   0x6   : > { %141 = sbr.rel (%p138_p2) target bundleno = 186 (0xba), region = 32 }
   0xb   : > { %v188_v0 = vld [vmem:[%s552_s1 + $0x20] sm:$0xf]  ;;  %vm253_vm0 = vcmask 1043456   ;;  %v438_v4 = vld [vmem:[%s552_s1 + $0x18] sm:$0xff]  ;;  %v437_v5 = vld [vmem:[%s552_s1 + $0x10] sm:$0xff]  ;;  %s556_s13 = smov (!%p161_p3, %s382_s13), 1 }
   0xc   : > { %v230_v1 = vunpack.c.l.b16 %v188_v0  ;;  %v436_v6 = vld [vmem:[%s552_s1 + $0x8] sm:$0xff]  ;;  %s429_s22 = sshll.u32 %s556_s13, 5  ;;  %v435_v7 = vld [vmem:[%s552_s1] sm:$0xff]  ;;  %vm240_vm1 = vcmask 588800   ;;  %vm318_vm4 = vcmask 60416  }
   0xd   : > { %s165_s27 = scalar_lea.vmem %s551_s0, %s429_s22  ;;  %v462_v12 = vld [vmem:[%s553_s2] ss:$0 sm:$0xff]  ;;  %s530_s5 = scalar_lea.vmem %s554_s3, %s429_s22 }
   0xe   : > { %v235_v2 = vpack.c.b16 %v230_v1, %v230_v1  ;;  %v431_v8 = vld [vmem:[%s165_s27] sm:$0xff]  ;;  %v432_v9 = vld [vmem:[%s165_s27 + $0x8] sm:$0xff]  ;;  %v433_v10 = vld [vmem:[%s165_s27 + $0x10] sm:$0xff] }
   0xf   : > { %v434_v11 = vld [vmem:[%s165_s27 + $0x18] sm:$0xff] }
  0x10   : > { %v255_v3 = vsel %vm253_vm0, %v235_v2, 0 }
  0x11   : > { %260 = vmatpush.bf16.msra.mxu0 %v255_v3  ;;  %439 = vmatpush.bf16.msra.mxu1 %v255_v3 }
  0x12   : > { %440 = vmatpush.bf16.msra.mxu2 %v255_v3  ;;  %441 = vmatpush.bf16.msra.mxu3 %v255_v3 }
  0x15   : > { %261 = vmatpush.bf16.msra.mxu0 %v438_v4  ;;  %442 = vmatpush.bf16.msra.mxu1 %v438_v4 }
  0x16   : > { %443 = vmatpush.bf16.msra.mxu2 %v438_v4  ;;  %444 = vmatpush.bf16.msra.mxu3 %v438_v4 }
  0x19   : > { %262 = vmatpush.bf16.msra.mxu0 %v437_v5  ;;  %445 = vmatpush.bf16.msra.mxu1 %v437_v5 }
  0x1a   : > { %446 = vmatpush.bf16.msra.mxu2 %v437_v5  ;;  %447 = vmatpush.bf16.msra.mxu3 %v437_v5 }
  0x1d   : > { %263 = vmatpush.bf16.msra.mxu0 %v436_v6  ;;  %448 = vmatpush.bf16.msra.mxu1 %v436_v6 }
  0x1e   : > { %449 = vmatpush.bf16.msra.mxu2 %v436_v6  ;;  %450 = vmatpush.bf16.msra.mxu3 %v436_v6 }
  0x21   : > { %264 = vmatpush.bf16.msra.mxu0 %v435_v7  ;;  %451 = vmatpush.bf16.msra.mxu1 %v435_v7 }
  0x22   : > { %452 = vmatpush.bf16.msra.mxu2 %v435_v7  ;;  %453 = vmatpush.bf16.msra.mxu3 %v435_v7 }
  0x24   : > { %423 = vmatmul.msk.bf16.vlgmr.msra.gmra.mxu0 %vm240_vm1, %v431_v8  ;;  %424 = vmatmul.msk.bf16.vlgmr.msra.gmra.mxu1 %vm240_vm1, %v432_v9 }
  0x25   : > { %425 = vmatmul.msk.bf16.vlgmr.msra.gmra.mxu2 %vm240_vm1, %v433_v10  ;;  %426 = vmatmul.msk.bf16.vlgmr.msra.gmra.mxu3 %vm240_vm1, %v434_v11 }
  0xa1   : > { %v266_v13 = vpop.f32.mrf.mxu0  ;;  %v271_v14 = vpop.f32.mrf.mxu1 }
  0xa2   : > { %v267_v15 = vadd.f32 %v462_v12, %v266_v13  ;;  %v272_v16 = vadd.f32 %v462_v12, %v271_v14 }
  0xa4   : > { %vm286_vm2 = vcmp.gt.f32.partialorder %v267_v15, 0.0  ;;  %v294_v17 = vmul.f32 0.2, %v267_v15  ;;  %vm288_vm3 = vcmp.gt.f32.partialorder %v272_v16, 0.0  ;;  %v296_v18 = vmul.f32 0.2, %v272_v16 }
  0xa6   : > { %v302_v19 = vsel %vm286_vm2, %v267_v15, %v294_v17  ;;  %v304_v20 = vsel %vm288_vm3, %v272_v16, %v296_v18 }
  0xa7   : > { %v310_v21 = vpack.c.bf16 %v302_v19, %v302_v19  ;;  %v312_v22 = vpack.c.bf16 %v304_v20, %v304_v20 }
  0xa8   : > { %v276_v23 = vpop.f32.mrf.mxu2  ;;  %v281_v24 = vpop.f32.mrf.mxu3 }
  0xa9   : > { %319 = vst.msk [vmem:[%s530_s5] sm:$0xf] %vm318_vm4, %v310_v21  ;;  %v277_v25 = vadd.f32 %v462_v12, %v276_v23  ;;  %v282_v26 = vadd.f32 %v462_v12, %v281_v24  ;;  %v268_v27 = vpop.f32.mrf.mxu0  ;;  %v273_v28 = vpop.f32.mrf.mxu1 }
  0xaa   : > { %321 = vst.msk [vmem:[%s530_s5 + $0x8] sm:$0xf] %vm318_vm4, %v312_v22  ;;  %v269_v29 = vadd.f32 %v462_v12, %v268_v27  ;;  %v274_v30 = vadd.f32 %v462_v12, %v273_v28 }
  0xab   : > { %vm290_vm5 = vcmp.gt.f32.partialorder %v277_v25, 0.0  ;;  %v298_v31 = vmul.f32 0.2, %v277_v25  ;;  %vm292_vm6 = vcmp.gt.f32.partialorder %v282_v26, 0.0  ;;  %v300_v32 = vmul.f32 0.2, %v282_v26 }
  0xac   : > { %vm287_vm7 = vcmp.gt.f32.partialorder %v269_v29, 0.0  ;;  %v295_v33 = vmul.f32 0.2, %v269_v29  ;;  %vm289_vm8 = vcmp.gt.f32.partialorder %v274_v30, 0.0  ;;  %v297_v34 = vmul.f32 0.2, %v274_v30 }
  0xad   : > { %v306_v35 = vsel %vm290_vm5, %v277_v25, %v298_v31  ;;  %v308_v36 = vsel %vm292_vm6, %v282_v26, %v300_v32 }
  0xae   : > { %v314_v37 = vpack.c.bf16 %v306_v35, %v306_v35  ;;  %v316_v38 = vpack.c.bf16 %v308_v36, %v308_v36  ;;  %v303_v39 = vsel %vm287_vm7, %v269_v29, %v295_v33  ;;  %v305_v40 = vsel %vm289_vm8, %v274_v30, %v297_v34 }
  0xaf   : > { %v311_v41 = vpack.c.bf16 %v303_v39, %v303_v39  ;;  %v313_v42 = vpack.c.bf16 %v305_v40, %v305_v40 }
  0xb0   : > { %323 = vst.msk [vmem:[%s530_s5 + $0x10] sm:$0xf] %vm318_vm4, %v314_v37  ;;  %v278_v43 = vpop.f32.mrf.mxu2  ;;  %v283_v44 = vpop.f32.mrf.mxu3 }
  0xb1   : > { %325 = vst.msk [vmem:[%s530_s5 + $0x18] sm:$0xf] %vm318_vm4, %v316_v38  ;;  %v279_v45 = vadd.f32 %v462_v12, %v278_v43  ;;  %v284_v46 = vadd.f32 %v462_v12, %v283_v44 }
  0xb2   : > { %320 = vst.msk [vmem:[%s530_s5 + $0x4] sm:$0xf] %vm318_vm4, %v311_v41 }
  0xb3   : > { %322 = vst.msk [vmem:[%s530_s5 + $0xc] sm:$0xf] %vm318_vm4, %v313_v42  ;;  %vm291_vm9 = vcmp.gt.f32.partialorder %v279_v45, 0.0  ;;  %v299_v47 = vmul.f32 0.2, %v279_v45  ;;  %vm293_vm10 = vcmp.gt.f32.partialorder %v284_v46, 0.0 }
  0xb4   : > { %v301_v48 = vmul.f32 0.2, %v284_v46 }
  0xb5   : > { %v307_v49 = vsel %vm291_vm9, %v279_v45, %v299_v47 }
  0xb6   : > { %v315_v50 = vpack.c.bf16 %v307_v49, %v307_v49  ;;  %v309_v51 = vsel %vm293_vm10, %v284_v46, %v301_v48 }
  0xb7   : > { %v317_v52 = vpack.c.bf16 %v309_v51, %v309_v51 }
  0xb8   : > { %324 = vst.msk [vmem:[%s530_s5 + $0x14] sm:$0xf] %vm318_vm4, %v315_v50 }
  0xb9   : > { %326 = vst.msk [vmem:[%s530_s5 + $0x1c] sm:$0xf] %vm318_vm4, %v317_v52 }
  0xba PF: > { %s13_s12 = sadd.s32 1, %s469_s12  }
  0xbb   : > { %p10_p4 = scmp.ge.s32.totalorder %s13_s12, 4  }
  0xbd   :  { %12 = sbr.rel (!%p10_p4) target bundleno = 1 (0x1), region = 62 }

// kernel: srflownet_normal_flow.24
= control target key start
LH: loop header
LB: loop body
LE: loop exit
PB: predicated region body
PF: predicated region fallthrough
CT: control target
= control target key end

     0   :  { %s607_s12 = smov 0   ;;  %s708_s0 = inlined_call_operand.vmem [shape: bf16[2,64,144], index: 0, kind: input, shape index: {}]   ;;  %s709_s1 = inlined_call_operand.vmem [shape: bf16[144,8], index: 1, kind: input, shape index: {}]   ;;  %s710_s2 = inlined_call_operand.vmem [shape: f32[1,8], index: 2, kind: input, shape index: {}]   ;;  %s711_s3 = inlined_call_operand.vmem [shape: bf16[2,64,8], index: 3, kind: output, shape index: {}]  }
   0x1 LB: > { %s459_s13 = sadd.s32 4294967295, %s585_s12   ;;  %p463_p0 = scmp.ge.s32.totalorder %s585_s12, 1  ;;  %s585_s12 = sphi %s607_s12, %s13_s12  }
   0x2   : > { %p137_p1 = scmp.lt.s32.totalorder %s585_s12, 3 }
   0x4   : > { %p138_p2 = pnand %p463_p0, %p137_p1 }
   0x5   : > { %p161_p3 = scmp.lt.s32.totalorder (!%p138_p2), %s459_s13, 1 }
   0x6   : > { %141 = sbr.rel (%p138_p2) target bundleno = 209 (0xd1), region = 32 }
   0xb   : > { %v559_v0 = vld [vmem:[%s709_s1 + $0x38] sm:$0xff]  ;;  %v560_v1 = vld [vmem:[%s709_s1 + $0x40] sm:$0xff]  ;;  %v558_v2 = vld [vmem:[%s709_s1 + $0x30] sm:$0xff]  ;;  %s713_s13 = smov (!%p161_p3, %s459_s13), 1  ;;  %vm292_vm0 = vcmask 130048   ;;  %vm395_vm2 = vcmask 60416  }
   0xc   : > { %305 = vmatpush.bf16.msra.mxu0 %v559_v0  ;;  %561 = vmatpush.bf16.msra.mxu2 %v559_v0  ;;  %s542_s20 = sshll.u32 %s713_s13, 6  ;;  %v557_v3 = vld [vmem:[%s709_s1 + $0x28] sm:$0xff]  ;;  %v556_v9 = vld [vmem:[%s709_s1 + $0x20] sm:$0xff]  ;;  %v555_v11 = vld [vmem:[%s709_s1 + $0x18] sm:$0xff]  ;;  %s543_s11 = sshll.u32 %s713_s13, 5 }
   0xd   : > { %569 = vmatpush.bf16.msra.mxu3 %v560_v1  ;;  %341 = vmatpush.bf16.msra.mxu1 %v560_v1  ;;  %s630_s23 = scalar_lea.vmem %s708_s0, %s542_s20  ;;  %v554_v12 = vld [vmem:[%s709_s1 + $0x10] sm:$0xff]  ;;  %v553_v16 = vld [vmem:[%s709_s1 + $0x8] sm:$0xff]  ;;  %v552_v17 = vld [vmem:[%s709_s1] sm:$0xff]  ;;  %s680_s16 = scalar_lea.vmem %s711_s3, %s543_s11 }
   0xe   : > { %v546_v4 = vld [vmem:[%s630_s23 + $0x14] sm:$0xf]  ;;  %v480_v5 = vld [vmem:[%s630_s23 + $0x18] sm:$0xf0]  ;;  %v544_v7 = vld [vmem:[%s630_s23 + $0x4] sm:$0xf] }
   0xf   : > { %v483_v6 = vor.u32 %v546_v4, %v480_v5  ;;  %v472_v8 = vld [vmem:[%s630_s23 + $0x8] sm:$0xf0]  ;;  %v548_v13 = vld [vmem:[%s630_s23 + $0x24] sm:$0xf]  ;;  %v470_v18 = vld [vmem:[%s630_s23] sm:$0xf] }
  0x10   : > { %306 = vmatpush.bf16.msra.mxu0 %v558_v2  ;;  %562 = vmatpush.bf16.msra.mxu2 %v558_v2  ;;  %v475_v10 = vor.u32 %v544_v7, %v472_v8  ;;  %v488_v14 = vld [vmem:[%s630_s23 + $0x28] sm:$0xf0]  ;;  %v545_v19 = vld [vmem:[%s630_s23 + $0x4] sm:$0xf0]  ;;  %v486_v20 = vld [vmem:[%s630_s23 + $0x20] sm:$0xf] }
  0x11   : > { %537 = vmatmul.msk.bf16.vlgmr.msra.gmra.mxu3 %vm292_vm0, %v483_v6  ;;  %v491_v15 = vor.u32 %v548_v13, %v488_v14  ;;  %v549_v21 = vld [vmem:[%s630_s23 + $0x24] sm:$0xf0]  ;;  %v471_v22 = vor.u32 %v545_v19, %v470_v18  ;;  %v550_v24 = vld [vmem:[%s630_s23 + $0x34] sm:$0xf]  ;;  %v496_v25 = vld [vmem:[%s630_s23 + $0x38] sm:$0xf0] }
  0x12   : > { %536 = vmatmul.msk.bf16.vlgmr.msra.gmra.mxu1 %vm292_vm0, %v475_v10  ;;  %v487_v23 = vor.u32 %v549_v21, %v486_v20  ;;  %v499_v26 = vor.u32 %v550_v24, %v496_v25  ;;  %v478_v27 = vld [vmem:[%s630_s23 + $0x10] sm:$0xf]  ;;  %v547_v28 = vld [vmem:[%s630_s23 + $0x14] sm:$0xf0]  ;;  %v673_v35 = vld [vmem:[%s710_s2] ss:$0 sm:$0xff] }
  0x13   : > { %v494_v29 = vld [vmem:[%s630_s23 + $0x30] sm:$0xf]  ;;  %v551_v30 = vld [vmem:[%s630_s23 + $0x34] sm:$0xf0]  ;;  %v479_v31 = vor.u32 %v547_v28, %v478_v27 }
  0x14   : > { %307 = vmatpush.bf16.msra.mxu0 %v557_v3  ;;  %563 = vmatpush.bf16.msra.mxu2 %v557_v3  ;;  %v495_v32 = vor.u32 %v551_v30, %v494_v29 }
  0x18   : > { %308 = vmatpush.bf16.msra.mxu0 %v556_v9  ;;  %564 = vmatpush.bf16.msra.mxu2 %v556_v9 }
  0x1c   : > { %309 = vmatpush.bf16.msra.mxu0 %v555_v11  ;;  %565 = vmatpush.bf16.msra.mxu2 %v555_v11 }
  0x20   : > { %310 = vmatpush.bf16.msra.mxu0 %v554_v12  ;;  %566 = vmatpush.bf16.msra.mxu2 %v554_v12 }
  0x21   : > { %538 = vmatmul.msk.bf16.gmra.mxu3 %vm292_vm0, %v491_v15 }
  0x24   : > { %311 = vmatpush.bf16.msra.mxu0 %v553_v16  ;;  %567 = vmatpush.bf16.msra.mxu2 %v553_v16 }
  0x28   : > { %312 = vmatpush.bf16.msra.mxu0 %v552_v17  ;;  %568 = vmatpush.bf16.msra.mxu2 %v552_v17 }
  0x2b   : > { %313 = vmatmul.bf16.vlgmr.msra.gmra.mxu0 %v471_v22  ;;  %323 = vmatmul.bf16.vlgmr.msra.gmra.mxu2 %v487_v23 }
  0x31   : > { %539 = vmatmul.msk.bf16.gmra.mxu3 %vm292_vm0, %v499_v26 }
  0x3b   : > { %318 = vmatmul.bf16.gmra.mxu0 %v479_v31  ;;  %328 = vmatmul.bf16.gmra.mxu2 %v495_v32 }
  0x8f   : > { %v343_v36 = vpop.f32.mrf.mxu1 }
  0x94   : > { %v348_v33 = vpop.f32.mrf.mxu3 }
  0x97   : > { %v345_v47 = vpop.f32.mrf.mxu1 }
  0x9c   : > { %v350_v34 = vpop.f32.mrf.mxu3 }
  0xa4   : > { %v353_v39 = vpop.f32.mrf.mxu3 }
  0xa8   : > { %v314_v37 = vpop.f32.mrf.mxu0 }
  0xa9   : > { %v315_v38 = vadd.f32 %v673_v35, %v314_v37 }
  0xab   : > { %v344_v40 = vadd.f32 %v343_v36, %v315_v38 }
  0xac   : > { %v355_v52 = vpop.f32.mrf.mxu3 }
  0xad   : > { %vm363_vm1 = vcmp.gt.f32.partialorder %v344_v40, 0.0  ;;  %v371_v41 = vmul.f32 0.2, %v344_v40 }
  0xae   : > { %v324_v42 = vpop.f32.mrf.mxu2 }
  0xaf   : > { %v379_v43 = vsel %vm363_vm1, %v344_v40, %v371_v41  ;;  %v325_v44 = vadd.f32 %v673_v35, %v324_v42 }
  0xb0   : > { %v387_v45 = vpack.c.bf16 %v379_v43, %v379_v43  ;;  %v316_v46 = vpop.f32.mrf.mxu0 }
  0xb1   : > { %v354_v48 = vadd.f32 %v353_v39, %v325_v44  ;;  %v317_v49 = vadd.f32 %v673_v35, %v316_v46 }
  0xb2   : > { %396 = vst.msk [vmem:[%s680_s16] sm:$0xf] %vm395_vm2, %v387_v45 }
  0xb3   : > { %vm367_vm3 = vcmp.gt.f32.partialorder %v354_v48, 0.0  ;;  %v375_v50 = vmul.f32 0.2, %v354_v48  ;;  %v346_v51 = vadd.f32 %v345_v47, %v317_v49 }
  0xb4   : > { %v358_v4 = vpop.f32.mrf.mxu3 }
  0xb5   : > { %v383_v53 = vsel %vm367_vm3, %v354_v48, %v375_v50  ;;  %vm364_vm4 = vcmp.gt.f32.partialorder %v346_v51, 0.0  ;;  %v372_v54 = vmul.f32 0.2, %v346_v51 }
  0xb6   : > { %v391_v55 = vpack.c.bf16 %v383_v53, %v383_v53  ;;  %v326_v56 = vpop.f32.mrf.mxu2 }
  0xb7   : > { %v380_v57 = vsel %vm364_vm4, %v346_v51, %v372_v54  ;;  %v327_v58 = vadd.f32 %v673_v35, %v326_v56 }
  0xb8   : > { %400 = vst.msk [vmem:[%s680_s16 + $0x10] sm:$0xf] %vm395_vm2, %v391_v55  ;;  %v388_v59 = vpack.c.bf16 %v380_v57, %v380_v57  ;;  %v319_v60 = vpop.f32.mrf.mxu0 }
  0xb9   : > { %v356_v61 = vadd.f32 %v355_v52, %v327_v58  ;;  %v320_v62 = vadd.f32 %v673_v35, %v319_v60 }
  0xba   : > { %397 = vst.msk [vmem:[%s680_s16 + $0x4] sm:$0xf] %vm395_vm2, %v388_v59 }
  0xbb   : > { %vm368_vm5 = vcmp.gt.f32.partialorder %v356_v61, 0.0  ;;  %v376_v63 = vmul.f32 0.2, %v356_v61  ;;  %v349_v0 = vadd.f32 %v348_v33, %v320_v62 }
  0xbc   : > { %v360_v21 = vpop.f32.mrf.mxu3 }
  0xbd   : > { %v384_v1 = vsel %vm368_vm5, %v356_v61, %v376_v63  ;;  %vm365_vm6 = vcmp.gt.f32.partialorder %v349_v0, 0.0  ;;  %v373_v2 = vmul.f32 0.2, %v349_v0 }
  0xbe   : > { %v392_v3 = vpack.c.bf16 %v384_v1, %v384_v1  ;;  %v329_v5 = vpop.f32.mrf.mxu2 }
  0xbf   : > { %v381_v6 = vsel %vm365_vm6, %v349_v0, %v373_v2  ;;  %v330_v7 = vadd.f32 %v673_v35, %v329_v5 }
  0xc0   : > { %401 = vst.msk [vmem:[%s680_s16 + $0x14] sm:$0xf] %vm395_vm2, %v392_v3  ;;  %v389_v8 = vpack.c.bf16 %v381_v6, %v381_v6  ;;  %v321_v9 = vpop.f32.mrf.mxu0 }
  0xc1   : > { %v359_v10 = vadd.f32 %v358_v4, %v330_v7  ;;  %v322_v11 = vadd.f32 %v673_v35, %v321_v9 }
  0xc2   : > { %398 = vst.msk [vmem:[%s680_s16 + $0x8] sm:$0xf] %vm395_vm2, %v389_v8 }
  0xc3   : > { %vm369_vm7 = vcmp.gt.f32.partialorder %v359_v10, 0.0  ;;  %v377_v12 = vmul.f32 0.2, %v359_v10  ;;  %v351_v13 = vadd.f32 %v350_v34, %v322_v11 }
  0xc5   : > { %v385_v14 = vsel %vm369_vm7, %v359_v10, %v377_v12  ;;  %vm366_vm8 = vcmp.gt.f32.partialorder %v351_v13, 0.0  ;;  %v374_v15 = vmul.f32 0.2, %v351_v13 }
  0xc6   : > { %v393_v16 = vpack.c.bf16 %v385_v14, %v385_v14  ;;  %v331_v17 = vpop.f32.mrf.mxu2 }
  0xc7   : > { %v382_v18 = vsel %vm366_vm8, %v351_v13, %v374_v15  ;;  %v332_v19 = vadd.f32 %v673_v35, %v331_v17 }
  0xc8   : > { %402 = vst.msk [vmem:[%s680_s16 + $0x18] sm:$0xf] %vm395_vm2, %v393_v16  ;;  %v390_v20 = vpack.c.bf16 %v382_v18, %v382_v18 }
  0xc9   : > { %v361_v22 = vadd.f32 %v360_v21, %v332_v19 }
  0xca   : > { %399 = vst.msk [vmem:[%s680_s16 + $0xc] sm:$0xf] %vm395_vm2, %v390_v20 }
  0xcb   : > { %vm370_vm9 = vcmp.gt.f32.partialorder %v361_v22, 0.0  ;;  %v378_v23 = vmul.f32 0.2, %v361_v22 }
  0xcd   : > { %v386_v24 = vsel %vm370_vm9, %v361_v22, %v378_v23 }
  0xce   : > { %v394_v25 = vpack.c.bf16 %v386_v24, %v386_v24 }
  0xd0   : > { %403 = vst.msk [vmem:[%s680_s16 + $0x1c] sm:$0xf] %vm395_vm2, %v394_v25 }
  0xd1 PF: > { %s13_s12 = sadd.s32 1, %s585_s12  }
  0xd2   : > { %p10_p4 = scmp.ge.s32.totalorder %s13_s12, 4  }
  0xd4   :  { %12 = sbr.rel (!%p10_p4) target bundleno = 1 (0x1), region = 62 }

// kernel: srflownet_normal_flow.25
= control target key start
LH: loop header
LB: loop body
LE: loop exit
PB: predicated region body
PF: predicated region fallthrough
CT: control target
= control target key end

     0   :  { %s648_s12 = smov 0   ;;  %s754_s0 = inlined_call_operand.vmem [shape: bf16[2,64,216], index: 0, kind: input, shape index: {}]   ;;  %s755_s1 = inlined_call_operand.vmem [shape: bf16[216,8], index: 1, kind: input, shape index: {}]   ;;  %s756_s2 = inlined_call_operand.vmem [shape: f32[1,8], index: 2, kind: input, shape index: {}]   ;;  %s757_s3 = inlined_call_operand.vmem [shape: bf16[2,64,8], index: 3, kind: output, shape index: {}]  }
   0x1 LB: > { %s475_s13 = sadd.s32 4294967295, %s626_s12   ;;  %p479_p0 = scmp.ge.s32.totalorder %s626_s12, 1  ;;  %s626_s12 = sphi %s648_s12, %s13_s12  }
   0x2   : > { %p137_p1 = scmp.lt.s32.totalorder %s626_s12, 3 }
   0x4   : > { %p138_p2 = pnand %p479_p0, %p137_p1 }
   0x5   : > { %p161_p3 = scmp.lt.s32.totalorder (!%p138_p2), %s475_s13, 1 }
   0x6   : > { %141 = sbr.rel (%p138_p2) target bundleno = 217 (0xd9), region = 32 }
   0xb   : > { %v591_v0 = vld [vmem:[%s755_s1 + $0x38] sm:$0xff]  ;;  %v206_v1 = vld [vmem:[%s755_s1 + $0x68] sm:$0xf]  ;;  %vm341_vm0 = vcmask 1043456   ;;  %v590_v3 = vld [vmem:[%s755_s1 + $0x30] sm:$0xff]  ;;  %s759_s13 = smov (!%p161_p3, %s475_s13), 1 }
   0xc   : > { %v300_v2 = vunpack.c.l.b16 %v206_v1  ;;  %345 = vmatpush.bf16.msra.mxu0 %v591_v0  ;;  %597 = vmatpush.bf16.msra.mxu2 %v591_v0  ;;  %v596_v6 = vld [vmem:[%s755_s1 + $0x60] sm:$0xff]  ;;  %v589_v7 = vld [vmem:[%s755_s1 + $0x28] sm:$0xff]  ;;  %v595_v8 = vld [vmem:[%s755_s1 + $0x58] sm:$0xff]  ;;  %s574_s5 = sshll.u32 %s759_s13, 6  ;;  %vm328_vm1 = vcmask 719872   ;;  %s575_s23 = sshll.u32 %s759_s13, 5 }
   0xd   : > { %v588_v9 = vld [vmem:[%s755_s1 + $0x20] sm:$0xff]  ;;  %v594_v10 = vld [vmem:[%s755_s1 + $0x50] sm:$0xff]  ;;  %v587_v11 = vld [vmem:[%s755_s1 + $0x18] sm:$0xff]  ;;  %s695_s14 = scalar_lea.vmem %s754_s0, %s574_s5  ;;  %s733_s26 = scalar_lea.vmem %s757_s3, %s575_s23  ;;  %vm411_vm2 = vcmask 60416  }
   0xe   : > { %v314_v4 = vpack.c.b16 %v300_v2, %v300_v2  ;;  %v593_v12 = vld [vmem:[%s755_s1 + $0x48] sm:$0xff]  ;;  %v586_v13 = vld [vmem:[%s755_s1 + $0x10] sm:$0xff]  ;;  %v592_v14 = vld [vmem:[%s755_s1 + $0x40] sm:$0xff] }
   0xf   : > { %v585_v15 = vld [vmem:[%s755_s1 + $0x8] sm:$0xff]  ;;  %v578_v16 = vld [vmem:[%s695_s14 + $0x14] sm:$0xf]  ;;  %v496_v17 = vld [vmem:[%s695_s14 + $0x18] sm:$0xf0] }
  0x10   : > { %v343_v5 = vsel %vm341_vm0, %v314_v4, 0  ;;  %346 = vmatpush.bf16.msra.mxu0 %v590_v3  ;;  %598 = vmatpush.bf16.msra.mxu2 %v590_v3  ;;  %v576_v18 = vld [vmem:[%s695_s14 + $0x4] sm:$0xf]  ;;  %v488_v19 = vld [vmem:[%s695_s14 + $0x8] sm:$0xf0]  ;;  %v499_v20 = vor.u32 %v578_v16, %v496_v17 }
  0x11   : > { %605 = vmatpush.bf16.msra.mxu3 %v343_v5  ;;  %376 = vmatpush.bf16.msra.mxu1 %v343_v5  ;;  %v584_v21 = vld [vmem:[%s755_s1] sm:$0xff]  ;;  %v577_v23 = vld [vmem:[%s695_s14 + $0x4] sm:$0xf0]  ;;  %v491_v24 = vor.u32 %v576_v18, %v488_v19  ;;  %v504_v30 = vld [vmem:[%s695_s14 + $0x28] sm:$0xf0] }
  0x12   : > { %v486_v22 = vld [vmem:[%s695_s14] sm:$0xf]  ;;  %v581_v26 = vld [vmem:[%s695_s14 + $0x24] sm:$0xf0]  ;;  %v580_v29 = vld [vmem:[%s695_s14 + $0x24] sm:$0xf] }
  0x13   : > { %v502_v25 = vld [vmem:[%s695_s14 + $0x20] sm:$0xf]  ;;  %v487_v27 = vor.u32 %v577_v23, %v486_v22  ;;  %v507_v31 = vor.u32 %v580_v29, %v504_v30  ;;  %v494_v32 = vld [vmem:[%s695_s14 + $0x10] sm:$0xf]  ;;  %v579_v33 = vld [vmem:[%s695_s14 + $0x14] sm:$0xf0] }
  0x14   : > { %347 = vmatpush.bf16.msra.mxu0 %v589_v7  ;;  %599 = vmatpush.bf16.msra.mxu2 %v589_v7  ;;  %v503_v28 = vor.u32 %v581_v26, %v502_v25  ;;  %v510_v34 = vld [vmem:[%s695_s14 + $0x30] sm:$0xf]  ;;  %v583_v35 = vld [vmem:[%s695_s14 + $0x34] sm:$0xf0]  ;;  %v495_v36 = vor.u32 %v579_v33, %v494_v32  ;;  %v582_v38 = vld [vmem:[%s695_s14 + $0x34] sm:$0xf] }
  0x15   : > { %606 = vmatpush.bf16.msra.mxu3 %v596_v6  ;;  %377 = vmatpush.bf16.msra.mxu1 %v596_v6  ;;  %v511_v37 = vor.u32 %v583_v35, %v510_v34  ;;  %v512_v39 = vld [vmem:[%s695_s14 + $0x38] sm:$0xf0]  ;;  %v619_v41 = vld [vmem:[%s756_s2] ss:$0 sm:$0xff] }
  0x16   : > { %v515_v40 = vor.u32 %v582_v38, %v512_v39 }
  0x18   : > { %348 = vmatpush.bf16.msra.mxu0 %v588_v9  ;;  %600 = vmatpush.bf16.msra.mxu2 %v588_v9 }
  0x19   : > { %607 = vmatpush.bf16.msra.mxu3 %v595_v8  ;;  %378 = vmatpush.bf16.msra.mxu1 %v595_v8 }
  0x1c   : > { %349 = vmatpush.bf16.msra.mxu0 %v587_v11  ;;  %601 = vmatpush.bf16.msra.mxu2 %v587_v11 }
  0x1d   : > { %608 = vmatpush.bf16.msra.mxu3 %v594_v10  ;;  %379 = vmatpush.bf16.msra.mxu1 %v594_v10 }
  0x20   : > { %350 = vmatpush.bf16.msra.mxu0 %v586_v13  ;;  %602 = vmatpush.bf16.msra.mxu2 %v586_v13 }
  0x21   : > { %609 = vmatpush.bf16.msra.mxu3 %v593_v12  ;;  %380 = vmatpush.bf16.msra.mxu1 %v593_v12 }
  0x24   : > { %351 = vmatpush.bf16.msra.mxu0 %v585_v15  ;;  %603 = vmatpush.bf16.msra.mxu2 %v585_v15 }
  0x25   : > { %610 = vmatpush.bf16.msra.mxu3 %v592_v14  ;;  %381 = vmatpush.bf16.msra.mxu1 %v592_v14 }
  0x28   : > { %569 = vmatmul.msk.bf16.vlgmr.msra.gmra.mxu3 %vm328_vm1, %v499_v20  ;;  %352 = vmatpush.bf16.msra.mxu0 %v584_v21 }
  0x29   : > { %568 = vmatmul.msk.bf16.vlgmr.msra.gmra.mxu1 %vm328_vm1, %v491_v24  ;;  %604 = vmatpush.bf16.msra.mxu2 %v584_v21 }
  0x2b   : > { %353 = vmatmul.bf16.vlgmr.msra.gmra.mxu0 %v487_v27 }
  0x2c   : > { %363 = vmatmul.bf16.vlgmr.msra.gmra.mxu2 %v503_v28 }
  0x38   : > { %570 = vmatmul.msk.bf16.gmra.mxu3 %vm328_vm1, %v507_v31 }
  0x3b   : > { %358 = vmatmul.bf16.gmra.mxu0 %v495_v36 }
  0x3c   : > { %368 = vmatmul.bf16.gmra.mxu2 %v511_v37 }
  0x48   : > { %571 = vmatmul.msk.bf16.gmra.mxu3 %vm328_vm1, %v515_v40 }
  0xa6   : > { %v383_v42 = vpop.f32.mrf.mxu1 }
  0xa8   : > { %v354_v43 = vpop.f32.mrf.mxu0 }
  0xa9   : > { %v355_v44 = vadd.f32 %v619_v41, %v354_v43 }
  0xab   : > { %v388_v45 = vpop.f32.mrf.mxu3  ;;  %v384_v46 = vadd.f32 %v383_v42, %v355_v44 }
  0xad   : > { %v403_v47 = vpack.c.bf16 %v384_v46, %v384_v46 }
  0xae   : > { %v385_v48 = vpop.f32.mrf.mxu1 }
  0xaf   : > { %412 = vst.msk [vmem:[%s733_s26] sm:$0xf] %vm411_vm2, %v403_v47  ;;  %v364_v49 = vpop.f32.mrf.mxu2 }
  0xb0   : > { %v356_v50 = vpop.f32.mrf.mxu0  ;;  %v365_v55 = vadd.f32 %v619_v41, %v364_v49 }
  0xb1   : > { %v357_v51 = vadd.f32 %v619_v41, %v356_v50 }
  0xb3   : > { %v390_v52 = vpop.f32.mrf.mxu3  ;;  %v386_v53 = vadd.f32 %v385_v48, %v357_v51 }
  0xb5   : > { %v404_v54 = vpack.c.bf16 %v386_v53, %v386_v53 }
  0xb7   : > { %413 = vst.msk [vmem:[%s733_s26 + $0x4] sm:$0xf] %vm411_vm2, %v404_v54  ;;  %v366_v58 = vpop.f32.mrf.mxu2 }
  0xb8   : > { %v359_v56 = vpop.f32.mrf.mxu0  ;;  %v367_v1 = vadd.f32 %v619_v41, %v366_v58 }
  0xb9   : > { %v360_v57 = vadd.f32 %v619_v41, %v359_v56 }
  0xbb   : > { %v393_v59 = vpop.f32.mrf.mxu3  ;;  %v389_v60 = vadd.f32 %v388_v45, %v360_v57 }
  0xbc   : > { %v394_v61 = vadd.f32 %v393_v59, %v365_v55 }
  0xbd   : > { %v405_v62 = vpack.c.bf16 %v389_v60, %v389_v60 }
  0xbe   : > { %v407_v63 = vpack.c.bf16 %v394_v61, %v394_v61 }
  0xbf   : > { %414 = vst.msk [vmem:[%s733_s26 + $0x8] sm:$0xf] %vm411_vm2, %v405_v62  ;;  %v369_v6 = vpop.f32.mrf.mxu2 }
  0xc0   : > { %416 = vst.msk [vmem:[%s733_s26 + $0x10] sm:$0xf] %vm411_vm2, %v407_v63  ;;  %v361_v0 = vpop.f32.mrf.mxu0  ;;  %v370_v9 = vadd.f32 %v619_v41, %v369_v6 }
  0xc1   : > { %v362_v2 = vadd.f32 %v619_v41, %v361_v0 }
  0xc3   : > { %v395_v3 = vpop.f32.mrf.mxu3  ;;  %v391_v4 = vadd.f32 %v390_v52, %v362_v2 }
  0xc4   : > { %v396_v5 = vadd.f32 %v395_v3, %v367_v1 }
  0xc5   : > { %v406_v7 = vpack.c.bf16 %v391_v4, %v391_v4 }
  0xc6   : > { %v408_v8 = vpack.c.bf16 %v396_v5, %v396_v5 }
  0xc7   : > { %415 = vst.msk [vmem:[%s733_s26 + $0xc] sm:$0xf] %vm411_vm2, %v406_v7  ;;  %v371_v13 = vpop.f32.mrf.mxu2 }
  0xc8   : > { %417 = vst.msk [vmem:[%s733_s26 + $0x14] sm:$0xf] %vm411_vm2, %v408_v8  ;;  %v372_v14 = vadd.f32 %v619_v41, %v371_v13 }
  0xcb   : > { %v398_v10 = vpop.f32.mrf.mxu3 }
  0xcc   : > { %v399_v11 = vadd.f32 %v398_v10, %v370_v9 }
  0xce   : > { %v409_v12 = vpack.c.bf16 %v399_v11, %v399_v11 }
  0xd0   : > { %418 = vst.msk [vmem:[%s733_s26 + $0x18] sm:$0xf] %vm411_vm2, %v409_v12 }
  0xd3   : > { %v400_v15 = vpop.f32.mrf.mxu3 }
  0xd4   : > { %v401_v16 = vadd.f32 %v400_v15, %v372_v14 }
  0xd6   : > { %v410_v17 = vpack.c.bf16 %v401_v16, %v401_v16 }
  0xd8   : > { %419 = vst.msk [vmem:[%s733_s26 + $0x1c] sm:$0xf] %vm411_vm2, %v410_v17 }
  0xd9 PF: > { %s13_s12 = sadd.s32 1, %s626_s12  }
  0xda   : > { %p10_p4 = scmp.ge.s32.totalorder %s13_s12, 4  }
  0xdc   :  { %12 = sbr.rel (!%p10_p4) target bundleno = 1 (0x1), region = 62 }

// kernel: srflownet_normal_flow.26
= control target key start
LH: loop header
LB: loop body
LE: loop exit
PB: predicated region body
PF: predicated region fallthrough
CT: control target
= control target key end

     0   :  { %s467_s12 = smov 0   ;;  %s513_s0 = inlined_call_operand.vmem [shape: bf16[2,64,72], index: 0, kind: input, shape index: {}]   ;;  %s514_s1 = inlined_call_operand.vmem [shape: bf16[72,8], index: 1, kind: input, shape index: {}]   ;;  %s515_s2 = inlined_call_operand.vmem [shape: f32[1,8], index: 2, kind: input, shape index: {}]   ;;  %s516_s3 = inlined_call_operand.vmem [shape: bf16[2,64,8], index: 3, kind: output, shape index: {}]  }
   0x1 LB: > { %s358_s13 = sadd.s32 4294967295, %s445_s12   ;;  %p362_p0 = scmp.ge.s32.totalorder %s445_s12, 1  ;;  %s445_s12 = sphi %s467_s12, %s13_s12  }
   0x2   : > { %p137_p1 = scmp.lt.s32.totalorder %s445_s12, 3 }
   0x4   : > { %p138_p2 = pnand %p362_p0, %p137_p1 }
   0x5   : > { %p161_p3 = scmp.lt.s32.totalorder (!%p138_p2), %s358_s13, 1 }
   0x6   : > { %141 = sbr.rel (%p138_p2) target bundleno = 183 (0xb7), region = 32 }
   0xb   : > { %v188_v0 = vld [vmem:[%s514_s1 + $0x20] sm:$0xf]  ;;  %vm253_vm0 = vcmask 1043456   ;;  %v414_v4 = vld [vmem:[%s514_s1 + $0x18] sm:$0xff]  ;;  %v413_v5 = vld [vmem:[%s514_s1 + $0x10] sm:$0xff]  ;;  %s518_s13 = smov (!%p161_p3, %s358_s13), 1 }
   0xc   : > { %v230_v1 = vunpack.c.l.b16 %v188_v0  ;;  %v412_v6 = vld [vmem:[%s514_s1 + $0x8] sm:$0xff]  ;;  %s405_s22 = sshll.u32 %s518_s13, 5  ;;  %v411_v7 = vld [vmem:[%s514_s1] sm:$0xff]  ;;  %vm240_vm1 = vcmask 588800   ;;  %vm294_vm2 = vcmask 60416  }
   0xd   : > { %s165_s27 = scalar_lea.vmem %s513_s0, %s405_s22  ;;  %v438_v12 = vld [vmem:[%s515_s2] ss:$0 sm:$0xff]  ;;  %s170_s5 = scalar_lea.vmem %s516_s3, %s405_s22 }
   0xe   : > { %v235_v2 = vpack.c.b16 %v230_v1, %v230_v1  ;;  %v407_v8 = vld [vmem:[%s165_s27] sm:$0xff]  ;;  %v408_v9 = vld [vmem:[%s165_s27 + $0x8] sm:$0xff]  ;;  %v409_v10 = vld [vmem:[%s165_s27 + $0x10] sm:$0xff] }
   0xf   : > { %v410_v11 = vld [vmem:[%s165_s27 + $0x18] sm:$0xff] }
  0x10   : > { %v255_v3 = vsel %vm253_vm0, %v235_v2, 0 }
  0x11   : > { %260 = vmatpush.bf16.msra.mxu0 %v255_v3  ;;  %415 = vmatpush.bf16.msra.mxu1 %v255_v3 }
  0x12   : > { %416 = vmatpush.bf16.msra.mxu2 %v255_v3  ;;  %417 = vmatpush.bf16.msra.mxu3 %v255_v3 }
  0x15   : > { %261 = vmatpush.bf16.msra.mxu0 %v414_v4  ;;  %418 = vmatpush.bf16.msra.mxu1 %v414_v4 }
  0x16   : > { %419 = vmatpush.bf16.msra.mxu2 %v414_v4  ;;  %420 = vmatpush.bf16.msra.mxu3 %v414_v4 }
  0x19   : > { %262 = vmatpush.bf16.msra.mxu0 %v413_v5  ;;  %421 = vmatpush.bf16.msra.mxu1 %v413_v5 }
  0x1a   : > { %422 = vmatpush.bf16.msra.mxu2 %v413_v5  ;;  %423 = vmatpush.bf16.msra.mxu3 %v413_v5 }
  0x1d   : > { %263 = vmatpush.bf16.msra.mxu0 %v412_v6  ;;  %424 = vmatpush.bf16.msra.mxu1 %v412_v6 }
  0x1e   : > { %425 = vmatpush.bf16.msra.mxu2 %v412_v6  ;;  %426 = vmatpush.bf16.msra.mxu3 %v412_v6 }
  0x21   : > { %264 = vmatpush.bf16.msra.mxu0 %v411_v7  ;;  %427 = vmatpush.bf16.msra.mxu1 %v411_v7 }
  0x22   : > { %428 = vmatpush.bf16.msra.mxu2 %v411_v7  ;;  %429 = vmatpush.bf16.msra.mxu3 %v411_v7 }
  0x24   : > { %399 = vmatmul.msk.bf16.vlgmr.msra.gmra.mxu0 %vm240_vm1, %v407_v8  ;;  %400 = vmatmul.msk.bf16.vlgmr.msra.gmra.mxu1 %vm240_vm1, %v408_v9 }
  0x25   : > { %401 = vmatmul.msk.bf16.vlgmr.msra.gmra.mxu2 %vm240_vm1, %v409_v10  ;;  %402 = vmatmul.msk.bf16.vlgmr.msra.gmra.mxu3 %vm240_vm1, %v410_v11 }
  0xa1   : > { %v266_v13 = vpop.f32.mrf.mxu0  ;;  %v271_v14 = vpop.f32.mrf.mxu1 }
  0xa2   : > { %v267_v15 = vadd.f32 %v438_v12, %v266_v13  ;;  %v272_v16 = vadd.f32 %v438_v12, %v271_v14 }
  0xa4   : > { %v286_v17 = vpack.c.bf16 %v267_v15, %v267_v15  ;;  %v288_v18 = vpack.c.bf16 %v272_v16, %v272_v16 }
  0xa6   : > { %295 = vst.msk [vmem:[%s170_s5] sm:$0xf] %vm294_vm2, %v286_v17 }
  0xa7   : > { %297 = vst.msk [vmem:[%s170_s5 + $0x8] sm:$0xf] %vm294_vm2, %v288_v18 }
  0xa8   : > { %v276_v19 = vpop.f32.mrf.mxu2  ;;  %v281_v20 = vpop.f32.mrf.mxu3 }
  0xa9   : > { %v277_v21 = vadd.f32 %v438_v12, %v276_v19  ;;  %v282_v22 = vadd.f32 %v438_v12, %v281_v20  ;;  %v268_v23 = vpop.f32.mrf.mxu0  ;;  %v273_v24 = vpop.f32.mrf.mxu1 }
  0xaa   : > { %v269_v25 = vadd.f32 %v438_v12, %v268_v23  ;;  %v274_v26 = vadd.f32 %v438_v12, %v273_v24 }
  0xab   : > { %v290_v27 = vpack.c.bf16 %v277_v21, %v277_v21  ;;  %v292_v28 = vpack.c.bf16 %v282_v22, %v282_v22 }
  0xac   : > { %v287_v29 = vpack.c.bf16 %v269_v25, %v269_v25  ;;  %v289_v30 = vpack.c.bf16 %v274_v26, %v274_v26 }
  0xad   : > { %299 = vst.msk [vmem:[%s170_s5 + $0x10] sm:$0xf] %vm294_vm2, %v290_v27 }
  0xae   : > { %301 = vst.msk [vmem:[%s170_s5 + $0x18] sm:$0xf] %vm294_vm2, %v292_v28 }
  0xaf   : > { %296 = vst.msk [vmem:[%s170_s5 + $0x4] sm:$0xf] %vm294_vm2, %v287_v29 }
  0xb0   : > { %298 = vst.msk [vmem:[%s170_s5 + $0xc] sm:$0xf] %vm294_vm2, %v289_v30  ;;  %v278_v31 = vpop.f32.mrf.mxu2  ;;  %v283_v32 = vpop.f32.mrf.mxu3 }
  0xb1   : > { %v279_v33 = vadd.f32 %v438_v12, %v278_v31  ;;  %v284_v34 = vadd.f32 %v438_v12, %v283_v32 }
  0xb3   : > { %v291_v35 = vpack.c.bf16 %v279_v33, %v279_v33  ;;  %v293_v36 = vpack.c.bf16 %v284_v34, %v284_v34 }
  0xb5   : > { %300 = vst.msk [vmem:[%s170_s5 + $0x14] sm:$0xf] %vm294_vm2, %v291_v35 }
  0xb6   : > { %302 = vst.msk [vmem:[%s170_s5 + $0x1c] sm:$0xf] %vm294_vm2, %v293_v36 }
  0xb7 PF: > { %s13_s12 = sadd.s32 1, %s445_s12  }
  0xb8   : > { %p10_p4 = scmp.ge.s32.totalorder %s13_s12, 4  }
  0xba   :  { %12 = sbr.rel (!%p10_p4) target bundleno = 1 (0x1), region = 62 }

// kernel: srflownet_normal_flow.29
= control target key start
LH: loop header
LB: loop body
LE: loop exit
PB: predicated region body
PF: predicated region fallthrough
CT: control target
= control target key end

     0   :  { %s863_s12 = smov 0   ;;  %s1039_s0 = inlined_call_operand.vmem [shape: bf16[2,256,72], index: 0, kind: input, shape index: {}]   ;;  %s1040_s1 = inlined_call_operand.vmem [shape: bf16[72,8], index: 1, kind: input, shape index: {}]   ;;  %s1041_s2 = inlined_call_operand.vmem [shape: f32[1,8], index: 2, kind: input, shape index: {}]   ;;  %s1042_s3 = inlined_call_operand.vmem [shape: bf16[2,256,8], index: 3, kind: output, shape index: {}]  }
   0x1 LB: > { %s682_s13 = sadd.s32 4294967295, %s841_s12   ;;  %p686_p0 = scmp.ge.s32.totalorder %s841_s12, 1  ;;  %s841_s12 = sphi %s863_s12, %s13_s12  }
   0x2   : > { %p137_p1 = scmp.lt.s32.totalorder %s841_s12, 3 }
   0x4   : > { %p138_p2 = pnand %p686_p0, %p137_p1 }
   0x5   : > { %p161_p3 = scmp.lt.s32.totalorder (!%p138_p2), %s682_s13, 1 }
   0x6   : > { %141 = sbr.rel (%p138_p2) target bundleno = 234 (0xea), region = 32 }
   0xb   : > { %v212_v0 = vld [vmem:[%s1040_s1 + $0x20] sm:$0xf]  ;;  %vm373_vm0 = vcmask 1043456   ;;  %v810_v4 = vld [vmem:[%s1040_s1 + $0x18] sm:$0xff]  ;;  %v809_v5 = vld [vmem:[%s1040_s1 + $0x10] sm:$0xff]  ;;  %s1044_s13 = smov (!%p161_p3, %s682_s13), 1 }
   0xc   : > { %v314_v1 = vunpack.c.l.b16 %v212_v0  ;;  %v808_v6 = vld [vmem:[%s1040_s1 + $0x8] sm:$0xff]  ;;  %s789_s22 = sshll.u32 %s1044_s13, 7  ;;  %v807_v7 = vld [vmem:[%s1040_s1] sm:$0xff]  ;;  %vm324_vm1 = vcmask 588800   ;;  %vm594_vm4 = vcmask 60416  }
   0xd   : > { %s894_s27 = scalar_lea.vmem %s1039_s0, %s789_s22  ;;  %v931_v24 = vld [vmem:[%s1041_s2] ss:$0 sm:$0xff]  ;;  %s940_s5 = scalar_lea.vmem %s1042_s3, %s789_s22 }
   0xe   : > { %v319_v2 = vpack.c.b16 %v314_v1, %v314_v1  ;;  %v791_v8 = vld [vmem:[%s894_s27] sm:$0xff]  ;;  %v792_v12 = vld [vmem:[%s894_s27 + $0x8] sm:$0xff]  ;;  %v793_v16 = vld [vmem:[%s894_s27 + $0x10] sm:$0xff] }
   0xf   : > { %v795_v9 = vld [vmem:[%s894_s27 + $0x20] sm:$0xff]  ;;  %v796_v13 = vld [vmem:[%s894_s27 + $0x28] sm:$0xff]  ;;  %v797_v17 = vld [vmem:[%s894_s27 + $0x30] sm:$0xff] }
  0x10   : > { %v375_v3 = vsel %vm373_vm0, %v319_v2, 0  ;;  %v799_v10 = vld [vmem:[%s894_s27 + $0x40] sm:$0xff]  ;;  %v800_v14 = vld [vmem:[%s894_s27 + $0x48] sm:$0xff]  ;;  %v801_v18 = vld [vmem:[%s894_s27 + $0x50] sm:$0xff] }
  0x11   : > { %380 = vmatpush.bf16.msra.mxu0 %v375_v3  ;;  %811 = vmatpush.bf16.msra.mxu1 %v375_v3  ;;  %v803_v11 = vld [vmem:[%s894_s27 + $0x60] sm:$0xff]  ;;  %v804_v15 = vld [vmem:[%s894_s27 + $0x68] sm:$0xff]  ;;  %v805_v19 = vld [vmem:[%s894_s27 + $0x70] sm:$0xff] }
  0x12   : > { %812 = vmatpush.bf16.msra.mxu2 %v375_v3  ;;  %813 = vmatpush.bf16.msra.mxu3 %v375_v3  ;;  %v794_v20 = vld [vmem:[%s894_s27 + $0x18] sm:$0xff] }
  0x13   : > { %v798_v21 = vld [vmem:[%s894_s27 + $0x38] sm:$0xff] }
  0x14   : > { %v802_v22 = vld [vmem:[%s894_s27 + $0x58] sm:$0xff] }
  0x15   : > { %381 = vmatpush.bf16.msra.mxu0 %v810_v4  ;;  %814 = vmatpush.bf16.msra.mxu1 %v810_v4  ;;  %v806_v23 = vld [vmem:[%s894_s27 + $0x78] sm:$0xff] }
  0x16   : > { %815 = vmatpush.bf16.msra.mxu2 %v810_v4  ;;  %816 = vmatpush.bf16.msra.mxu3 %v810_v4 }
  0x19   : > { %382 = vmatpush.bf16.msra.mxu0 %v809_v5  ;;  %817 = vmatpush.bf16.msra.mxu1 %v809_v5 }
  0x1a   : > { %818 = vmatpush.bf16.msra.mxu2 %v809_v5  ;;  %819 = vmatpush.bf16.msra.mxu3 %v809_v5 }
  0x1d   : > { %383 = vmatpush.bf16.msra.mxu0 %v808_v6  ;;  %820 = vmatpush.bf16.msra.mxu1 %v808_v6 }
  0x1e   : > { %821 = vmatpush.bf16.msra.mxu2 %v808_v6  ;;  %822 = vmatpush.bf16.msra.mxu3 %v808_v6 }
  0x21   : > { %384 = vmatpush.bf16.msra.mxu0 %v807_v7  ;;  %823 = vmatpush.bf16.msra.mxu1 %v807_v7 }
  0x22   : > { %824 = vmatpush.bf16.msra.mxu2 %v807_v7  ;;  %825 = vmatpush.bf16.msra.mxu3 %v807_v7 }
  0x24   : > { %771 = vmatmul.msk.bf16.vlgmr.msra.gmra.mxu0 %vm324_vm1, %v791_v8  ;;  %775 = vmatmul.msk.bf16.vlgmr.msra.gmra.mxu1 %vm324_vm1, %v795_v9 }
  0x25   : > { %779 = vmatmul.msk.bf16.vlgmr.msra.gmra.mxu2 %vm324_vm1, %v799_v10  ;;  %783 = vmatmul.msk.bf16.vlgmr.msra.gmra.mxu3 %vm324_vm1, %v803_v11 }
  0x34   : > { %772 = vmatmul.msk.bf16.gmra.mxu0 %vm324_vm1, %v792_v12  ;;  %776 = vmatmul.msk.bf16.gmra.mxu1 %vm324_vm1, %v796_v13 }
  0x35   : > { %780 = vmatmul.msk.bf16.gmra.mxu2 %vm324_vm1, %v800_v14  ;;  %784 = vmatmul.msk.bf16.gmra.mxu3 %vm324_vm1, %v804_v15 }
  0x44   : > { %773 = vmatmul.msk.bf16.gmra.mxu0 %vm324_vm1, %v793_v16  ;;  %777 = vmatmul.msk.bf16.gmra.mxu1 %vm324_vm1, %v797_v17 }
  0x45   : > { %781 = vmatmul.msk.bf16.gmra.mxu2 %vm324_vm1, %v801_v18  ;;  %785 = vmatmul.msk.bf16.gmra.mxu3 %vm324_vm1, %v805_v19 }
  0x54   : > { %774 = vmatmul.msk.bf16.gmra.mxu0 %vm324_vm1, %v794_v20  ;;  %778 = vmatmul.msk.bf16.gmra.mxu1 %vm324_vm1, %v798_v21 }
  0x55   : > { %782 = vmatmul.msk.bf16.gmra.mxu2 %vm324_vm1, %v802_v22  ;;  %786 = vmatmul.msk.bf16.gmra.mxu3 %vm324_vm1, %v806_v23 }
  0xa1   : > { %v386_v25 = vpop.f32.mrf.mxu0  ;;  %v406_v26 = vpop.f32.mrf.mxu1 }
  0xa2   : > { %v387_v27 = vadd.f32 %v931_v24, %v386_v25  ;;  %v407_v28 = vadd.f32 %v931_v24, %v406_v26 }
  0xa4   : > { %vm466_vm2 = vcmp.gt.f32.partialorder %v387_v27, 0.0  ;;  %v498_v29 = vmul.f32 0.2, %v387_v27  ;;  %vm474_vm3 = vcmp.gt.f32.partialorder %v407_v28, 0.0  ;;  %v506_v30 = vmul.f32 0.2, %v407_v28 }
  0xa6   : > { %v530_v31 = vsel %vm466_vm2, %v387_v27, %v498_v29  ;;  %v538_v32 = vsel %vm474_vm3, %v407_v28, %v506_v30 }
  0xa7   : > { %v562_v33 = vpack.c.bf16 %v530_v31, %v530_v31  ;;  %v570_v34 = vpack.c.bf16 %v538_v32, %v538_v32 }
  0xa8   : > { %v426_v35 = vpop.f32.mrf.mxu2  ;;  %v446_v36 = vpop.f32.mrf.mxu3 }
  0xa9   : > { %595 = vst.msk [vmem:[%s940_s5] sm:$0xf] %vm594_vm4, %v562_v33  ;;  %v427_v37 = vadd.f32 %v931_v24, %v426_v35  ;;  %v447_v38 = vadd.f32 %v931_v24, %v446_v36  ;;  %v388_v39 = vpop.f32.mrf.mxu0  ;;  %v408_v40 = vpop.f32.mrf.mxu1 }
  0xaa   : > { %603 = vst.msk [vmem:[%s940_s5 + $0x20] sm:$0xf] %vm594_vm4, %v570_v34  ;;  %v389_v41 = vadd.f32 %v931_v24, %v388_v39  ;;  %v409_v42 = vadd.f32 %v931_v24, %v408_v40 }
  0xab   : > { %vm482_vm5 = vcmp.gt.f32.partialorder %v427_v37, 0.0  ;;  %v514_v43 = vmul.f32 0.2, %v427_v37  ;;  %vm490_vm6 = vcmp.gt.f32.partialorder %v447_v38, 0.0  ;;  %v522_v44 = vmul.f32 0.2, %v447_v38 }
  0xac   : > { %vm467_vm7 = vcmp.gt.f32.partialorder %v389_v41, 0.0  ;;  %v499_v45 = vmul.f32 0.2, %v389_v41  ;;  %vm475_vm8 = vcmp.gt.f32.partialorder %v409_v42, 0.0  ;;  %v507_v46 = vmul.f32 0.2, %v409_v42 }
  0xad   : > { %v546_v47 = vsel %vm482_vm5, %v427_v37, %v514_v43  ;;  %v554_v48 = vsel %vm490_vm6, %v447_v38, %v522_v44 }
  0xae   : > { %v578_v49 = vpack.c.bf16 %v546_v47, %v546_v47  ;;  %v586_v50 = vpack.c.bf16 %v554_v48, %v554_v48  ;;  %v531_v51 = vsel %vm467_vm7, %v389_v41, %v499_v45  ;;  %v539_v52 = vsel %vm475_vm8, %v409_v42, %v507_v46 }
  0xaf   : > { %v563_v53 = vpack.c.bf16 %v531_v51, %v531_v51  ;;  %v571_v54 = vpack.c.bf16 %v539_v52, %v539_v52 }
  0xb0   : > { %611 = vst.msk [vmem:[%s940_s5 + $0x40] sm:$0xf] %vm594_vm4, %v578_v49  ;;  %v428_v55 = vpop.f32.mrf.mxu2  ;;  %v448_v56 = vpop.f32.mrf.mxu3 }
  0xb1   : > { %619 = vst.msk [vmem:[%s940_s5 + $0x60] sm:$0xf] %vm594_vm4, %v586_v50  ;;  %v429_v57 = vadd.f32 %v931_v24, %v428_v55  ;;  %v449_v58 = vadd.f32 %v931_v24, %v448_v56  ;;  %v391_v59 = vpop.f32.mrf.mxu0  ;;  %v411_v60 = vpop.f32.mrf.mxu1 }
  0xb2   : > { %596 = vst.msk [vmem:[%s940_s5 + $0x4] sm:$0xf] %vm594_vm4, %v563_v53  ;;  %v392_v61 = vadd.f32 %v931_v24, %v391_v59  ;;  %v412_v62 = vadd.f32 %v931_v24, %v411_v60 }
  0xb3   : > { %604 = vst.msk [vmem:[%s940_s5 + $0x24] sm:$0xf] %vm594_vm4, %v571_v54  ;;  %vm483_vm9 = vcmp.gt.f32.partialorder %v429_v57, 0.0  ;;  %v515_v63 = vmul.f32 0.2, %v429_v57  ;;  %vm491_vm10 = vcmp.gt.f32.partialorder %v449_v58, 0.0 }
  0xb4   : > { %v523_v0 = vmul.f32 0.2, %v449_v58  ;;  %vm468_vm11 = vcmp.gt.f32.partialorder %v392_v61, 0.0  ;;  %v500_v1 = vmul.f32 0.2, %v392_v61  ;;  %vm476_vm12 = vcmp.gt.f32.partialorder %v412_v62, 0.0 }
  0xb5   : > { %v547_v2 = vsel %vm483_vm9, %v429_v57, %v515_v63  ;;  %v508_v3 = vmul.f32 0.2, %v412_v62 }
  0xb6   : > { %v579_v4 = vpack.c.bf16 %v547_v2, %v547_v2  ;;  %v555_v5 = vsel %vm491_vm10, %v449_v58, %v523_v0  ;;  %v532_v6 = vsel %vm468_vm11, %v392_v61, %v500_v1 }
  0xb7   : > { %v587_v7 = vpack.c.bf16 %v555_v5, %v555_v5  ;;  %v564_v8 = vpack.c.bf16 %v532_v6, %v532_v6  ;;  %v540_v9 = vsel %vm476_vm12, %v412_v62, %v508_v3 }
  0xb8   : > { %612 = vst.msk [vmem:[%s940_s5 + $0x44] sm:$0xf] %vm594_vm4, %v579_v4  ;;  %v572_v10 = vpack.c.bf16 %v540_v9, %v540_v9  ;;  %v431_v11 = vpop.f32.mrf.mxu2  ;;  %v451_v12 = vpop.f32.mrf.mxu3 }
  0xb9   : > { %620 = vst.msk [vmem:[%s940_s5 + $0x64] sm:$0xf] %vm594_vm4, %v587_v7  ;;  %v432_v13 = vadd.f32 %v931_v24, %v431_v11  ;;  %v452_v14 = vadd.f32 %v931_v24, %v451_v12  ;;  %v393_v15 = vpop.f32.mrf.mxu0  ;;  %v413_v16 = vpop.f32.mrf.mxu1 }
  0xba   : > { %597 = vst.msk [vmem:[%s940_s5 + $0x8] sm:$0xf] %vm594_vm4, %v564_v8  ;;  %v394_v17 = vadd.f32 %v931_v24, %v393_v15  ;;  %v414_v18 = vadd.f32 %v931_v24, %v413_v16 }
  0xbb   : > { %605 = vst.msk [vmem:[%s940_s5 + $0x28] sm:$0xf] %vm594_vm4, %v572_v10  ;;  %vm484_vm13 = vcmp.gt.f32.partialorder %v432_v13, 0.0  ;;  %v516_v19 = vmul.f32 0.2, %v432_v13  ;;  %vm492_vm14 = vcmp.gt.f32.partialorder %v452_v14, 0.0 }
  0xbc   : > { %v524_v20 = vmul.f32 0.2, %v452_v14  ;;  %vm469_vm15 = vcmp.gt.f32.partialorder %v394_v17, 0.0  ;;  %v501_v21 = vmul.f32 0.2, %v394_v17  ;;  %vm477_vm0 = vcmp.gt.f32.partialorder %v414_v18, 0.0 }
  0xbd   : > { %v548_v22 = vsel %vm484_vm13, %v432_v13, %v516_v19  ;;  %v509_v23 = vmul.f32 0.2, %v414_v18 }
  0xbe   : > { %v580_v25 = vpack.c.bf16 %v548_v22, %v548_v22  ;;  %v556_v26 = vsel %vm492_vm14, %v452_v14, %v524_v20  ;;  %v533_v27 = vsel %vm469_vm15, %v394_v17, %v501_v21 }
  0xbf   : > { %v588_v28 = vpack.c.bf16 %v556_v26, %v556_v26  ;;  %v565_v29 = vpack.c.bf16 %v533_v27, %v533_v27  ;;  %v541_v30 = vsel %vm477_vm0, %v414_v18, %v509_v23 }
  0xc0   : > { %613 = vst.msk [vmem:[%s940_s5 + $0x48] sm:$0xf] %vm594_vm4, %v580_v25  ;;  %v573_v31 = vpack.c.bf16 %v541_v30, %v541_v30  ;;  %v433_v32 = vpop.f32.mrf.mxu2  ;;  %v453_v33 = vpop.f32.mrf.mxu3 }
  0xc1   : > { %621 = vst.msk [vmem:[%s940_s5 + $0x68] sm:$0xf] %vm594_vm4, %v588_v28  ;;  %v434_v34 = vadd.f32 %v931_v24, %v433_v32  ;;  %v454_v35 = vadd.f32 %v931_v24, %v453_v33  ;;  %v396_v36 = vpop.f32.mrf.mxu0  ;;  %v416_v37 = vpop.f32.mrf.mxu1 }
  0xc2   : > { %598 = vst.msk [vmem:[%s940_s5 + $0xc] sm:$0xf] %vm594_vm4, %v565_v29  ;;  %v397_v38 = vadd.f32 %v931_v24, %v396_v36  ;;  %v417_v39 = vadd.f32 %v931_v24, %v416_v37 }
  0xc3   : > { %606 = vst.msk [vmem:[%s940_s5 + $0x2c] sm:$0xf] %vm594_vm4, %v573_v31  ;;  %vm485_vm1 = vcmp.gt.f32.partialorder %v434_v34, 0.0  ;;  %v517_v40 = vmul.f32 0.2, %v434_v34  ;;  %vm493_vm2 = vcmp.gt.f32.partialorder %v454_v35, 0.0 }
  0xc4   : > { %v525_v41 = vmul.f32 0.2, %v454_v35  ;;  %vm470_vm3 = vcmp.gt.f32.partialorder %v397_v38, 0.0  ;;  %v502_v42 = vmul.f32 0.2, %v397_v38  ;;  %vm478_vm5 = vcmp.gt.f32.partialorder %v417_v39, 0.0 }
  0xc5   : > { %v549_v43 = vsel %vm485_vm1, %v434_v34, %v517_v40  ;;  %v510_v44 = vmul.f32 0.2, %v417_v39 }
  0xc6   : > { %v581_v45 = vpack.c.bf16 %v549_v43, %v549_v43  ;;  %v557_v46 = vsel %vm493_vm2, %v454_v35, %v525_v41  ;;  %v534_v47 = vsel %vm470_vm3, %v397_v38, %v502_v42 }
  0xc7   : > { %v589_v48 = vpack.c.bf16 %v557_v46, %v557_v46  ;;  %v566_v49 = vpack.c.bf16 %v534_v47, %v534_v47  ;;  %v542_v50 = vsel %vm478_vm5, %v417_v39, %v510_v44 }
  0xc8   : > { %614 = vst.msk [vmem:[%s940_s5 + $0x4c] sm:$0xf] %vm594_vm4, %v581_v45  ;;  %v574_v51 = vpack.c.bf16 %v542_v50, %v542_v50  ;;  %v436_v52 = vpop.f32.mrf.mxu2  ;;  %v456_v53 = vpop.f32.mrf.mxu3 }
  0xc9   : > { %622 = vst.msk [vmem:[%s940_s5 + $0x6c] sm:$0xf] %vm594_vm4, %v589_v48  ;;  %v437_v54 = vadd.f32 %v931_v24, %v436_v52  ;;  %v457_v55 = vadd.f32 %v931_v24, %v456_v53  ;;  %v398_v56 = vpop.f32.mrf.mxu0  ;;  %v418_v57 = vpop.f32.mrf.mxu1 }
  0xca   : > { %599 = vst.msk [vmem:[%s940_s5 + $0x10] sm:$0xf] %vm594_vm4, %v566_v49  ;;  %v399_v58 = vadd.f32 %v931_v24, %v398_v56  ;;  %v419_v59 = vadd.f32 %v931_v24, %v418_v57 }
  0xcb   : > { %607 = vst.msk [vmem:[%s940_s5 + $0x30] sm:$0xf] %vm594_vm4, %v574_v51  ;;  %vm486_vm6 = vcmp.gt.f32.partialorder %v437_v54, 0.0  ;;  %v518_v60 = vmul.f32 0.2, %v437_v54  ;;  %vm494_vm7 = vcmp.gt.f32.partialorder %v457_v55, 0.0 }
  0xcc   : > { %v526_v61 = vmul.f32 0.2, %v457_v55  ;;  %vm471_vm8 = vcmp.gt.f32.partialorder %v399_v58, 0.0  ;;  %v503_v62 = vmul.f32 0.2, %v399_v58  ;;  %vm479_vm9 = vcmp.gt.f32.partialorder %v419_v59, 0.0 }
  0xcd   : > { %v550_v63 = vsel %vm486_vm6, %v437_v54, %v518_v60  ;;  %v511_v0 = vmul.f32 0.2, %v419_v59 }
  0xce   : > { %v582_v1 = vpack.c.bf16 %v550_v63, %v550_v63  ;;  %v558_v2 = vsel %vm494_vm7, %v457_v55, %v526_v61  ;;  %v535_v3 = vsel %vm471_vm8, %v399_v58, %v503_v62 }
  0xcf   : > { %v590_v4 = vpack.c.bf16 %v558_v2, %v558_v2  ;;  %v567_v5 = vpack.c.bf16 %v535_v3, %v535_v3  ;;  %v543_v6 = vsel %vm479_vm9, %v419_v59, %v511_v0 }
  0xd0   : > { %615 = vst.msk [vmem:[%s940_s5 + $0x50] sm:$0xf] %vm594_vm4, %v582_v1  ;;  %v575_v7 = vpack.c.bf16 %v543_v6, %v543_v6  ;;  %v438_v8 = vpop.f32.mrf.mxu2  ;;  %v458_v9 = vpop.f32.mrf.mxu3 }
  0xd1   : > { %623 = vst.msk [vmem:[%s940_s5 + $0x70] sm:$0xf] %vm594_vm4, %v590_v4  ;;  %v439_v10 = vadd.f32 %v931_v24, %v438_v8  ;;  %v459_v11 = vadd.f32 %v931_v24, %v458_v9  ;;  %v401_v12 = vpop.f32.mrf.mxu0  ;;  %v421_v13 = vpop.f32.mrf.mxu1 }
  0xd2   : > { %600 = vst.msk [vmem:[%s940_s5 + $0x14] sm:$0xf] %vm594_vm4, %v567_v5  ;;  %v402_v14 = vadd.f32 %v931_v24, %v401_v12  ;;  %v422_v15 = vadd.f32 %v931_v24, %v421_v13 }
  0xd3   : > { %608 = vst.msk [vmem:[%s940_s5 + $0x34] sm:$0xf] %vm594_vm4, %v575_v7  ;;  %vm487_vm10 = vcmp.gt.f32.partialorder %v439_v10, 0.0  ;;  %v519_v16 = vmul.f32 0.2, %v439_v10  ;;  %vm495_vm11 = vcmp.gt.f32.partialorder %v459_v11, 0.0 }
  0xd4   : > { %v527_v17 = vmul.f32 0.2, %v459_v11  ;;  %vm472_vm12 = vcmp.gt.f32.partialorder %v402_v14, 0.0  ;;  %v504_v18 = vmul.f32 0.2, %v402_v14  ;;  %vm480_vm13 = vcmp.gt.f32.partialorder %v422_v15, 0.0 }
  0xd5   : > { %v551_v19 = vsel %vm487_vm10, %v439_v10, %v519_v16  ;;  %v512_v20 = vmul.f32 0.2, %v422_v15 }
  0xd6   : > { %v583_v21 = vpack.c.bf16 %v551_v19, %v551_v19  ;;  %v559_v22 = vsel %vm495_vm11, %v459_v11, %v527_v17  ;;  %v536_v23 = vsel %vm472_vm12, %v402_v14, %v504_v18 }
  0xd7   : > { %v591_v25 = vpack.c.bf16 %v559_v22, %v559_v22  ;;  %v568_v26 = vpack.c.bf16 %v536_v23, %v536_v23  ;;  %v544_v27 = vsel %vm480_vm13, %v422_v15, %v512_v20 }
  0xd8   : > { %616 = vst.msk [vmem:[%s940_s5 + $0x54] sm:$0xf] %vm594_vm4, %v583_v21  ;;  %v576_v28 = vpack.c.bf16 %v544_v27, %v544_v27  ;;  %v441_v29 = vpop.f32.mrf.mxu2  ;;  %v461_v30 = vpop.f32.mrf.mxu3 }
  0xd9   : > { %624 = vst.msk [vmem:[%s940_s5 + $0x74] sm:$0xf] %vm594_vm4, %v591_v25  ;;  %v442_v31 = vadd.f32 %v931_v24, %v441_v29  ;;  %v462_v32 = vadd.f32 %v931_v24, %v461_v30  ;;  %v403_v33 = vpop.f32.mrf.mxu0  ;;  %v423_v34 = vpop.f32.mrf.mxu1 }
  0xda   : > { %601 = vst.msk [vmem:[%s940_s5 + $0x18] sm:$0xf] %vm594_vm4, %v568_v26  ;;  %v404_v35 = vadd.f32 %v931_v24, %v403_v33  ;;  %v424_v36 = vadd.f32 %v931_v24, %v423_v34 }
  0xdb   : > { %609 = vst.msk [vmem:[%s940_s5 + $0x38] sm:$0xf] %vm594_vm4, %v576_v28  ;;  %vm488_vm14 = vcmp.gt.f32.partialorder %v442_v31, 0.0  ;;  %v520_v37 = vmul.f32 0.2, %v442_v31  ;;  %vm496_vm15 = vcmp.gt.f32.partialorder %v462_v32, 0.0 }
  0xdc   : > { %v528_v38 = vmul.f32 0.2, %v462_v32  ;;  %vm473_vm0 = vcmp.gt.f32.partialorder %v404_v35, 0.0  ;;  %v505_v39 = vmul.f32 0.2, %v404_v35  ;;  %vm481_vm1 = vcmp.gt.f32.partialorder %v424_v36, 0.0 }
  0xdd   : > { %v552_v40 = vsel %vm488_vm14, %v442_v31, %v520_v37  ;;  %v513_v41 = vmul.f32 0.2, %v424_v36 }
  0xde   : > { %v584_v42 = vpack.c.bf16 %v552_v40, %v552_v40  ;;  %v560_v43 = vsel %vm496_vm15, %v462_v32, %v528_v38  ;;  %v537_v44 = vsel %vm473_vm0, %v404_v35, %v505_v39 }
  0xdf   : > { %v592_v45 = vpack.c.bf16 %v560_v43, %v560_v43  ;;  %v569_v46 = vpack.c.bf16 %v537_v44, %v537_v44  ;;  %v545_v47 = vsel %vm481_vm1, %v424_v36, %v513_v41 }
  0xe0   : > { %617 = vst.msk [vmem:[%s940_s5 + $0x58] sm:$0xf] %vm594_vm4, %v584_v42  ;;  %v577_v48 = vpack.c.bf16 %v545_v47, %v545_v47  ;;  %v443_v49 = vpop.f32.mrf.mxu2  ;;  %v463_v50 = vpop.f32.mrf.mxu3 }
  0xe1   : > { %625 = vst.msk [vmem:[%s940_s5 + $0x78] sm:$0xf] %vm594_vm4, %v592_v45  ;;  %v444_v51 = vadd.f32 %v931_v24, %v443_v49  ;;  %v464_v52 = vadd.f32 %v931_v24, %v463_v50 }
  0xe2   : > { %602 = vst.msk [vmem:[%s940_s5 + $0x1c] sm:$0xf] %vm594_vm4, %v569_v46 }
  0xe3   : > { %610 = vst.msk [vmem:[%s940_s5 + $0x3c] sm:$0xf] %vm594_vm4, %v577_v48  ;;  %vm489_vm2 = vcmp.gt.f32.partialorder %v444_v51, 0.0  ;;  %v521_v53 = vmul.f32 0.2, %v444_v51  ;;  %vm497_vm3 = vcmp.gt.f32.partialorder %v464_v52, 0.0 }
  0xe4   : > { %v529_v54 = vmul.f32 0.2, %v464_v52 }
  0xe5   : > { %v553_v55 = vsel %vm489_vm2, %v444_v51, %v521_v53 }
  0xe6   : > { %v585_v56 = vpack.c.bf16 %v553_v55, %v553_v55  ;;  %v561_v57 = vsel %vm497_vm3, %v464_v52, %v529_v54 }
  0xe7   : > { %v593_v58 = vpack.c.bf16 %v561_v57, %v561_v57 }
  0xe8   : > { %618 = vst.msk [vmem:[%s940_s5 + $0x5c] sm:$0xf] %vm594_vm4, %v585_v56 }
  0xe9   : > { %626 = vst.msk [vmem:[%s940_s5 + $0x7c] sm:$0xf] %vm594_vm4, %v593_v58 }
  0xea PF: > { %s13_s12 = sadd.s32 1, %s841_s12  }
  0xeb   : > { %p10_p4 = scmp.ge.s32.totalorder %s13_s12, 4  }
  0xed   :  { %12 = sbr.rel (!%p10_p4) target bundleno = 1 (0x1), region = 62 }

// kernel: srflownet_normal_flow.31
= control target key start
LH: loop header
LB: loop body
LE: loop exit
PB: predicated region body
PF: predicated region fallthrough
CT: control target
= control target key end

     0   :  { %s1074_s18 = smov 0   ;;  %s1309_s0 = inlined_call_operand.vmem [shape: bf16[2,256,72], index: 0, kind: input, shape index: {}]   ;;  %s1310_s1 = inlined_call_operand.vmem [shape: bf16[72,16], index: 1, kind: input, shape index: {}]   ;;  %s1311_s2 = inlined_call_operand.vmem [shape: f32[1,16], index: 2, kind: input, shape index: {}]   ;;  %s1312_s3 = inlined_call_operand.vmem [shape: bf16[16,16], index: 3, kind: input, shape index: {}]   ;;  %s1313_s4 = inlined_call_operand.vmem [shape: f32[1,16], index: 4, kind: input, shape index: {}]   ;;  %s1314_s5 = inlined_call_operand.vmem [shape: bf16[2,256,16], index: 5, kind: output, shape index: {}]  }
   0x1 LB: > { %s870_s19 = sadd.s32 4294967295, %s1042_s18   ;;  %p874_p0 = scmp.ge.s32.totalorder %s1042_s18, 1  ;;  %s1042_s18 = sphi %s1074_s18, %s15_s18  }
   0x2   : > { %p187_p1 = scmp.lt.s32.totalorder %s1042_s18, 3 }
   0x4   : > { %p188_p2 = pnand %p874_p0, %p187_p1 }
   0x5   : > { %p215_p3 = scmp.lt.s32.totalorder (!%p188_p2), %s870_s19, 1 }
   0x6   : > { %191 = sbr.rel (%p188_p2) target bundleno = 445 (0x1bd), region = 40 }
   0xb   : > { %v266_v0 = vld [vmem:[%s1310_s1 + $0x20] sm:$0xf]  ;;  %vm427_vm0 = vcmask 1043456   ;;  %v1018_v4 = vld [vmem:[%s1310_s1 + $0x18] sm:$0xff]  ;;  %v1017_v5 = vld [vmem:[%s1310_s1 + $0x10] sm:$0xff]  ;;  %s1316_s19 = smov (!%p215_p3, %s870_s19), 1 }
   0xc   : > { %v368_v1 = vunpack.c.l.b16 %v266_v0  ;;  %v1016_v6 = vld [vmem:[%s1310_s1 + $0x8] sm:$0xff]  ;;  %s997_s28 = sshll.u32 %s1316_s19, 7  ;;  %v1015_v7 = vld [vmem:[%s1310_s1] sm:$0xff]  ;;  %vm378_vm1 = vcmask 588800   ;;  %vm580_vm2 = vcmask 130048   ;;  %vm782_vm3 = vcmask 125952  }
   0xd   : > { %s1105_s8 = scalar_lea.vmem %s1309_s0, %s997_s28  ;;  %v1019_v22 = vld [vmem:[%s1312_s3] sm:$0xff]  ;;  %s1209_s17 = scalar_lea.vmem %s1314_s5, %s997_s28 }
   0xe   : > { %v373_v2 = vpack.c.b16 %v368_v1, %v368_v1  ;;  %v999_v8 = vld [vmem:[%s1105_s8] sm:$0xff]  ;;  %v1000_v10 = vld [vmem:[%s1105_s8 + $0x8] sm:$0xff]  ;;  %v1001_v12 = vld [vmem:[%s1105_s8 + $0x10] sm:$0xff]  ;;  %636 = vmatpush.bf16.msra.mxu1 %v1019_v22  ;;  %1025 = vmatpush.bf16.msra.mxu3 %v1019_v22 }
   0xf   : > { %v1007_v9 = vld [vmem:[%s1105_s8 + $0x40] sm:$0xff]  ;;  %v1008_v11 = vld [vmem:[%s1105_s8 + $0x48] sm:$0xff]  ;;  %v1009_v13 = vld [vmem:[%s1105_s8 + $0x50] sm:$0xff] }
  0x10   : > { %v429_v3 = vsel %vm427_vm0, %v373_v2, 0  ;;  %v1002_v14 = vld [vmem:[%s1105_s8 + $0x18] sm:$0xff]  ;;  %v1003_v16 = vld [vmem:[%s1105_s8 + $0x20] sm:$0xff]  ;;  %v1004_v18 = vld [vmem:[%s1105_s8 + $0x28] sm:$0xff] }
  0x11   : > { %434 = vmatpush.bf16.msra.mxu0 %v429_v3  ;;  %1020 = vmatpush.bf16.msra.mxu2 %v429_v3  ;;  %v1010_v15 = vld [vmem:[%s1105_s8 + $0x58] sm:$0xff]  ;;  %v1011_v17 = vld [vmem:[%s1105_s8 + $0x60] sm:$0xff]  ;;  %v1012_v19 = vld [vmem:[%s1105_s8 + $0x68] sm:$0xff] }
  0x12   : > { %v1005_v20 = vld [vmem:[%s1105_s8 + $0x30] sm:$0xff]  ;;  %v1006_v23 = vld [vmem:[%s1105_s8 + $0x38] sm:$0xff]  ;;  %v1145_v26 = vld [vmem:[%s1311_s2] ss:$0 sm:$0xff] }
  0x13   : > { %v1013_v21 = vld [vmem:[%s1105_s8 + $0x70] sm:$0xff]  ;;  %v1014_v24 = vld [vmem:[%s1105_s8 + $0x78] sm:$0xff] }
  0x15   : > { %435 = vmatpush.bf16.msra.mxu0 %v1018_v4  ;;  %1021 = vmatpush.bf16.msra.mxu2 %v1018_v4 }
  0x19   : > { %436 = vmatpush.bf16.msra.mxu0 %v1017_v5  ;;  %1022 = vmatpush.bf16.msra.mxu2 %v1017_v5 }
  0x1d   : > { %437 = vmatpush.bf16.msra.mxu0 %v1016_v6  ;;  %1023 = vmatpush.bf16.msra.mxu2 %v1016_v6 }
  0x21   : > { %438 = vmatpush.bf16.msra.mxu0 %v1015_v7  ;;  %1024 = vmatpush.bf16.msra.mxu2 %v1015_v7 }
  0x24   : > { %959 = vmatmul.msk.bf16.vlgmr.msra.gmra.mxu0 %vm378_vm1, %v999_v8  ;;  %967 = vmatmul.msk.bf16.vlgmr.msra.gmra.mxu2 %vm378_vm1, %v1007_v9 }
  0x34   : > { %960 = vmatmul.msk.bf16.gmra.mxu0 %vm378_vm1, %v1000_v10  ;;  %968 = vmatmul.msk.bf16.gmra.mxu2 %vm378_vm1, %v1008_v11 }
  0x44   : > { %961 = vmatmul.msk.bf16.gmra.mxu0 %vm378_vm1, %v1001_v12  ;;  %969 = vmatmul.msk.bf16.gmra.mxu2 %vm378_vm1, %v1009_v13 }
  0x54   : > { %962 = vmatmul.msk.bf16.gmra.mxu0 %vm378_vm1, %v1002_v14  ;;  %970 = vmatmul.msk.bf16.gmra.mxu2 %vm378_vm1, %v1010_v15 }
  0x64   : > { %963 = vmatmul.msk.bf16.gmra.mxu0 %vm378_vm1, %v1003_v16  ;;  %971 = vmatmul.msk.bf16.gmra.mxu2 %vm378_vm1, %v1011_v17 }
  0x74   : > { %964 = vmatmul.msk.bf16.gmra.mxu0 %vm378_vm1, %v1004_v18  ;;  %972 = vmatmul.msk.bf16.gmra.mxu2 %vm378_vm1, %v1012_v19 }
  0x84   : > { %965 = vmatmul.msk.bf16.gmra.mxu0 %vm378_vm1, %v1005_v20  ;;  %973 = vmatmul.msk.bf16.gmra.mxu2 %vm378_vm1, %v1013_v21 }
  0x94   : > { %966 = vmatmul.msk.bf16.gmra.mxu0 %vm378_vm1, %v1006_v23  ;;  %974 = vmatmul.msk.bf16.gmra.mxu2 %vm378_vm1, %v1014_v24 }
  0xa1   : > { %v440_v25 = vpop.f32.mrf.mxu0 }
  0xa2   : > { %v441_v28 = vadd.f32 %v1145_v26, %v440_v25 }
  0xa4   : > { %v520_v31 = vmax.f32 %v441_v28, 0.0 }
  0xa7   : > { %v480_v27 = vpop.f32.mrf.mxu2 }
  0xa8   : > { %v481_v33 = vadd.f32 %v1145_v26, %v480_v27 }
  0xa9   : > { %v442_v29 = vpop.f32.mrf.mxu0 }
  0xaa   : > { %v443_v30 = vadd.f32 %v1145_v26, %v442_v29  ;;  %v536_v38 = vmax.f32 %v481_v33, 0.0 }
  0xac   : > { %v521_v32 = vmax.f32 %v443_v30, 0.0 }
  0xae   : > { %v552_v34 = vpack.c.bf16 %v521_v32, %v520_v31 }
  0xaf   : > { %v482_v35 = vpop.f32.mrf.mxu2 }
  0xb0   : > { %v483_v36 = vadd.f32 %v1145_v26, %v482_v35  ;;  %979 = vmatmul.msk.bf16.vlgmr.msra.gmra.mxu1 %vm580_vm2, %v552_v34 }
  0xb1   : > { %v445_v37 = vpop.f32.mrf.mxu0 }
  0xb2   : > { %v537_v39 = vmax.f32 %v483_v36, 0.0  ;;  %v446_v42 = vadd.f32 %v1145_v26, %v445_v37 }
  0xb4   : > { %v1152_v40 = vpack.c.bf16 %v537_v39, %v536_v38  ;;  %v522_v45 = vmax.f32 %v446_v42, 0.0 }
  0xb7   : > { %v485_v41 = vpop.f32.mrf.mxu2 }
  0xb8   : > { %v486_v47 = vadd.f32 %v1145_v26, %v485_v41 }
  0xb9   : > { %v447_v43 = vpop.f32.mrf.mxu0 }
  0xba   : > { %v448_v44 = vadd.f32 %v1145_v26, %v447_v43  ;;  %v538_v52 = vmax.f32 %v486_v47, 0.0 }
  0xbc   : > { %v523_v46 = vmax.f32 %v448_v44, 0.0 }
  0xbe   : > { %v553_v48 = vpack.c.bf16 %v523_v46, %v522_v45 }
  0xbf   : > { %v487_v49 = vpop.f32.mrf.mxu2 }
  0xc0   : > { %v488_v50 = vadd.f32 %v1145_v26, %v487_v49  ;;  %980 = vmatmul.msk.bf16.gmra.mxu1 %vm580_vm2, %v553_v48 }
  0xc1   : > { %v450_v51 = vpop.f32.mrf.mxu0 }
  0xc2   : > { %v539_v53 = vmax.f32 %v488_v50, 0.0  ;;  %v451_v56 = vadd.f32 %v1145_v26, %v450_v51 }
  0xc4   : > { %v561_v54 = vpack.c.bf16 %v539_v53, %v538_v52  ;;  %v524_v59 = vmax.f32 %v451_v56, 0.0 }
  0xc6   : > { %988 = vmatmul.msk.bf16.vlgmr.msra.gmra.mxu3 %vm580_vm2, %v561_v54 }
  0xc7   : > { %v490_v55 = vpop.f32.mrf.mxu2 }
  0xc8   : > { %v491_v61 = vadd.f32 %v1145_v26, %v490_v55 }
  0xc9   : > { %v452_v57 = vpop.f32.mrf.mxu0 }
  0xca   : > { %v453_v58 = vadd.f32 %v1145_v26, %v452_v57  ;;  %v540_v2 = vmax.f32 %v491_v61, 0.0 }
  0xcc   : > { %v525_v60 = vmax.f32 %v453_v58, 0.0 }
  0xce   : > { %v554_v62 = vpack.c.bf16 %v525_v60, %v524_v59 }
  0xcf   : > { %v492_v63 = vpop.f32.mrf.mxu2 }
  0xd0   : > { %v493_v0 = vadd.f32 %v1145_v26, %v492_v63  ;;  %981 = vmatmul.msk.bf16.gmra.mxu1 %vm580_vm2, %v554_v62 }
  0xd1   : > { %v455_v1 = vpop.f32.mrf.mxu0 }
  0xd2   : > { %v541_v3 = vmax.f32 %v493_v0, 0.0  ;;  %v456_v6 = vadd.f32 %v1145_v26, %v455_v1 }
  0xd4   : > { %v562_v4 = vpack.c.bf16 %v541_v3, %v540_v2  ;;  %v526_v9 = vmax.f32 %v456_v6, 0.0 }
  0xd6   : > { %989 = vmatmul.msk.bf16.gmra.mxu3 %vm580_vm2, %v562_v4 }
  0xd7   : > { %v495_v5 = vpop.f32.mrf.mxu2 }
  0xd8   : > { %v496_v11 = vadd.f32 %v1145_v26, %v495_v5 }
  0xd9   : > { %v457_v7 = vpop.f32.mrf.mxu0 }
  0xda   : > { %v458_v8 = vadd.f32 %v1145_v26, %v457_v7  ;;  %v542_v16 = vmax.f32 %v496_v11, 0.0 }
  0xdc   : > { %v527_v10 = vmax.f32 %v458_v8, 0.0 }
  0xde   : > { %v555_v12 = vpack.c.bf16 %v527_v10, %v526_v9 }
  0xdf   : > { %v497_v13 = vpop.f32.mrf.mxu2 }
  0xe0   : > { %v498_v14 = vadd.f32 %v1145_v26, %v497_v13  ;;  %982 = vmatmul.msk.bf16.gmra.mxu1 %vm580_vm2, %v555_v12  ;;  %v1199_v12 = vld [vmem:[%s1313_s4] ss:$0 sm:$0xff] }
  0xe1   : > { %v460_v15 = vpop.f32.mrf.mxu0 }
  0xe2   : > { %v543_v17 = vmax.f32 %v498_v14, 0.0  ;;  %v461_v20 = vadd.f32 %v1145_v26, %v460_v15 }
  0xe4   : > { %v563_v18 = vpack.c.bf16 %v543_v17, %v542_v16  ;;  %v528_v23 = vmax.f32 %v461_v20, 0.0 }
  0xe6   : > { %990 = vmatmul.msk.bf16.gmra.mxu3 %vm580_vm2, %v563_v18 }
  0xe7   : > { %v500_v19 = vpop.f32.mrf.mxu2 }
  0xe8   : > { %v501_v25 = vadd.f32 %v1145_v26, %v500_v19 }
  0xe9   : > { %v462_v21 = vpop.f32.mrf.mxu0 }
  0xea   : > { %v463_v22 = vadd.f32 %v1145_v26, %v462_v21  ;;  %v544_v31 = vmax.f32 %v501_v25, 0.0 }
  0xec   : > { %v529_v24 = vmax.f32 %v463_v22, 0.0 }
  0xee   : > { %v556_v27 = vpack.c.bf16 %v529_v24, %v528_v23 }
  0xef   : > { %v502_v28 = vpop.f32.mrf.mxu2 }
  0xf0   : > { %v503_v29 = vadd.f32 %v1145_v26, %v502_v28  ;;  %983 = vmatmul.msk.bf16.gmra.mxu1 %vm580_vm2, %v556_v27 }
  0xf1   : > { %v465_v30 = vpop.f32.mrf.mxu0 }
  0xf2   : > { %v545_v32 = vmax.f32 %v503_v29, 0.0  ;;  %v466_v35 = vadd.f32 %v1145_v26, %v465_v30 }
  0xf4   : > { %v564_v33 = vpack.c.bf16 %v545_v32, %v544_v31  ;;  %v530_v38 = vmax.f32 %v466_v35, 0.0 }
  0xf6   : > { %991 = vmatmul.msk.bf16.gmra.mxu3 %vm580_vm2, %v564_v33 }
  0xf7   : > { %v505_v34 = vpop.f32.mrf.mxu2 }
  0xf8   : > { %v506_v41 = vadd.f32 %v1145_v26, %v505_v34 }
  0xf9   : > { %v467_v36 = vpop.f32.mrf.mxu0 }
  0xfa   : > { %v468_v37 = vadd.f32 %v1145_v26, %v467_v36  ;;  %v546_v46 = vmax.f32 %v506_v41, 0.0 }
  0xfc   : > { %v531_v39 = vmax.f32 %v468_v37, 0.0 }
  0xfe   : > { %v557_v42 = vpack.c.bf16 %v531_v39, %v530_v38 }
  0xff   : > { %v507_v43 = vpop.f32.mrf.mxu2 }
 0x100   : > { %v508_v44 = vadd.f32 %v1145_v26, %v507_v43  ;;  %984 = vmatmul.msk.bf16.gmra.mxu1 %vm580_vm2, %v557_v42 }
 0x101   : > { %v470_v45 = vpop.f32.mrf.mxu0 }
 0x102   : > { %v547_v47 = vmax.f32 %v508_v44, 0.0  ;;  %v471_v50 = vadd.f32 %v1145_v26, %v470_v45 }
 0x104   : > { %v565_v48 = vpack.c.bf16 %v547_v47, %v546_v46  ;;  %v532_v53 = vmax.f32 %v471_v50, 0.0 }
 0x106   : > { %992 = vmatmul.msk.bf16.gmra.mxu3 %vm580_vm2, %v565_v48 }
 0x107   : > { %v510_v49 = vpop.f32.mrf.mxu2 }
 0x108   : > { %v511_v55 = vadd.f32 %v1145_v26, %v510_v49 }
 0x109   : > { %v472_v51 = vpop.f32.mrf.mxu0 }
 0x10a   : > { %v473_v52 = vadd.f32 %v1145_v26, %v472_v51  ;;  %v548_v60 = vmax.f32 %v511_v55, 0.0 }
 0x10c   : > { %v533_v54 = vmax.f32 %v473_v52, 0.0 }
 0x10e   : > { %v558_v56 = vpack.c.bf16 %v533_v54, %v532_v53 }
 0x10f   : > { %v512_v57 = vpop.f32.mrf.mxu2 }
 0x110   : > { %v513_v58 = vadd.f32 %v1145_v26, %v512_v57  ;;  %985 = vmatmul.msk.bf16.gmra.mxu1 %vm580_vm2, %v558_v56 }
 0x111   : > { %v475_v59 = vpop.f32.mrf.mxu0 }
 0x112   : > { %v549_v61 = vmax.f32 %v513_v58, 0.0  ;;  %v476_v0 = vadd.f32 %v1145_v26, %v475_v59 }
 0x114   : > { %v566_v62 = vpack.c.bf16 %v549_v61, %v548_v60  ;;  %v534_v3 = vmax.f32 %v476_v0, 0.0 }
 0x116   : > { %993 = vmatmul.msk.bf16.gmra.mxu3 %vm580_vm2, %v566_v62 }
 0x117   : > { %v515_v63 = vpop.f32.mrf.mxu2 }
 0x118   : > { %v516_v5 = vadd.f32 %v1145_v26, %v515_v63 }
 0x119   : > { %v477_v1 = vpop.f32.mrf.mxu0 }
 0x11a   : > { %v478_v2 = vadd.f32 %v1145_v26, %v477_v1  ;;  %v550_v9 = vmax.f32 %v516_v5, 0.0 }
 0x11c   : > { %v535_v4 = vmax.f32 %v478_v2, 0.0 }
 0x11e   : > { %v559_v6 = vpack.c.bf16 %v535_v4, %v534_v3 }
 0x11f   : > { %v517_v7 = vpop.f32.mrf.mxu2 }
 0x120   : > { %v518_v8 = vadd.f32 %v1145_v26, %v517_v7  ;;  %986 = vmatmul.msk.bf16.gmra.mxu1 %vm580_vm2, %v559_v6 }
 0x122   : > { %v551_v10 = vmax.f32 %v518_v8, 0.0 }
 0x124   : > { %v567_v11 = vpack.c.bf16 %v551_v10, %v550_v9 }
 0x126   : > { %994 = vmatmul.msk.bf16.gmra.mxu3 %vm580_vm2, %v567_v11 }
 0x12d   : > { %v638_v13 = vpop.f32.mrf.mxu1 }
 0x12e   : > { %v639_v14 = vadd.f32 %v1199_v12, %v638_v13 }
 0x130   : > { %v718_v15 = vmax.f32 %v639_v14, 0.0  ;;  %987 = vmatmul.msk.bf16.gmra.mxu1 %vm580_vm2, %v1152_v40 }
 0x132   : > { %v750_v26 = vpack.c.bf16 %v718_v15, %v718_v15 }
 0x134   : > { %783 = vst.msk [vmem:[%s1209_s17] sm:$0xf] %vm782_vm3, %v750_v26 }
 0x135   : > { %v640_v16 = vpop.f32.mrf.mxu1 }
 0x136   : > { %v641_v17 = vadd.f32 %v1199_v12, %v640_v16 }
 0x138   : > { %v719_v18 = vmax.f32 %v641_v17, 0.0 }
 0x13a   : > { %v751_v19 = vpack.c.bf16 %v719_v18, %v719_v18 }
 0x13c   : > { %784 = vst.msk [vmem:[%s1209_s17 + $0x4] sm:$0xf] %vm782_vm3, %v751_v19 }
 0x13d   : > { %v643_v40 = vpop.f32.mrf.mxu1 }
 0x13e   : > { %v644_v20 = vadd.f32 %v1199_v12, %v643_v40 }
 0x140   : > { %v720_v21 = vmax.f32 %v644_v20, 0.0 }
 0x142   : > { %v752_v22 = vpack.c.bf16 %v720_v21, %v720_v21 }
 0x144   : > { %785 = vst.msk [vmem:[%s1209_s17 + $0x8] sm:$0xf] %vm782_vm3, %v752_v22 }
 0x145   : > { %v645_v23 = vpop.f32.mrf.mxu1 }
 0x146   : > { %v646_v24 = vadd.f32 %v1199_v12, %v645_v23 }
 0x148   : > { %v721_v25 = vmax.f32 %v646_v24, 0.0 }
 0x149   : > { %v683_v27 = vpop.f32.mrf.mxu3 }
 0x14a   : > { %v753_v28 = vpack.c.bf16 %v721_v25, %v721_v25  ;;  %v684_v29 = vadd.f32 %v1199_v12, %v683_v27 }
 0x14c   : > { %786 = vst.msk [vmem:[%s1209_s17 + $0xc] sm:$0xf] %vm782_vm3, %v753_v28  ;;  %v736_v30 = vmax.f32 %v684_v29, 0.0 }
 0x14d   : > { %v648_v31 = vpop.f32.mrf.mxu1 }
 0x14e   : > { %v768_v32 = vpack.c.bf16 %v736_v30, %v736_v30  ;;  %v649_v33 = vadd.f32 %v1199_v12, %v648_v31 }
 0x150   : > { %801 = vst.msk [vmem:[%s1209_s17 + $0x48] sm:$0xf] %vm782_vm3, %v768_v32  ;;  %v722_v34 = vmax.f32 %v649_v33, 0.0 }
 0x151   : > { %v685_v35 = vpop.f32.mrf.mxu3 }
 0x152   : > { %v754_v36 = vpack.c.bf16 %v722_v34, %v722_v34  ;;  %v686_v37 = vadd.f32 %v1199_v12, %v685_v35 }
 0x154   : > { %787 = vst.msk [vmem:[%s1209_s17 + $0x10] sm:$0xf] %vm782_vm3, %v754_v36  ;;  %v737_v38 = vmax.f32 %v686_v37, 0.0 }
 0x155   : > { %v650_v39 = vpop.f32.mrf.mxu1 }
 0x156   : > { %v769_v41 = vpack.c.bf16 %v737_v38, %v737_v38  ;;  %v651_v42 = vadd.f32 %v1199_v12, %v650_v39 }
 0x158   : > { %802 = vst.msk [vmem:[%s1209_s17 + $0x4c] sm:$0xf] %vm782_vm3, %v769_v41  ;;  %v723_v43 = vmax.f32 %v651_v42, 0.0 }
 0x159   : > { %v688_v44 = vpop.f32.mrf.mxu3 }
 0x15a   : > { %v755_v45 = vpack.c.bf16 %v723_v43, %v723_v43  ;;  %v689_v46 = vadd.f32 %v1199_v12, %v688_v44 }
 0x15c   : > { %788 = vst.msk [vmem:[%s1209_s17 + $0x14] sm:$0xf] %vm782_vm3, %v755_v45  ;;  %v738_v47 = vmax.f32 %v689_v46, 0.0 }
 0x15d   : > { %v653_v48 = vpop.f32.mrf.mxu1 }
 0x15e   : > { %v770_v49 = vpack.c.bf16 %v738_v47, %v738_v47  ;;  %v654_v50 = vadd.f32 %v1199_v12, %v653_v48 }
 0x160   : > { %803 = vst.msk [vmem:[%s1209_s17 + $0x50] sm:$0xf] %vm782_vm3, %v770_v49  ;;  %v724_v51 = vmax.f32 %v654_v50, 0.0 }
 0x161   : > { %v690_v52 = vpop.f32.mrf.mxu3 }
 0x162   : > { %v756_v53 = vpack.c.bf16 %v724_v51, %v724_v51  ;;  %v691_v54 = vadd.f32 %v1199_v12, %v690_v52 }
 0x164   : > { %789 = vst.msk [vmem:[%s1209_s17 + $0x18] sm:$0xf] %vm782_vm3, %v756_v53  ;;  %v739_v55 = vmax.f32 %v691_v54, 0.0 }
 0x165   : > { %v655_v56 = vpop.f32.mrf.mxu1 }
 0x166   : > { %v771_v57 = vpack.c.bf16 %v739_v55, %v739_v55  ;;  %v656_v58 = vadd.f32 %v1199_v12, %v655_v56 }
 0x168   : > { %804 = vst.msk [vmem:[%s1209_s17 + $0x54] sm:$0xf] %vm782_vm3, %v771_v57  ;;  %v725_v59 = vmax.f32 %v656_v58, 0.0 }
 0x169   : > { %v693_v60 = vpop.f32.mrf.mxu3 }
 0x16a   : > { %v757_v61 = vpack.c.bf16 %v725_v59, %v725_v59  ;;  %v694_v62 = vadd.f32 %v1199_v12, %v693_v60 }
 0x16c   : > { %790 = vst.msk [vmem:[%s1209_s17 + $0x1c] sm:$0xf] %vm782_vm3, %v757_v61  ;;  %v740_v63 = vmax.f32 %v694_v62, 0.0 }
 0x16d   : > { %v658_v0 = vpop.f32.mrf.mxu1 }
 0x16e   : > { %v772_v1 = vpack.c.bf16 %v740_v63, %v740_v63  ;;  %v659_v2 = vadd.f32 %v1199_v12, %v658_v0 }
 0x170   : > { %805 = vst.msk [vmem:[%s1209_s17 + $0x58] sm:$0xf] %vm782_vm3, %v772_v1  ;;  %v726_v3 = vmax.f32 %v659_v2, 0.0 }
 0x171   : > { %v695_v4 = vpop.f32.mrf.mxu3 }
 0x172   : > { %v758_v5 = vpack.c.bf16 %v726_v3, %v726_v3  ;;  %v696_v6 = vadd.f32 %v1199_v12, %v695_v4 }
 0x174   : > { %791 = vst.msk [vmem:[%s1209_s17 + $0x20] sm:$0xf] %vm782_vm3, %v758_v5  ;;  %v741_v7 = vmax.f32 %v696_v6, 0.0 }
 0x175   : > { %v660_v8 = vpop.f32.mrf.mxu1 }
 0x176   : > { %v773_v9 = vpack.c.bf16 %v741_v7, %v741_v7  ;;  %v661_v10 = vadd.f32 %v1199_v12, %v660_v8 }
 0x178   : > { %806 = vst.msk [vmem:[%s1209_s17 + $0x5c] sm:$0xf] %vm782_vm3, %v773_v9  ;;  %v727_v11 = vmax.f32 %v661_v10, 0.0 }
 0x179   : > { %v698_v13 = vpop.f32.mrf.mxu3 }
 0x17a   : > { %v759_v14 = vpack.c.bf16 %v727_v11, %v727_v11  ;;  %v699_v15 = vadd.f32 %v1199_v12, %v698_v13 }
 0x17c   : > { %792 = vst.msk [vmem:[%s1209_s17 + $0x24] sm:$0xf] %vm782_vm3, %v759_v14  ;;  %v742_v26 = vmax.f32 %v699_v15, 0.0 }
 0x17d   : > { %v663_v16 = vpop.f32.mrf.mxu1 }
 0x17e   : > { %v774_v17 = vpack.c.bf16 %v742_v26, %v742_v26  ;;  %v664_v18 = vadd.f32 %v1199_v12, %v663_v16 }
 0x180   : > { %807 = vst.msk [vmem:[%s1209_s17 + $0x60] sm:$0xf] %vm782_vm3, %v774_v17  ;;  %v728_v19 = vmax.f32 %v664_v18, 0.0 }
 0x181   : > { %v700_v40 = vpop.f32.mrf.mxu3 }
 0x182   : > { %v760_v20 = vpack.c.bf16 %v728_v19, %v728_v19  ;;  %v701_v21 = vadd.f32 %v1199_v12, %v700_v40 }
 0x184   : > { %793 = vst.msk [vmem:[%s1209_s17 + $0x28] sm:$0xf] %vm782_vm3, %v760_v20  ;;  %v743_v22 = vmax.f32 %v701_v21, 0.0 }
 0x185   : > { %v665_v23 = vpop.f32.mrf.mxu1 }
 0x186   : > { %v775_v24 = vpack.c.bf16 %v743_v22, %v743_v22  ;;  %v666_v25 = vadd.f32 %v1199_v12, %v665_v23 }
 0x188   : > { %808 = vst.msk [vmem:[%s1209_s17 + $0x64] sm:$0xf] %vm782_vm3, %v775_v24  ;;  %v729_v27 = vmax.f32 %v666_v25, 0.0 }
 0x189   : > { %v703_v28 = vpop.f32.mrf.mxu3 }
 0x18a   : > { %v761_v29 = vpack.c.bf16 %v729_v27, %v729_v27  ;;  %v704_v30 = vadd.f32 %v1199_v12, %v703_v28 }
 0x18c   : > { %794 = vst.msk [vmem:[%s1209_s17 + $0x2c] sm:$0xf] %vm782_vm3, %v761_v29  ;;  %v744_v31 = vmax.f32 %v704_v30, 0.0 }
 0x18d   : > { %v668_v32 = vpop.f32.mrf.mxu1 }
 0x18e   : > { %v776_v33 = vpack.c.bf16 %v744_v31, %v744_v31  ;;  %v669_v34 = vadd.f32 %v1199_v12, %v668_v32 }
 0x190   : > { %809 = vst.msk [vmem:[%s1209_s17 + $0x68] sm:$0xf] %vm782_vm3, %v776_v33  ;;  %v730_v35 = vmax.f32 %v669_v34, 0.0 }
 0x191   : > { %v705_v36 = vpop.f32.mrf.mxu3 }
 0x192   : > { %v762_v37 = vpack.c.bf16 %v730_v35, %v730_v35  ;;  %v706_v38 = vadd.f32 %v1199_v12, %v705_v36 }
 0x194   : > { %795 = vst.msk [vmem:[%s1209_s17 + $0x30] sm:$0xf] %vm782_vm3, %v762_v37  ;;  %v745_v39 = vmax.f32 %v706_v38, 0.0 }
 0x195   : > { %v670_v41 = vpop.f32.mrf.mxu1 }
 0x196   : > { %v777_v42 = vpack.c.bf16 %v745_v39, %v745_v39  ;;  %v671_v43 = vadd.f32 %v1199_v12, %v670_v41 }
 0x198   : > { %810 = vst.msk [vmem:[%s1209_s17 + $0x6c] sm:$0xf] %vm782_vm3, %v777_v42  ;;  %v731_v44 = vmax.f32 %v671_v43, 0.0 }
 0x199   : > { %v708_v45 = vpop.f32.mrf.mxu3 }
 0x19a   : > { %v763_v46 = vpack.c.bf16 %v731_v44, %v731_v44  ;;  %v709_v47 = vadd.f32 %v1199_v12, %v708_v45 }
 0x19c   : > { %796 = vst.msk [vmem:[%s1209_s17 + $0x34] sm:$0xf] %vm782_vm3, %v763_v46  ;;  %v746_v48 = vmax.f32 %v709_v47, 0.0 }
 0x19d   : > { %v673_v49 = vpop.f32.mrf.mxu1 }
 0x19e   : > { %v778_v50 = vpack.c.bf16 %v746_v48, %v746_v48  ;;  %v674_v51 = vadd.f32 %v1199_v12, %v673_v49 }
 0x1a0   : > { %811 = vst.msk [vmem:[%s1209_s17 + $0x70] sm:$0xf] %vm782_vm3, %v778_v50  ;;  %v732_v52 = vmax.f32 %v674_v51, 0.0 }
 0x1a1   : > { %v710_v53 = vpop.f32.mrf.mxu3 }
 0x1a2   : > { %v764_v54 = vpack.c.bf16 %v732_v52, %v732_v52  ;;  %v711_v55 = vadd.f32 %v1199_v12, %v710_v53 }
 0x1a4   : > { %797 = vst.msk [vmem:[%s1209_s17 + $0x38] sm:$0xf] %vm782_vm3, %v764_v54  ;;  %v747_v56 = vmax.f32 %v711_v55, 0.0 }
 0x1a5   : > { %v675_v57 = vpop.f32.mrf.mxu1 }
 0x1a6   : > { %v779_v58 = vpack.c.bf16 %v747_v56, %v747_v56  ;;  %v676_v59 = vadd.f32 %v1199_v12, %v675_v57 }
 0x1a8   : > { %812 = vst.msk [vmem:[%s1209_s17 + $0x74] sm:$0xf] %vm782_vm3, %v779_v58  ;;  %v733_v60 = vmax.f32 %v676_v59, 0.0 }
 0x1a9   : > { %v713_v61 = vpop.f32.mrf.mxu3 }
 0x1aa   : > { %v765_v62 = vpack.c.bf16 %v733_v60, %v733_v60  ;;  %v714_v63 = vadd.f32 %v1199_v12, %v713_v61 }
 0x1ac   : > { %798 = vst.msk [vmem:[%s1209_s17 + $0x3c] sm:$0xf] %vm782_vm3, %v765_v62  ;;  %v748_v0 = vmax.f32 %v714_v63, 0.0 }
 0x1ad   : > { %v678_v1 = vpop.f32.mrf.mxu1 }
 0x1ae   : > { %v780_v2 = vpack.c.bf16 %v748_v0, %v748_v0  ;;  %v679_v3 = vadd.f32 %v1199_v12, %v678_v1 }
 0x1b0   : > { %813 = vst.msk [vmem:[%s1209_s17 + $0x78] sm:$0xf] %vm782_vm3, %v780_v2  ;;  %v734_v4 = vmax.f32 %v679_v3, 0.0 }
 0x1b1   : > { %v715_v5 = vpop.f32.mrf.mxu3 }
 0x1b2   : > { %v766_v6 = vpack.c.bf16 %v734_v4, %v734_v4  ;;  %v716_v7 = vadd.f32 %v1199_v12, %v715_v5 }
 0x1b4   : > { %799 = vst.msk [vmem:[%s1209_s17 + $0x40] sm:$0xf] %vm782_vm3, %v766_v6  ;;  %v749_v8 = vmax.f32 %v716_v7, 0.0 }
 0x1b5   : > { %v680_v9 = vpop.f32.mrf.mxu1 }
 0x1b6   : > { %v781_v10 = vpack.c.bf16 %v749_v8, %v749_v8  ;;  %v681_v11 = vadd.f32 %v1199_v12, %v680_v9 }
 0x1b8   : > { %814 = vst.msk [vmem:[%s1209_s17 + $0x7c] sm:$0xf] %vm782_vm3, %v781_v10  ;;  %v735_v13 = vmax.f32 %v681_v11, 0.0 }
 0x1ba   : > { %v767_v14 = vpack.c.bf16 %v735_v13, %v735_v13 }
 0x1bc   : > { %800 = vst.msk [vmem:[%s1209_s17 + $0x44] sm:$0xf] %vm782_vm3, %v767_v14 }
 0x1bd PF: > { %s15_s18 = sadd.s32 1, %s1042_s18  }
 0x1be   : > { %p12_p4 = scmp.ge.s32.totalorder %s15_s18, 4  }
 0x1c0   :  { %14 = sbr.rel (!%p12_p4) target bundleno = 1 (0x1), region = 70 }

// kernel: srflownet_normal_flow.32
= control target key start
LH: loop header
LB: loop body
LE: loop exit
PB: predicated region body
PF: predicated region fallthrough
CT: control target
= control target key end

     0   :  { %s3434_s30 = smov 0   ;;  %s4581_s0 = inlined_call_operand.vmem [shape: bf16[2,288,48], index: 0, kind: input, shape index: {}]   ;;  %s4582_s1 = inlined_call_operand.vmem [shape: bf16[3,48,12], index: 1, kind: input, shape index: {}]   ;;  %s4583_s2 = inlined_call_operand.vmem [shape: bf16[3,48,12], index: 2, kind: input, shape index: {}]   ;;  %s4584_s3 = inlined_call_operand.vmem [shape: f32[1,12], index: 3, kind: input, shape index: {}]   ;;  %s4585_s4 = inlined_call_operand.vmem [shape: f32[1,12], index: 4, kind: input, shape index: {}]   ;;  %s4586_s5 = inlined_call_operand.vmem [shape: f32[2,256,12], index: 5, kind: input, shape index: {}]   ;;  %s4587_s6 = inlined_call_operand.vmem [shape: bf16[12,12], index: 6, kind: input, shape index: {}]   ;;  %s4588_s7 = inlined_call_operand.vmem [shape: f32[1,12], index: 7, kind: input, shape index: {}]   ;;  %s4589_s8 = inlined_call_operand.vmem [shape: f32[2,256,12], index: 8, kind: output, shape index: {0}]   ;;  %s4590_s9 = inlined_call_operand.vmem [shape: f32[2,1,12], index: 9, kind: output, shape index: {1}]  }
   0x1 LB: > { %s2708_s10 = sadd.s32 4294967295, %s3382_s30   ;;  %p2712_p0 = scmp.ge.s32.totalorder %s3382_s30, 1  ;;  %s3382_s30 = sphi %s3434_s30, %s20_s30  }
   0x2   : > { %p300_p1 = scmp.lt.s32.totalorder %s3382_s30, 3 }
   0x4   : > { %p301_p2 = pnand %p2712_p0, %p300_p1 }
   0x6   : > { %304 = sbr.rel (%p301_p2) target bundleno = 660 (0x294), region = 52 }
   0xb   : > { %v3120_v0 = vld [vmem:[%s4582_s1 + $0x28] sm:$0xff]  ;;  %v3116_v1 = vld [vmem:[%s4582_s1 + $0x10] sm:$0xff]  ;;  %v3139_v2 = vld [vmem:[%s4582_s1 + $0x40] sm:$0xff]  ;;  %p344_p3 = scmp.lt.s32.totalorder %s2708_s10, 1  ;;  %vm508_vm0 = vcmask 392192   ;;  %vm1620_vm1 = vcmask 1045504  }
   0xc   : > { %562 = vmatpush.bf16.msra.mxu0 %v3120_v0  ;;  %3150 = vmatpush.bf16.msra.mxu3 %v3120_v0  ;;  %v3119_v3 = vld [vmem:[%s4582_s1 + $0x20] sm:$0xff]  ;;  %v3115_v4 = vld [vmem:[%s4582_s1 + $0x8] sm:$0xff]  ;;  %v3138_v5 = vld [vmem:[%s4582_s1 + $0x38] sm:$0xff]  ;;  %vm1571_vm2 = vcmask 97280  }
   0xd   : > { %s4604_s10 = smov (!%p344_p3, %s2708_s10), 1  ;;  %677 = vmatpush.bf16.msra.mxu1 %v3116_v1  ;;  %951 = vmatpush.bf16.msra.mxu2 %v3139_v2  ;;  %v3118_v6 = vld [vmem:[%s4582_s1 + $0x18] sm:$0xff]  ;;  %v3114_v7 = vld [vmem:[%s4582_s1] sm:$0xff]  ;;  %v3137_v8 = vld [vmem:[%s4582_s1 + $0x30] sm:$0xff] }
   0xe   : > { %s3159_s23 = smul.u32 144, %s4604_s10  ;;  %v3142_v9 = vld [vmem:[%s4583_s2 + $0x10] sm:$0xff]  ;;  %v3148_v14 = vld [vmem:[%s4583_s2 + $0x40] sm:$0xff]  ;;  %v3141_v25 = vld [vmem:[%s4583_s2 + $0x8] sm:$0xff]  ;;  %s3096_s18 = sshll.u32 %s4604_s10, 8 }
   0xf   : > { %v3044_v18 = vld [vmem:[%s4587_s6] sm:$0xf]  ;;  %v3149_v19 = vld [vmem:[%s4587_s6] sm:$0x30]  ;;  %v3147_v26 = vld [vmem:[%s4583_s2 + $0x38] sm:$0xff]  ;;  %s3715_s21 = scalar_lea.vmem %s4586_s5, %s3096_s18  ;;  %s3945_s12 = scalar_lea.vmem %s4589_s8, %s3096_s18 }
  0x10   : > { %563 = vmatpush.bf16.msra.mxu0 %v3119_v3  ;;  %3151 = vmatpush.bf16.msra.mxu3 %v3119_v3  ;;  %s3469_s28 = scalar_lea.vmem %s4581_s0, %s3159_s23  ;;  %v3045_v20 = vor.u32 %v3149_v19, %v3044_v18  ;;  %v3145_v37 = vld [vmem:[%s4583_s2 + $0x28] sm:$0xff]  ;;  %v3140_v38 = vld [vmem:[%s4583_s2] sm:$0xff]  ;;  %v3146_v39 = vld [vmem:[%s4583_s2 + $0x30] sm:$0xff]  ;;  %s361_s26 = scalar_lea.vmem %s4590_s9, %s4604_s10 }
  0x11   : > { %678 = vmatpush.bf16.msra.mxu1 %v3115_v4  ;;  %952 = vmatpush.bf16.msra.mxu2 %v3138_v5  ;;  %v3481_v10 = vld [vmem:[%s3469_s28 + $0x8] sm:$0xff]  ;;  %v3485_v12 = vld [vmem:[%s3469_s28] sm:$0xff]  ;;  %v3488_v13 = vld [vmem:[%s3469_s28 + $0x10] sm:$0xff] }
  0x12   : > { %v3111_v11 = vld [vmem:[%s3469_s28 + $0x68] sm:$0xff]  ;;  %v3501_v15 = vld [vmem:[%s3469_s28 + $0x10] sm:$0xff]  ;;  %v3505_v17 = vld [vmem:[%s3469_s28 + $0x18] sm:$0xff]  ;;  %v1622_v21 = vsel %vm1620_vm1, %v3045_v20, 0 }
  0x13   : > { %v3112_v16 = vld [vmem:[%s3469_s28 + $0x70] sm:$0xff]  ;;  %v3521_v22 = vld [vmem:[%s3469_s28 + $0x18] sm:$0xff]  ;;  %v3525_v24 = vld [vmem:[%s3469_s28 + $0x20] sm:$0xff] }
  0x14   : > { %564 = vmatpush.bf16.msra.mxu0 %v3118_v6  ;;  %3152 = vmatpush.bf16.msra.mxu3 %v3118_v6  ;;  %v3113_v23 = vld [vmem:[%s3469_s28 + $0x78] sm:$0xff]  ;;  %v3541_v27 = vld [vmem:[%s3469_s28 + $0x20] sm:$0xff]  ;;  %v3545_v29 = vld [vmem:[%s3469_s28 + $0x28] sm:$0xff] }
  0x15   : > { %679 = vmatpush.bf16.msra.mxu1 %v3114_v7  ;;  %953 = vmatpush.bf16.msra.mxu2 %v3137_v8  ;;  %v3117_v28 = vld [vmem:[%s3469_s28 + $0x80] sm:$0xff]  ;;  %v3555_v30 = vld [vmem:[%s3469_s28 + $0x28] sm:$0xff]  ;;  %v3561_v32 = vld [vmem:[%s3469_s28 + $0x30] sm:$0xff] }
  0x16   : > { %v3558_v31 = vld [vmem:[%s3469_s28 + $0x60] sm:$0xff]  ;;  %v3572_v33 = vld [vmem:[%s3469_s28 + $0x30] sm:$0xff]  ;;  %v3575_v34 = vld [vmem:[%s3469_s28 + $0x38] sm:$0xff] }
  0x17   : > { %2800 = vmatmul.msk.bf16.vlgmr.msra.gmra.mxu0 %vm508_vm0, %v3481_v10  ;;  %2812 = vmatmul.msk.bf16.vlgmr.msra.gmra.mxu3 %vm508_vm0, %v3111_v11  ;;  %v3585_v35 = vld [vmem:[%s3469_s28 + $0x38] sm:$0xff]  ;;  %v3588_v36 = vld [vmem:[%s3469_s28 + $0x40] sm:$0xff]  ;;  %v3610_v41 = vld [vmem:[%s3469_s28 + $0x48] sm:$0xff] }
  0x18   : > { %3153 = vmatpush.bf16.msrb.mxu3 %v3116_v1  ;;  %1246 = vmatpush.bf16.msrb.mxu0 %v3142_v9  ;;  %v3607_v40 = vld [vmem:[%s3469_s28 + $0x40] sm:$0xff]  ;;  %v3623_v43 = vld [vmem:[%s3469_s28 + $0x48] sm:$0xff]  ;;  %v3626_v44 = vld [vmem:[%s3469_s28 + $0x70] sm:$0xff] }
  0x19   : > { %2832 = vmatmul.msk.bf16.vlgmr.msra.gmra.mxu1 %vm508_vm0, %v3485_v12  ;;  %2930 = vmatmul.msk.bf16.vlgmr.msra.gmra.mxu2 %vm508_vm0, %v3488_v13  ;;  %v3144_v42 = vld [vmem:[%s4583_s2 + $0x20] sm:$0xff]  ;;  %v3629_v46 = vld [vmem:[%s3469_s28 + $0x50] sm:$0xff]  ;;  %v3134_v58 = vld [vmem:[%s3469_s28 + $0x78] sm:$0xff] }
  0x1a   : > { %1360 = vmatpush.bf16.msrb.mxu1 %v3148_v14  ;;  %1631 = vmatpush.bf16.msrb.mxu2 %v1622_v21  ;;  %v3646_v57 = vld [vmem:[%s3469_s28 + $0x50] sm:$0xff]  ;;  %v3652_v61 = vld [vmem:[%s3469_s28 + $0x58] sm:$0xff]  ;;  %v3677_v18 = vld [vmem:[%s3469_s28 + $0x60] sm:$0xff] }
  0x1b   : > { %v3143_v0 = vld [vmem:[%s4583_s2 + $0x18] sm:$0xff] }
  0x1c   : > { %3154 = vmatpush.bf16.msrb.mxu3 %v3115_v4  ;;  %1247 = vmatpush.bf16.msrb.mxu0 %v3141_v25  ;;  %v3671_v9 = vld [vmem:[%s3469_s28 + $0x58] sm:$0xff] }
  0x1e   : > { %1361 = vmatpush.bf16.msrb.mxu1 %v3147_v26 }
  0x20   : > { %3155 = vmatpush.bf16.msrb.mxu3 %v3114_v7  ;;  %1248 = vmatpush.bf16.msrb.mxu0 %v3140_v38 }
  0x22   : > { %1362 = vmatpush.bf16.msrb.mxu1 %v3146_v39 }
  0x24   : > { %3156 = vmatpush.bf16.msra.mxu3 %v3139_v2 }
  0x27   : > { %2801 = vmatmul.msk.bf16.gmra.mxu0 %vm508_vm0, %v3501_v15  ;;  %2813 = vmatmul.msk.bf16.gmra.mxu3 %vm508_vm0, %v3112_v16 }
  0x28   : > { %3157 = vmatpush.bf16.msra.mxu3 %v3138_v5 }
  0x29   : > { %2833 = vmatmul.msk.bf16.gmra.mxu1 %vm508_vm0, %v3481_v10  ;;  %2931 = vmatmul.msk.bf16.gmra.mxu2 %vm508_vm0, %v3505_v17 }
  0x2c   : > { %3158 = vmatpush.bf16.msra.mxu3 %v3137_v8 }
  0x37   : > { %2802 = vmatmul.msk.bf16.gmra.mxu0 %vm508_vm0, %v3521_v22  ;;  %2814 = vmatmul.msk.bf16.gmra.mxu3 %vm508_vm0, %v3113_v23 }
  0x39   : > { %2834 = vmatmul.msk.bf16.gmra.mxu1 %vm508_vm0, %v3501_v15  ;;  %2932 = vmatmul.msk.bf16.gmra.mxu2 %vm508_vm0, %v3525_v24 }
  0x47   : > { %2803 = vmatmul.msk.bf16.gmra.mxu0 %vm508_vm0, %v3541_v27  ;;  %2815 = vmatmul.msk.bf16.gmra.mxu3 %vm508_vm0, %v3117_v28 }
  0x49   : > { %2835 = vmatmul.msk.bf16.gmra.mxu1 %vm508_vm0, %v3521_v22  ;;  %2933 = vmatmul.msk.bf16.gmra.mxu2 %vm508_vm0, %v3545_v29 }
  0x57   : > { %2804 = vmatmul.msk.bf16.gmra.mxu0 %vm508_vm0, %v3555_v30  ;;  %2844 = vmatmul.msk.bf16.vlgmr.msrb.gmra.mxu3 %vm508_vm0, %v3558_v31 }
  0x58   : > { %1139 = vmatpush.bf16.msrb.mxu3 %v3145_v37 }
  0x59   : > { %2836 = vmatmul.msk.bf16.gmra.mxu1 %vm508_vm0, %v3541_v27  ;;  %2934 = vmatmul.msk.bf16.gmra.mxu2 %vm508_vm0, %v3561_v32 }
  0x5c   : > { %1140 = vmatpush.bf16.msrb.mxu3 %v3144_v42  ;;  %v3136_v42 = vld [vmem:[%s3469_s28 + $0x88] sm:$0xff] }
  0x60   : > { %1141 = vmatpush.bf16.msrb.mxu3 %v3143_v0  ;;  %v1513_v0 = vld [vmem:[%s3715_s21 + $0x8] sm:$0xff] }
  0x67   : > { %2805 = vmatmul.msk.bf16.gmra.mxu0 %vm508_vm0, %v3572_v33  ;;  %2845 = vmatmul.msk.bf16.gmra.mxu3 %vm508_vm0, %v3111_v11  ;;  %v3135_v11 = vld [vmem:[%s3469_s28 + $0x80] sm:$0xff] }
  0x69   : > { %2837 = vmatmul.msk.bf16.gmra.mxu1 %vm508_vm0, %v3555_v30  ;;  %2935 = vmatmul.msk.bf16.gmra.mxu2 %vm508_vm0, %v3575_v34 }
  0x77   : > { %2806 = vmatmul.msk.bf16.gmra.mxu0 %vm508_vm0, %v3585_v35  ;;  %2846 = vmatmul.msk.bf16.gmra.mxu3 %vm508_vm0, %v3112_v16 }
  0x79   : > { %2838 = vmatmul.msk.bf16.gmra.mxu1 %vm508_vm0, %v3572_v33  ;;  %2936 = vmatmul.msk.bf16.gmra.mxu2 %vm508_vm0, %v3588_v36 }
  0x87   : > { %2807 = vmatmul.msk.bf16.gmra.mxu0 %vm508_vm0, %v3607_v40  ;;  %2847 = vmatmul.msk.bf16.gmra.mxu3 %vm508_vm0, %v3113_v23 }
  0x89   : > { %2839 = vmatmul.msk.bf16.gmra.mxu1 %vm508_vm0, %v3585_v35  ;;  %2937 = vmatmul.msk.bf16.gmra.mxu2 %vm508_vm0, %v3610_v41 }
  0x94   : > { %v566_v45 = vpop.f32.mrf.mxu0 }
  0x96   : > { %v681_v47 = vpop.f32.mrf.mxu1 }
  0x97   : > { %v682_v48 = vadd.f32 %v681_v47, %v566_v45  ;;  %2808 = vmatmul.msk.bf16.gmra.mxu0 %vm508_vm0, %v3623_v43  ;;  %2942 = vmatmul.msk.bf16.vlgmr.msra.gmra.mxu3 %vm508_vm0, %v3626_v44 }
  0x99   : > { %2840 = vmatmul.msk.bf16.gmra.mxu1 %vm508_vm0, %v3607_v40  ;;  %2938 = vmatmul.msk.bf16.gmra.mxu2 %vm508_vm0, %v3629_v46 }
  0x9a   : > { %v3639_v49 = vpop.f32.mrf.mxu3 }
  0x9c   : > { %v955_v50 = vpop.f32.mrf.mxu2  ;;  %v568_v52 = vpop.f32.mrf.mxu0 }
  0x9d   : > { %v3641_v51 = vadd.f32 %v955_v50, %v682_v48  ;;  %v3696_v48 = vld [vmem:[%s3469_s28 + $0x68] sm:$0xff] }
  0x9e   : > { %v683_v53 = vpop.f32.mrf.mxu1 }
  0x9f   : > { %v684_v54 = vadd.f32 %v683_v53, %v568_v52 }
  0xa2   : > { %v3643_v55 = vpop.f32.mrf.mxu3 }
  0xa4   : > { %v957_v56 = vpop.f32.mrf.mxu2  ;;  %v571_v60 = vpop.f32.mrf.mxu0 }
  0xa5   : > { %v3649_v59 = vadd.f32 %v957_v56, %v684_v54 }
  0xa6   : > { %v686_v62 = vpop.f32.mrf.mxu1 }
  0xa7   : > { %v687_v63 = vadd.f32 %v686_v62, %v571_v60  ;;  %2809 = vmatmul.msk.bf16.gmra.mxu0 %vm508_vm0, %v3646_v57  ;;  %2943 = vmatmul.msk.bf16.gmra.mxu3 %vm508_vm0, %v3134_v58 }
  0xa9   : > { %2841 = vmatmul.msk.bf16.gmra.mxu1 %vm508_vm0, %v3623_v43  ;;  %2939 = vmatmul.msk.bf16.gmra.mxu2 %vm508_vm0, %v3652_v61 }
  0xaa   : > { %v3664_v1 = vpop.f32.mrf.mxu3 }
  0xac   : > { %v960_v2 = vpop.f32.mrf.mxu2  ;;  %v573_v4 = vpop.f32.mrf.mxu0 }
  0xad   : > { %v3666_v3 = vadd.f32 %v960_v2, %v687_v63  ;;  %v1512_v63 = vld [vmem:[%s3715_s21] sm:$0xff] }
  0xae   : > { %v688_v5 = vpop.f32.mrf.mxu1 }
  0xaf   : > { %v689_v6 = vadd.f32 %v688_v5, %v573_v4 }
  0xb2   : > { %v3668_v7 = vpop.f32.mrf.mxu3 }
  0xb4   : > { %v962_v8 = vpop.f32.mrf.mxu2  ;;  %v576_v16 = vpop.f32.mrf.mxu0 }
  0xb5   : > { %v3674_v14 = vadd.f32 %v962_v8, %v689_v6  ;;  %v1544_v8 = vpack.c.bf16 %v1513_v0, %v1512_v63 }
  0xb6   : > { %v691_v19 = vpop.f32.mrf.mxu1 }
  0xb7   : > { %v692_v20 = vadd.f32 %v691_v19, %v576_v16  ;;  %2810 = vmatmul.msk.bf16.gmra.mxu0 %vm508_vm0, %v3671_v9  ;;  %2944 = vmatmul.msk.bf16.gmra.mxu3 %vm508_vm0, %v3135_v11 }
  0xb9   : > { %2842 = vmatmul.msk.bf16.gmra.mxu1 %vm508_vm0, %v3646_v57  ;;  %2940 = vmatmul.msk.bf16.gmra.mxu2 %vm508_vm0, %v3677_v18 }
  0xba   : > { %v3686_v21 = vpop.f32.mrf.mxu3 }
  0xbc   : > { %v965_v23 = vpop.f32.mrf.mxu2  ;;  %v578_v26 = vpop.f32.mrf.mxu0 }
  0xbd   : > { %v3688_v25 = vadd.f32 %v965_v23, %v692_v20 }
  0xbe   : > { %v693_v28 = vpop.f32.mrf.mxu1 }
  0xbf   : > { %v694_v37 = vadd.f32 %v693_v28, %v578_v26 }
  0xc2   : > { %v3690_v38 = vpop.f32.mrf.mxu3 }
  0xc4   : > { %v967_v39 = vpop.f32.mrf.mxu2  ;;  %v581_v47 = vpop.f32.mrf.mxu0 }
  0xc5   : > { %v3693_v45 = vadd.f32 %v967_v39, %v694_v37 }
  0xc6   : > { %v696_v50 = vpop.f32.mrf.mxu1 }
  0xc7   : > { %v697_v52 = vadd.f32 %v696_v50, %v581_v47  ;;  %2811 = vmatmul.msk.bf16.gmra.mxu0 %vm508_vm0, %v3558_v31  ;;  %2945 = vmatmul.msk.bf16.gmra.mxu3 %vm508_vm0, %v3136_v42  ;;  %v1514_v42 = vld [vmem:[%s3715_s21 + $0x10] sm:$0xff]  ;;  %v1515_v47 = vld [vmem:[%s3715_s21 + $0x18] sm:$0xff] }
  0xc9   : > { %2843 = vmatmul.msk.bf16.gmra.mxu1 %vm508_vm0, %v3671_v9  ;;  %2941 = vmatmul.msk.bf16.gmra.mxu2 %vm508_vm0, %v3696_v48 }
  0xca   : > { %v3705_v53 = vpop.f32.mrf.mxu3 }
  0xcc   : > { %v970_v54 = vpop.f32.mrf.mxu2  ;;  %v583_v58 = vpop.f32.mrf.mxu0 }
  0xcd   : > { %v3708_v56 = vadd.f32 %v970_v54, %v697_v52 }
  0xce   : > { %v698_v60 = vpop.f32.mrf.mxu1 }
  0xcf   : > { %v699_v62 = vadd.f32 %v698_v60, %v583_v58 }
  0xd2   : > { %v3719_v2 = vpop.f32.mrf.mxu3 }
  0xd4   : > { %v972_v4 = vpop.f32.mrf.mxu2  ;;  %v586_v6 = vpop.f32.mrf.mxu0 }
  0xd5   : > { %v3721_v5 = vadd.f32 %v972_v4, %v699_v62 }
  0xd6   : > { %v701_v11 = vpop.f32.mrf.mxu1 }
  0xd7   : > { %v702_v16 = vadd.f32 %v701_v11, %v586_v6  ;;  %2964 = vmatmul.msk.bf16.vlgmr.msrb.gmra.mxu3 %vm508_vm0, %v3481_v10  ;;  %2992 = vmatmul.msk.bf16.vlgmr.msrb.gmra.mxu0 %vm508_vm0, %v3485_v12  ;;  %v1516_v11 = vld [vmem:[%s3715_s21 + $0x20] sm:$0xff] }
  0xd9   : > { %3026 = vmatmul.msk.bf16.vlgmr.msrb.gmra.mxu1 %vm508_vm0, %v3488_v13  ;;  %3046 = vmatmul.msk.bf16.vlgmr.msrb.gmra.mxu2 %vm1571_vm2, %v1544_v8 }
  0xda   : > { %v741_v19 = vpop.f32.mrf.mxu3 }
  0xdb   : > { %v3731_v20 = vadd.f32 %v741_v19, %v3639_v49  ;;  %v1545_v49 = vpack.c.bf16 %v1515_v47, %v1514_v42 }
  0xdc   : > { %v975_v23 = vpop.f32.mrf.mxu2  ;;  %v588_v28 = vpop.f32.mrf.mxu0 }
  0xdd   : > { %v3733_v26 = vadd.f32 %v975_v23, %v702_v16  ;;  %v1517_v16 = vld [vmem:[%s3715_s21 + $0x28] sm:$0xff] }
  0xde   : > { %v703_v37 = vpop.f32.mrf.mxu1 }
  0xdf   : > { %v704_v39 = vadd.f32 %v703_v37, %v588_v28 }
  0xe2   : > { %v743_v50 = vpop.f32.mrf.mxu3 }
  0xe3   : > { %v3738_v12 = vadd.f32 %v743_v50, %v3643_v55 }
  0xe4   : > { %v977_v52 = vpop.f32.mrf.mxu2  ;;  %v591_v54 = vpop.f32.mrf.mxu0 }
  0xe5   : > { %v3740_v13 = vadd.f32 %v977_v52, %v704_v39 }
  0xe6   : > { %v706_v58 = vpop.f32.mrf.mxu1 }
  0xe7   : > { %v707_v60 = vadd.f32 %v706_v58, %v591_v54  ;;  %2965 = vmatmul.msk.bf16.gmra.mxu3 %vm508_vm0, %v3501_v15  ;;  %2993 = vmatmul.msk.bf16.gmra.mxu0 %vm508_vm0, %v3481_v10  ;;  %v1518_v58 = vld [vmem:[%s3715_s21 + $0x30] sm:$0xff] }
  0xe9   : > { %3027 = vmatmul.msk.bf16.gmra.mxu1 %vm508_vm0, %v3505_v17  ;;  %3047 = vmatmul.msk.bf16.gmra.mxu2 %vm1571_vm2, %v1545_v49 }
  0xea   : > { %v746_v55 = vpop.f32.mrf.mxu3 }
  0xeb   : > { %v3750_v62 = vadd.f32 %v746_v55, %v3664_v1  ;;  %v1546_v1 = vpack.c.bf16 %v1517_v16, %v1516_v11 }
  0xec   : > { %v980_v63 = vpop.f32.mrf.mxu2  ;;  %v593_v4 = vpop.f32.mrf.mxu0 }
  0xed   : > { %v3752_v0 = vadd.f32 %v980_v63, %v707_v60  ;;  %v1519_v60 = vld [vmem:[%s3715_s21 + $0x38] sm:$0xff] }
  0xee   : > { %v708_v6 = vpop.f32.mrf.mxu1 }
  0xef   : > { %v709_v8 = vadd.f32 %v708_v6, %v593_v4 }
  0xf2   : > { %v748_v19 = vpop.f32.mrf.mxu3 }
  0xf3   : > { %v3757_v10 = vadd.f32 %v748_v19, %v3668_v7 }
  0xf4   : > { %v982_v23 = vpop.f32.mrf.mxu2  ;;  %v596_v28 = vpop.f32.mrf.mxu0 }
  0xf5   : > { %v3759_v17 = vadd.f32 %v982_v23, %v709_v8 }
  0xf6   : > { %v711_v37 = vpop.f32.mrf.mxu1 }
  0xf7   : > { %v712_v39 = vadd.f32 %v711_v37, %v596_v28  ;;  %2966 = vmatmul.msk.bf16.gmra.mxu3 %vm508_vm0, %v3521_v22  ;;  %2994 = vmatmul.msk.bf16.gmra.mxu0 %vm508_vm0, %v3501_v15  ;;  %v1520_v37 = vld [vmem:[%s3715_s21 + $0x40] sm:$0xff] }
  0xf9   : > { %3028 = vmatmul.msk.bf16.gmra.mxu1 %vm508_vm0, %v3525_v24  ;;  %3048 = vmatmul.msk.bf16.gmra.mxu2 %vm1571_vm2, %v1546_v1 }
  0xfa   : > { %v751_v7 = vpop.f32.mrf.mxu3 }
  0xfb   : > { %v3769_v42 = vadd.f32 %v751_v7, %v3686_v21  ;;  %v1547_v21 = vpack.c.bf16 %v1519_v60, %v1518_v58 }
  0xfc   : > { %v985_v47 = vpop.f32.mrf.mxu2  ;;  %v598_v52 = vpop.f32.mrf.mxu0 }
  0xfd   : > { %v3771_v50 = vadd.f32 %v985_v47, %v712_v39  ;;  %v1521_v39 = vld [vmem:[%s3715_s21 + $0x48] sm:$0xff] }
  0xfe   : > { %v713_v54 = vpop.f32.mrf.mxu1 }
  0xff   : > { %v714_v49 = vadd.f32 %v713_v54, %v598_v52 }
 0x102   : > { %v753_v55 = vpop.f32.mrf.mxu3 }
 0x103   : > { %v3776_v15 = vadd.f32 %v753_v55, %v3690_v38 }
 0x104   : > { %v987_v63 = vpop.f32.mrf.mxu2  ;;  %v601_v4 = vpop.f32.mrf.mxu0 }
 0x105   : > { %v3778_v24 = vadd.f32 %v987_v63, %v714_v49 }
 0x106   : > { %v716_v6 = vpop.f32.mrf.mxu1 }
 0x107   : > { %v717_v8 = vadd.f32 %v716_v6, %v601_v4  ;;  %2967 = vmatmul.msk.bf16.gmra.mxu3 %vm508_vm0, %v3541_v27  ;;  %2995 = vmatmul.msk.bf16.gmra.mxu0 %vm508_vm0, %v3521_v22  ;;  %v1522_v6 = vld [vmem:[%s3715_s21 + $0x50] sm:$0xff] }
 0x109   : > { %3029 = vmatmul.msk.bf16.gmra.mxu1 %vm508_vm0, %v3545_v29  ;;  %3049 = vmatmul.msk.bf16.gmra.mxu2 %vm1571_vm2, %v1547_v21 }
 0x10a   : > { %v756_v38 = vpop.f32.mrf.mxu3 }
 0x10b   : > { %v3788_v11 = vadd.f32 %v756_v38, %v3705_v53  ;;  %v1548_v53 = vpack.c.bf16 %v1521_v39, %v1520_v37 }
 0x10c   : > { %v990_v16 = vpop.f32.mrf.mxu2  ;;  %v603_v23 = vpop.f32.mrf.mxu0 }
 0x10d   : > { %v3790_v19 = vadd.f32 %v990_v16, %v717_v8  ;;  %v1523_v8 = vld [vmem:[%s3715_s21 + $0x58] sm:$0xff] }
 0x10e   : > { %v718_v28 = vpop.f32.mrf.mxu1 }
 0x10f   : > { %v719_v1 = vadd.f32 %v718_v28, %v603_v23  ;;  %v1549_v28 = vpack.c.bf16 %v1523_v8, %v1522_v6 }
 0x112   : > { %v758_v7 = vpop.f32.mrf.mxu3 }
 0x113   : > { %v3795_v22 = vadd.f32 %v758_v7, %v3719_v2 }
 0x114   : > { %v992_v47 = vpop.f32.mrf.mxu2  ;;  %v606_v52 = vpop.f32.mrf.mxu0 }
 0x115   : > { %v3797_v29 = vadd.f32 %v992_v47, %v719_v1 }
 0x116   : > { %v721_v54 = vpop.f32.mrf.mxu1 }
 0x117   : > { %v722_v49 = vadd.f32 %v721_v54, %v606_v52  ;;  %2968 = vmatmul.msk.bf16.gmra.mxu3 %vm508_vm0, %v3555_v30  ;;  %2996 = vmatmul.msk.bf16.gmra.mxu0 %vm508_vm0, %v3541_v27  ;;  %v1524_v54 = vld [vmem:[%s3715_s21 + $0x60] sm:$0xff] }
 0x119   : > { %3030 = vmatmul.msk.bf16.gmra.mxu1 %vm508_vm0, %v3561_v32  ;;  %3050 = vmatmul.msk.bf16.gmra.mxu2 %vm1571_vm2, %v1548_v53 }
 0x11a   : > { %v1015_v2 = vpop.f32.mrf.mxu3 }
 0x11b   : > { %v3807_v60 = vadd.f32 %v1015_v2, %v3731_v20 }
 0x11c   : > { %v995_v58 = vpop.f32.mrf.mxu2  ;;  %v608_v63 = vpop.f32.mrf.mxu0 }
 0x11d   : > { %v3809_v55 = vadd.f32 %v995_v58, %v722_v49  ;;  %v1525_v49 = vld [vmem:[%s3715_s21 + $0x68] sm:$0xff] }
 0x11e   : > { %v723_v4 = vpop.f32.mrf.mxu1 }
 0x11f   : > { %v724_v21 = vadd.f32 %v723_v4, %v608_v63  ;;  %v1550_v4 = vpack.c.bf16 %v1525_v49, %v1524_v54 }
 0x122   : > { %v1017_v38 = vpop.f32.mrf.mxu3 }
 0x123   : > { %v3814_v27 = vadd.f32 %v1017_v38, %v3738_v12 }
 0x124   : > { %v997_v16 = vpop.f32.mrf.mxu2  ;;  %v611_v23 = vpop.f32.mrf.mxu0 }
 0x125   : > { %v3816_v32 = vadd.f32 %v997_v16, %v724_v21 }
 0x126   : > { %v726_v20 = vpop.f32.mrf.mxu1 }
 0x127   : > { %v727_v1 = vadd.f32 %v726_v20, %v611_v23  ;;  %2969 = vmatmul.msk.bf16.gmra.mxu3 %vm508_vm0, %v3572_v33  ;;  %2997 = vmatmul.msk.bf16.gmra.mxu0 %vm508_vm0, %v3555_v30  ;;  %v1526_v20 = vld [vmem:[%s3715_s21 + $0x70] sm:$0xff] }
 0x129   : > { %3031 = vmatmul.msk.bf16.gmra.mxu1 %vm508_vm0, %v3575_v34  ;;  %3051 = vmatmul.msk.bf16.gmra.mxu2 %vm1571_vm2, %v1549_v28 }
 0x12a   : > { %v1020_v12 = vpop.f32.mrf.mxu3 }
 0x12b   : > { %v3826_v39 = vadd.f32 %v1020_v12, %v3750_v62 }
 0x12c   : > { %v1000_v37 = vpop.f32.mrf.mxu2  ;;  %v613_v47 = vpop.f32.mrf.mxu0 }
 0x12d   : > { %v3828_v7 = vadd.f32 %v1000_v37, %v727_v1  ;;  %v1527_v1 = vld [vmem:[%s3715_s21 + $0x78] sm:$0xff] }
 0x12e   : > { %v728_v52 = vpop.f32.mrf.mxu1 }
 0x12f   : > { %v729_v53 = vadd.f32 %v728_v52, %v613_v47  ;;  %v1551_v52 = vpack.c.bf16 %v1527_v1, %v1526_v20  ;;  %v3885_v20 = vld [vmem:[%s4585_s4] ss:$0 sm:$0xff] }
 0x132   : > { %v1022_v2 = vpop.f32.mrf.mxu3 }
 0x133   : > { %v3833_v30 = vadd.f32 %v1022_v2, %v3757_v10 }
 0x134   : > { %v1002_v58 = vpop.f32.mrf.mxu2  ;;  %v616_v63 = vpop.f32.mrf.mxu0 }
 0x135   : > { %4591 = vst [vmem:[#allocation2_spill] sm:$0xff] %v3833_v30  ;;  %v3835_v34 = vadd.f32 %v1002_v58, %v729_v53 }
 0x136   : > { %v731_v62 = vpop.f32.mrf.mxu1 }
 0x137   : > { %v732_v21 = vadd.f32 %v731_v62, %v616_v63  ;;  %2970 = vmatmul.msk.bf16.gmra.mxu3 %vm508_vm0, %v3585_v35  ;;  %2998 = vmatmul.msk.bf16.gmra.mxu0 %vm508_vm0, %v3572_v33  ;;  %v1528_v62 = vld [vmem:[%s3715_s21 + $0x80] sm:$0xff] }
 0x139   : > { %3032 = vmatmul.msk.bf16.gmra.mxu1 %vm508_vm0, %v3588_v36  ;;  %3052 = vmatmul.msk.bf16.gmra.mxu2 %vm1571_vm2, %v1550_v4 }
 0x13a   : > { %v1025_v10 = vpop.f32.mrf.mxu3 }
 0x13b   : > { %v3845_v8 = vadd.f32 %v1025_v10, %v3769_v42 }
 0x13c   : > { %v1005_v6 = vpop.f32.mrf.mxu2  ;;  %v618_v16 = vpop.f32.mrf.mxu0 }
 0x13d   : > { %4592 = vst [vmem:[#allocation3_spill] sm:$0xff] %v3845_v8  ;;  %v3847_v38 = vadd.f32 %v1005_v6, %v732_v21  ;;  %v1529_v21 = vld [vmem:[%s3715_s21 + $0x88] sm:$0xff] }
 0x13e   : > { %v733_v23 = vpop.f32.mrf.mxu1 }
 0x13f   : > { %v734_v28 = vadd.f32 %v733_v23, %v618_v16  ;;  %v1552_v23 = vpack.c.bf16 %v1529_v21, %v1528_v62 }
 0x142   : > { %v1027_v12 = vpop.f32.mrf.mxu3 }
 0x143   : > { %v3852_v33 = vadd.f32 %v1027_v12, %v3776_v15 }
 0x144   : > { %v1007_v37 = vpop.f32.mrf.mxu2  ;;  %v621_v47 = vpop.f32.mrf.mxu0 }
 0x145   : > { %4593 = vst [vmem:[#allocation4_spill] sm:$0xff] %v3852_v33  ;;  %v3854_v36 = vadd.f32 %v1007_v37, %v734_v28 }
 0x146   : > { %v736_v42 = vpop.f32.mrf.mxu1 }
 0x147   : > { %v737_v53 = vadd.f32 %v736_v42, %v621_v47  ;;  %2971 = vmatmul.msk.bf16.gmra.mxu3 %vm508_vm0, %v3607_v40  ;;  %2999 = vmatmul.msk.bf16.gmra.mxu0 %vm508_vm0, %v3585_v35  ;;  %v1530_v42 = vld [vmem:[%s3715_s21 + $0x90] sm:$0xff] }
 0x149   : > { %3033 = vmatmul.msk.bf16.gmra.mxu1 %vm508_vm0, %v3610_v41  ;;  %3053 = vmatmul.msk.bf16.gmra.mxu2 %vm1571_vm2, %v1551_v52 }
 0x14a   : > { %v1030_v15 = vpop.f32.mrf.mxu3 }
 0x14b   : > { %v3864_v49 = vadd.f32 %v1030_v15, %v3788_v11 }
 0x14c   : > { %v1010_v54 = vpop.f32.mrf.mxu2  ;;  %v623_v58 = vpop.f32.mrf.mxu0 }
 0x14d   : > { %4594 = vst [vmem:[#allocation5_spill] sm:$0xff] %v3864_v49  ;;  %v3866_v2 = vadd.f32 %v1010_v54, %v737_v53  ;;  %v1531_v53 = vld [vmem:[%s3715_s21 + $0x98] sm:$0xff] }
 0x14e   : > { %v738_v63 = vpop.f32.mrf.mxu1 }
 0x14f   : > { %v739_v4 = vadd.f32 %v738_v63, %v623_v58 }
 0x152   : > { %v1032_v10 = vpop.f32.mrf.mxu3 }
 0x153   : > { %v3871_v35 = vadd.f32 %v1032_v10, %v3795_v22 }
 0x154   : > { %v1012_v6 = vpop.f32.mrf.mxu2  ;;  %v1250_v16 = vpop.f32.mrf.mxu0 }
 0x155   : > { %4595 = vst [vmem:[#allocation6_spill] sm:$0xff] %v3871_v35  ;;  %v3873_v41 = vadd.f32 %v1012_v6, %v739_v4  ;;  %v1553_v4 = vpack.c.bf16 %v1531_v53, %v1530_v42  ;;  %v1533_v42 = vld [vmem:[%s3715_s21 + $0xa8] sm:$0xff] }
 0x156   : > { %v1364_v11 = vpop.f32.mrf.mxu1 }
 0x157   : > { %2972 = vmatmul.msk.bf16.gmra.mxu3 %vm508_vm0, %v3623_v43  ;;  %3000 = vmatmul.msk.bf16.gmra.mxu0 %vm508_vm0, %v3607_v40 }
 0x159   : > { %3034 = vmatmul.msk.bf16.gmra.mxu1 %vm508_vm0, %v3629_v46  ;;  %3054 = vmatmul.msk.bf16.gmra.mxu2 %vm1571_vm2, %v1552_v23 }
 0x15a   : > { %v1143_v22 = vpop.f32.mrf.mxu3 }
 0x15b   : > { %v1251_v28 = vadd.f32 %v1250_v16, %v1143_v22 }
 0x15c   : > { %v3887_v1 = vpop.f32.mrf.mxu2  ;;  %v1252_v12 = vpop.f32.mrf.mxu0 }
 0x15d   : > { %v1444_v37 = vadd.f32 %v1364_v11, %v1251_v28 }
 0x15e   : > { %v1366_v47 = vpop.f32.mrf.mxu1 }
 0x15f   : > { %v1480_v52 = vadd.f32 %v3885_v20, %v1444_v37 }
 0x161   : > { %v1713_v40 = vadd.f32 2.0, %v1480_v52 }
 0x162   : > { %v1145_v46 = vpop.f32.mrf.mxu3 }
 0x163   : > { %v3062_v15 = vmul.f32 -1.442695, %v1713_v40  ;;  %v1253_v54 = vadd.f32 %v1252_v12, %v1145_v46  ;;  %v1532_v40 = vld [vmem:[%s3715_s21 + $0xa0] sm:$0xff] }
 0x164   : > { %v3892_v58 = vpop.f32.mrf.mxu2  ;;  %v1255_v63 = vpop.f32.mrf.mxu0 }
 0x165   : > { %3171 = vpow2.f32 %v3062_v15  ;;  %v1445_v62 = vadd.f32 %v1366_v47, %v1253_v54 }
 0x166   : > { %v1369_v21 = vpop.f32.mrf.mxu1 }
 0x167   : > { %v1481_v10 = vadd.f32 %v3885_v20, %v1445_v62  ;;  %2973 = vmatmul.msk.bf16.gmra.mxu3 %vm508_vm0, %v3646_v57  ;;  %3001 = vmatmul.msk.bf16.gmra.mxu0 %vm508_vm0, %v3623_v43 }
 0x169   : > { %3035 = vmatmul.msk.bf16.gmra.mxu1 %vm508_vm0, %v3652_v61  ;;  %3055 = vmatmul.msk.bf16.gmra.mxu2 %vm1571_vm2, %v1553_v4  ;;  %v1714_v6 = vadd.f32 2.0, %v1481_v10 }
 0x16a   : > { %v1148_v16 = vpop.f32.mrf.mxu3 }
 0x16b   : > { %v3172_v23 = vpop.eup %3171  ;;  %v3063_v11 = vmul.f32 -1.442695, %v1714_v6  ;;  %v1256_v22 = vadd.f32 %v1255_v63, %v1148_v16  ;;  %v1554_v6 = vpack.c.bf16 %v1533_v42, %v1532_v40 }
 0x16c   : > { %v3902_v28 = vpop.f32.mrf.mxu2  ;;  %v1841_v12 = vadd.f32 1.0, %v3172_v23  ;;  %v1257_v37 = vpop.f32.mrf.mxu0 }
 0x16d   : > { %3173 = vpow2.f32 %v3063_v11  ;;  %v1446_v47 = vadd.f32 %v1369_v21, %v1256_v22  ;;  %v3914_v11 = vld [vmem:[%s4588_s7] ss:$0 sm:$0xff] }
 0x16e   : > { %v1371_v52 = vpop.f32.mrf.mxu1  ;;  %3175 = vrcp.f32 %v1841_v12  ;;  %v1634_v42 = vadd.f32 %v3914_v11, %v3887_v1  ;;  %vm1878_vm4 = vweird.f32 %v1841_v12 }
 0x16f   : > { %v1482_v43 = vadd.f32 %v3885_v20, %v1446_v47  ;;  %v3925_v47 = vld [vmem:[%s4584_s3] ss:$0 sm:$0xff] }
 0x171   : > { %v1715_v61 = vadd.f32 2.0, %v1482_v43 }
 0x172   : > { %v1150_v53 = vpop.f32.mrf.mxu3 }
 0x173   : > { %v3174_v46 = vpop.eup %3173  ;;  %v3064_v15 = vmul.f32 -1.442695, %v1715_v61  ;;  %v1258_v54 = vadd.f32 %v1257_v37, %v1150_v53  ;;  %v1882_v61 = vand.u32 2147483647, %v1841_v12 }
 0x174   : > { %v3907_v4 = vpop.f32.mrf.mxu2  ;;  %v3176_v63 = vpop.eup %3175  ;;  %v3909_v62 = vadd.f32 1.0, %v3174_v46 }
 0x175   : > { %v1260_v10 = vpop.f32.mrf.mxu0  ;;  %v1874_v16 = vmul.f32 %v3176_v63, %v1841_v12  ;;  %3177 = vpow2.f32 %v3064_v15  ;;  %v1447_v21 = vadd.f32 %v1371_v52, %v1258_v54  ;;  %v1884_v52 = vand.u32 2147483648, %v1841_v12 }
 0x176   : > { %v1374_v23 = vpop.f32.mrf.mxu1  ;;  %3179 = vrcp.f32 %v3909_v62  ;;  %vm1879_vm3 = vweird.f32 %v3176_v63  ;;  %vm1883_vm6 = vcmp.eq.f32.partialorder %v1882_v61, 8.507059e+37  ;;  %v1534_v61 = vld [vmem:[%s3715_s21 + $0xb0] sm:$0xff]  ;;  %vm1893_vm8 = vweird.f32 %v3909_v62 }
 0x177   : > { %v1875_v22 = vsub.f32 1.0, %v1874_v16  ;;  %v1483_v37 = vadd.f32 %v3885_v20, %v1447_v21  ;;  %2974 = vmatmul.msk.bf16.gmra.mxu3 %vm508_vm0, %v3671_v9  ;;  %3002 = vmatmul.msk.bf16.gmra.mxu0 %vm508_vm0, %v3646_v57  ;;  %vm1880_vm5 = vmor %vm1878_vm4, %vm1879_vm3 }
 0x179   : > { %3036 = vmatmul.msk.bf16.gmra.mxu1 %vm508_vm0, %v3677_v18  ;;  %3056 = vmatmul.msk.bf16.gmra.mxu2 %vm1571_vm2, %v1554_v6  ;;  %v1876_v43 = vmul.f32 %v3176_v63, %v1875_v22  ;;  %v1716_v40 = vadd.f32 2.0, %v1483_v37  ;;  %v1071_v18 = vadd.f32 %v3925_v47, %v3641_v51  ;;  %v1885_v6 = vor.u32 1.1754944e-38, %v1884_v52 }
 0x17a   : > { %v1153_v53 = vpop.f32.mrf.mxu3  ;;  %v1899_v52 = vand.u32 2147483648, %v3909_v62 }
 0x17b   : > { %v3178_v57 = vpop.eup %3177  ;;  %v1877_v46 = vadd.f32 %v3176_v63, %v1876_v43  ;;  %v3065_v15 = vmul.f32 -1.442695, %v1716_v40  ;;  %v1261_v54 = vadd.f32 %v1260_v10, %v1153_v53  ;;  %v2385_v53 = vadd.f32 %v1634_v42, %v1071_v18 }
 0x17c   : > { %v3932_v16 = vpop.f32.mrf.mxu2  ;;  %v3180_v21 = vpop.eup %3179  ;;  %v3936_v22 = vadd.f32 1.0, %v3178_v57  ;;  %v1535_v57 = vld [vmem:[%s3715_s21 + $0xb8] sm:$0xff]  ;;  %v1072_v42 = vadd.f32 %v3925_v47, %v3649_v59  ;;  %v1900_v59 = vor.u32 1.1754944e-38, %v1899_v52 }
 0x17d   : > { %v1262_v37 = vpop.f32.mrf.mxu0  ;;  %v1881_v1 = vsel %vm1880_vm5, %v3176_v63, %v1877_v46  ;;  %v1889_v12 = vmul.f32 %v3180_v21, %v3909_v62  ;;  %3181 = vpow2.f32 %v3065_v15  ;;  %v1448_v35 = vadd.f32 %v1374_v23, %v1261_v54 }
 0x17e   : > { %v1376_v10 = vpop.f32.mrf.mxu1  ;;  %v1886_v43 = vsel %vm1883_vm6, %v1885_v6, %v1881_v1  ;;  %3183 = vrcp.f32 %v3936_v22  ;;  %v1897_v63 = vand.u32 2147483647, %v3909_v62  ;;  %vm1894_vm7 = vweird.f32 %v3180_v21 }
 0x17f   : > { %v2353_v40 = vadd.f32 0.0001, %v1886_v43  ;;  %v1890_v51 = vsub.f32 1.0, %v1889_v12  ;;  %v1636_v23 = vadd.f32 %v3914_v11, %v3892_v58  ;;  %v1484_v54 = vadd.f32 %v3885_v20, %v1448_v35  ;;  %vm1895_vm9 = vmor %vm1893_vm8, %vm1894_vm7 }
 0x180   : > { %vm1898_vm10 = vcmp.eq.f32.partialorder %v1897_v63, 8.507059e+37  ;;  %vm1908_vm12 = vweird.f32 %v3936_v22 }
 0x181   : > { %v2417_v46 = vmul.f32 %v2385_v53, %v2353_v40  ;;  %v1891_v15 = vmul.f32 %v3180_v21, %v1890_v51  ;;  %v1555_v53 = vpack.c.bf16 %v1535_v57, %v1534_v61  ;;  %v1717_v58 = vadd.f32 2.0, %v1484_v54 }
 0x182   : > { %v1155_v18 = vpop.f32.mrf.mxu3  ;;  %3185 = vlog2.f32 %v2353_v40  ;;  %v1914_v40 = vand.u32 2147483648, %v3936_v22 }
 0x183   : > { %v3182_v6 = vpop.eup %3181  ;;  %2449 = vst.msk [vmem:[%s3945_s12] sm:$0xff] %vm1571_vm2, %v2417_v46  ;;  %v1892_v1 = vadd.f32 %v3180_v21, %v1891_v15  ;;  %v1263_v12 = vadd.f32 %v1262_v37, %v1155_v18  ;;  %v2386_v37 = vadd.f32 %v1636_v23, %v1072_v42  ;;  %v3066_v57 = vmul.f32 -1.442695, %v1717_v58 }
 0x184   : > { %v3959_v43 = vpop.f32.mrf.mxu2  ;;  %v3184_v51 = vpop.eup %3183  ;;  %v3961_v49 = vadd.f32 1.0, %v3182_v6  ;;  %v1073_v6 = vadd.f32 %v3925_v47, %v3666_v3 }
 0x185   : > { %v1265_v33 = vpop.f32.mrf.mxu0  ;;  %v1896_v35 = vsel %vm1895_vm9, %v3180_v21, %v1892_v1  ;;  %v1904_v8 = vmul.f32 %v3184_v51, %v3936_v22  ;;  %v1449_v46 = vadd.f32 %v1376_v10, %v1263_v12  ;;  %v1912_v21 = vand.u32 2147483647, %v3936_v22 }
 0x186   : > { %v1379_v15 = vpop.f32.mrf.mxu1  ;;  %v1901_v30 = vsel %vm1898_vm10, %v1900_v59, %v1896_v35  ;;  %3187 = vrcp.f32 %v3961_v49  ;;  %vm1909_vm11 = vweird.f32 %v3184_v51  ;;  %v1915_v1 = vor.u32 1.1754944e-38, %v1914_v40 }
 0x187   : > { %v2354_v62 = vadd.f32 0.0001, %v1901_v30  ;;  %v1905_v61 = vsub.f32 1.0, %v1904_v8  ;;  %2975 = vmatmul.msk.bf16.gmra.mxu3 %vm508_vm0, %v3558_v31  ;;  %3003 = vmatmul.msk.bf16.gmra.mxu0 %vm508_vm0, %v3671_v9  ;;  %v1485_v10 = vadd.f32 %v3885_v20, %v1449_v46  ;;  %v1639_v9 = vadd.f32 %v3914_v11, %v3902_v28  ;;  %vm1910_vm13 = vmor %vm1908_vm12, %vm1909_vm11 }
 0x188   : > { %v3186_v42 = vpop.eup %3185  ;;  %vm1913_vm14 = vcmp.eq.f32.partialorder %v1912_v21, 8.507059e+37  ;;  %vm1923_vm1 = vweird.f32 %v3961_v49 }
 0x189   : > { %3037 = vmatmul.msk.bf16.gmra.mxu1 %vm508_vm0, %v3696_v48  ;;  %3057 = vmatmul.msk.bf16.gmra.mxu2 %vm1571_vm2, %v1555_v53  ;;  %v2418_v30 = vmul.f32 %v2386_v37, %v2354_v62  ;;  %3189 = vlog2.f32 %v2354_v62  ;;  %v1906_v8 = vmul.f32 %v3184_v51, %v1905_v61  ;;  %v1718_v63 = vadd.f32 2.0, %v1485_v10 }
 0x18a   : > { %3191 = vpow2.f32 %v3066_v57  ;;  %v1158_v52 = vpop.f32.mrf.mxu3  ;;  %v2482_v46 = vmul.f32 0.6931472, %v3186_v42  ;;  %v2387_v37 = vadd.f32 %v1639_v9, %v1073_v6  ;;  %v1641_v9 = vadd.f32 %v3914_v11, %v3907_v4 }
 0x18b   : > { %2450 = vst.msk [vmem:[%s3945_s12 + $0x8] sm:$0xff] %vm1571_vm2, %v2418_v30  ;;  %v1907_v23 = vadd.f32 %v3184_v51, %v1906_v8  ;;  %v1266_v54 = vadd.f32 %v1265_v33, %v1158_v52  ;;  %v3067_v12 = vmul.f32 -1.442695, %v1718_v63  ;;  %v1536_v8 = vld [vmem:[%s3715_s21 + $0xc0] sm:$0xff]  ;;  %v1537_v63 = vld [vmem:[%s3715_s21 + $0xc8] sm:$0xff] }
 0x18c   : > { %v3980_v48 = vpop.f32.mrf.mxu2  ;;  %v3188_v18 = vpop.eup %3187  ;;  %v2545_v52 = vsel %vm1571_vm2, %v2482_v46, 0.0 }
 0x18d   : > { %v1267_v53 = vpop.f32.mrf.mxu0  ;;  %v1911_v59 = vsel %vm1910_vm13, %v3184_v51, %v1907_v23  ;;  %v1919_v58 = vmul.f32 %v3188_v18, %v3961_v49  ;;  %v1450_v35 = vadd.f32 %v1379_v15, %v1266_v54  ;;  %3193 = vpow2.f32 %v3067_v12 }
 0x18e   : > { %v1381_v28 = vpop.f32.mrf.mxu1  ;;  %v1916_v62 = vsel %vm1913_vm14, %v1915_v1, %v1911_v59  ;;  %vm1924_vm15 = vweird.f32 %v3188_v18  ;;  %v1927_v51 = vand.u32 2147483647, %v3961_v49  ;;  %v1929_v15 = vand.u32 2147483648, %v3961_v49 }
 0x18f   : > { %v3190_v33 = vpop.eup %3189  ;;  %v2355_v22 = vadd.f32 0.0001, %v1916_v62  ;;  %v1920_v61 = vsub.f32 1.0, %v1919_v58  ;;  %v1486_v3 = vadd.f32 %v3885_v20, %v1450_v35  ;;  %vm1925_vm3 = vmor %vm1923_vm1, %vm1924_vm15  ;;  %v1556_v62 = vpack.c.bf16 %v1537_v63, %v1536_v8 }
 0x190   : > { %v3192_v57 = vpop.eup %3191  ;;  %v2484_v40 = vmul.f32 0.6931472, %v3190_v33  ;;  %v1930_v58 = vor.u32 1.1754944e-38, %v1929_v15  ;;  %v1074_v33 = vadd.f32 %v3925_v47, %v3674_v14  ;;  %vm1928_vm4 = vcmp.eq.f32.partialorder %v1927_v51, 8.507059e+37  ;;  %v4009_v15 = vld [vmem:[%s3469_s28 + $0x68] sm:$0xff] }
 0x191   : > { %v2419_v21 = vmul.f32 %v2387_v37, %v2355_v22  ;;  %3195 = vlog2.f32 %v2355_v22  ;;  %v1921_v10 = vmul.f32 %v3188_v18, %v1920_v61  ;;  %v3988_v30 = vadd.f32 1.0, %v3192_v57 }
 0x192   : > { %v2546_v42 = vsel %vm1571_vm2, %v2484_v40, 0.0  ;;  %v1719_v23 = vadd.f32 2.0, %v1486_v3  ;;  %v1160_v54 = vpop.f32.mrf.mxu3  ;;  %v2388_v40 = vadd.f32 %v1641_v9, %v1074_v33 }
 0x193   : > { %v2547_v6 = vadd.f32 %v2546_v42, %v2545_v52  ;;  %2451 = vst.msk [vmem:[%s3945_s12 + $0x10] sm:$0xff] %vm1571_vm2, %v2419_v21  ;;  %v1922_v1 = vadd.f32 %v3188_v18, %v1921_v10  ;;  %3197 = vrcp.f32 %v3988_v30  ;;  %v3194_v59 = vpop.eup %3193  ;;  %v1268_v46 = vadd.f32 %v1267_v53, %v1160_v54 }
 0x194   : > { %v4000_v12 = vpop.f32.mrf.mxu2  ;;  %v3068_v35 = vmul.f32 -1.442695, %v1719_v23  ;;  %v4005_v37 = vadd.f32 1.0, %v3194_v59  ;;  %v1644_v21 = vadd.f32 %v3914_v11, %v3932_v16  ;;  %v1075_v10 = vadd.f32 %v3925_v47, %v3688_v25 }
 0x195   : > { %v1270_v4 = vpop.f32.mrf.mxu0  ;;  %v1926_v22 = vsel %vm1925_vm3, %v3188_v18, %v1922_v1  ;;  %v1451_v18 = vadd.f32 %v1381_v28, %v1268_v46  ;;  %v1942_v28 = vand.u32 2147483647, %v3988_v30  ;;  %v4033_v25 = vadd.f32 %v3925_v47, %v3693_v45 }
 0x196   : > { %v1384_v49 = vpop.f32.mrf.mxu1  ;;  %v1931_v61 = vsel %vm1928_vm4, %v1930_v58, %v1926_v22  ;;  %3199 = vpow2.f32 %v3068_v35  ;;  %v2389_v58 = vadd.f32 %v1644_v21, %v1075_v10  ;;  %vm1938_vm6 = vweird.f32 %v3988_v30  ;;  %v1539_v21 = vld [vmem:[%s3715_s21 + $0xd8] sm:$0xff] }
 0x197   : > { %v3196_v3 = vpop.eup %3195  ;;  %v2356_v57 = vadd.f32 0.0001, %v1931_v61  ;;  %3201 = vrcp.f32 %v4005_v37  ;;  %2976 = vmatmul.msk.bf16.gmra.mxu3 %vm508_vm0, %v4009_v15  ;;  %3004 = vmatmul.msk.bf16.gmra.mxu0 %vm508_vm0, %v3558_v31  ;;  %v1487_v42 = vadd.f32 %v3885_v20, %v1451_v18  ;;  %vm4041_vm7 = vcmp.eq.f32.partialorder %v1942_v28, 8.507059e+37 }
 0x198   : > { %v2486_v14 = vmul.f32 0.6931472, %v3196_v3  ;;  %v1959_v18 = vand.u32 2147483648, %v4005_v37  ;;  %vm1953_vm10 = vweird.f32 %v4005_v37 }
 0x199   : > { %3038 = vmatmul.msk.bf16.gmra.mxu1 %vm508_vm0, %v3626_v44  ;;  %3058 = vmatmul.msk.bf16.gmra.mxu2 %vm1571_vm2, %v1556_v62  ;;  %v3198_v53 = vpop.eup %3197  ;;  %v2420_v51 = vmul.f32 %v2388_v40, %v2356_v57  ;;  %3203 = vlog2.f32 %v2356_v57  ;;  %v1944_v44 = vand.u32 2147483648, %v3988_v30 }
 0x19a   : > { %v2548_v8 = vsel %vm1571_vm2, %v2486_v14, 0.0  ;;  %v1934_v31 = vmul.f32 %v3198_v53, %v3988_v30  ;;  %v1163_v63 = vpop.f32.mrf.mxu3  ;;  %vm1939_vm5 = vweird.f32 %v3198_v53  ;;  %v1538_v30 = vld [vmem:[%s3715_s21 + $0xd0] sm:$0xff] }
 0x19b   : > { %v2549_v52 = vadd.f32 %v2548_v8, %v2547_v6  ;;  %2452 = vst.msk [vmem:[%s3945_s12 + $0x18] sm:$0xff] %vm1571_vm2, %v2420_v51  ;;  %v1271_v9 = vadd.f32 %v1270_v4, %v1163_v63  ;;  %v1720_v6 = vadd.f32 2.0, %v1487_v42  ;;  %v1646_v4 = vadd.f32 %v3914_v11, %v3959_v43  ;;  %vm1940_vm8 = vmor %vm1938_vm6, %vm1939_vm5 }
 0x19c   : > { %v4029_v23 = vpop.f32.mrf.mxu2  ;;  %v3200_v16 = vpop.eup %3199  ;;  %v1935_v54 = vsub.f32 1.0, %v1934_v31  ;;  %v1945_v3 = vor.u32 1.1754944e-38, %v1944_v44  ;;  %v1957_v43 = vand.u32 2147483647, %v4005_v37 }
 0x19d   : > { %v1272_v1 = vpop.f32.mrf.mxu0  ;;  %v3202_v59 = vpop.eup %3201  ;;  %v4035_v35 = vadd.f32 1.0, %v3200_v16  ;;  %v1452_v46 = vadd.f32 %v1384_v49, %v1271_v9  ;;  %v3069_v14 = vmul.f32 -1.442695, %v1720_v6 }
 0x19e   : > { %v1386_v62 = vpop.f32.mrf.mxu1  ;;  %v1936_v33 = vmul.f32 %v3198_v53, %v1935_v54  ;;  %v1949_v22 = vmul.f32 %v3202_v59, %v4005_v37  ;;  %vm1954_vm9 = vweird.f32 %v3202_v59  ;;  %vm1958_vm12 = vcmp.eq.f32.partialorder %v1957_v43, 8.507059e+37  ;;  %v3365_v43 = vld [vmem:[%s3469_s28 + $0x78] sm:$0xff] }
 0x19f   : > { %v3204_v45 = vpop.eup %3203  ;;  %3205 = vrcp.f32 %v4035_v35  ;;  %v1488_v51 = vadd.f32 %v3885_v20, %v1452_v46  ;;  %vm1955_vm11 = vmor %vm1953_vm10, %vm1954_vm9  ;;  %vm1968_vm14 = vweird.f32 %v4035_v35 }
 0x1a0   : > { %v2488_v49 = vmul.f32 0.6931472, %v3204_v45  ;;  %v1937_v57 = vadd.f32 %v3198_v53, %v1936_v33  ;;  %v1950_v40 = vsub.f32 1.0, %v1949_v22  ;;  %3207 = vpow2.f32 %v3069_v14 }
 0x1a1   : > { %v1721_v42 = vadd.f32 2.0, %v1488_v51  ;;  %v1557_v33 = vpack.c.bf16 %v1539_v21, %v1538_v30  ;;  %v1974_v51 = vand.u32 2147483648, %v4035_v35 }
 0x1a2   : > { %v2550_v10 = vsel %vm1571_vm2, %v2488_v49, 0.0  ;;  %v1941_v8 = vsel %vm1940_vm8, %v3198_v53, %v1937_v57  ;;  %v1951_v31 = vmul.f32 %v3202_v59, %v1950_v40  ;;  %v1165_v28 = vpop.f32.mrf.mxu3  ;;  %v4063_v40 = vld [vmem:[%s3469_s28 + $0x70] sm:$0xff] }
 0x1a3   : > { %v4052_v63 = vadd.f32 %v2550_v10, %v2549_v52  ;;  %v1946_v44 = vsel %vm4041_vm7, %v1945_v3, %v1941_v8  ;;  %v1273_v9 = vadd.f32 %v1272_v1, %v1165_v28  ;;  %v1960_v52 = vor.u32 1.1754944e-38, %v1959_v18 }
 0x1a4   : > { %v4056_v16 = vpop.f32.mrf.mxu2  ;;  %v2357_v54 = vadd.f32 0.0001, %v1946_v44  ;;  %v1952_v6 = vadd.f32 %v3202_v59, %v1951_v31  ;;  %v3070_v22 = vmul.f32 -1.442695, %v1721_v42  ;;  %v1972_v18 = vand.u32 2147483647, %v4035_v35 }
 0x1a5   : > { %v1275_v46 = vpop.f32.mrf.mxu0  ;;  %v3206_v53 = vpop.eup %3205  ;;  %v1453_v45 = vadd.f32 %v1386_v62, %v1273_v9 }
 0x1a6   : > { %v1389_v61 = vpop.f32.mrf.mxu1  ;;  %v2421_v1 = vmul.f32 %v2389_v58, %v2357_v54  ;;  %3209 = vlog2.f32 %v2357_v54  ;;  %v1956_v3 = vsel %vm1955_vm11, %v3202_v59, %v1952_v6  ;;  %v1964_v49 = vmul.f32 %v3206_v53, %v4035_v35  ;;  %v3208_v62 = vpop.eup %3207 }
 0x1a7   : > { %v1961_v57 = vsel %vm1958_vm12, %v1960_v52, %v1956_v3  ;;  %3211 = vpow2.f32 %v3070_v22  ;;  %v1489_v37 = vadd.f32 %v3885_v20, %v1453_v45  ;;  %2977 = vmatmul.msk.bf16.gmra.mxu3 %vm508_vm0, %v4063_v40  ;;  %3005 = vmatmul.msk.bf16.gmra.mxu0 %vm508_vm0, %v4009_v15  ;;  %v2390_v59 = vadd.f32 %v1646_v4, %v4033_v25 }
 0x1a8   : > { %2453 = vst.msk [vmem:[%s3945_s12 + $0x20] sm:$0xff] %vm1571_vm2, %v2421_v1  ;;  %v2358_v58 = vadd.f32 0.0001, %v1961_v57  ;;  %v1965_v14 = vsub.f32 1.0, %v1964_v49  ;;  %v4077_v30 = vadd.f32 1.0, %v3208_v62  ;;  %vm1969_vm13 = vweird.f32 %v3206_v53  ;;  %v1541_v62 = vld [vmem:[%s3715_s21 + $0xe8] sm:$0xff] }
 0x1a9   : > { %3039 = vmatmul.msk.bf16.gmra.mxu1 %vm508_vm0, %v3365_v43  ;;  %3059 = vmatmul.msk.bf16.gmra.mxu2 %vm1571_vm2, %v1557_v33  ;;  %v1722_v15 = vadd.f32 2.0, %v1489_v37  ;;  %v1649_v25 = vadd.f32 %v3914_v11, %v3980_v48  ;;  %v1077_v6 = vadd.f32 %v3925_v47, %v3708_v56  ;;  %vm1970_vm15 = vmor %vm1968_vm14, %vm1969_vm13  ;;  %vm1973_vm1 = vcmp.eq.f32.partialorder %v1972_v18, 8.507059e+37  ;;  %v1540_v37 = vld [vmem:[%s3715_s21 + $0xe0] sm:$0xff] }
 0x1aa   : > { %v2422_v21 = vmul.f32 %v2390_v59, %v2358_v58  ;;  %3213 = vlog2.f32 %v2358_v58  ;;  %v1966_v10 = vmul.f32 %v3206_v53, %v1965_v14  ;;  %v1168_v8 = vpop.f32.mrf.mxu3  ;;  %v1975_v48 = vor.u32 1.1754944e-38, %v1974_v51 }
 0x1ab   : > { %3215 = vrcp.f32 %v4077_v30  ;;  %v3071_v44 = vmul.f32 -1.442695, %v1722_v15  ;;  %v1276_v42 = vadd.f32 %v1275_v46, %v1168_v8  ;;  %v2391_v57 = vadd.f32 %v1649_v25, %v1077_v6 }
 0x1ac   : > { %v4082_v4 = vpop.f32.mrf.mxu2  ;;  %v3210_v31 = vpop.eup %3209  ;;  %2454 = vst.msk [vmem:[%s3945_s12 + $0x28] sm:$0xff] %vm1571_vm2, %v2422_v21  ;;  %v1967_v28 = vadd.f32 %v3206_v53, %v1966_v10  ;;  %v1558_v21 = vpack.c.bf16 %v1541_v62, %v1540_v37  ;;  %vm1983_vm4 = vweird.f32 %v4077_v30 }
 0x1ad   : > { %v1277_v9 = vpop.f32.mrf.mxu0  ;;  %v3212_v54 = vpop.eup %3211  ;;  %v2490_v33 = vmul.f32 0.6931472, %v3210_v31  ;;  %3217 = vpow2.f32 %v3071_v44  ;;  %v1454_v35 = vadd.f32 %v1389_v61, %v1276_v42  ;;  %v1989_v31 = vand.u32 2147483648, %v4077_v30 }
 0x1ae   : > { %v1391_v52 = vpop.f32.mrf.mxu1  ;;  %v1971_v22 = vsel %vm1970_vm15, %v3206_v53, %v1967_v28  ;;  %v4090_v45 = vadd.f32 1.0, %v3212_v54  ;;  %v1078_v42 = vadd.f32 %v3925_v47, %v3721_v5  ;;  %v4117_v5 = vld [vmem:[%s3469_s28 + $0x78] sm:$0xff] }
 0x1af   : > { %v2552_v46 = vsel %vm1571_vm2, %v2490_v33, 0.0  ;;  %v1976_v1 = vsel %vm1973_vm1, %v1975_v48, %v1971_v22  ;;  %v1490_v53 = vadd.f32 %v3885_v20, %v1454_v35  ;;  %v1987_v22 = vand.u32 2147483647, %v4077_v30 }
 0x1b0   : > { %v3214_v3 = vpop.eup %3213  ;;  %v2553_v49 = vadd.f32 %v2552_v46, %v4052_v63  ;;  %v2359_v56 = vadd.f32 0.0001, %v1976_v1  ;;  %3219 = vrcp.f32 %v4090_v45  ;;  %v1651_v63 = vadd.f32 %v3914_v11, %v4000_v12 }
 0x1b1   : > { %v3216_v58 = vpop.eup %3215  ;;  %v2492_v59 = vmul.f32 0.6931472, %v3214_v3  ;;  %v1723_v51 = vadd.f32 2.0, %v1490_v53  ;;  %v1079_v46 = vadd.f32 %v3925_v47, %v3733_v26  ;;  %v3367_v26 = vld [vmem:[%s3469_s28 + $0x80] sm:$0xff]  ;;  %v2002_v37 = vand.u32 2147483647, %v4090_v45 }
 0x1b2   : > { %v2423_v14 = vmul.f32 %v2391_v57, %v2359_v56  ;;  %3221 = vlog2.f32 %v2359_v56  ;;  %v1979_v61 = vmul.f32 %v3216_v58, %v4077_v30  ;;  %v1170_v43 = vpop.f32.mrf.mxu3  ;;  %vm1984_vm3 = vweird.f32 %v3216_v58 }
 0x1b3   : > { %v2554_v18 = vsel %vm1571_vm2, %v2492_v59, 0.0  ;;  %v3218_v10 = vpop.eup %3217  ;;  %v1278_v28 = vadd.f32 %v1277_v9, %v1170_v43  ;;  %v3072_v12 = vmul.f32 -1.442695, %v1723_v51  ;;  %v2392_v1 = vadd.f32 %v1651_v63, %v1078_v42  ;;  %vm1985_vm5 = vmor %vm1983_vm4, %vm1984_vm3 }
 0x1b4   : > { %v4102_v15 = vpop.f32.mrf.mxu2  ;;  %v2555_v8 = vadd.f32 %v2554_v18, %v2553_v49  ;;  %2455 = vst.msk [vmem:[%s3945_s12 + $0x30] sm:$0xff] %vm1571_vm2, %v2423_v14  ;;  %v1980_v25 = vsub.f32 1.0, %v1979_v61  ;;  %v4109_v54 = vadd.f32 1.0, %v3218_v10  ;;  %vm1988_vm6 = vcmp.eq.f32.partialorder %v1987_v22, 8.507059e+37 }
 0x1b5   : > { %v1280_v44 = vpop.f32.mrf.mxu0  ;;  %v1455_v35 = vadd.f32 %v1391_v52, %v1278_v28  ;;  %v1990_v52 = vor.u32 1.1754944e-38, %v1989_v31  ;;  %v2004_v30 = vand.u32 2147483648, %v4090_v45  ;;  %vm1998_vm8 = vweird.f32 %v4090_v45 }
 0x1b6   : > { %v1394_v6 = vpop.f32.mrf.mxu1  ;;  %v3220_v33 = vpop.eup %3219  ;;  %v1981_v48 = vmul.f32 %v3216_v58, %v1980_v25  ;;  %3223 = vrcp.f32 %v4109_v54  ;;  %vm2003_vm9 = vcmp.eq.f32.partialorder %v2002_v37, 8.507059e+37  ;;  %vm2013_vm12 = vweird.f32 %v4109_v54 }
 0x1b7   : > { %v1994_v9 = vmul.f32 %v3220_v33, %v4090_v45  ;;  %2978 = vmatmul.msk.bf16.gmra.mxu3 %vm508_vm0, %v4117_v5  ;;  %3006 = vmatmul.msk.bf16.gmra.mxu0 %vm508_vm0, %v4063_v40  ;;  %3225 = vpow2.f32 %v3072_v12  ;;  %v1491_v62 = vadd.f32 %v3885_v20, %v1455_v35  ;;  %vm1999_vm7 = vweird.f32 %v3220_v33 }
 0x1b8   : > { %v3222_v3 = vpop.eup %3221  ;;  %v1982_v49 = vadd.f32 %v3216_v58, %v1981_v48  ;;  %vm2000_vm10 = vmor %vm1998_vm8, %vm1999_vm7 }
 0x1b9   : > { %3040 = vmatmul.msk.bf16.gmra.mxu1 %vm508_vm0, %v3367_v26  ;;  %3060 = vmatmul.msk.bf16.gmra.mxu2 %vm1571_vm2, %v1558_v21  ;;  %v2494_v56 = vmul.f32 0.6931472, %v3222_v3  ;;  %v1995_v57 = vsub.f32 1.0, %v1994_v9  ;;  %v1724_v43 = vadd.f32 2.0, %v1491_v62  ;;  %v1654_v21 = vadd.f32 %v3914_v11, %v4029_v23  ;;  %v1543_v26 = vld [vmem:[%s3715_s21 + $0xf8] sm:$0xff] }
 0x1ba   : > { %v1986_v40 = vsel %vm1985_vm5, %v3216_v58, %v1982_v49  ;;  %v1173_v59 = vpop.f32.mrf.mxu3  ;;  %v1656_v62 = vadd.f32 %v3914_v11, %v4056_v16 }
 0x1bb   : > { %v2556_v53 = vsel %vm1571_vm2, %v2494_v56, 0.0  ;;  %v1991_v14 = vsel %vm1988_vm6, %v1990_v52, %v1986_v40  ;;  %v1996_v61 = vmul.f32 %v3220_v33, %v1995_v57  ;;  %v1281_v10 = vadd.f32 %v1280_v44, %v1173_v59  ;;  %v1542_v52 = vld [vmem:[%s3715_s21 + $0xf0] sm:$0xff] }
 0x1bc   : > { %v4132_v18 = vpop.f32.mrf.mxu2  ;;  %v4134_v63 = vadd.f32 %v2556_v53, %v2555_v8  ;;  %v2360_v51 = vadd.f32 0.0001, %v1991_v14  ;;  %v3224_v25 = vpop.eup %3223  ;;  %v3073_v28 = vmul.f32 -1.442695, %v1724_v43  ;;  %v2005_v8 = vor.u32 1.1754944e-38, %v2004_v30 }
 0x1bd   : > { %v1282_v58 = vpop.f32.mrf.mxu0  ;;  %v1997_v31 = vadd.f32 %v3220_v33, %v1996_v61  ;;  %v3226_v12 = vpop.eup %3225  ;;  %v2009_v23 = vmul.f32 %v3224_v25, %v4109_v54  ;;  %v1456_v35 = vadd.f32 %v1394_v6, %v1281_v10  ;;  %v2393_v49 = vadd.f32 %v1654_v21, %v1079_v46 }
 0x1be   : > { %v1396_v42 = vpop.f32.mrf.mxu1  ;;  %v2424_v48 = vmul.f32 %v2392_v1, %v2360_v51  ;;  %3227 = vlog2.f32 %v2360_v51  ;;  %v4141_v22 = vadd.f32 1.0, %v3226_v12  ;;  %v2019_v1 = vand.u32 2147483648, %v4109_v54 }
 0x1bf   : > { %v2001_v44 = vsel %vm2000_vm10, %v3220_v33, %v1997_v31  ;;  %3229 = vpow2.f32 %v3073_v28  ;;  %v2010_v9 = vsub.f32 1.0, %v2009_v23  ;;  %vm2014_vm11 = vweird.f32 %v3224_v25 }
 0x1c0   : > { %2456 = vst.msk [vmem:[%s3945_s12 + $0x38] sm:$0xff] %vm1571_vm2, %v2424_v48  ;;  %v2006_v45 = vsel %vm2003_vm9, %v2005_v8, %v2001_v44  ;;  %3231 = vrcp.f32 %v4141_v22  ;;  %v2017_v33 = vand.u32 2147483647, %v4109_v54  ;;  %v1492_v57 = vadd.f32 %v3885_v20, %v1456_v35  ;;  %vm2015_vm13 = vmor %vm2013_vm12, %vm2014_vm11  ;;  %v3368_v44 = vld [vmem:[%s3469_s28 + $0x80] sm:$0xff] }
 0x1c1   : > { %v2361_v3 = vadd.f32 0.0001, %v2006_v45  ;;  %v2011_v56 = vmul.f32 %v3224_v25, %v2010_v9  ;;  %v1559_v61 = vpack.c.bf16 %v1543_v26, %v1542_v52  ;;  %v2020_v21 = vor.u32 1.1754944e-38, %v2019_v1  ;;  %v3369_v45 = vld [vmem:[%s3469_s28 + $0x88] sm:$0xff] }
 0x1c2   : > { %v1175_v6 = vpop.f32.mrf.mxu3  ;;  %v1725_v53 = vadd.f32 2.0, %v1492_v57  ;;  %vm2018_vm14 = vcmp.eq.f32.partialorder %v2017_v33, 8.507059e+37  ;;  %v2034_v52 = vand.u32 2147483648, %v4141_v22  ;;  %vm2028_vm15 = vweird.f32 %v4141_v22 }
 0x1c3   : > { %v2425_v37 = vmul.f32 %v2393_v49, %v2361_v3  ;;  %3233 = vlog2.f32 %v2361_v3  ;;  %v1283_v46 = vadd.f32 %v1282_v58, %v1175_v6  ;;  %v2012_v59 = vadd.f32 %v3224_v25, %v2011_v56 }
 0x1c4   : > { %v4153_v40 = vpop.f32.mrf.mxu2  ;;  %v3228_v30 = vpop.eup %3227  ;;  %v1080_v58 = vadd.f32 %v3925_v47, %v3740_v13  ;;  %v3074_v8 = vmul.f32 -1.442695, %v1725_v53 }
 0x1c5   : > { %v1285_v14 = vpop.f32.mrf.mxu0  ;;  %v3230_v43 = vpop.eup %3229  ;;  %v2496_v51 = vmul.f32 0.6931472, %v3228_v30  ;;  %2457 = vst.msk [vmem:[%s3945_s12 + $0x40] sm:$0xff] %vm1571_vm2, %v2425_v37  ;;  %v1457_v10 = vadd.f32 %v1396_v42, %v1283_v46  ;;  %v2016_v31 = vsel %vm2015_vm13, %v3224_v25, %v2012_v59  ;;  %v1659_v46 = vadd.f32 %v3914_v11, %v4082_v4 }
 0x1c6   : > { %v1399_v16 = vpop.f32.mrf.mxu1  ;;  %v4161_v54 = vadd.f32 1.0, %v3230_v43  ;;  %v3232_v28 = vpop.eup %3231  ;;  %v2021_v48 = vsel %vm2018_vm14, %v2020_v21, %v2016_v31  ;;  %v2394_v25 = vadd.f32 %v1656_v62, %v1080_v58  ;;  %v2035_v21 = vor.u32 1.1754944e-38, %v2034_v52 }
 0x1c7   : > { %v2558_v12 = vsel %vm1571_vm2, %v2496_v51, 0.0  ;;  %v1493_v23 = vadd.f32 %v3885_v20, %v1457_v10  ;;  %2979 = vmatmul.msk.bf16.gmra.mxu3 %vm508_vm0, %v3368_v44  ;;  %3007 = vmatmul.msk.bf16.gmra.mxu0 %vm508_vm0, %v4117_v5  ;;  %v2362_v42 = vadd.f32 0.0001, %v2021_v48  ;;  %v2024_v35 = vmul.f32 %v3232_v28, %v4141_v22 }
 0x1c8   : > { %v2559_v13 = vadd.f32 %v2558_v12, %v4134_v63  ;;  %3235 = vrcp.f32 %v4161_v54  ;;  %v2032_v63 = vand.u32 2147483647, %v4141_v22  ;;  %v1081_v51 = vadd.f32 %v3925_v47, %v3752_v0 }
 0x1c9   : > { %3041 = vmatmul.msk.bf16.gmra.mxu1 %vm508_vm0, %v3369_v45  ;;  %3061 = vmatmul.msk.bf16.gmra.mxu2 %vm1571_vm2, %v1559_v61  ;;  %v3234_v9 = vpop.eup %3233  ;;  %v2426_v49 = vmul.f32 %v2394_v25, %v2362_v42  ;;  %3237 = vlog2.f32 %v2362_v42  ;;  %v2025_v1 = vsub.f32 1.0, %v2024_v35  ;;  %v1726_v26 = vadd.f32 2.0, %v1493_v23 }
 0x1ca   : > { %v2498_v3 = vmul.f32 0.6931472, %v3234_v9  ;;  %v1178_v5 = vpop.f32.mrf.mxu3  ;;  %3239 = vpow2.f32 %v3074_v8  ;;  %vm2029_vm0 = vweird.f32 %v3232_v28  ;;  %vm2033_vm3 = vcmp.eq.f32.partialorder %v2032_v63, 8.507059e+37 }
 0x1cb   : > { %2458 = vst.msk [vmem:[%s3945_s12 + $0x48] sm:$0xff] %vm1571_vm2, %v2426_v49  ;;  %v2026_v57 = vmul.f32 %v3232_v28, %v2025_v1  ;;  %v1286_v6 = vadd.f32 %v1285_v14, %v1178_v5  ;;  %v3075_v30 = vmul.f32 -1.442695, %v1726_v26  ;;  %vm2030_vm1 = vmor %vm2028_vm15, %vm2029_vm0  ;;  %v2395_v8 = vadd.f32 %v1659_v46, %v1081_v51 }
 0x1cc   : > { %v4177_v56 = vpop.f32.mrf.mxu2  ;;  %v2560_v33 = vsel %vm1571_vm2, %v2498_v3, 0.0  ;;  %v2047_v22 = vand.u32 2147483647, %v4161_v54  ;;  %v2049_v42 = vand.u32 2147483648, %v4161_v54  ;;  %v1661_v1 = vadd.f32 %v3914_v11, %v4102_v15 }
 0x1cd   : > { %v1287_v37 = vpop.f32.mrf.mxu0  ;;  %v2561_v62 = vadd.f32 %v2560_v33, %v2559_v13  ;;  %v2027_v53 = vadd.f32 %v3232_v28, %v2026_v57  ;;  %v1458_v61 = vadd.f32 %v1399_v16, %v1286_v6  ;;  %3241 = vpow2.f32 %v3075_v30 }
 0x1ce   : > { %v1401_v59 = vpop.f32.mrf.mxu1  ;;  %v3236_v43 = vpop.eup %3235  ;;  %vm2043_vm5 = vweird.f32 %v4161_v54  ;;  %v2050_v57 = vor.u32 1.1754944e-38, %v2049_v42  ;;  %v1082_v6 = vadd.f32 %v3925_v47, %v3759_v17  ;;  %vm2048_vm7 = vcmp.eq.f32.partialorder %v2047_v22, 8.507059e+37 }
 0x1cf   : > { %v3238_v10 = vpop.eup %3237  ;;  %v2031_v14 = vsel %vm2030_vm1, %v3232_v28, %v2027_v53  ;;  %v2039_v58 = vmul.f32 %v3236_v43, %v4161_v54  ;;  %v1494_v4 = vadd.f32 %v3885_v20, %v1458_v61  ;;  %vm2044_vm4 = vweird.f32 %v3236_v43  ;;  %v4211_v54 = vld [vmem:[%s4585_s4] ss:$0 sm:$0xff] }
 0x1d0   : > { %v3240_v31 = vpop.eup %3239  ;;  %v2500_v12 = vmul.f32 0.6931472, %v3238_v10  ;;  %v2036_v48 = vsel %vm2033_vm3, %v2035_v21, %v2031_v14  ;;  %vm2045_vm6 = vmor %vm2043_vm5, %vm2044_vm4  ;;  %v1664_v53 = vadd.f32 %v3914_v11, %v4132_v18  ;;  %v1083_v10 = vadd.f32 %v3925_v47, %v3771_v50 }
 0x1d1   : > { %v2363_v16 = vadd.f32 0.0001, %v2036_v48  ;;  %v2040_v23 = vsub.f32 1.0, %v2039_v58  ;;  %v4190_v44 = vadd.f32 1.0, %v3240_v31  ;;  %v1727_v0 = vadd.f32 2.0, %v1494_v4 }
 0x1d2   : > { %v1180_v13 = vpop.f32.mrf.mxu3  ;;  %v2562_v28 = vsel %vm1571_vm2, %v2500_v12, 0.0  ;;  %v2397_v50 = vadd.f32 %v1664_v53, %v1083_v10 }
 0x1d3   : > { %v1288_v25 = vadd.f32 %v1287_v37, %v1180_v13  ;;  %v2563_v35 = vadd.f32 %v2562_v28, %v2561_v62  ;;  %v2427_v45 = vmul.f32 %v2395_v8, %v2363_v16  ;;  %3243 = vlog2.f32 %v2363_v16  ;;  %v3242_v49 = vpop.eup %3241 }
 0x1d4   : > { %v4194_v20 = vpop.f32.mrf.mxu2  ;;  %v2041_v9 = vmul.f32 %v3236_v43, %v2040_v23  ;;  %3245 = vrcp.f32 %v4190_v44  ;;  %v4202_v52 = vadd.f32 1.0, %v3242_v49  ;;  %v3076_v26 = vmul.f32 -1.442695, %v1727_v0 }
 0x1d5   : > { %v1290_v3 = vpop.f32.mrf.mxu0  ;;  %2459 = vst.msk [vmem:[%s3945_s12 + $0x50] sm:$0xff] %vm1571_vm2, %v2427_v45  ;;  %v1459_v33 = vadd.f32 %v1401_v59, %v1288_v25  ;;  %v2396_v59 = vadd.f32 %v1661_v1, %v1082_v6  ;;  %v2064_v0 = vand.u32 2147483648, %v4190_v44  ;;  %v1666_v13 = vadd.f32 %v3914_v11, %v4153_v40 }
 0x1d6   : > { %v1404_v5 = vpop.f32.mrf.mxu1  ;;  %v2042_v63 = vadd.f32 %v3236_v43, %v2041_v9  ;;  %3247 = vrcp.f32 %v4202_v52  ;;  %v2062_v45 = vand.u32 2147483647, %v4190_v44  ;;  %vm2058_vm9 = vweird.f32 %v4190_v44 }
 0x1d7   : > { %3249 = vpow2.f32 %v3076_v26  ;;  %v1495_v62 = vadd.f32 %v4211_v54, %v1459_v33  ;;  %v2065_v11 = vor.u32 1.1754944e-38, %v2064_v0  ;;  %v2077_v40 = vand.u32 2147483647, %v4202_v52 }
 0x1d8   : > { %v2046_v37 = vsel %vm2045_vm6, %v3236_v43, %v2042_v63  ;;  %vm2063_vm12 = vcmp.eq.f32.partialorder %v2062_v45, 8.507059e+37  ;;  %vm2073_vm13 = vweird.f32 %v4202_v52 }
 0x1d9   : > { %v2051_v15 = vsel %vm2048_vm7, %v2050_v57, %v2046_v37  ;;  %v3244_v46 = vpop.eup %3243  ;;  %v1728_v51 = vadd.f32 2.0, %v1495_v62  ;;  %vm2078_vm0 = vcmp.eq.f32.partialorder %v2077_v40, 8.507059e+37 }
 0x1da   : > { %v2364_v30 = vadd.f32 0.0001, %v2051_v15  ;;  %v1183_v17 = vpop.f32.mrf.mxu3  ;;  %v3246_v61 = vpop.eup %3245  ;;  %v2502_v43 = vmul.f32 0.6931472, %v3244_v46 }
 0x1db   : > { %v1291_v21 = vadd.f32 %v1290_v3, %v1183_v17  ;;  %v2054_v58 = vmul.f32 %v3246_v61, %v4190_v44  ;;  %v3077_v12 = vmul.f32 -1.442695, %v1728_v51  ;;  %vm2059_vm8 = vweird.f32 %v3246_v61 }
 0x1dc   : > { %v2428_v14 = vmul.f32 %v2396_v59, %v2364_v30  ;;  %3251 = vlog2.f32 %v2364_v30  ;;  %v2564_v31 = vsel %vm1571_vm2, %v2502_v43, 0.0  ;;  %v4220_v8 = vpop.f32.mrf.mxu2  ;;  %v3248_v22 = vpop.eup %3247  ;;  %v2079_v3 = vand.u32 2147483648, %v4202_v52  ;;  %vm2060_vm10 = vmor %vm2058_vm9, %vm2059_vm8 }
 0x1dd   : > { %v1292_v4 = vpop.f32.mrf.mxu0  ;;  %v1460_v48 = vadd.f32 %v1404_v5, %v1291_v21  ;;  %v2565_v16 = vadd.f32 %v2564_v31, %v2563_v35  ;;  %v2055_v23 = vsub.f32 1.0, %v2054_v58  ;;  %v3250_v47 = vpop.eup %3249  ;;  %v2069_v28 = vmul.f32 %v3248_v22, %v4202_v52  ;;  %v4244_v52 = vld [vmem:[%s4584_s3] ss:$0 sm:$0xff] }
 0x1de   : > { %v1406_v18 = vpop.f32.mrf.mxu1  ;;  %2460 = vst.msk [vmem:[%s3945_s12 + $0x58] sm:$0xff] %vm1571_vm2, %v2428_v14  ;;  %3253 = vpow2.f32 %v3077_v12  ;;  %v4230_v35 = vadd.f32 1.0, %v3250_v47  ;;  %vm2074_vm11 = vweird.f32 %v3248_v22  ;;  %v2080_v59 = vor.u32 1.1754944e-38, %v2079_v3 }
 0x1df   : > { %v1496_v42 = vadd.f32 %v4211_v54, %v1460_v48  ;;  %v2056_v25 = vmul.f32 %v3246_v61, %v2055_v23  ;;  %v2070_v9 = vsub.f32 1.0, %v2069_v28  ;;  %vm2075_vm14 = vmor %vm2073_vm13, %vm2074_vm11  ;;  %v1085_v28 = vadd.f32 %v4244_v52, %v3790_v19 }
 0x1e0   : > { %3255 = vrcp.f32 %v4230_v35  ;;  %vm2088_vm1 = vweird.f32 %v4230_v35 }
 0x1e1   : > { %v1729_v49 = vadd.f32 2.0, %v1496_v42  ;;  %v2057_v5 = vadd.f32 %v3246_v61, %v2056_v25  ;;  %v2071_v33 = vmul.f32 %v3248_v22, %v2070_v9  ;;  %v2092_v42 = vand.u32 2147483647, %v4230_v35 }
 0x1e2   : > { %v3252_v1 = vpop.eup %3251  ;;  %v1185_v63 = vpop.f32.mrf.mxu3  ;;  %v2094_v25 = vand.u32 2147483648, %v4230_v35 }
 0x1e3   : > { %v2504_v26 = vmul.f32 0.6931472, %v3252_v1  ;;  %v3078_v57 = vmul.f32 -1.442695, %v1729_v49  ;;  %v2061_v6 = vsel %vm2060_vm10, %v3246_v61, %v2057_v5  ;;  %v1293_v44 = vadd.f32 %v1292_v4, %v1185_v63 }
 0x1e4   : > { %v3254_v15 = vpop.eup %3253  ;;  %v2066_v46 = vsel %vm2063_vm12, %v2065_v11, %v2061_v6  ;;  %v2072_v30 = vadd.f32 %v3248_v22, %v2071_v33  ;;  %v1084_v61 = vadd.f32 %v4244_v52, %v3778_v24  ;;  %v4248_v14 = vpop.f32.mrf.mxu2  ;;  %v4257_v24 = vld [vmem:[%s4588_s7] ss:$0 sm:$0xff]  ;;  %vm2093_vm4 = vcmp.eq.f32.partialorder %v2092_v42, 8.507059e+37 }
 0x1e5   : > { %v1295_v37 = vpop.f32.mrf.mxu0  ;;  %v2566_v62 = vsel %vm1571_vm2, %v2504_v26, 0.0  ;;  %v2365_v43 = vadd.f32 0.0001, %v2066_v46  ;;  %v4239_v51 = vadd.f32 1.0, %v3254_v15  ;;  %3257 = vpow2.f32 %v3078_v57 }
 0x1e6   : > { %v1409_v53 = vpop.f32.mrf.mxu1  ;;  %v2567_v17 = vadd.f32 %v2566_v62, %v2565_v16  ;;  %v2076_v21 = vsel %vm2075_vm14, %v3248_v22, %v2072_v30  ;;  %v1461_v10 = vadd.f32 %v1406_v18, %v1293_v44  ;;  %v3256_v58 = vpop.eup %3255  ;;  %v2398_v48 = vadd.f32 %v1666_v13, %v1084_v61 }
 0x1e7   : > { %v2429_v4 = vmul.f32 %v2397_v50, %v2365_v43  ;;  %3259 = vlog2.f32 %v2365_v43  ;;  %v2081_v31 = vsel %vm2078_vm0, %v2080_v59, %v2076_v21  ;;  %v2084_v16 = vmul.f32 %v3256_v58, %v4230_v35 }
 0x1e8   : > { %v2366_v12 = vadd.f32 0.0001, %v2081_v31  ;;  %3261 = vrcp.f32 %v4239_v51  ;;  %v1669_v18 = vadd.f32 %v4257_v24, %v4177_v56  ;;  %v1497_v22 = vadd.f32 %v4211_v54, %v1461_v10 }
 0x1e9   : > { %2461 = vst.msk [vmem:[%s3945_s12 + $0x60] sm:$0xff] %vm1571_vm2, %v2429_v4  ;;  %v2085_v50 = vsub.f32 1.0, %v2084_v16  ;;  %vm2089_vm15 = vweird.f32 %v3256_v58  ;;  %v2095_v33 = vor.u32 1.1754944e-38, %v2094_v25  ;;  %v1671_v57 = vadd.f32 %v4257_v24, %v4194_v20 }
 0x1ea   : > { %v1188_v23 = vpop.f32.mrf.mxu3  ;;  %v2430_v0 = vmul.f32 %v2398_v48, %v2366_v12  ;;  %3263 = vlog2.f32 %v2366_v12  ;;  %v1730_v45 = vadd.f32 2.0, %v1497_v22  ;;  %v2399_v11 = vadd.f32 %v1669_v18, %v1085_v28  ;;  %vm2090_vm3 = vmor %vm2088_vm1, %vm2089_vm15 }
 0x1eb   : > { %v1296_v47 = vadd.f32 %v1295_v37, %v1188_v23  ;;  %v3258_v13 = vpop.eup %3257  ;;  %v2086_v56 = vmul.f32 %v3256_v58, %v2085_v50  ;;  %v2107_v21 = vand.u32 2147483647, %v4239_v51  ;;  %v2109_v20 = vand.u32 2147483648, %v4239_v51 }
 0x1ec   : > { %2462 = vst.msk [vmem:[%s3945_s12 + $0x68] sm:$0xff] %vm1571_vm2, %v2430_v0  ;;  %v4268_v3 = vadd.f32 1.0, %v3258_v13  ;;  %v3079_v40 = vmul.f32 -1.442695, %v1730_v45  ;;  %v4277_v46 = vpop.f32.mrf.mxu2  ;;  %vm2103_vm6 = vweird.f32 %v4239_v51  ;;  %v1086_v13 = vadd.f32 %v4244_v52, %v3797_v29 }
 0x1ed   : > { %v1297_v9 = vpop.f32.mrf.mxu0  ;;  %v1462_v49 = vadd.f32 %v1409_v53, %v1296_v47  ;;  %v3260_v5 = vpop.eup %3259  ;;  %v2087_v19 = vadd.f32 %v3256_v58, %v2086_v56  ;;  %vm2108_vm8 = vcmp.eq.f32.partialorder %v2107_v21, 8.507059e+37  ;;  %v2110_v28 = vor.u32 1.1754944e-38, %v2109_v20 }
 0x1ee   : > { %v1411_v1 = vpop.f32.mrf.mxu1  ;;  %v3262_v63 = vpop.eup %3261  ;;  %v2506_v26 = vmul.f32 0.6931472, %v3260_v5  ;;  %3265 = vrcp.f32 %v4268_v3  ;;  %v2400_v56 = vadd.f32 %v1671_v57, %v1086_v13  ;;  %vm2118_vm10 = vweird.f32 %v4268_v3 }
 0x1ef   : > { %v2099_v6 = vmul.f32 %v3262_v63, %v4239_v51  ;;  %v2091_v15 = vsel %vm2090_vm3, %v3256_v58, %v2087_v19  ;;  %3267 = vpow2.f32 %v3079_v40  ;;  %v1498_v62 = vadd.f32 %v4211_v54, %v1462_v49 }
 0x1f0   : > { %v3264_v44 = vpop.eup %3263  ;;  %v2568_v37 = vsel %vm1571_vm2, %v2506_v26, 0.0  ;;  %v2096_v59 = vsel %vm2093_vm4, %v2095_v33, %v2091_v15  ;;  %vm2104_vm5 = vweird.f32 %v3262_v63  ;;  %v2122_v49 = vand.u32 2147483647, %v4268_v3 }
 0x1f1   : > { %v2569_v35 = vadd.f32 %v2568_v37, %v2567_v17  ;;  %v2508_v30 = vmul.f32 0.6931472, %v3264_v44  ;;  %v2100_v53 = vsub.f32 1.0, %v2099_v6  ;;  %v2367_v61 = vadd.f32 0.0001, %v2096_v59  ;;  %vm2105_vm7 = vmor %vm2103_vm6, %vm2104_vm5 }
 0x1f2   : > { %v1190_v43 = vpop.f32.mrf.mxu3  ;;  %v1731_v10 = vadd.f32 2.0, %v1498_v62  ;;  %v1087_v62 = vadd.f32 %v4244_v52, %v3809_v55  ;;  %vm2123_vm12 = vcmp.eq.f32.partialorder %v2122_v49, 8.507059e+37 }
 0x1f3   : > { %v2570_v4 = vsel %vm1571_vm2, %v2508_v30, 0.0  ;;  %v2101_v31 = vmul.f32 %v3262_v63, %v2100_v53  ;;  %v1298_v58 = vadd.f32 %v1297_v9, %v1190_v43  ;;  %v2431_v17 = vmul.f32 %v2399_v11, %v2367_v61 }
 0x1f4   : > { %v3266_v48 = vpop.eup %3265  ;;  %v2571_v16 = vadd.f32 %v2570_v4, %v2569_v35  ;;  %3269 = vlog2.f32 %v2367_v61  ;;  %v3080_v18 = vmul.f32 -1.442695, %v1731_v10  ;;  %v4298_v19 = vpop.f32.mrf.mxu2 }
 0x1f5   : > { %v1300_v12 = vpop.f32.mrf.mxu0  ;;  %v2102_v23 = vadd.f32 %v3262_v63, %v2101_v31  ;;  %v2114_v0 = vmul.f32 %v3266_v48, %v4268_v3  ;;  %v1463_v50 = vadd.f32 %v1411_v1, %v1298_v58  ;;  %v3268_v47 = vpop.eup %3267  ;;  %2463 = vst.msk [vmem:[%s3945_s12 + $0x70] sm:$0xff] %vm1571_vm2, %v2431_v17  ;;  %v2124_v1 = vand.u32 2147483648, %v4268_v3 }
 0x1f6   : > { %v1414_v22 = vpop.f32.mrf.mxu1  ;;  %3271 = vpow2.f32 %v3080_v18  ;;  %v4289_v45 = vadd.f32 1.0, %v3268_v47  ;;  %vm2119_vm9 = vweird.f32 %v3266_v48 }
 0x1f7   : > { %v2106_v42 = vsel %vm2105_vm7, %v3262_v63, %v2102_v23  ;;  %v2115_v25 = vsub.f32 1.0, %v2114_v0  ;;  %v1499_v51 = vadd.f32 %v4211_v54, %v1463_v50  ;;  %v1674_v63 = vadd.f32 %v4257_v24, %v4220_v8  ;;  %vm2120_vm11 = vmor %vm2118_vm10, %vm2119_vm9 }
 0x1f8   : > { %v2111_v9 = vsel %vm2108_vm8, %v2110_v28, %v2106_v42  ;;  %3273 = vrcp.f32 %v4289_v45  ;;  %v2125_v35 = vor.u32 1.1754944e-38, %v2124_v1  ;;  %v1088_v0 = vadd.f32 %v4244_v52, %v3816_v32 }
 0x1f9   : > { %v2368_v29 = vadd.f32 0.0001, %v2111_v9  ;;  %v2116_v5 = vmul.f32 %v3266_v48, %v2115_v25  ;;  %v1732_v26 = vadd.f32 2.0, %v1499_v51  ;;  %v2401_v4 = vadd.f32 %v1674_v63, %v1087_v62 }
 0x1fa   : > { %v1193_v11 = vpop.f32.mrf.mxu3  ;;  %v3270_v40 = vpop.eup %3269  ;;  %v2137_v50 = vand.u32 2147483647, %v4289_v45  ;;  %v2139_v47 = vand.u32 2147483648, %v4289_v45  ;;  %vm2133_vm14 = vweird.f32 %v4289_v45 }
 0x1fb   : > { %v1301_v33 = vadd.f32 %v1300_v12, %v1193_v11  ;;  %v2510_v57 = vmul.f32 0.6931472, %v3270_v40  ;;  %v2432_v6 = vmul.f32 %v2400_v56, %v2368_v29  ;;  %3275 = vlog2.f32 %v2368_v29 }
 0x1fc   : > { %v2117_v44 = vadd.f32 %v3266_v48, %v2116_v5  ;;  %v3272_v15 = vpop.eup %3271  ;;  %v3081_v8 = vmul.f32 -1.442695, %v1732_v26  ;;  %vm2138_vm15 = vcmp.eq.f32.partialorder %v2137_v50, 8.507059e+37  ;;  %v2140_v63 = vor.u32 1.1754944e-38, %v2139_v47 }
 0x1fd   : > { %v1302_v37 = vpop.f32.mrf.mxu0  ;;  %v1464_v30 = vadd.f32 %v1414_v22, %v1301_v33  ;;  %v2572_v59 = vsel %vm1571_vm2, %v2510_v57, 0.0  ;;  %2464 = vst.msk [vmem:[%s3945_s12 + $0x78] sm:$0xff] %vm1571_vm2, %v2432_v6  ;;  %v4306_v43 = vadd.f32 1.0, %v3272_v15  ;;  %v1679_v26 = vadd.f32 %v4257_v24, %v4277_v46 }
 0x1fe   : > { %v1416_v3 = vpop.f32.mrf.mxu1  ;;  %v2121_v53 = vsel %vm2120_vm11, %v3266_v48, %v2117_v44  ;;  %v2573_v61 = vadd.f32 %v2572_v59, %v2571_v16  ;;  %3277 = vpow2.f32 %v3081_v8  ;;  %v3274_v55 = vpop.eup %3273  ;;  %v1676_v16 = vadd.f32 %v4257_v24, %v4248_v14 }
 0x1ff   : > { %v2126_v21 = vsel %vm2123_vm12, %v2125_v35, %v2121_v53  ;;  %v1500_v20 = vadd.f32 %v4211_v54, %v1464_v30  ;;  %3279 = vrcp.f32 %v4306_v43  ;;  %v2129_v31 = vmul.f32 %v3274_v55, %v4289_v45  ;;  %v4320_v14 = vpop.f32.mrf.mxu2 }
 0x200   : > { %v2369_v10 = vadd.f32 0.0001, %v2126_v21  ;;  %vm2134_vm13 = vweird.f32 %v3274_v55  ;;  %v2402_v5 = vadd.f32 %v1676_v16, %v1088_v0  ;;  %v2152_v45 = vand.u32 2147483647, %v4306_v43 }
 0x201   : > { %v1733_v58 = vadd.f32 2.0, %v1500_v20  ;;  %v3276_v12 = vpop.eup %3275  ;;  %v2130_v22 = vsub.f32 1.0, %v2129_v31  ;;  %vm2135_vm0 = vmor %vm2133_vm14, %vm2134_vm13  ;;  %v2154_v15 = vand.u32 2147483648, %v4306_v43  ;;  %vm2148_vm3 = vweird.f32 %v4306_v43 }
 0x202   : > { %v2433_v17 = vmul.f32 %v2401_v4, %v2369_v10  ;;  %3281 = vlog2.f32 %v2369_v10  ;;  %v1195_v48 = vpop.f32.mrf.mxu3  ;;  %v2512_v18 = vmul.f32 0.6931472, %v3276_v12  ;;  %vm2153_vm5 = vcmp.eq.f32.partialorder %v2152_v45, 8.507059e+37 }
 0x203   : > { %v3082_v23 = vmul.f32 -1.442695, %v1733_v58  ;;  %v1303_v13 = vadd.f32 %v1302_v37, %v1195_v48  ;;  %v2131_v51 = vmul.f32 %v3274_v55, %v2130_v22  ;;  %v1089_v58 = vadd.f32 %v4244_v52, %v3828_v7 }
 0x204   : > { %2465 = vst.msk [vmem:[%s3945_s12 + $0x80] sm:$0xff] %vm1571_vm2, %v2433_v17  ;;  %v3278_v42 = vpop.eup %3277  ;;  %v2574_v25 = vsel %vm1571_vm2, %v2512_v18, 0.0  ;;  %v2155_v12 = vor.u32 1.1754944e-38, %v2154_v15  ;;  %v1681_v16 = vadd.f32 %v4257_v24, %v4298_v19  ;;  %v1090_v47 = vadd.f32 %v4244_v52, %v3835_v34 }
 0x205   : > { %v1305_v28 = vpop.f32.mrf.mxu0  ;;  %3283 = vpow2.f32 %v3082_v23  ;;  %v3280_v56 = vpop.eup %3279  ;;  %v2575_v49 = vadd.f32 %v2574_v25, %v2573_v61  ;;  %v4322_v32 = vadd.f32 1.0, %v3278_v42  ;;  %v1465_v1 = vadd.f32 %v1416_v3, %v1303_v13 }
 0x206   : > { %v1419_v9 = vpop.f32.mrf.mxu1  ;;  %v2132_v29 = vadd.f32 %v3274_v55, %v2131_v51  ;;  %v2144_v11 = vmul.f32 %v3280_v56, %v4306_v43  ;;  %vm2149_vm1 = vweird.f32 %v3280_v56  ;;  %v2403_v23 = vadd.f32 %v1679_v26, %v1089_v58 }
 0x207   : > { %3285 = vrcp.f32 %v4322_v32  ;;  %v1501_v44 = vadd.f32 %v4211_v54, %v1465_v1  ;;  %vm2150_vm4 = vmor %vm2148_vm3, %vm2149_vm1  ;;  %v4343_v48 = vpop.f32.mrf.mxu2  ;;  %v2167_v50 = vand.u32 2147483647, %v4322_v32  ;;  %v2169_v13 = vand.u32 2147483648, %v4322_v32 }
 0x208   : > { %v3282_v40 = vpop.eup %3281  ;;  %v2136_v57 = vsel %vm2135_vm0, %v3274_v55, %v2132_v29  ;;  %v2145_v6 = vsub.f32 1.0, %v2144_v11  ;;  %vm2163_vm7 = vweird.f32 %v4322_v32  ;;  %v2404_v1 = vadd.f32 %v1681_v16, %v1090_v47 }
 0x209   : > { %v2514_v33 = vmul.f32 0.6931472, %v3282_v40  ;;  %v2141_v37 = vsel %vm2138_vm15, %v2140_v63, %v2136_v57  ;;  %v1734_v46 = vadd.f32 2.0, %v1501_v44  ;;  %vm2168_vm8 = vcmp.eq.f32.partialorder %v2167_v50, 8.507059e+37 }
 0x20a   : > { %v1198_v62 = vpop.f32.mrf.mxu3  ;;  %v2370_v30 = vadd.f32 0.0001, %v2141_v37  ;;  %v2146_v3 = vmul.f32 %v3280_v56, %v2145_v6  ;;  %v2170_v57 = vor.u32 1.1754944e-38, %v2169_v13 }
 0x20b   : > { %v3284_v35 = vpop.eup %3283  ;;  %v2576_v8 = vsel %vm1571_vm2, %v2514_v33, 0.0  ;;  %v1306_v61 = vadd.f32 %v1305_v28, %v1198_v62  ;;  %v3083_v10 = vmul.f32 -1.442695, %v1734_v46 }
 0x20c   : > { %v2577_v59 = vadd.f32 %v2576_v8, %v2575_v49  ;;  %v4334_v53 = vadd.f32 1.0, %v3284_v35  ;;  %v2434_v20 = vmul.f32 %v2402_v5, %v2370_v30  ;;  %3287 = vlog2.f32 %v2370_v30 }
 0x20d   : > { %v1307_v21 = vpop.f32.mrf.mxu0  ;;  %v2147_v55 = vadd.f32 %v3280_v56, %v2146_v3  ;;  %v3286_v31 = vpop.eup %3285  ;;  %v1466_v22 = vadd.f32 %v1419_v9, %v1306_v61 }
 0x20e   : > { %v1421_v4 = vpop.f32.mrf.mxu1  ;;  %3289 = vrcp.f32 %v4334_v53  ;;  %2466 = vst.msk [vmem:[%s3945_s12 + $0x88] sm:$0xff] %vm1571_vm2, %v2434_v20  ;;  %v2159_v17 = vmul.f32 %v3286_v31, %v4322_v32  ;;  %vm2164_vm6 = vweird.f32 %v3286_v31  ;;  %v2182_v35 = vand.u32 2147483647, %v4334_v53 }
 0x20f   : > { %v2151_v43 = vsel %vm2150_vm4, %v3280_v56, %v2147_v55  ;;  %3291 = vpow2.f32 %v3083_v10  ;;  %v1502_v28 = vadd.f32 %v4211_v54, %v1466_v22  ;;  %vm2165_vm9 = vmor %vm2163_vm7, %vm2164_vm6  ;;  %v2184_v8 = vand.u32 2147483648, %v4334_v53  ;;  %v4364_v61 = vpop.f32.mrf.mxu2 }
 0x210   : > { %v2156_v18 = vsel %vm2153_vm5, %v2155_v12, %v2151_v43  ;;  %v2160_v0 = vsub.f32 1.0, %v2159_v17  ;;  %vm2178_vm11 = vweird.f32 %v4334_v53  ;;  %vm2183_vm13 = vcmp.eq.f32.partialorder %v2182_v35, 8.507059e+37 }
 0x211   : > { %v2371_v7 = vadd.f32 0.0001, %v2156_v18  ;;  %v1735_v29 = vadd.f32 2.0, %v1502_v28  ;;  %v2185_v58 = vor.u32 1.1754944e-38, %v2184_v8  ;;  %v1091_v18 = vadd.f32 %v4244_v52, %v3847_v38 }
 0x212   : > { %v1200_v42 = vpop.f32.mrf.mxu3  ;;  %v3288_v25 = vpop.eup %3287  ;;  %v2161_v19 = vmul.f32 %v3286_v31, %v2160_v0  ;;  %v1092_v35 = vadd.f32 %v4244_v52, %v3854_v36 }
 0x213   : > { %v2435_v51 = vmul.f32 %v2403_v23, %v2371_v7  ;;  %3293 = vlog2.f32 %v2371_v7  ;;  %v1308_v9 = vadd.f32 %v1307_v21, %v1200_v42  ;;  %v2516_v49 = vmul.f32 0.6931472, %v3288_v25 }
 0x214   : > { %v3290_v56 = vpop.eup %3289  ;;  %v2162_v11 = vadd.f32 %v3286_v31, %v2161_v19  ;;  %v3084_v32 = vmul.f32 -1.442695, %v1735_v29 }
 0x215   : > { %v1310_v5 = vpop.f32.mrf.mxu0  ;;  %v3292_v34 = vpop.eup %3291  ;;  %2467 = vst.msk [vmem:[%s3945_s12 + $0x90] sm:$0xff] %vm1571_vm2, %v2435_v51  ;;  %v2174_v40 = vmul.f32 %v3290_v56, %v4334_v53  ;;  %v1467_v63 = vadd.f32 %v1421_v4, %v1308_v9  ;;  %v2578_v33 = vsel %vm1571_vm2, %v2516_v49, 0.0  ;;  %vm2179_vm10 = vweird.f32 %v3290_v56 }
 0x216   : > { %v1424_v26 = vpop.f32.mrf.mxu1  ;;  %v4358_v6 = vadd.f32 1.0, %v3292_v34  ;;  %v2579_v44 = vadd.f32 %v2578_v33, %v2577_v59  ;;  %v2166_v37 = vsel %vm2165_vm9, %v3286_v31, %v2162_v11  ;;  %v1684_v59 = vadd.f32 %v4257_v24, %v4320_v14  ;;  %vm2180_vm12 = vmor %vm2178_vm11, %vm2179_vm10 }
 0x217   : > { %v2175_v45 = vsub.f32 1.0, %v2174_v40  ;;  %v1503_v15 = vadd.f32 %v4211_v54, %v1467_v63  ;;  %v2171_v62 = vsel %vm2168_vm8, %v2170_v57, %v2166_v37  ;;  %v4383_v29 = vpop.f32.mrf.mxu2  ;;  %v1686_v63 = vadd.f32 %v4257_v24, %v4343_v48 }
 0x218   : > { %3295 = vrcp.f32 %v4358_v6  ;;  %v2372_v3 = vadd.f32 0.0001, %v2171_v62  ;;  %v2405_v47 = vadd.f32 %v1684_v59, %v1091_v18  ;;  %v2197_v9 = vand.u32 2147483647, %v4358_v6 }
 0x219   : > { %v3294_v30 = vpop.eup %3293  ;;  %v2176_v46 = vmul.f32 %v3290_v56, %v2175_v45  ;;  %3297 = vpow2.f32 %v3084_v32  ;;  %v1736_v20 = vadd.f32 2.0, %v1503_v15  ;;  %vm2193_vm0 = vweird.f32 %v4358_v6 }
 0x21a   : > { %v2518_v21 = vmul.f32 0.6931472, %v3294_v30  ;;  %v1203_v55 = vpop.f32.mrf.mxu3  ;;  %v2436_v10 = vmul.f32 %v2404_v1, %v2372_v3  ;;  %3299 = vlog2.f32 %v2372_v3  ;;  %vm2198_vm1 = vcmp.eq.f32.partialorder %v2197_v9, 8.507059e+37 }
 0x21b   : > { %v2177_v4 = vadd.f32 %v3290_v56, %v2176_v46  ;;  %v3085_v12 = vmul.f32 -1.442695, %v1736_v20  ;;  %v1311_v43 = vadd.f32 %v1310_v5, %v1203_v55  ;;  %v2406_v46 = vadd.f32 %v1686_v63, %v1092_v35 }
 0x21c   : > { %v2580_v31 = vsel %vm1571_vm2, %v2518_v21, 0.0  ;;  %2468 = vst.msk [vmem:[%s3945_s12 + $0x98] sm:$0xff] %vm1571_vm2, %v2436_v10 }
 0x21d   : > { %v1312_v17 = vpop.f32.mrf.mxu0  ;;  %v2581_v16 = vadd.f32 %v2580_v31, %v2579_v44  ;;  %v2181_v14 = vsel %vm2180_vm12, %v3290_v56, %v2177_v4  ;;  %3301 = vpow2.f32 %v3085_v12  ;;  %v1468_v53 = vadd.f32 %v1424_v26, %v1311_v43 }
 0x21e   : > { %v1426_v22 = vpop.f32.mrf.mxu1  ;;  %v3296_v7 = vpop.eup %3295  ;;  %v2186_v23 = vsel %vm2183_vm13, %v2185_v58, %v2181_v14  ;;  %v2199_v56 = vand.u32 2147483648, %v4358_v6 }
 0x21f   : > { %v3298_v0 = vpop.eup %3297  ;;  %v2373_v50 = vadd.f32 0.0001, %v2186_v23  ;;  %v2189_v13 = vmul.f32 %v3296_v7, %v4358_v6  ;;  %v1504_v38 = vadd.f32 %v4211_v54, %v1468_v53  ;;  %vm2194_vm14 = vweird.f32 %v3296_v7  ;;  %v4406_v14 = vpop.f32.mrf.mxu2 }
 0x220   : > { %v4375_v28 = vadd.f32 1.0, %v3298_v0  ;;  %v3300_v42 = vpop.eup %3299  ;;  %vm2195_vm15 = vmor %vm2193_vm0, %vm2194_vm14  ;;  %v2200_v37 = vor.u32 1.1754944e-38, %v2199_v56 }
 0x221   : > { %v2437_v25 = vmul.f32 %v2405_v47, %v2373_v50  ;;  %3303 = vlog2.f32 %v2373_v50  ;;  %v2190_v51 = vsub.f32 1.0, %v2189_v13  ;;  %v2520_v19 = vmul.f32 0.6931472, %v3300_v42 }
 0x222   : > { %3305 = vrcp.f32 %v4375_v28  ;;  %v1205_v49 = vpop.f32.mrf.mxu3  ;;  %v1737_v5 = vadd.f32 2.0, %v1504_v38  ;;  %v2214_v31 = vand.u32 2147483648, %v4375_v28  ;;  %v1689_v47 = vadd.f32 %v4257_v24, %v4364_v61 }
 0x223   : > { %2469 = vst.msk [vmem:[%s3945_s12 + $0xa0] sm:$0xff] %vm1571_vm2, %v2437_v25  ;;  %v2191_v1 = vmul.f32 %v3296_v7, %v2190_v51  ;;  %v1313_v34 = vadd.f32 %v1312_v17, %v1205_v49  ;;  %v3302_v11 = vpop.eup %3301  ;;  %v2582_v40 = vsel %vm1571_vm2, %v2520_v19, 0.0  ;;  %vm2208_vm4 = vweird.f32 %v4375_v28 }
 0x224   : > { %v2583_v33 = vadd.f32 %v2582_v40, %v2581_v16  ;;  %v4389_v32 = vadd.f32 1.0, %v3302_v11  ;;  %v3086_v45 = vmul.f32 -1.442695, %v1737_v5  ;;  %v2212_v16 = vand.u32 2147483647, %v4375_v28 }
 0x225   : > { %v1315_v26 = vpop.f32.mrf.mxu0  ;;  %v2192_v57 = vadd.f32 %v3296_v7, %v2191_v1  ;;  %v1469_v15 = vadd.f32 %v1426_v22, %v1313_v34  ;;  %v2215_v42 = vor.u32 1.1754944e-38, %v2214_v31  ;;  %v1691_v11 = vadd.f32 %v4257_v24, %v4383_v29 }
 0x226   : > { %v1429_v44 = vpop.f32.mrf.mxu1  ;;  %3307 = vrcp.f32 %v4389_v32  ;;  %vm2213_vm6 = vcmp.eq.f32.partialorder %v2212_v16, 8.507059e+37  ;;  %v2229_v19 = vand.u32 2147483648, %v4389_v32  ;;  %v2227_v61 = vand.u32 2147483647, %v4389_v32 }
 0x227   : > { %v3304_v62 = vpop.eup %3303  ;;  %v2196_v8 = vsel %vm2195_vm15, %v3296_v7, %v2192_v57  ;;  %3309 = vpow2.f32 %v3086_v45  ;;  %v1505_v20 = vadd.f32 %v4211_v54, %v1469_v15  ;;  %v1093_v7 = vadd.f32 %v4244_v52, %v3866_v2 }
 0x228   : > { %v3306_v48 = vpop.eup %3305  ;;  %v2522_v30 = vmul.f32 0.6931472, %v3304_v62  ;;  %v2201_v3 = vsel %vm2198_vm1, %v2200_v37, %v2196_v8  ;;  %vm2223_vm8 = vweird.f32 %v4389_v32  ;;  %v1094_v37 = vadd.f32 %v4244_v52, %v3873_v41 }
 0x229   : > { %v4394_v6 = vadd.f32 0.0001, %v2201_v3  ;;  %v2204_v21 = vmul.f32 %v3306_v48, %v4375_v28  ;;  %v1738_v58 = vadd.f32 2.0, %v1505_v20  ;;  %vm2209_vm3 = vweird.f32 %v3306_v48 }
 0x22a   : > { %v2584_v59 = vsel %vm1571_vm2, %v2522_v30, 0.0  ;;  %v1208_v55 = vpop.f32.mrf.mxu3  ;;  %vm2210_vm5 = vmor %vm2208_vm4, %vm2209_vm3  ;;  %v2407_v1 = vadd.f32 %v1689_v47, %v1093_v7  ;;  %vm2228_vm10 = vcmp.eq.f32.partialorder %v2227_v61, 8.507059e+37  ;;  %v1095_v7 = vadd.f32 %v4244_v52, %v3807_v60 }
 0x22b   : > { %v4399_v36 = vadd.f32 %v2584_v59, %v2583_v33  ;;  %v2438_v10 = vmul.f32 %v2406_v46, %v4394_v6  ;;  %v2205_v4 = vsub.f32 1.0, %v2204_v21  ;;  %v1316_v12 = vadd.f32 %v1315_v26, %v1208_v55 }
 0x22c   : > { %v3308_v17 = vpop.eup %3307  ;;  %v3087_v53 = vmul.f32 -1.442695, %v1738_v58  ;;  %v2230_v26 = vor.u32 1.1754944e-38, %v2229_v19 }
 0x22d   : > { %v1317_v43 = vpop.f32.mrf.mxu0  ;;  %2470 = vst.msk [vmem:[%s3945_s12 + $0xa8] sm:$0xff] %vm1571_vm2, %v2438_v10  ;;  %v2206_v18 = vmul.f32 %v3306_v48, %v2205_v4  ;;  %v3310_v22 = vpop.eup %3309  ;;  %v2219_v23 = vmul.f32 %v3308_v17, %v4389_v32  ;;  %v1470_v0 = vadd.f32 %v1429_v44, %v1316_v12  ;;  %vm2224_vm7 = vweird.f32 %v3308_v17 }
 0x22e   : > { %v1431_v50 = vpop.f32.mrf.mxu1  ;;  %v4414_v38 = vadd.f32 1.0, %v3310_v22  ;;  %3311 = vpow2.f32 %v3087_v53  ;;  %vm2225_vm9 = vmor %vm2223_vm8, %vm2224_vm7  ;;  %v1695_v32 = vpop.f32.mrf.mxu2 }
 0x22f   : > { %v2207_v13 = vadd.f32 %v3306_v48, %v2206_v18  ;;  %v2220_v25 = vsub.f32 1.0, %v2219_v23  ;;  %v1506_v51 = vadd.f32 %v4211_v54, %v1470_v0 }
 0x230   : > { %3313 = vrcp.f32 %v4414_v38  ;;  %v2244_v55 = vand.u32 2147483648, %v4414_v38  ;;  %v2242_v31 = vand.u32 2147483647, %v4414_v38  ;;  %vm2238_vm12 = vweird.f32 %v4414_v38 }
 0x231   : > { %v2211_v2 = vsel %vm2210_vm5, %v3306_v48, %v2207_v13  ;;  %v2221_v56 = vmul.f32 %v3308_v17, %v2220_v25  ;;  %v1739_v5 = vadd.f32 2.0, %v1506_v51  ;;  %v2408_v48 = vadd.f32 %v1691_v11, %v1094_v37 }
 0x232   : > { %v2216_v9 = vsel %vm2213_vm6, %v2215_v42, %v2211_v2  ;;  %v1210_v28 = vpop.f32.mrf.mxu3  ;;  %v2245_v23 = vor.u32 1.1754944e-38, %v2244_v55  ;;  %vm2243_vm14 = vcmp.eq.f32.partialorder %v2242_v31, 8.507059e+37 }
 0x233   : > { %v4420_v49 = vadd.f32 0.0001, %v2216_v9  ;;  %v1318_v34 = vadd.f32 %v1317_v43, %v1210_v28  ;;  %v2222_v40 = vadd.f32 %v3308_v17, %v2221_v56  ;;  %v3088_v33 = vmul.f32 -1.442695, %v1739_v5 }
 0x234   : > { %v3312_v44 = vpop.eup %3311  ;;  %v1694_v43 = vadd.f32 %v4257_v24, %v4406_v14 }
 0x235   : > { %v2439_v63 = vmul.f32 %v2407_v1, %v4420_v49  ;;  %v1320_v57 = vpop.f32.mrf.mxu0  ;;  %v2226_v45 = vsel %vm2225_vm9, %v3308_v17, %v2222_v40  ;;  %v1471_v15 = vadd.f32 %v1431_v50, %v1318_v34  ;;  %v4430_v35 = vadd.f32 1.0, %v3312_v44 }
 0x236   : > { %v3314_v62 = vpop.eup %3313  ;;  %v2231_v29 = vsel %vm2228_vm10, %v2230_v26, %v2226_v45  ;;  %3315 = vpow2.f32 %v3088_v33  ;;  %v1434_v41 = vpop.f32.mrf.mxu1  ;;  %v2409_v42 = vadd.f32 %v1694_v43, %v1095_v7  ;;  %v1696_v40 = vadd.f32 %v4257_v24, %v1695_v32 }
 0x237   : > { %2471 = vst.msk [vmem:[%s3945_s12 + $0xb0] sm:$0xff] %vm1571_vm2, %v2439_v63  ;;  %v4432_v8 = vadd.f32 0.0001, %v2231_v29  ;;  %v2234_v30 = vmul.f32 %v3314_v62, %v4414_v38  ;;  %v1507_v3 = vadd.f32 %v4211_v54, %v1471_v15  ;;  %3317 = vrcp.f32 %v4430_v35  ;;  %v1698_v13 = vpop.f32.mrf.mxu2  ;;  %v4470_v15 = vld [vmem:[%s4585_s4] ss:$0 sm:$0xff] }
 0x238   : > { %vm2239_vm11 = vweird.f32 %v3314_v62  ;;  %v2259_v19 = vand.u32 2147483648, %v4430_v35  ;;  %v2257_v28 = vand.u32 2147483647, %v4430_v35  ;;  %vm2253_vm15 = vweird.f32 %v4430_v35 }
 0x239   : > { %v2440_v46 = vmul.f32 %v2408_v48, %v4432_v8  ;;  %v2235_v21 = vsub.f32 1.0, %v2234_v30  ;;  %v1740_v59 = vadd.f32 2.0, %v1507_v3  ;;  %vm2240_vm13 = vmor %vm2238_vm12, %vm2239_vm11  ;;  %v1097_v43 = vadd.f32 %v4244_v52, %v3826_v39 }
 0x23a   : > { %v1213_v20 = vpop.f32.mrf.mxu3  ;;  %v2260_v26 = vor.u32 1.1754944e-38, %v2259_v19  ;;  %vm2258_vm3 = vcmp.eq.f32.partialorder %v2257_v28, 8.507059e+37 }
 0x23b   : > { %v1321_v10 = vadd.f32 %v1320_v57, %v1213_v20  ;;  %2472 = vst.msk [vmem:[%s3945_s12 + $0xb8] sm:$0xff] %vm1571_vm2, %v2440_v46  ;;  %v2236_v4 = vmul.f32 %v3314_v62, %v2235_v21  ;;  %v3089_v58 = vmul.f32 -1.442695, %v1740_v59  ;;  %v1096_v57 = vadd.f32 %v4244_v52, %v3814_v27 }
 0x23c   : > { %v3316_v12 = vpop.eup %3315  ;;  %v1699_v20 = vadd.f32 %v4257_v24, %v1698_v13 }
 0x23d   : > { %v1472_v17 = vadd.f32 %v1434_v41, %v1321_v10  ;;  %v2237_v18 = vadd.f32 %v3314_v62, %v2236_v4  ;;  %v4445_v16 = vadd.f32 1.0, %v3316_v12  ;;  %3319 = vpow2.f32 %v3089_v58  ;;  %v3318_v22 = vpop.eup %3317  ;;  %v1322_v0 = vpop.f32.mrf.mxu0 }
 0x23e   : > { %v2249_v14 = vmul.f32 %v3318_v22, %v4430_v35  ;;  %v1436_v60 = vpop.f32.mrf.mxu1  ;;  %vm2254_vm0 = vweird.f32 %v3318_v22  ;;  %v2410_v32 = vadd.f32 %v1696_v40, %v1096_v57 }
 0x23f   : > { %v1508_v53 = vadd.f32 %v4211_v54, %v1472_v17  ;;  %v2241_v50 = vsel %vm2240_vm13, %v3314_v62, %v2237_v18  ;;  %3321 = vrcp.f32 %v4445_v16  ;;  %vm2255_vm1 = vmor %vm2253_vm15, %vm2254_vm0  ;;  %v2272_v48 = vand.u32 2147483647, %v4445_v16  ;;  %v1700_v41 = vpop.f32.mrf.mxu2 }
 0x240   : > { %v2246_v47 = vsel %vm2243_vm14, %v2245_v23, %v2241_v50  ;;  %v2250_v25 = vsub.f32 1.0, %v2249_v14  ;;  %v2274_v27 = vand.u32 2147483648, %v4445_v16  ;;  %vm2268_vm5 = vweird.f32 %v4445_v16 }
 0x241   : > { %v4452_v38 = vadd.f32 0.0001, %v2246_v47  ;;  %v1741_v51 = vadd.f32 2.0, %v1508_v53  ;;  %vm2273_vm7 = vcmp.eq.f32.partialorder %v2272_v48, 8.507059e+37  ;;  %v2411_v50 = vadd.f32 %v1699_v20, %v1097_v43 }
 0x242   : > { %v1215_v2 = vpop.f32.mrf.mxu3  ;;  %v2251_v61 = vmul.f32 %v3318_v22, %v2250_v25  ;;  %v2275_v17 = vor.u32 1.1754944e-38, %v2274_v27 }
 0x243   : > { %v1323_v54 = vadd.f32 %v1322_v0, %v1215_v2  ;;  %v3320_v9 = vpop.eup %3319  ;;  %v2441_v56 = vmul.f32 %v2409_v42, %v4452_v38  ;;  %v3090_v5 = vmul.f32 -1.442695, %v1741_v51  ;;  %v1701_v51 = vadd.f32 %v4257_v24, %v1700_v41 }
 0x244   : > { %v4457_v1 = vadd.f32 1.0, %v3320_v9  ;;  %v2252_v63 = vadd.f32 %v3318_v22, %v2251_v61 }
 0x245   : > { %v1473_v34 = vadd.f32 %v1436_v60, %v1323_v54  ;;  %v3322_v11 = vpop.eup %3321  ;;  %2473 = vst.msk [vmem:[%s3945_s12 + $0xc0] sm:$0xff] %vm1571_vm2, %v2441_v56  ;;  %v1325_v29 = vpop.f32.mrf.mxu0  ;;  %v4598_v56 = vld [vmem:[#allocation2_spill] sm:$0xff] }
 0x246   : > { %v2264_v33 = vmul.f32 %v3322_v11, %v4445_v16  ;;  %3323 = vrcp.f32 %v4457_v1  ;;  %v2256_v44 = vsel %vm2255_vm1, %v3318_v22, %v2252_v63  ;;  %vm2269_vm4 = vweird.f32 %v3322_v11  ;;  %v1439_v55 = vpop.f32.mrf.mxu1 }
 0x247   : > { %3325 = vpow2.f32 %v3090_v5  ;;  %v2261_v37 = vsel %vm2258_vm3, %v2260_v26, %v2256_v44  ;;  %v1509_v62 = vadd.f32 %v4470_v15, %v1473_v34  ;;  %vm2270_vm6 = vmor %vm2268_vm5, %vm2269_vm4  ;;  %v2289_v39 = vand.u32 2147483648, %v4457_v1  ;;  %v1703_v5 = vpop.f32.mrf.mxu2 }
 0x248   : > { %v2265_v45 = vsub.f32 1.0, %v2264_v33  ;;  %v4473_v35 = vadd.f32 0.0001, %v2261_v37  ;;  %v2287_v47 = vand.u32 2147483647, %v4457_v1  ;;  %vm2283_vm9 = vweird.f32 %v4457_v1 }
 0x249   : > { %v1742_v46 = vadd.f32 2.0, %v1509_v62  ;;  %v1098_v61 = vadd.f32 %v4244_v52, %v4598_v56  ;;  %v2290_v28 = vor.u32 1.1754944e-38, %v2289_v39 }
 0x24a   : > { %v1218_v30 = vpop.f32.mrf.mxu3  ;;  %v2266_v3 = vmul.f32 %v3322_v11, %v2265_v45  ;;  %v2442_v59 = vmul.f32 %v2410_v32, %v4473_v35  ;;  %vm2288_vm11 = vcmp.eq.f32.partialorder %v2287_v47, 8.507059e+37  ;;  %v4600_v47 = vld [vmem:[#allocation4_spill] sm:$0xff] }
 0x24b   : > { %v1326_v21 = vadd.f32 %v1325_v29, %v1218_v30  ;;  %v3091_v31 = vmul.f32 -1.442695, %v1742_v46  ;;  %v2412_v33 = vadd.f32 %v1701_v51, %v1098_v61 }
 0x24c   : > { %v3324_v10 = vpop.eup %3323  ;;  %v2267_v4 = vadd.f32 %v3322_v11, %v2266_v3  ;;  %2474 = vst.msk [vmem:[%s3945_s12 + $0xc8] sm:$0xff] %vm1571_vm2, %v2442_v59 }
 0x24d   : > { %v1474_v58 = vadd.f32 %v1439_v55, %v1326_v21  ;;  %v3326_v12 = vpop.eup %3325  ;;  %v2279_v18 = vmul.f32 %v3324_v10, %v4457_v1  ;;  %3327 = vpow2.f32 %v3091_v31  ;;  %vm2284_vm8 = vweird.f32 %v3324_v10  ;;  %v1327_v60 = vpop.f32.mrf.mxu0  ;;  %v4599_v55 = vld [vmem:[#allocation3_spill] sm:$0xff] }
 0x24e   : > { %v2271_v22 = vsel %vm2270_vm6, %v3322_v11, %v2267_v4  ;;  %v4486_v7 = vadd.f32 1.0, %v3326_v12  ;;  %vm2285_vm10 = vmor %vm2283_vm9, %vm2284_vm8  ;;  %v1441_v24 = vpop.f32.mrf.mxu1 }
 0x24f   : > { %v1510_v16 = vadd.f32 %v4470_v15, %v1474_v58  ;;  %v2276_v23 = vsel %vm2273_vm7, %v2275_v17, %v2271_v22  ;;  %v2280_v53 = vsub.f32 1.0, %v2279_v18  ;;  %v1705_v59 = vpop.f32.mrf.mxu2 }
 0x250   : > { %v4489_v0 = vadd.f32 0.0001, %v2276_v23  ;;  %3329 = vrcp.f32 %v4486_v7  ;;  %v2304_v45 = vand.u32 2147483648, %v4486_v7  ;;  %v2302_v48 = vand.u32 2147483647, %v4486_v7 }
 0x251   : > { %v2281_v14 = vmul.f32 %v3324_v10, %v2280_v53  ;;  %v1743_v13 = vadd.f32 2.0, %v1510_v16  ;;  %vm2298_vm13 = vweird.f32 %v4486_v7 }
 0x252   : > { %v1220_v42 = vpop.f32.mrf.mxu3  ;;  %v2443_v25 = vmul.f32 %v2411_v50, %v4489_v0  ;;  %v2305_v21 = vor.u32 1.1754944e-38, %v2304_v45  ;;  %vm2303_vm0 = vcmp.eq.f32.partialorder %v2302_v48, 8.507059e+37 }
 0x253   : > { %v2282_v2 = vadd.f32 %v3324_v10, %v2281_v14  ;;  %v3092_v19 = vmul.f32 -1.442695, %v1743_v13  ;;  %v1328_v54 = vadd.f32 %v1327_v60, %v1220_v42  ;;  %v3328_v9 = vpop.eup %3327 }
 0x254   : > { %2475 = vst.msk [vmem:[%s3945_s12 + $0xd0] sm:$0xff] %vm1571_vm2, %v2443_v25  ;;  %v1870_v11 = vadd.f32 1.0, %v3328_v9 }
 0x255   : > { %v2286_v34 = vsel %vm2285_vm10, %v3324_v10, %v2282_v2  ;;  %3331 = vpow2.f32 %v3092_v19  ;;  %v1475_v1 = vadd.f32 %v1441_v24, %v1328_v54 }
 0x256   : > { %v3330_v40 = vpop.eup %3329  ;;  %v2291_v63 = vsel %vm2288_vm11, %v2290_v28, %v2286_v34  ;;  %3333 = vrcp.f32 %v1870_v11  ;;  %v2319_v17 = vand.u32 2147483648, %v1870_v11  ;;  %v2317_v22 = vand.u32 2147483647, %v1870_v11 }
 0x257   : > { %v4501_v26 = vadd.f32 0.0001, %v2291_v63  ;;  %v2294_v57 = vmul.f32 %v3330_v40, %v4486_v7  ;;  %v1511_v52 = vadd.f32 %v4470_v15, %v1475_v1  ;;  %vm2299_vm12 = vweird.f32 %v3330_v40  ;;  %v4516_v15 = vld [vmem:[%s4588_s7] ss:$0 sm:$0xff]  ;;  %v1708_v9 = vpop.f32.mrf.mxu2 }
 0x258   : > { %3335 = vlog2.f32 %v4394_v6  ;;  %v1704_v41 = vadd.f32 %v4516_v15, %v1703_v5  ;;  %vm2300_vm14 = vmor %vm2298_vm13, %vm2299_vm12  ;;  %v4524_v6 = vld [vmem:[%s4584_s3] ss:$0 sm:$0xff]  ;;  %v1706_v53 = vadd.f32 %v4516_v15, %v1705_v59  ;;  %vm2313_vm1 = vweird.f32 %v1870_v11 }
 0x259   : > { %v2444_v44 = vmul.f32 %v2412_v33, %v4501_v26  ;;  %v2295_v37 = vsub.f32 1.0, %v2294_v57  ;;  %v1744_v62 = vadd.f32 2.0, %v1511_v52  ;;  %v1099_v10 = vadd.f32 %v4524_v6, %v4599_v55 }
 0x25a   : > { %v1100_v13 = vadd.f32 %v4524_v6, %v4600_v47  ;;  %vm2318_vm4 = vcmp.eq.f32.partialorder %v2317_v22, 8.507059e+37  ;;  %vm2614_vm13 = vcmask 90112  }
 0x25b   : > { %v3332_v29 = vpop.eup %3331  ;;  %2476 = vst.msk [vmem:[%s3945_s12 + $0xd8] sm:$0xff] %vm1571_vm2, %v2444_v44  ;;  %v2296_v32 = vmul.f32 %v3330_v40, %v2295_v37  ;;  %v3093_v30 = vmul.f32 -1.442695, %v1744_v62  ;;  %v2413_v43 = vadd.f32 %v1704_v41, %v1099_v10 }
 0x25c   : > { %v4510_v27 = vadd.f32 1.0, %v3332_v29  ;;  %v3334_v3 = vpop.eup %3333  ;;  %v2414_v54 = vadd.f32 %v1706_v53, %v1100_v13 }
 0x25d   : > { %v2297_v46 = vadd.f32 %v3330_v40, %v2296_v32  ;;  %v2309_v20 = vmul.f32 %v3334_v3, %v1870_v11  ;;  %vm2314_vm15 = vweird.f32 %v3334_v3 }
 0x25e   : > { %3337 = vrcp.f32 %v4510_v27  ;;  %v3336_v7 = vpop.eup %3335  ;;  %vm2315_vm3 = vmor %vm2313_vm1, %vm2314_vm15  ;;  %v2334_v56 = vand.u32 2147483648, %v4510_v27  ;;  %v2332_v28 = vand.u32 2147483647, %v4510_v27  ;;  %vm2328_vm6 = vweird.f32 %v4510_v27 }
 0x25f   : > { %v2301_v4 = vsel %vm2300_vm14, %v3330_v40, %v2297_v46  ;;  %3339 = vpow2.f32 %v3093_v30  ;;  %v2310_v58 = vsub.f32 1.0, %v2309_v20  ;;  %v2524_v60 = vmul.f32 0.6931472, %v3336_v7  ;;  %v4601_v40 = vld [vmem:[#allocation5_spill] sm:$0xff]  ;;  %v1710_v59 = vpop.f32.mrf.mxu2 }
 0x260   : > { %v2306_v31 = vsel %vm2303_vm0, %v2305_v21, %v2301_v4  ;;  %3341 = vlog2.f32 %v4420_v49  ;;  %v2320_v49 = vor.u32 1.1754944e-38, %v2319_v17  ;;  %v1101_v63 = vadd.f32 %v4524_v6, %v4601_v40 }
 0x261   : > { %v2381_v12 = vadd.f32 0.0001, %v2306_v31  ;;  %v2311_v18 = vmul.f32 %v3334_v3, %v2310_v58  ;;  %3343 = vlog2.f32 %v4432_v8  ;;  %v2586_v33 = vsel %vm1571_vm2, %v2524_v60, 0.0 }
 0x262   : > { %3345 = vlog2.f32 %v4452_v38  ;;  %v1709_v38 = vadd.f32 %v4516_v15, %v1708_v9  ;;  %vm2333_vm8 = vcmp.eq.f32.partialorder %v2332_v28, 8.507059e+37  ;;  %v2587_v48 = vadd.f32 %v2586_v33, %v4399_v36 }
 0x263   : > { %v2445_v16 = vmul.f32 %v2413_v43, %v2381_v12  ;;  %v2312_v50 = vadd.f32 %v3334_v3, %v2311_v18  ;;  %v1711_v43 = vadd.f32 %v4516_v15, %v1710_v59 }
 0x264   : > { %v3338_v23 = vpop.eup %3337  ;;  %v2415_v29 = vadd.f32 %v1709_v38, %v1101_v63 }
 0x265   : > { %v3340_v39 = vpop.eup %3339  ;;  %2477 = vst.msk [vmem:[%s3945_s12 + $0xe0] sm:$0xff] %vm1571_vm2, %v2445_v16  ;;  %v2324_v14 = vmul.f32 %v3338_v23, %v4510_v27  ;;  %v2316_v42 = vsel %vm2315_vm3, %v3334_v3, %v2312_v50  ;;  %vm2329_vm5 = vweird.f32 %v3338_v23 }
 0x266   : > { %v4536_v25 = vadd.f32 1.0, %v3340_v39  ;;  %v3342_v51 = vpop.eup %3341  ;;  %v2321_v2 = vsel %vm2318_vm4, %v2320_v49, %v2316_v42  ;;  %vm2330_vm7 = vmor %vm2328_vm6, %vm2329_vm5 }
 0x267   : > { %v2325_v19 = vsub.f32 1.0, %v2324_v14  ;;  %v2382_v8 = vadd.f32 0.0001, %v2321_v2  ;;  %v2526_v5 = vmul.f32 0.6931472, %v3342_v51  ;;  %v3344_v11 = vpop.eup %3343 }
 0x268   : > { %3347 = vrcp.f32 %v4536_v25  ;;  %v3346_v1 = vpop.eup %3345  ;;  %v2528_v44 = vmul.f32 0.6931472, %v3344_v11  ;;  %v2349_v20 = vand.u32 2147483648, %v4536_v25  ;;  %v2347_v36 = vand.u32 2147483647, %v4536_v25 }
 0x269   : > { %3349 = vlog2.f32 %v4473_v35  ;;  %v2326_v61 = vmul.f32 %v3338_v23, %v2325_v19  ;;  %v2446_v34 = vmul.f32 %v2414_v54, %v2382_v8  ;;  %v2335_v35 = vor.u32 1.1754944e-38, %v2334_v56 }
 0x26a   : > { %3351 = vlog2.f32 %v4489_v0  ;;  %v2588_v52 = vsel %vm1571_vm2, %v2526_v5, 0.0  ;;  %v2530_v27 = vmul.f32 0.6931472, %v3346_v1  ;;  %v2590_v46 = vsel %vm1571_vm2, %v2528_v44, 0.0 }
 0x26b   : > { %v2327_v24 = vadd.f32 %v3338_v23, %v2326_v61  ;;  %2478 = vst.msk [vmem:[%s3945_s12 + $0xe8] sm:$0xff] %vm1571_vm2, %v2446_v34  ;;  %3353 = vlog2.f32 %v4501_v26  ;;  %v2589_v41 = vadd.f32 %v2588_v52, %v2587_v48  ;;  %vm2343_vm10 = vweird.f32 %v4536_v25 }
 0x26c   : > { %3355 = vlog2.f32 %v2381_v12  ;;  %v2592_v4 = vsel %vm1571_vm2, %v2530_v27, 0.0  ;;  %v2350_v7 = vor.u32 1.1754944e-38, %v2349_v20  ;;  %vm2348_vm12 = vcmp.eq.f32.partialorder %v2347_v36, 8.507059e+37 }
 0x26d   : > { %v2331_v57 = vsel %vm2330_vm7, %v3338_v23, %v2327_v24  ;;  %3357 = vlog2.f32 %v2382_v8  ;;  %v2591_v12 = vadd.f32 %v2590_v46, %v2589_v41  ;;  %v4602_v23 = vld [vmem:[#allocation6_spill] sm:$0xff] }
 0x26e   : > { %v3348_v0 = vpop.eup %3347  ;;  %v2336_v37 = vsel %vm2333_vm8, %v2335_v35, %v2331_v57  ;;  %v1102_v53 = vadd.f32 %v4524_v6, %v4602_v23 }
 0x26f   : > { %v3350_v45 = vpop.eup %3349  ;;  %v2383_v62 = vadd.f32 0.0001, %v2336_v37  ;;  %v2339_v32 = vmul.f32 %v3348_v0, %v4536_v25  ;;  %vm2344_vm9 = vweird.f32 %v3348_v0  ;;  %v2593_v50 = vadd.f32 %v2592_v4, %v2591_v12 }
 0x270   : > { %v3352_v30 = vpop.eup %3351  ;;  %v2532_v21 = vmul.f32 0.6931472, %v3350_v45  ;;  %vm2345_vm11 = vmor %vm2343_vm10, %vm2344_vm9  ;;  %v2416_v25 = vadd.f32 %v1711_v43, %v1102_v53 }
 0x271   : > { %v2447_v26 = vmul.f32 %v2415_v29, %v2383_v62  ;;  %v2340_v3 = vsub.f32 1.0, %v2339_v32  ;;  %v3354_v55 = vpop.eup %3353  ;;  %3359 = vlog2.f32 %v2383_v62  ;;  %v2534_v31 = vmul.f32 0.6931472, %v3352_v30 }
 0x272   : > { %v3356_v58 = vpop.eup %3355  ;;  %v2594_v18 = vsel %vm1571_vm2, %v2532_v21, 0.0  ;;  %v2536_v22 = vmul.f32 0.6931472, %v3354_v55 }
 0x273   : > { %2479 = vst.msk [vmem:[%s3945_s12 + $0xf0] sm:$0xff] %vm1571_vm2, %v2447_v26  ;;  %v2341_v10 = vmul.f32 %v3348_v0, %v2340_v3  ;;  %v3358_v16 = vpop.eup %3357  ;;  %v2596_v49 = vsel %vm1571_vm2, %v2534_v31, 0.0  ;;  %v2538_v14 = vmul.f32 0.6931472, %v3356_v58  ;;  %v2595_v13 = vadd.f32 %v2594_v18, %v2593_v50 }
 0x274   : > { %v2598_v51 = vsel %vm1571_vm2, %v2536_v22, 0.0  ;;  %v2540_v60 = vmul.f32 0.6931472, %v3358_v16 }
 0x275   : > { %v2342_v17 = vadd.f32 %v3348_v0, %v2341_v10  ;;  %v2597_v2 = vadd.f32 %v2596_v49, %v2595_v13  ;;  %v2600_v6 = vsel %vm1571_vm2, %v2538_v14, 0.0 }
 0x276   : > { %v2602_v9 = vsel %vm1571_vm2, %v2540_v60, 0.0 }
 0x277   : > { %v2346_v39 = vsel %vm2345_vm11, %v3348_v0, %v2342_v17  ;;  %v3360_v47 = vpop.eup %3359  ;;  %v2599_v54 = vadd.f32 %v2598_v51, %v2597_v2 }
 0x278   : > { %v2351_v15 = vsel %vm2348_vm12, %v2350_v7, %v2346_v39  ;;  %v2542_v8 = vmul.f32 0.6931472, %v3360_v47 }
 0x279   : > { %v2384_v42 = vadd.f32 0.0001, %v2351_v15  ;;  %v2601_v56 = vadd.f32 %v2600_v6, %v2599_v54 }
 0x27a   : > { %v2604_v61 = vsel %vm1571_vm2, %v2542_v8, 0.0 }
 0x27b   : > { %v2448_v19 = vmul.f32 %v2416_v25, %v2384_v42  ;;  %3361 = vlog2.f32 %v2384_v42  ;;  %v2603_v5 = vadd.f32 %v2602_v9, %v2601_v56 }
 0x27d   : > { %2480 = vst.msk [vmem:[%s3945_s12 + $0xf8] sm:$0xff] %vm1571_vm2, %v2448_v19  ;;  %v2605_v11 = vadd.f32 %v2604_v61, %v2603_v5 }
 0x281   : > { %v3362_v28 = vpop.eup %3361 }
 0x282   : > { %v2544_v34 = vmul.f32 0.6931472, %v3362_v28 }
 0x284   : > { %v2606_v38 = vsel %vm1571_vm2, %v2544_v34, 0.0 }
 0x285   : > { %v2607_v24 = vadd.f32 %v2606_v38, %v2605_v11 }
 0x287   : > { %v2608_v40 = vrot.slane %v2607_v24, 4 }
 0x289   : > { %v2609_v63 = vadd.f32 %v2608_v40, %v2607_v24 }
 0x28b   : > { %v2610_v35 = vrot.slane %v2609_v63, 2 }
 0x28d   : > { %v2611_v1 = vadd.f32 %v2610_v35, %v2609_v63 }
 0x28f   : > { %v2612_v33 = vrot.slane %v2611_v1, 1 }
 0x291   : > { %v2613_v57 = vadd.f32 %v2612_v33, %v2611_v1 }
 0x293   : > { %2615 = vst.msk [vmem:[%s361_s26] sm:$0x1] %vm2614_vm13, %v2613_v57 }
 0x294 PF: > { %s20_s30 = sadd.s32 1, %s3382_s30  }
 0x295   : > { %p17_p4 = scmp.ge.s32.totalorder %s20_s30, 4  }
 0x297   :  { %19 = sbr.rel (!%p17_p4) target bundleno = 1 (0x1), region = 101 }

// kernel: srflownet_normal_flow.33
= control target key start
LH: loop header
LB: loop body
LE: loop exit
PB: predicated region body
PF: predicated region fallthrough
CT: control target
= control target key end

     0   :  { %s1124_s18 = smov 0   ;;  %s1371_s0 = inlined_call_operand.vmem [shape: bf16[2,256,126], index: 0, kind: input, shape index: {}]   ;;  %s1372_s1 = inlined_call_operand.vmem [shape: bf16[126,16], index: 1, kind: input, shape index: {}]   ;;  %s1373_s2 = inlined_call_operand.vmem [shape: f32[1,16], index: 2, kind: input, shape index: {}]   ;;  %s1374_s3 = inlined_call_operand.vmem [shape: bf16[16,16], index: 3, kind: input, shape index: {}]   ;;  %s1375_s4 = inlined_call_operand.vmem [shape: f32[1,16], index: 4, kind: input, shape index: {}]   ;;  %s1376_s5 = inlined_call_operand.vmem [shape: bf16[2,256,16], index: 5, kind: output, shape index: {}]  }
   0x1 LB: > { %s897_s19 = sadd.s32 4294967295, %s1092_s18   ;;  %p901_p0 = scmp.ge.s32.totalorder %s1092_s18, 1  ;;  %s1092_s18 = sphi %s1124_s18, %s15_s18  }
   0x2   : > { %p187_p1 = scmp.lt.s32.totalorder %s1092_s18, 3 }
   0x4   : > { %p188_p2 = pnand %p901_p0, %p187_p1 }
   0x5   : > { %p215_p3 = scmp.lt.s32.totalorder (!%p188_p2), %s897_s19, 1 }
   0x6   : > { %191 = sbr.rel (%p188_p2) target bundleno = 455 (0x1c7), region = 40 }
   0xb   : > { %v1000_v0 = vld [vmem:[%s1372_s1 + $0x38] sm:$0xf]  ;;  %v1065_v1 = vld [vmem:[%s1372_s1 + $0x38] sm:$0x70]  ;;  %vm454_vm0 = vcmask 1046528   ;;  %v1064_v4 = vld [vmem:[%s1372_s1 + $0x30] sm:$0xff] }
   0xc   : > { %v1001_v2 = vor.u32 %v1065_v1, %v1000_v0  ;;  %v1063_v5 = vld [vmem:[%s1372_s1 + $0x28] sm:$0xff]  ;;  %v1062_v6 = vld [vmem:[%s1372_s1 + $0x20] sm:$0xff]  ;;  %v1061_v7 = vld [vmem:[%s1372_s1 + $0x18] sm:$0xff]  ;;  %s1378_s19 = smov (!%p215_p3, %s897_s19), 1  ;;  %vm405_vm1 = vcmask 1031168   ;;  %vm607_vm2 = vcmask 130048  }
   0xd   : > { %v1060_v8 = vld [vmem:[%s1372_s1 + $0x10] sm:$0xff]  ;;  %v1059_v9 = vld [vmem:[%s1372_s1 + $0x8] sm:$0xff]  ;;  %s1040_s11 = sshll.u32 %s1378_s19, 7  ;;  %v1058_v10 = vld [vmem:[%s1372_s1] sm:$0xff]  ;;  %vm809_vm3 = vcmask 125952  }
   0xe   : > { %v456_v3 = vsel %vm454_vm0, %v1001_v2, 0  ;;  %s1167_s16 = scalar_lea.vmem %s1371_s0, %s1040_s11  ;;  %v1066_v25 = vld [vmem:[%s1374_s3] sm:$0xff]  ;;  %s1271_s27 = scalar_lea.vmem %s1376_s5, %s1040_s11 }
   0xf   : > { %458 = vmatpush.bf16.msra.mxu0 %v456_v3  ;;  %1067 = vmatpush.bf16.msra.mxu2 %v456_v3  ;;  %v1042_v11 = vld [vmem:[%s1167_s16] sm:$0xff]  ;;  %v1043_v13 = vld [vmem:[%s1167_s16 + $0x8] sm:$0xff]  ;;  %v1044_v15 = vld [vmem:[%s1167_s16 + $0x10] sm:$0xff] }
  0x10   : > { %v1050_v12 = vld [vmem:[%s1167_s16 + $0x40] sm:$0xff]  ;;  %v1051_v14 = vld [vmem:[%s1167_s16 + $0x48] sm:$0xff]  ;;  %v1052_v16 = vld [vmem:[%s1167_s16 + $0x50] sm:$0xff]  ;;  %663 = vmatpush.bf16.msra.mxu1 %v1066_v25  ;;  %1075 = vmatpush.bf16.msra.mxu3 %v1066_v25 }
  0x11   : > { %v1045_v17 = vld [vmem:[%s1167_s16 + $0x18] sm:$0xff]  ;;  %v1046_v19 = vld [vmem:[%s1167_s16 + $0x20] sm:$0xff]  ;;  %v1047_v21 = vld [vmem:[%s1167_s16 + $0x28] sm:$0xff] }
  0x12   : > { %v1053_v18 = vld [vmem:[%s1167_s16 + $0x58] sm:$0xff]  ;;  %v1054_v20 = vld [vmem:[%s1167_s16 + $0x60] sm:$0xff]  ;;  %v1055_v22 = vld [vmem:[%s1167_s16 + $0x68] sm:$0xff] }
  0x13   : > { %459 = vmatpush.bf16.msra.mxu0 %v1064_v4  ;;  %1068 = vmatpush.bf16.msra.mxu2 %v1064_v4  ;;  %v1048_v23 = vld [vmem:[%s1167_s16 + $0x30] sm:$0xff]  ;;  %v1049_v26 = vld [vmem:[%s1167_s16 + $0x38] sm:$0xff]  ;;  %v1207_v29 = vld [vmem:[%s1373_s2] ss:$0 sm:$0xff] }
  0x14   : > { %v1056_v24 = vld [vmem:[%s1167_s16 + $0x70] sm:$0xff]  ;;  %v1057_v27 = vld [vmem:[%s1167_s16 + $0x78] sm:$0xff] }
  0x17   : > { %460 = vmatpush.bf16.msra.mxu0 %v1063_v5  ;;  %1069 = vmatpush.bf16.msra.mxu2 %v1063_v5 }
  0x1b   : > { %461 = vmatpush.bf16.msra.mxu0 %v1062_v6  ;;  %1070 = vmatpush.bf16.msra.mxu2 %v1062_v6 }
  0x1f   : > { %462 = vmatpush.bf16.msra.mxu0 %v1061_v7  ;;  %1071 = vmatpush.bf16.msra.mxu2 %v1061_v7 }
  0x23   : > { %463 = vmatpush.bf16.msra.mxu0 %v1060_v8  ;;  %1072 = vmatpush.bf16.msra.mxu2 %v1060_v8 }
  0x27   : > { %464 = vmatpush.bf16.msra.mxu0 %v1059_v9  ;;  %1073 = vmatpush.bf16.msra.mxu2 %v1059_v9 }
  0x2b   : > { %465 = vmatpush.bf16.msra.mxu0 %v1058_v10  ;;  %1074 = vmatpush.bf16.msra.mxu2 %v1058_v10 }
  0x2e   : > { %1002 = vmatmul.msk.bf16.vlgmr.msra.gmra.mxu0 %vm405_vm1, %v1042_v11  ;;  %1010 = vmatmul.msk.bf16.vlgmr.msra.gmra.mxu2 %vm405_vm1, %v1050_v12 }
  0x3e   : > { %1003 = vmatmul.msk.bf16.gmra.mxu0 %vm405_vm1, %v1043_v13  ;;  %1011 = vmatmul.msk.bf16.gmra.mxu2 %vm405_vm1, %v1051_v14 }
  0x4e   : > { %1004 = vmatmul.msk.bf16.gmra.mxu0 %vm405_vm1, %v1044_v15  ;;  %1012 = vmatmul.msk.bf16.gmra.mxu2 %vm405_vm1, %v1052_v16 }
  0x5e   : > { %1005 = vmatmul.msk.bf16.gmra.mxu0 %vm405_vm1, %v1045_v17  ;;  %1013 = vmatmul.msk.bf16.gmra.mxu2 %vm405_vm1, %v1053_v18 }
  0x6e   : > { %1006 = vmatmul.msk.bf16.gmra.mxu0 %vm405_vm1, %v1046_v19  ;;  %1014 = vmatmul.msk.bf16.gmra.mxu2 %vm405_vm1, %v1054_v20 }
  0x7e   : > { %1007 = vmatmul.msk.bf16.gmra.mxu0 %vm405_vm1, %v1047_v21  ;;  %1015 = vmatmul.msk.bf16.gmra.mxu2 %vm405_vm1, %v1055_v22 }
  0x8e   : > { %1008 = vmatmul.msk.bf16.gmra.mxu0 %vm405_vm1, %v1048_v23  ;;  %1016 = vmatmul.msk.bf16.gmra.mxu2 %vm405_vm1, %v1056_v24 }
  0x9e   : > { %1009 = vmatmul.msk.bf16.gmra.mxu0 %vm405_vm1, %v1049_v26  ;;  %1017 = vmatmul.msk.bf16.gmra.mxu2 %vm405_vm1, %v1057_v27 }
  0xab   : > { %v467_v28 = vpop.f32.mrf.mxu0 }
  0xac   : > { %v468_v31 = vadd.f32 %v1207_v29, %v467_v28 }
  0xae   : > { %v547_v34 = vmax.f32 %v468_v31, 0.0 }
  0xb1   : > { %v507_v30 = vpop.f32.mrf.mxu2 }
  0xb2   : > { %v508_v36 = vadd.f32 %v1207_v29, %v507_v30 }
  0xb3   : > { %v469_v32 = vpop.f32.mrf.mxu0 }
  0xb4   : > { %v470_v33 = vadd.f32 %v1207_v29, %v469_v32  ;;  %v563_v41 = vmax.f32 %v508_v36, 0.0 }
  0xb6   : > { %v548_v35 = vmax.f32 %v470_v33, 0.0 }
  0xb8   : > { %v579_v37 = vpack.c.bf16 %v548_v35, %v547_v34 }
  0xb9   : > { %v509_v38 = vpop.f32.mrf.mxu2 }
  0xba   : > { %v510_v39 = vadd.f32 %v1207_v29, %v509_v38  ;;  %1022 = vmatmul.msk.bf16.vlgmr.msra.gmra.mxu1 %vm607_vm2, %v579_v37 }
  0xbb   : > { %v472_v40 = vpop.f32.mrf.mxu0 }
  0xbc   : > { %v564_v42 = vmax.f32 %v510_v39, 0.0  ;;  %v473_v45 = vadd.f32 %v1207_v29, %v472_v40 }
  0xbe   : > { %v1214_v43 = vpack.c.bf16 %v564_v42, %v563_v41  ;;  %v549_v48 = vmax.f32 %v473_v45, 0.0 }
  0xc1   : > { %v512_v44 = vpop.f32.mrf.mxu2 }
  0xc2   : > { %v513_v50 = vadd.f32 %v1207_v29, %v512_v44 }
  0xc3   : > { %v474_v46 = vpop.f32.mrf.mxu0 }
  0xc4   : > { %v475_v47 = vadd.f32 %v1207_v29, %v474_v46  ;;  %v565_v55 = vmax.f32 %v513_v50, 0.0 }
  0xc6   : > { %v550_v49 = vmax.f32 %v475_v47, 0.0 }
  0xc8   : > { %v580_v51 = vpack.c.bf16 %v550_v49, %v549_v48 }
  0xc9   : > { %v514_v52 = vpop.f32.mrf.mxu2 }
  0xca   : > { %v515_v53 = vadd.f32 %v1207_v29, %v514_v52  ;;  %1023 = vmatmul.msk.bf16.gmra.mxu1 %vm607_vm2, %v580_v51 }
  0xcb   : > { %v477_v54 = vpop.f32.mrf.mxu0 }
  0xcc   : > { %v566_v56 = vmax.f32 %v515_v53, 0.0  ;;  %v478_v59 = vadd.f32 %v1207_v29, %v477_v54 }
  0xce   : > { %v588_v57 = vpack.c.bf16 %v566_v56, %v565_v55  ;;  %v551_v62 = vmax.f32 %v478_v59, 0.0 }
  0xd0   : > { %1031 = vmatmul.msk.bf16.vlgmr.msra.gmra.mxu3 %vm607_vm2, %v588_v57 }
  0xd1   : > { %v517_v58 = vpop.f32.mrf.mxu2 }
  0xd2   : > { %v518_v0 = vadd.f32 %v1207_v29, %v517_v58 }
  0xd3   : > { %v479_v60 = vpop.f32.mrf.mxu0 }
  0xd4   : > { %v480_v61 = vadd.f32 %v1207_v29, %v479_v60  ;;  %v567_v5 = vmax.f32 %v518_v0, 0.0 }
  0xd6   : > { %v552_v63 = vmax.f32 %v480_v61, 0.0 }
  0xd8   : > { %v581_v1 = vpack.c.bf16 %v552_v63, %v551_v62 }
  0xd9   : > { %v519_v2 = vpop.f32.mrf.mxu2 }
  0xda   : > { %v520_v3 = vadd.f32 %v1207_v29, %v519_v2  ;;  %1024 = vmatmul.msk.bf16.gmra.mxu1 %vm607_vm2, %v581_v1 }
  0xdb   : > { %v482_v4 = vpop.f32.mrf.mxu0 }
  0xdc   : > { %v568_v6 = vmax.f32 %v520_v3, 0.0  ;;  %v483_v9 = vadd.f32 %v1207_v29, %v482_v4 }
  0xde   : > { %v589_v7 = vpack.c.bf16 %v568_v6, %v567_v5  ;;  %v553_v12 = vmax.f32 %v483_v9, 0.0 }
  0xe0   : > { %1032 = vmatmul.msk.bf16.gmra.mxu3 %vm607_vm2, %v589_v7 }
  0xe1   : > { %v522_v8 = vpop.f32.mrf.mxu2 }
  0xe2   : > { %v523_v14 = vadd.f32 %v1207_v29, %v522_v8 }
  0xe3   : > { %v484_v10 = vpop.f32.mrf.mxu0 }
  0xe4   : > { %v485_v11 = vadd.f32 %v1207_v29, %v484_v10  ;;  %v569_v19 = vmax.f32 %v523_v14, 0.0 }
  0xe6   : > { %v554_v13 = vmax.f32 %v485_v11, 0.0 }
  0xe8   : > { %v582_v15 = vpack.c.bf16 %v554_v13, %v553_v12 }
  0xe9   : > { %v524_v16 = vpop.f32.mrf.mxu2 }
  0xea   : > { %v525_v17 = vadd.f32 %v1207_v29, %v524_v16  ;;  %1025 = vmatmul.msk.bf16.gmra.mxu1 %vm607_vm2, %v582_v15  ;;  %v1261_v15 = vld [vmem:[%s1375_s4] ss:$0 sm:$0xff] }
  0xeb   : > { %v487_v18 = vpop.f32.mrf.mxu0 }
  0xec   : > { %v570_v20 = vmax.f32 %v525_v17, 0.0  ;;  %v488_v23 = vadd.f32 %v1207_v29, %v487_v18 }
  0xee   : > { %v590_v21 = vpack.c.bf16 %v570_v20, %v569_v19  ;;  %v555_v26 = vmax.f32 %v488_v23, 0.0 }
  0xf0   : > { %1033 = vmatmul.msk.bf16.gmra.mxu3 %vm607_vm2, %v590_v21 }
  0xf1   : > { %v527_v22 = vpop.f32.mrf.mxu2 }
  0xf2   : > { %v528_v28 = vadd.f32 %v1207_v29, %v527_v22 }
  0xf3   : > { %v489_v24 = vpop.f32.mrf.mxu0 }
  0xf4   : > { %v490_v25 = vadd.f32 %v1207_v29, %v489_v24  ;;  %v571_v34 = vmax.f32 %v528_v28, 0.0 }
  0xf6   : > { %v556_v27 = vmax.f32 %v490_v25, 0.0 }
  0xf8   : > { %v583_v30 = vpack.c.bf16 %v556_v27, %v555_v26 }
  0xf9   : > { %v529_v31 = vpop.f32.mrf.mxu2 }
  0xfa   : > { %v530_v32 = vadd.f32 %v1207_v29, %v529_v31  ;;  %1026 = vmatmul.msk.bf16.gmra.mxu1 %vm607_vm2, %v583_v30 }
  0xfb   : > { %v492_v33 = vpop.f32.mrf.mxu0 }
  0xfc   : > { %v572_v35 = vmax.f32 %v530_v32, 0.0  ;;  %v493_v38 = vadd.f32 %v1207_v29, %v492_v33 }
  0xfe   : > { %v591_v36 = vpack.c.bf16 %v572_v35, %v571_v34  ;;  %v557_v41 = vmax.f32 %v493_v38, 0.0 }
 0x100   : > { %1034 = vmatmul.msk.bf16.gmra.mxu3 %vm607_vm2, %v591_v36 }
 0x101   : > { %v532_v37 = vpop.f32.mrf.mxu2 }
 0x102   : > { %v533_v44 = vadd.f32 %v1207_v29, %v532_v37 }
 0x103   : > { %v494_v39 = vpop.f32.mrf.mxu0 }
 0x104   : > { %v495_v40 = vadd.f32 %v1207_v29, %v494_v39  ;;  %v573_v49 = vmax.f32 %v533_v44, 0.0 }
 0x106   : > { %v558_v42 = vmax.f32 %v495_v40, 0.0 }
 0x108   : > { %v584_v45 = vpack.c.bf16 %v558_v42, %v557_v41 }
 0x109   : > { %v534_v46 = vpop.f32.mrf.mxu2 }
 0x10a   : > { %v535_v47 = vadd.f32 %v1207_v29, %v534_v46  ;;  %1027 = vmatmul.msk.bf16.gmra.mxu1 %vm607_vm2, %v584_v45 }
 0x10b   : > { %v497_v48 = vpop.f32.mrf.mxu0 }
 0x10c   : > { %v574_v50 = vmax.f32 %v535_v47, 0.0  ;;  %v498_v53 = vadd.f32 %v1207_v29, %v497_v48 }
 0x10e   : > { %v592_v51 = vpack.c.bf16 %v574_v50, %v573_v49  ;;  %v559_v56 = vmax.f32 %v498_v53, 0.0 }
 0x110   : > { %1035 = vmatmul.msk.bf16.gmra.mxu3 %vm607_vm2, %v592_v51 }
 0x111   : > { %v537_v52 = vpop.f32.mrf.mxu2 }
 0x112   : > { %v538_v58 = vadd.f32 %v1207_v29, %v537_v52 }
 0x113   : > { %v499_v54 = vpop.f32.mrf.mxu0 }
 0x114   : > { %v500_v55 = vadd.f32 %v1207_v29, %v499_v54  ;;  %v575_v63 = vmax.f32 %v538_v58, 0.0 }
 0x116   : > { %v560_v57 = vmax.f32 %v500_v55, 0.0 }
 0x118   : > { %v585_v59 = vpack.c.bf16 %v560_v57, %v559_v56 }
 0x119   : > { %v539_v60 = vpop.f32.mrf.mxu2 }
 0x11a   : > { %v540_v61 = vadd.f32 %v1207_v29, %v539_v60  ;;  %1028 = vmatmul.msk.bf16.gmra.mxu1 %vm607_vm2, %v585_v59 }
 0x11b   : > { %v502_v62 = vpop.f32.mrf.mxu0 }
 0x11c   : > { %v576_v0 = vmax.f32 %v540_v61, 0.0  ;;  %v503_v3 = vadd.f32 %v1207_v29, %v502_v62 }
 0x11e   : > { %v593_v1 = vpack.c.bf16 %v576_v0, %v575_v63  ;;  %v561_v6 = vmax.f32 %v503_v3, 0.0 }
 0x120   : > { %1036 = vmatmul.msk.bf16.gmra.mxu3 %vm607_vm2, %v593_v1 }
 0x121   : > { %v542_v2 = vpop.f32.mrf.mxu2 }
 0x122   : > { %v543_v8 = vadd.f32 %v1207_v29, %v542_v2 }
 0x123   : > { %v504_v4 = vpop.f32.mrf.mxu0 }
 0x124   : > { %v505_v5 = vadd.f32 %v1207_v29, %v504_v4  ;;  %v577_v12 = vmax.f32 %v543_v8, 0.0 }
 0x126   : > { %v562_v7 = vmax.f32 %v505_v5, 0.0 }
 0x128   : > { %v586_v9 = vpack.c.bf16 %v562_v7, %v561_v6 }
 0x129   : > { %v544_v10 = vpop.f32.mrf.mxu2 }
 0x12a   : > { %v545_v11 = vadd.f32 %v1207_v29, %v544_v10  ;;  %1029 = vmatmul.msk.bf16.gmra.mxu1 %vm607_vm2, %v586_v9 }
 0x12c   : > { %v578_v13 = vmax.f32 %v545_v11, 0.0 }
 0x12e   : > { %v594_v14 = vpack.c.bf16 %v578_v13, %v577_v12 }
 0x130   : > { %1037 = vmatmul.msk.bf16.gmra.mxu3 %vm607_vm2, %v594_v14 }
 0x137   : > { %v665_v16 = vpop.f32.mrf.mxu1 }
 0x138   : > { %v666_v17 = vadd.f32 %v1261_v15, %v665_v16 }
 0x13a   : > { %v745_v18 = vmax.f32 %v666_v17, 0.0  ;;  %1030 = vmatmul.msk.bf16.gmra.mxu1 %vm607_vm2, %v1214_v43 }
 0x13c   : > { %v777_v29 = vpack.c.bf16 %v745_v18, %v745_v18 }
 0x13e   : > { %810 = vst.msk [vmem:[%s1271_s27] sm:$0xf] %vm809_vm3, %v777_v29 }
 0x13f   : > { %v667_v19 = vpop.f32.mrf.mxu1 }
 0x140   : > { %v668_v20 = vadd.f32 %v1261_v15, %v667_v19 }
 0x142   : > { %v746_v21 = vmax.f32 %v668_v20, 0.0 }
 0x144   : > { %v778_v22 = vpack.c.bf16 %v746_v21, %v746_v21 }
 0x146   : > { %811 = vst.msk [vmem:[%s1271_s27 + $0x4] sm:$0xf] %vm809_vm3, %v778_v22 }
 0x147   : > { %v670_v43 = vpop.f32.mrf.mxu1 }
 0x148   : > { %v671_v23 = vadd.f32 %v1261_v15, %v670_v43 }
 0x14a   : > { %v747_v24 = vmax.f32 %v671_v23, 0.0 }
 0x14c   : > { %v779_v25 = vpack.c.bf16 %v747_v24, %v747_v24 }
 0x14e   : > { %812 = vst.msk [vmem:[%s1271_s27 + $0x8] sm:$0xf] %vm809_vm3, %v779_v25 }
 0x14f   : > { %v672_v26 = vpop.f32.mrf.mxu1 }
 0x150   : > { %v673_v27 = vadd.f32 %v1261_v15, %v672_v26 }
 0x152   : > { %v748_v28 = vmax.f32 %v673_v27, 0.0 }
 0x153   : > { %v710_v30 = vpop.f32.mrf.mxu3 }
 0x154   : > { %v780_v31 = vpack.c.bf16 %v748_v28, %v748_v28  ;;  %v711_v32 = vadd.f32 %v1261_v15, %v710_v30 }
 0x156   : > { %813 = vst.msk [vmem:[%s1271_s27 + $0xc] sm:$0xf] %vm809_vm3, %v780_v31  ;;  %v763_v33 = vmax.f32 %v711_v32, 0.0 }
 0x157   : > { %v675_v34 = vpop.f32.mrf.mxu1 }
 0x158   : > { %v795_v35 = vpack.c.bf16 %v763_v33, %v763_v33  ;;  %v676_v36 = vadd.f32 %v1261_v15, %v675_v34 }
 0x15a   : > { %828 = vst.msk [vmem:[%s1271_s27 + $0x48] sm:$0xf] %vm809_vm3, %v795_v35  ;;  %v749_v37 = vmax.f32 %v676_v36, 0.0 }
 0x15b   : > { %v712_v38 = vpop.f32.mrf.mxu3 }
 0x15c   : > { %v781_v39 = vpack.c.bf16 %v749_v37, %v749_v37  ;;  %v713_v40 = vadd.f32 %v1261_v15, %v712_v38 }
 0x15e   : > { %814 = vst.msk [vmem:[%s1271_s27 + $0x10] sm:$0xf] %vm809_vm3, %v781_v39  ;;  %v764_v41 = vmax.f32 %v713_v40, 0.0 }
 0x15f   : > { %v677_v42 = vpop.f32.mrf.mxu1 }
 0x160   : > { %v796_v44 = vpack.c.bf16 %v764_v41, %v764_v41  ;;  %v678_v45 = vadd.f32 %v1261_v15, %v677_v42 }
 0x162   : > { %829 = vst.msk [vmem:[%s1271_s27 + $0x4c] sm:$0xf] %vm809_vm3, %v796_v44  ;;  %v750_v46 = vmax.f32 %v678_v45, 0.0 }
 0x163   : > { %v715_v47 = vpop.f32.mrf.mxu3 }
 0x164   : > { %v782_v48 = vpack.c.bf16 %v750_v46, %v750_v46  ;;  %v716_v49 = vadd.f32 %v1261_v15, %v715_v47 }
 0x166   : > { %815 = vst.msk [vmem:[%s1271_s27 + $0x14] sm:$0xf] %vm809_vm3, %v782_v48  ;;  %v765_v50 = vmax.f32 %v716_v49, 0.0 }
 0x167   : > { %v680_v51 = vpop.f32.mrf.mxu1 }
 0x168   : > { %v797_v52 = vpack.c.bf16 %v765_v50, %v765_v50  ;;  %v681_v53 = vadd.f32 %v1261_v15, %v680_v51 }
 0x16a   : > { %830 = vst.msk [vmem:[%s1271_s27 + $0x50] sm:$0xf] %vm809_vm3, %v797_v52  ;;  %v751_v54 = vmax.f32 %v681_v53, 0.0 }
 0x16b   : > { %v717_v55 = vpop.f32.mrf.mxu3 }
 0x16c   : > { %v783_v56 = vpack.c.bf16 %v751_v54, %v751_v54  ;;  %v718_v57 = vadd.f32 %v1261_v15, %v717_v55 }
 0x16e   : > { %816 = vst.msk [vmem:[%s1271_s27 + $0x18] sm:$0xf] %vm809_vm3, %v783_v56  ;;  %v766_v58 = vmax.f32 %v718_v57, 0.0 }
 0x16f   : > { %v682_v59 = vpop.f32.mrf.mxu1 }
 0x170   : > { %v798_v60 = vpack.c.bf16 %v766_v58, %v766_v58  ;;  %v683_v61 = vadd.f32 %v1261_v15, %v682_v59 }
 0x172   : > { %831 = vst.msk [vmem:[%s1271_s27 + $0x54] sm:$0xf] %vm809_vm3, %v798_v60  ;;  %v752_v62 = vmax.f32 %v683_v61, 0.0 }
 0x173   : > { %v720_v63 = vpop.f32.mrf.mxu3 }
 0x174   : > { %v784_v0 = vpack.c.bf16 %v752_v62, %v752_v62  ;;  %v721_v1 = vadd.f32 %v1261_v15, %v720_v63 }
 0x176   : > { %817 = vst.msk [vmem:[%s1271_s27 + $0x1c] sm:$0xf] %vm809_vm3, %v784_v0  ;;  %v767_v2 = vmax.f32 %v721_v1, 0.0 }
 0x177   : > { %v685_v3 = vpop.f32.mrf.mxu1 }
 0x178   : > { %v799_v4 = vpack.c.bf16 %v767_v2, %v767_v2  ;;  %v686_v5 = vadd.f32 %v1261_v15, %v685_v3 }
 0x17a   : > { %832 = vst.msk [vmem:[%s1271_s27 + $0x58] sm:$0xf] %vm809_vm3, %v799_v4  ;;  %v753_v6 = vmax.f32 %v686_v5, 0.0 }
 0x17b   : > { %v722_v7 = vpop.f32.mrf.mxu3 }
 0x17c   : > { %v785_v8 = vpack.c.bf16 %v753_v6, %v753_v6  ;;  %v723_v9 = vadd.f32 %v1261_v15, %v722_v7 }
 0x17e   : > { %818 = vst.msk [vmem:[%s1271_s27 + $0x20] sm:$0xf] %vm809_vm3, %v785_v8  ;;  %v768_v10 = vmax.f32 %v723_v9, 0.0 }
 0x17f   : > { %v687_v11 = vpop.f32.mrf.mxu1 }
 0x180   : > { %v800_v12 = vpack.c.bf16 %v768_v10, %v768_v10  ;;  %v688_v13 = vadd.f32 %v1261_v15, %v687_v11 }
 0x182   : > { %833 = vst.msk [vmem:[%s1271_s27 + $0x5c] sm:$0xf] %vm809_vm3, %v800_v12  ;;  %v754_v14 = vmax.f32 %v688_v13, 0.0 }
 0x183   : > { %v725_v16 = vpop.f32.mrf.mxu3 }
 0x184   : > { %v786_v17 = vpack.c.bf16 %v754_v14, %v754_v14  ;;  %v726_v18 = vadd.f32 %v1261_v15, %v725_v16 }
 0x186   : > { %819 = vst.msk [vmem:[%s1271_s27 + $0x24] sm:$0xf] %vm809_vm3, %v786_v17  ;;  %v769_v29 = vmax.f32 %v726_v18, 0.0 }
 0x187   : > { %v690_v19 = vpop.f32.mrf.mxu1 }
 0x188   : > { %v801_v20 = vpack.c.bf16 %v769_v29, %v769_v29  ;;  %v691_v21 = vadd.f32 %v1261_v15, %v690_v19 }
 0x18a   : > { %834 = vst.msk [vmem:[%s1271_s27 + $0x60] sm:$0xf] %vm809_vm3, %v801_v20  ;;  %v755_v22 = vmax.f32 %v691_v21, 0.0 }
 0x18b   : > { %v727_v43 = vpop.f32.mrf.mxu3 }
 0x18c   : > { %v787_v23 = vpack.c.bf16 %v755_v22, %v755_v22  ;;  %v728_v24 = vadd.f32 %v1261_v15, %v727_v43 }
 0x18e   : > { %820 = vst.msk [vmem:[%s1271_s27 + $0x28] sm:$0xf] %vm809_vm3, %v787_v23  ;;  %v770_v25 = vmax.f32 %v728_v24, 0.0 }
 0x18f   : > { %v692_v26 = vpop.f32.mrf.mxu1 }
 0x190   : > { %v802_v27 = vpack.c.bf16 %v770_v25, %v770_v25  ;;  %v693_v28 = vadd.f32 %v1261_v15, %v692_v26 }
 0x192   : > { %835 = vst.msk [vmem:[%s1271_s27 + $0x64] sm:$0xf] %vm809_vm3, %v802_v27  ;;  %v756_v30 = vmax.f32 %v693_v28, 0.0 }
 0x193   : > { %v730_v31 = vpop.f32.mrf.mxu3 }
 0x194   : > { %v788_v32 = vpack.c.bf16 %v756_v30, %v756_v30  ;;  %v731_v33 = vadd.f32 %v1261_v15, %v730_v31 }
 0x196   : > { %821 = vst.msk [vmem:[%s1271_s27 + $0x2c] sm:$0xf] %vm809_vm3, %v788_v32  ;;  %v771_v34 = vmax.f32 %v731_v33, 0.0 }
 0x197   : > { %v695_v35 = vpop.f32.mrf.mxu1 }
 0x198   : > { %v803_v36 = vpack.c.bf16 %v771_v34, %v771_v34  ;;  %v696_v37 = vadd.f32 %v1261_v15, %v695_v35 }
 0x19a   : > { %836 = vst.msk [vmem:[%s1271_s27 + $0x68] sm:$0xf] %vm809_vm3, %v803_v36  ;;  %v757_v38 = vmax.f32 %v696_v37, 0.0 }
 0x19b   : > { %v732_v39 = vpop.f32.mrf.mxu3 }
 0x19c   : > { %v789_v40 = vpack.c.bf16 %v757_v38, %v757_v38  ;;  %v733_v41 = vadd.f32 %v1261_v15, %v732_v39 }
 0x19e   : > { %822 = vst.msk [vmem:[%s1271_s27 + $0x30] sm:$0xf] %vm809_vm3, %v789_v40  ;;  %v772_v42 = vmax.f32 %v733_v41, 0.0 }
 0x19f   : > { %v697_v44 = vpop.f32.mrf.mxu1 }
 0x1a0   : > { %v804_v45 = vpack.c.bf16 %v772_v42, %v772_v42  ;;  %v698_v46 = vadd.f32 %v1261_v15, %v697_v44 }
 0x1a2   : > { %837 = vst.msk [vmem:[%s1271_s27 + $0x6c] sm:$0xf] %vm809_vm3, %v804_v45  ;;  %v758_v47 = vmax.f32 %v698_v46, 0.0 }
 0x1a3   : > { %v735_v48 = vpop.f32.mrf.mxu3 }
 0x1a4   : > { %v790_v49 = vpack.c.bf16 %v758_v47, %v758_v47  ;;  %v736_v50 = vadd.f32 %v1261_v15, %v735_v48 }
 0x1a6   : > { %823 = vst.msk [vmem:[%s1271_s27 + $0x34] sm:$0xf] %vm809_vm3, %v790_v49  ;;  %v773_v51 = vmax.f32 %v736_v50, 0.0 }
 0x1a7   : > { %v700_v52 = vpop.f32.mrf.mxu1 }
 0x1a8   : > { %v805_v53 = vpack.c.bf16 %v773_v51, %v773_v51  ;;  %v701_v54 = vadd.f32 %v1261_v15, %v700_v52 }
 0x1aa   : > { %838 = vst.msk [vmem:[%s1271_s27 + $0x70] sm:$0xf] %vm809_vm3, %v805_v53  ;;  %v759_v55 = vmax.f32 %v701_v54, 0.0 }
 0x1ab   : > { %v737_v56 = vpop.f32.mrf.mxu3 }
 0x1ac   : > { %v791_v57 = vpack.c.bf16 %v759_v55, %v759_v55  ;;  %v738_v58 = vadd.f32 %v1261_v15, %v737_v56 }
 0x1ae   : > { %824 = vst.msk [vmem:[%s1271_s27 + $0x38] sm:$0xf] %vm809_vm3, %v791_v57  ;;  %v774_v59 = vmax.f32 %v738_v58, 0.0 }
 0x1af   : > { %v702_v60 = vpop.f32.mrf.mxu1 }
 0x1b0   : > { %v806_v61 = vpack.c.bf16 %v774_v59, %v774_v59  ;;  %v703_v62 = vadd.f32 %v1261_v15, %v702_v60 }
 0x1b2   : > { %839 = vst.msk [vmem:[%s1271_s27 + $0x74] sm:$0xf] %vm809_vm3, %v806_v61  ;;  %v760_v63 = vmax.f32 %v703_v62, 0.0 }
 0x1b3   : > { %v740_v0 = vpop.f32.mrf.mxu3 }
 0x1b4   : > { %v792_v1 = vpack.c.bf16 %v760_v63, %v760_v63  ;;  %v741_v2 = vadd.f32 %v1261_v15, %v740_v0 }
 0x1b6   : > { %825 = vst.msk [vmem:[%s1271_s27 + $0x3c] sm:$0xf] %vm809_vm3, %v792_v1  ;;  %v775_v3 = vmax.f32 %v741_v2, 0.0 }
 0x1b7   : > { %v705_v4 = vpop.f32.mrf.mxu1 }
 0x1b8   : > { %v807_v5 = vpack.c.bf16 %v775_v3, %v775_v3  ;;  %v706_v6 = vadd.f32 %v1261_v15, %v705_v4 }
 0x1ba   : > { %840 = vst.msk [vmem:[%s1271_s27 + $0x78] sm:$0xf] %vm809_vm3, %v807_v5  ;;  %v761_v7 = vmax.f32 %v706_v6, 0.0 }
 0x1bb   : > { %v742_v8 = vpop.f32.mrf.mxu3 }
 0x1bc   : > { %v793_v9 = vpack.c.bf16 %v761_v7, %v761_v7  ;;  %v743_v10 = vadd.f32 %v1261_v15, %v742_v8 }
 0x1be   : > { %826 = vst.msk [vmem:[%s1271_s27 + $0x40] sm:$0xf] %vm809_vm3, %v793_v9  ;;  %v776_v11 = vmax.f32 %v743_v10, 0.0 }
 0x1bf   : > { %v707_v12 = vpop.f32.mrf.mxu1 }
 0x1c0   : > { %v808_v13 = vpack.c.bf16 %v776_v11, %v776_v11  ;;  %v708_v14 = vadd.f32 %v1261_v15, %v707_v12 }
 0x1c2   : > { %841 = vst.msk [vmem:[%s1271_s27 + $0x7c] sm:$0xf] %vm809_vm3, %v808_v13  ;;  %v762_v16 = vmax.f32 %v708_v14, 0.0 }
 0x1c4   : > { %v794_v17 = vpack.c.bf16 %v762_v16, %v762_v16 }
 0x1c6   : > { %827 = vst.msk [vmem:[%s1271_s27 + $0x44] sm:$0xf] %vm809_vm3, %v794_v17 }
 0x1c7 PF: > { %s15_s18 = sadd.s32 1, %s1092_s18  }
 0x1c8   : > { %p12_p4 = scmp.ge.s32.totalorder %s15_s18, 4  }
 0x1ca   :  { %14 = sbr.rel (!%p12_p4) target bundleno = 1 (0x1), region = 70 }

// kernel: srflownet_normal_flow.34
= control target key start
LH: loop header
LB: loop body
LE: loop exit
PB: predicated region body
PF: predicated region fallthrough
CT: control target
= control target key end

     0   :  { %s3171_s24 = smov 0   ;;  %s4167_s0 = inlined_call_operand.vmem [shape: bf16[2,288,48], index: 0, kind: input, shape index: {}]   ;;  %s4168_s1 = inlined_call_operand.vmem [shape: bf16[3,48,6], index: 1, kind: input, shape index: {}]   ;;  %s4169_s2 = inlined_call_operand.vmem [shape: bf16[3,48,6], index: 2, kind: input, shape index: {}]   ;;  %s4170_s3 = inlined_call_operand.vmem [shape: f32[1,6], index: 3, kind: input, shape index: {}]   ;;  %s4171_s4 = inlined_call_operand.vmem [shape: f32[1,6], index: 4, kind: input, shape index: {}]   ;;  %s4172_s5 = inlined_call_operand.vmem [shape: f32[2,256,6], index: 5, kind: input, shape index: {}]   ;;  %s4173_s6 = inlined_call_operand.vmem [shape: f32[2,256,6], index: 6, kind: output, shape index: {0}]   ;;  %s4174_s7 = inlined_call_operand.vmem [shape: f32[2,1,6], index: 7, kind: output, shape index: {1}]  }
   0x1 LB: > { %s2486_s25 = sadd.s32 4294967295, %s3129_s24   ;;  %p2490_p0 = scmp.ge.s32.totalorder %s3129_s24, 1  ;;  %s3129_s24 = sphi %s3171_s24, %s18_s24  }
   0x2   : > { %p250_p1 = scmp.lt.s32.totalorder %s3129_s24, 3 }
   0x4   : > { %p251_p2 = pnand %p2490_p0, %p250_p1 }
   0x6   : > { %254 = sbr.rel (%p251_p2) target bundleno = 597 (0x255), region = 44 }
   0xb   : > { %v2878_v0 = vld [vmem:[%s4168_s1 + $0x28] sm:$0xff]  ;;  %v2874_v1 = vld [vmem:[%s4168_s1 + $0x10] sm:$0xff]  ;;  %p290_p3 = scmp.lt.s32.totalorder %s2486_s25, 1  ;;  %v2877_v2 = vld [vmem:[%s4168_s1 + $0x20] sm:$0xff]  ;;  %vm454_vm0 = vcmask 392192   ;;  %vm2226_vm5 = vcmask 48128  }
   0xc   : > { %508 = vmatpush.bf16.msra.mxu0 %v2878_v0  ;;  %2907 = vmatpush.bf16.msra.mxu2 %v2878_v0  ;;  %v2873_v3 = vld [vmem:[%s4168_s1 + $0x8] sm:$0xff]  ;;  %v2876_v4 = vld [vmem:[%s4168_s1 + $0x18] sm:$0xff]  ;;  %v2872_v5 = vld [vmem:[%s4168_s1] sm:$0xff] }
   0xd   : > { %s4190_s25 = smov (!%p290_p3, %s2486_s25), 1  ;;  %623 = vmatpush.bf16.msra.mxu1 %v2874_v1  ;;  %2910 = vmatpush.bf16.msra.mxu3 %v2874_v1  ;;  %v2903_v6 = vld [vmem:[%s4169_s2 + $0x28] sm:$0xff]  ;;  %v2900_v7 = vld [vmem:[%s4169_s2 + $0x10] sm:$0xff]  ;;  %v2906_v12 = vld [vmem:[%s4169_s2 + $0x40] sm:$0xff] }
   0xe   : > { %s2913_s11 = smul.u32 144, %s4190_s25  ;;  %v2902_v13 = vld [vmem:[%s4169_s2 + $0x20] sm:$0xff]  ;;  %v2899_v16 = vld [vmem:[%s4169_s2 + $0x8] sm:$0xff]  ;;  %v2905_v17 = vld [vmem:[%s4169_s2 + $0x38] sm:$0xff]  ;;  %s2854_s27 = sshll.u32 %s4190_s25, 8 }
   0xf   : > { %v2897_v18 = vld [vmem:[%s4168_s1 + $0x40] sm:$0xff]  ;;  %v2901_v23 = vld [vmem:[%s4169_s2 + $0x18] sm:$0xff]  ;;  %v2904_v25 = vld [vmem:[%s4169_s2 + $0x30] sm:$0xff]  ;;  %s3520_s9 = scalar_lea.vmem %s4172_s5, %s2854_s27  ;;  %s3537_s12 = scalar_lea.vmem %s4173_s6, %s2854_s27 }
  0x10   : > { %509 = vmatpush.bf16.msra.mxu0 %v2877_v2  ;;  %2908 = vmatpush.bf16.msra.mxu2 %v2877_v2  ;;  %s3200_s16 = scalar_lea.vmem %s4167_s0, %s2913_s11  ;;  %v2898_v24 = vld [vmem:[%s4169_s2] sm:$0xff]  ;;  %v2896_v28 = vld [vmem:[%s4168_s1 + $0x38] sm:$0xff]  ;;  %v2895_v33 = vld [vmem:[%s4168_s1 + $0x30] sm:$0xff]  ;;  %s307_s23 = scalar_lea.vmem %s4174_s7, %s4190_s25 }
  0x11   : > { %624 = vmatpush.bf16.msra.mxu1 %v2873_v3  ;;  %2911 = vmatpush.bf16.msra.mxu3 %v2873_v3  ;;  %v3212_v8 = vld [vmem:[%s3200_s16 + $0x8] sm:$0xff]  ;;  %v3218_v10 = vld [vmem:[%s3200_s16] sm:$0xff]  ;;  %v3238_v14 = vld [vmem:[%s3200_s16 + $0x10] sm:$0xff] }
  0x12   : > { %v3215_v9 = vld [vmem:[%s3200_s16 + $0x48] sm:$0xff]  ;;  %v3221_v11 = vld [vmem:[%s3200_s16 + $0x40] sm:$0xff]  ;;  %v3241_v15 = vld [vmem:[%s3200_s16 + $0x50] sm:$0xff] }
  0x13   : > { %v3261_v19 = vld [vmem:[%s3200_s16 + $0x18] sm:$0xff]  ;;  %v3275_v21 = vld [vmem:[%s3200_s16 + $0x20] sm:$0xff]  ;;  %v3298_v26 = vld [vmem:[%s3200_s16 + $0x28] sm:$0xff] }
  0x14   : > { %510 = vmatpush.bf16.msra.mxu0 %v2876_v4  ;;  %2909 = vmatpush.bf16.msra.mxu2 %v2876_v4  ;;  %v3264_v20 = vld [vmem:[%s3200_s16 + $0x58] sm:$0xff]  ;;  %v3278_v22 = vld [vmem:[%s3200_s16 + $0x60] sm:$0xff]  ;;  %v3301_v27 = vld [vmem:[%s3200_s16 + $0x68] sm:$0xff] }
  0x15   : > { %625 = vmatpush.bf16.msra.mxu1 %v2872_v5  ;;  %2912 = vmatpush.bf16.msra.mxu3 %v2872_v5  ;;  %v3315_v29 = vld [vmem:[%s3200_s16 + $0x30] sm:$0xff]  ;;  %v3329_v31 = vld [vmem:[%s3200_s16 + $0x38] sm:$0xff]  ;;  %v2875_v34 = vld [vmem:[%s3200_s16 + $0x80] sm:$0xff] }
  0x16   : > { %v3318_v30 = vld [vmem:[%s3200_s16 + $0x70] sm:$0xff]  ;;  %v2871_v32 = vld [vmem:[%s3200_s16 + $0x78] sm:$0xff]  ;;  %v2881_v60 = vld [vmem:[%s3200_s16 + $0x20] sm:$0xff] }
  0x17   : > { %2578 = vmatmul.msk.bf16.vlgmr.msra.gmra.mxu0 %vm454_vm0, %v3212_v8  ;;  %2586 = vmatmul.msk.bf16.vlgmr.msra.gmra.mxu2 %vm454_vm0, %v3215_v9  ;;  %v2879_v35 = vld [vmem:[%s3200_s16 + $0x10] sm:$0xff]  ;;  %v2880_v47 = vld [vmem:[%s3200_s16 + $0x18] sm:$0xff] }
  0x18   : > { %1192 = vmatpush.bf16.msrb.mxu0 %v2900_v7  ;;  %2610 = vmatmul.msk.bf16.vlgmr.msra.gmra.mxu1 %vm454_vm0, %v3218_v10 }
  0x19   : > { %1085 = vmatpush.bf16.msrb.mxu3 %v2903_v6  ;;  %1306 = vmatpush.bf16.msrb.mxu1 %v2906_v12 }
  0x1a   : > { %2618 = vmatmul.msk.bf16.vlgmr.msra.gmra.mxu3 %vm454_vm0, %v3221_v11  ;;  %897 = vmatpush.bf16.msrb.mxu2 %v2897_v18 }
  0x1c   : > { %1193 = vmatpush.bf16.msrb.mxu0 %v2899_v16 }
  0x1d   : > { %1086 = vmatpush.bf16.msrb.mxu3 %v2902_v13  ;;  %1307 = vmatpush.bf16.msrb.mxu1 %v2905_v17 }
  0x1e   : > { %898 = vmatpush.bf16.msrb.mxu2 %v2896_v28 }
  0x20   : > { %1194 = vmatpush.bf16.msrb.mxu0 %v2898_v24 }
  0x21   : > { %1087 = vmatpush.bf16.msrb.mxu3 %v2901_v23  ;;  %1308 = vmatpush.bf16.msrb.mxu1 %v2904_v25 }
  0x22   : > { %899 = vmatpush.bf16.msrb.mxu2 %v2895_v33 }
  0x27   : > { %2579 = vmatmul.msk.bf16.gmra.mxu0 %vm454_vm0, %v3238_v14  ;;  %2587 = vmatmul.msk.bf16.gmra.mxu2 %vm454_vm0, %v3241_v15 }
  0x28   : > { %2611 = vmatmul.msk.bf16.gmra.mxu1 %vm454_vm0, %v3212_v8 }
  0x2a   : > { %2619 = vmatmul.msk.bf16.gmra.mxu3 %vm454_vm0, %v3215_v9 }
  0x37   : > { %2580 = vmatmul.msk.bf16.gmra.mxu0 %vm454_vm0, %v3261_v19  ;;  %2588 = vmatmul.msk.bf16.gmra.mxu2 %vm454_vm0, %v3264_v20 }
  0x38   : > { %2612 = vmatmul.msk.bf16.gmra.mxu1 %vm454_vm0, %v3238_v14 }
  0x3a   : > { %2620 = vmatmul.msk.bf16.gmra.mxu3 %vm454_vm0, %v3241_v15 }
  0x47   : > { %2581 = vmatmul.msk.bf16.gmra.mxu0 %vm454_vm0, %v3275_v21  ;;  %2589 = vmatmul.msk.bf16.gmra.mxu2 %vm454_vm0, %v3278_v22 }
  0x48   : > { %2613 = vmatmul.msk.bf16.gmra.mxu1 %vm454_vm0, %v3261_v19 }
  0x4a   : > { %2621 = vmatmul.msk.bf16.gmra.mxu3 %vm454_vm0, %v3264_v20 }
  0x57   : > { %2582 = vmatmul.msk.bf16.gmra.mxu0 %vm454_vm0, %v3298_v26  ;;  %2590 = vmatmul.msk.bf16.gmra.mxu2 %vm454_vm0, %v3301_v27 }
  0x58   : > { %2614 = vmatmul.msk.bf16.gmra.mxu1 %vm454_vm0, %v3275_v21 }
  0x5a   : > { %2622 = vmatmul.msk.bf16.gmra.mxu3 %vm454_vm0, %v3278_v22 }
  0x67   : > { %2583 = vmatmul.msk.bf16.gmra.mxu0 %vm454_vm0, %v3315_v29  ;;  %2591 = vmatmul.msk.bf16.gmra.mxu2 %vm454_vm0, %v3318_v30 }
  0x68   : > { %2615 = vmatmul.msk.bf16.gmra.mxu1 %vm454_vm0, %v3298_v26 }
  0x6a   : > { %2623 = vmatmul.msk.bf16.gmra.mxu3 %vm454_vm0, %v3301_v27 }
  0x77   : > { %2584 = vmatmul.msk.bf16.gmra.mxu0 %vm454_vm0, %v3329_v31  ;;  %2592 = vmatmul.msk.bf16.gmra.mxu2 %vm454_vm0, %v2871_v32 }
  0x78   : > { %2616 = vmatmul.msk.bf16.gmra.mxu1 %vm454_vm0, %v3315_v29 }
  0x7a   : > { %2624 = vmatmul.msk.bf16.gmra.mxu3 %vm454_vm0, %v3318_v30 }
  0x87   : > { %2585 = vmatmul.msk.bf16.gmra.mxu0 %vm454_vm0, %v3221_v11  ;;  %2593 = vmatmul.msk.bf16.gmra.mxu2 %vm454_vm0, %v2875_v34  ;;  %v2883_v34 = vld [vmem:[%s3200_s16 + $0x30] sm:$0xff] }
  0x88   : > { %2617 = vmatmul.msk.bf16.gmra.mxu1 %vm454_vm0, %v3329_v31 }
  0x8a   : > { %2625 = vmatmul.msk.bf16.gmra.mxu3 %vm454_vm0, %v2871_v32 }
  0x94   : > { %v512_v36 = vpop.f32.mrf.mxu0 }
  0x95   : > { %v627_v37 = vpop.f32.mrf.mxu1 }
  0x96   : > { %v3350_v38 = vadd.f32 %v627_v37, %v512_v36 }
  0x97   : > { %2708 = vmatmul.msk.bf16.vlgmr.msrb.gmra.mxu2 %vm454_vm0, %v2879_v35  ;;  %2770 = vmatmul.msk.bf16.vlgmr.msrb.gmra.mxu0 %vm454_vm0, %v3218_v10  ;;  %v2882_v10 = vld [vmem:[%s3200_s16 + $0x28] sm:$0xff] }
  0x98   : > { %2804 = vmatmul.msk.bf16.vlgmr.msrb.gmra.mxu1 %vm454_vm0, %v2879_v35 }
  0x9a   : > { %2742 = vmatmul.msk.bf16.vlgmr.msrb.gmra.mxu3 %vm454_vm0, %v3212_v8  ;;  %v552_v39 = vpop.f32.mrf.mxu2 }
  0x9c   : > { %v514_v42 = vpop.f32.mrf.mxu0 }
  0x9d   : > { %v667_v40 = vpop.f32.mrf.mxu3  ;;  %v629_v43 = vpop.f32.mrf.mxu1 }
  0x9e   : > { %v3358_v41 = vadd.f32 %v667_v40, %v552_v39  ;;  %v3360_v44 = vadd.f32 %v629_v43, %v514_v42 }
  0xa2   : > { %v554_v45 = vpop.f32.mrf.mxu2 }
  0xa4   : > { %v517_v49 = vpop.f32.mrf.mxu0 }
  0xa5   : > { %v669_v46 = vpop.f32.mrf.mxu3  ;;  %v632_v50 = vpop.f32.mrf.mxu1 }
  0xa6   : > { %v3363_v48 = vadd.f32 %v669_v46, %v554_v45  ;;  %v3365_v51 = vadd.f32 %v632_v50, %v517_v49  ;;  %v2884_v50 = vld [vmem:[%s3200_s16 + $0x38] sm:$0xff] }
  0xa7   : > { %2709 = vmatmul.msk.bf16.gmra.mxu2 %vm454_vm0, %v2880_v47  ;;  %2771 = vmatmul.msk.bf16.gmra.mxu0 %vm454_vm0, %v3212_v8 }
  0xa8   : > { %2805 = vmatmul.msk.bf16.gmra.mxu1 %vm454_vm0, %v2880_v47 }
  0xaa   : > { %2743 = vmatmul.msk.bf16.gmra.mxu3 %vm454_vm0, %v3238_v14  ;;  %v557_v52 = vpop.f32.mrf.mxu2 }
  0xac   : > { %v519_v55 = vpop.f32.mrf.mxu0 }
  0xad   : > { %v672_v53 = vpop.f32.mrf.mxu3  ;;  %v634_v56 = vpop.f32.mrf.mxu1 }
  0xae   : > { %v3373_v54 = vadd.f32 %v672_v53, %v557_v52  ;;  %v3375_v57 = vadd.f32 %v634_v56, %v519_v55 }
  0xb2   : > { %v559_v58 = vpop.f32.mrf.mxu2 }
  0xb4   : > { %v522_v62 = vpop.f32.mrf.mxu0 }
  0xb5   : > { %v674_v59 = vpop.f32.mrf.mxu3  ;;  %v637_v63 = vpop.f32.mrf.mxu1 }
  0xb6   : > { %v3378_v61 = vadd.f32 %v674_v59, %v559_v58  ;;  %v3380_v0 = vadd.f32 %v637_v63, %v522_v62 }
  0xb7   : > { %2710 = vmatmul.msk.bf16.gmra.mxu2 %vm454_vm0, %v2881_v60  ;;  %2772 = vmatmul.msk.bf16.gmra.mxu0 %vm454_vm0, %v3238_v14 }
  0xb8   : > { %2806 = vmatmul.msk.bf16.gmra.mxu1 %vm454_vm0, %v2881_v60 }
  0xba   : > { %2744 = vmatmul.msk.bf16.gmra.mxu3 %vm454_vm0, %v3261_v19  ;;  %v562_v1 = vpop.f32.mrf.mxu2 }
  0xbc   : > { %v524_v4 = vpop.f32.mrf.mxu0 }
  0xbd   : > { %v677_v2 = vpop.f32.mrf.mxu3  ;;  %v639_v5 = vpop.f32.mrf.mxu1 }
  0xbe   : > { %v3388_v3 = vadd.f32 %v677_v2, %v562_v1  ;;  %v3390_v6 = vadd.f32 %v639_v5, %v524_v4  ;;  %v2885_v4 = vld [vmem:[%s3200_s16 + $0x40] sm:$0xff] }
  0xc2   : > { %v564_v7 = vpop.f32.mrf.mxu2 }
  0xc4   : > { %v527_v13 = vpop.f32.mrf.mxu0 }
  0xc5   : > { %v679_v8 = vpop.f32.mrf.mxu3  ;;  %v642_v14 = vpop.f32.mrf.mxu1 }
  0xc6   : > { %v3393_v12 = vadd.f32 %v679_v8, %v564_v7  ;;  %v3395_v16 = vadd.f32 %v642_v14, %v527_v13 }
  0xc7   : > { %2711 = vmatmul.msk.bf16.gmra.mxu2 %vm454_vm0, %v2882_v10  ;;  %2773 = vmatmul.msk.bf16.gmra.mxu0 %vm454_vm0, %v3261_v19 }
  0xc8   : > { %2807 = vmatmul.msk.bf16.gmra.mxu1 %vm454_vm0, %v2882_v10 }
  0xca   : > { %2745 = vmatmul.msk.bf16.gmra.mxu3 %vm454_vm0, %v3275_v21  ;;  %v567_v17 = vpop.f32.mrf.mxu2 }
  0xcc   : > { %v529_v24 = vpop.f32.mrf.mxu0 }
  0xcd   : > { %v682_v18 = vpop.f32.mrf.mxu3  ;;  %v644_v25 = vpop.f32.mrf.mxu1 }
  0xce   : > { %v3403_v23 = vadd.f32 %v682_v18, %v567_v17  ;;  %v3405_v28 = vadd.f32 %v644_v25, %v529_v24 }
  0xd2   : > { %v569_v32 = vpop.f32.mrf.mxu2 }
  0xd4   : > { %v532_v19 = vpop.f32.mrf.mxu0 }
  0xd5   : > { %v684_v33 = vpop.f32.mrf.mxu3  ;;  %v647_v36 = vpop.f32.mrf.mxu1 }
  0xd6   : > { %v3408_v35 = vadd.f32 %v684_v33, %v569_v32  ;;  %v3410_v37 = vadd.f32 %v647_v36, %v532_v19  ;;  %v2886_v33 = vld [vmem:[%s3200_s16 + $0x48] sm:$0xff] }
  0xd7   : > { %2712 = vmatmul.msk.bf16.gmra.mxu2 %vm454_vm0, %v2883_v34  ;;  %2774 = vmatmul.msk.bf16.gmra.mxu0 %vm454_vm0, %v3275_v21 }
  0xd8   : > { %2808 = vmatmul.msk.bf16.gmra.mxu1 %vm454_vm0, %v2883_v34 }
  0xda   : > { %2746 = vmatmul.msk.bf16.gmra.mxu3 %vm454_vm0, %v3298_v26  ;;  %v572_v39 = vpop.f32.mrf.mxu2 }
  0xdc   : > { %v534_v43 = vpop.f32.mrf.mxu0 }
  0xdd   : > { %v687_v40 = vpop.f32.mrf.mxu3  ;;  %v649_v45 = vpop.f32.mrf.mxu1 }
  0xde   : > { %v3418_v42 = vadd.f32 %v687_v40, %v572_v39  ;;  %v3420_v46 = vadd.f32 %v649_v45, %v534_v43 }
  0xe2   : > { %v574_v47 = vpop.f32.mrf.mxu2 }
  0xe4   : > { %v537_v21 = vpop.f32.mrf.mxu0 }
  0xe5   : > { %v689_v49 = vpop.f32.mrf.mxu3  ;;  %v652_v53 = vpop.f32.mrf.mxu1 }
  0xe6   : > { %v3423_v52 = vadd.f32 %v689_v49, %v574_v47  ;;  %v3425_v55 = vadd.f32 %v652_v53, %v537_v21  ;;  %v2887_v53 = vld [vmem:[%s3200_s16 + $0x50] sm:$0xff] }
  0xe7   : > { %2713 = vmatmul.msk.bf16.gmra.mxu2 %vm454_vm0, %v2884_v50  ;;  %2775 = vmatmul.msk.bf16.gmra.mxu0 %vm454_vm0, %v3298_v26 }
  0xe8   : > { %2809 = vmatmul.msk.bf16.gmra.mxu1 %vm454_vm0, %v2884_v50 }
  0xea   : > { %2747 = vmatmul.msk.bf16.gmra.mxu3 %vm454_vm0, %v3315_v29  ;;  %v577_v56 = vpop.f32.mrf.mxu2 }
  0xec   : > { %v539_v60 = vpop.f32.mrf.mxu0 }
  0xed   : > { %v692_v58 = vpop.f32.mrf.mxu3  ;;  %v654_v62 = vpop.f32.mrf.mxu1 }
  0xee   : > { %v3433_v59 = vadd.f32 %v692_v58, %v577_v56  ;;  %v3435_v63 = vadd.f32 %v654_v62, %v539_v60 }
  0xf2   : > { %v579_v1 = vpop.f32.mrf.mxu2 }
  0xf4   : > { %v542_v26 = vpop.f32.mrf.mxu0 }
  0xf5   : > { %v694_v2 = vpop.f32.mrf.mxu3  ;;  %v657_v7 = vpop.f32.mrf.mxu1 }
  0xf6   : > { %v3438_v5 = vadd.f32 %v694_v2, %v579_v1  ;;  %v3440_v8 = vadd.f32 %v657_v7, %v542_v26  ;;  %v3479_v2 = vld [vmem:[%s4171_s4] ss:$0 sm:$0xff] }
  0xf7   : > { %2714 = vmatmul.msk.bf16.gmra.mxu2 %vm454_vm0, %v2885_v4  ;;  %2776 = vmatmul.msk.bf16.gmra.mxu0 %vm454_vm0, %v3315_v29 }
  0xf8   : > { %2810 = vmatmul.msk.bf16.gmra.mxu1 %vm454_vm0, %v2885_v4 }
  0xfa   : > { %2748 = vmatmul.msk.bf16.gmra.mxu3 %vm454_vm0, %v3329_v31  ;;  %v582_v10 = vpop.f32.mrf.mxu2 }
  0xfc   : > { %v544_v17 = vpop.f32.mrf.mxu0 }
  0xfd   : > { %v697_v13 = vpop.f32.mrf.mxu3  ;;  %v659_v18 = vpop.f32.mrf.mxu1 }
  0xfe   : > { %v3448_v14 = vadd.f32 %v697_v13, %v582_v10  ;;  %v3450_v24 = vadd.f32 %v659_v18, %v544_v17  ;;  %v2888_v18 = vld [vmem:[%s3200_s16 + $0x58] sm:$0xff] }
 0x100   : > { %4175 = vst [vmem:[#allocation2_spill] sm:$0xff] %v3448_v14 }
 0x102   : > { %v584_v25 = vpop.f32.mrf.mxu2 }
 0x104   : > { %v547_v29 = vpop.f32.mrf.mxu0 }
 0x105   : > { %v699_v32 = vpop.f32.mrf.mxu3  ;;  %v662_v19 = vpop.f32.mrf.mxu1 }
 0x106   : > { %v3453_v34 = vadd.f32 %v699_v32, %v584_v25  ;;  %v3455_v36 = vadd.f32 %v662_v19, %v547_v29 }
 0x107   : > { %2715 = vmatmul.msk.bf16.gmra.mxu2 %vm454_vm0, %v2886_v33  ;;  %2777 = vmatmul.msk.bf16.gmra.mxu0 %vm454_vm0, %v3329_v31 }
 0x108   : > { %4176 = vst [vmem:[#allocation3_spill] sm:$0xff] %v3453_v34  ;;  %2811 = vmatmul.msk.bf16.gmra.mxu1 %vm454_vm0, %v2886_v33 }
 0x10a   : > { %2749 = vmatmul.msk.bf16.gmra.mxu3 %vm454_vm0, %v3221_v11  ;;  %v587_v39 = vpop.f32.mrf.mxu2 }
 0x10c   : > { %v549_v45 = vpop.f32.mrf.mxu0 }
 0x10d   : > { %v702_v40 = vpop.f32.mrf.mxu3  ;;  %v664_v47 = vpop.f32.mrf.mxu1 }
 0x10e   : > { %v3463_v43 = vadd.f32 %v702_v40, %v587_v39  ;;  %v3465_v49 = vadd.f32 %v664_v47, %v549_v45 }
 0x110   : > { %4177 = vst [vmem:[#allocation4_spill] sm:$0xff] %v3463_v43 }
 0x112   : > { %v589_v50 = vpop.f32.mrf.mxu2 }
 0x114   : > { %v1196_v58 = vpop.f32.mrf.mxu0 }
 0x115   : > { %v704_v21 = vpop.f32.mrf.mxu3  ;;  %v1310_v31 = vpop.f32.mrf.mxu1 }
 0x116   : > { %v3468_v56 = vadd.f32 %v704_v21, %v589_v50 }
 0x117   : > { %2716 = vmatmul.msk.bf16.gmra.mxu2 %vm454_vm0, %v2887_v53  ;;  %2778 = vmatmul.msk.bf16.gmra.mxu0 %vm454_vm0, %v3221_v11 }
 0x118   : > { %4178 = vst [vmem:[#allocation5_spill] sm:$0xff] %v3468_v56  ;;  %2812 = vmatmul.msk.bf16.gmra.mxu1 %vm454_vm0, %v2887_v53 }
 0x11a   : > { %2750 = vmatmul.msk.bf16.gmra.mxu3 %vm454_vm0, %v3215_v9  ;;  %v901_v60 = vpop.f32.mrf.mxu2 }
 0x11c   : > { %v1198_v4 = vpop.f32.mrf.mxu0 }
 0x11d   : > { %v1089_v62 = vpop.f32.mrf.mxu3  ;;  %v1312_v26 = vpop.f32.mrf.mxu1 }
 0x11e   : > { %v1197_v1 = vadd.f32 %v1196_v58, %v1089_v62 }
 0x120   : > { %v1390_v7 = vadd.f32 %v1310_v31, %v1197_v1 }
 0x122   : > { %v1426_v10 = vadd.f32 %v3479_v2, %v1390_v7  ;;  %v3482_v11 = vpop.f32.mrf.mxu2 }
 0x124   : > { %v1458_v13 = vadd.f32 2.0, %v1426_v10  ;;  %v1201_v33 = vpop.f32.mrf.mxu0  ;;  %v2889_v10 = vld [vmem:[%s3200_s16 + $0x60] sm:$0xff] }
 0x125   : > { %v1091_v17 = vpop.f32.mrf.mxu3  ;;  %v1315_v29 = vpop.f32.mrf.mxu1 }
 0x126   : > { %v2820_v25 = vmul.f32 -1.442695, %v1458_v13  ;;  %v1199_v32 = vadd.f32 %v1198_v4, %v1091_v17 }
 0x127   : > { %2717 = vmatmul.msk.bf16.gmra.mxu2 %vm454_vm0, %v2888_v18  ;;  %2779 = vmatmul.msk.bf16.gmra.mxu0 %vm454_vm0, %v3215_v9 }
 0x128   : > { %2924 = vpow2.f32 %v2820_v25  ;;  %v1391_v19 = vadd.f32 %v1312_v26, %v1199_v32  ;;  %2813 = vmatmul.msk.bf16.gmra.mxu1 %vm454_vm0, %v2888_v18 }
 0x12a   : > { %v1427_v39 = vadd.f32 %v3479_v2, %v1391_v19  ;;  %2751 = vmatmul.msk.bf16.gmra.mxu3 %vm454_vm0, %v3241_v15  ;;  %v3492_v45 = vpop.f32.mrf.mxu2 }
 0x12c   : > { %v1459_v40 = vadd.f32 2.0, %v1427_v39  ;;  %v1203_v58 = vpop.f32.mrf.mxu0 }
 0x12d   : > { %v1094_v47 = vpop.f32.mrf.mxu3  ;;  %v1317_v62 = vpop.f32.mrf.mxu1 }
 0x12e   : > { %v2925_v50 = vpop.eup %2924  ;;  %v2821_v21 = vmul.f32 -1.442695, %v1459_v40  ;;  %v1202_v53 = vadd.f32 %v1201_v33, %v1094_v47  ;;  %v981_v40 = vadd.f32 %v901_v60, %v3350_v38  ;;  %v3509_v47 = vld [vmem:[%s4170_s3] ss:$0 sm:$0xff] }
 0x12f   : > { %v1586_v31 = vadd.f32 1.0, %v2925_v50 }
 0x130   : > { %2926 = vpow2.f32 %v2821_v21  ;;  %v1392_v9 = vadd.f32 %v1315_v29, %v1202_v53 }
 0x131   : > { %2928 = vrcp.f32 %v1586_v31  ;;  %v1629_v53 = vand.u32 2147483648, %v1586_v31  ;;  %v1627_v38 = vand.u32 2147483647, %v1586_v31  ;;  %vm1623_vm2 = vweird.f32 %v1586_v31 }
 0x132   : > { %v1428_v1 = vadd.f32 %v3479_v2, %v1392_v9  ;;  %v3495_v26 = vpop.f32.mrf.mxu2 }
 0x133   : > { %vm1628_vm4 = vcmp.eq.f32.partialorder %v1627_v38, 8.507059e+37 }
 0x134   : > { %v1460_v4 = vadd.f32 2.0, %v1428_v1  ;;  %v1206_v25 = vpop.f32.mrf.mxu0  ;;  %v1017_v1 = vadd.f32 %v3509_v47, %v981_v40 }
 0x135   : > { %v1096_v7 = vpop.f32.mrf.mxu3  ;;  %v1320_v19 = vpop.f32.mrf.mxu1 }
 0x136   : > { %v2927_v13 = vpop.eup %2926  ;;  %v2822_v17 = vmul.f32 -1.442695, %v1460_v4  ;;  %v1204_v18 = vadd.f32 %v1203_v58, %v1096_v7 }
 0x137   : > { %v2929_v32 = vpop.eup %2928  ;;  %v3498_v33 = vadd.f32 1.0, %v2927_v13  ;;  %2718 = vmatmul.msk.bf16.gmra.mxu2 %vm454_vm0, %v2889_v10  ;;  %2780 = vmatmul.msk.bf16.gmra.mxu0 %vm454_vm0, %v3241_v15 }
 0x138   : > { %v1619_v39 = vmul.f32 %v2929_v32, %v1586_v31  ;;  %2930 = vpow2.f32 %v2822_v17  ;;  %v1393_v29 = vadd.f32 %v1317_v62, %v1204_v18  ;;  %2814 = vmatmul.msk.bf16.gmra.mxu1 %vm454_vm0, %v2889_v10  ;;  %vm1624_vm1 = vweird.f32 %v2929_v32  ;;  %v2130_v17 = vld [vmem:[%s3520_s9] sm:$0xff] }
 0x139   : > { %2932 = vrcp.f32 %v3498_v33  ;;  %vm1625_vm3 = vmor %vm1623_vm2, %vm1624_vm1  ;;  %v1630_v18 = vor.u32 1.1754944e-38, %v1629_v53  ;;  %v982_v31 = vadd.f32 %v3482_v11, %v3360_v44  ;;  %v2162_v40 = vadd.f32 %v2130_v17, %v1017_v1 }
 0x13a   : > { %v1620_v50 = vsub.f32 1.0, %v1619_v39  ;;  %v1429_v21 = vadd.f32 %v3479_v2, %v1393_v29  ;;  %2752 = vmatmul.msk.bf16.gmra.mxu3 %vm454_vm0, %v3264_v20  ;;  %v3522_v58 = vpop.f32.mrf.mxu2  ;;  %vm1638_vm7 = vweird.f32 %v3498_v33 }
 0x13c   : > { %v1621_v15 = vmul.f32 %v2929_v32, %v1620_v50  ;;  %v1461_v60 = vadd.f32 2.0, %v1429_v21  ;;  %v1208_v10 = vpop.f32.mrf.mxu0 }
 0x13d   : > { %v1099_v62 = vpop.f32.mrf.mxu3  ;;  %v1322_v50 = vpop.f32.mrf.mxu1 }
 0x13e   : > { %v2931_v9 = vpop.eup %2930  ;;  %v1622_v4 = vadd.f32 %v2929_v32, %v1621_v15  ;;  %v2823_v7 = vmul.f32 -1.442695, %v1461_v60  ;;  %v1207_v29 = vadd.f32 %v1206_v25, %v1099_v62  ;;  %v1642_v25 = vand.u32 2147483647, %v3498_v33 }
 0x13f   : > { %v2933_v13 = vpop.eup %2932  ;;  %v3526_v39 = vadd.f32 1.0, %v2931_v9  ;;  %v2890_v9 = vld [vmem:[%s3200_s16 + $0x68] sm:$0xff] }
 0x140   : > { %v1626_v21 = vsel %vm1625_vm3, %v2929_v32, %v1622_v4  ;;  %v1634_v56 = vmul.f32 %v2933_v13, %v3498_v33  ;;  %2934 = vpow2.f32 %v2823_v7  ;;  %v1644_v32 = vand.u32 2147483648, %v3498_v33  ;;  %v2131_v4 = vld [vmem:[%s3520_s9 + $0x8] sm:$0xff] }
 0x141   : > { %v1631_v43 = vsel %vm1628_vm4, %v1630_v18, %v1626_v21  ;;  %2936 = vrcp.f32 %v3526_v39  ;;  %v1394_v44 = vadd.f32 %v1320_v19, %v1207_v29  ;;  %vm1639_vm6 = vweird.f32 %v2933_v13 }
 0x142   : > { %v2098_v15 = vadd.f32 0.0001, %v1631_v43  ;;  %v1635_v60 = vsub.f32 1.0, %v1634_v56  ;;  %v3541_v38 = vpop.f32.mrf.mxu2  ;;  %v1018_v43 = vadd.f32 %v3509_v47, %v982_v31  ;;  %vm1640_vm8 = vmor %vm1638_vm7, %vm1639_vm6  ;;  %vm1643_vm9 = vcmp.eq.f32.partialorder %v1642_v25, 8.507059e+37 }
 0x143   : > { %v1430_v56 = vadd.f32 %v3479_v2, %v1394_v44  ;;  %v1645_v29 = vor.u32 1.1754944e-38, %v1644_v32  ;;  %vm1653_vm11 = vweird.f32 %v3526_v39 }
 0x144   : > { %v2194_v11 = vmul.f32 %v2162_v40, %v2098_v15  ;;  %v1636_v53 = vmul.f32 %v2933_v13, %v1635_v60  ;;  %v1211_v19 = vpop.f32.mrf.mxu0  ;;  %2938 = vlog2.f32 %v2098_v15 }
 0x145   : > { %v1101_v62 = vpop.f32.mrf.mxu3  ;;  %v1462_v31 = vadd.f32 2.0, %v1430_v56  ;;  %v1325_v40 = vpop.f32.mrf.mxu1 }
 0x146   : > { %v2935_v1 = vpop.eup %2934  ;;  %2227 = vst.msk [vmem:[%s3537_s12] sm:$0xff] %vm2226_vm5, %v2194_v11  ;;  %v1637_v7 = vadd.f32 %v2933_v13, %v1636_v53  ;;  %v1209_v17 = vadd.f32 %v1208_v10, %v1101_v62  ;;  %v2163_v11 = vadd.f32 %v2131_v4, %v1018_v43  ;;  %v983_v10 = vadd.f32 %v3492_v45, %v3365_v51  ;;  %v2132_v4 = vld [vmem:[%s3520_s9 + $0x10] sm:$0xff] }
 0x147   : > { %v2937_v18 = vpop.eup %2936  ;;  %v3550_v21 = vadd.f32 1.0, %v2935_v1  ;;  %2719 = vmatmul.msk.bf16.gmra.mxu2 %vm454_vm0, %v2890_v9  ;;  %2781 = vmatmul.msk.bf16.gmra.mxu0 %vm454_vm0, %v3264_v20  ;;  %v2824_v15 = vmul.f32 -1.442695, %v1462_v31 }
 0x148   : > { %v1641_v60 = vsel %vm1640_vm8, %v2933_v13, %v1637_v7  ;;  %v1649_v44 = vmul.f32 %v2937_v18, %v3526_v39  ;;  %v1395_v34 = vadd.f32 %v1322_v50, %v1209_v17  ;;  %2815 = vmatmul.msk.bf16.gmra.mxu1 %vm454_vm0, %v2890_v9  ;;  %v1657_v13 = vand.u32 2147483647, %v3526_v39 }
 0x149   : > { %v1646_v14 = vsel %vm1643_vm9, %v1645_v29, %v1641_v60  ;;  %2940 = vrcp.f32 %v3550_v21  ;;  %v1659_v50 = vand.u32 2147483648, %v3526_v39  ;;  %vm1654_vm10 = vweird.f32 %v2937_v18 }
 0x14a   : > { %v2099_v33 = vadd.f32 0.0001, %v1646_v14  ;;  %v1650_v25 = vsub.f32 1.0, %v1649_v44  ;;  %2753 = vmatmul.msk.bf16.gmra.mxu3 %vm454_vm0, %v3278_v22  ;;  %v1431_v32 = vadd.f32 %v3479_v2, %v1395_v34  ;;  %v3565_v51 = vpop.f32.mrf.mxu2  ;;  %v2939_v43 = vpop.eup %2938  ;;  %v1019_v56 = vadd.f32 %v3509_v47, %v983_v10  ;;  %vm1655_vm12 = vmor %vm1653_vm11, %vm1654_vm10 }
 0x14b   : > { %v1660_v7 = vor.u32 1.1754944e-38, %v1659_v50  ;;  %vm1658_vm13 = vcmp.eq.f32.partialorder %v1657_v13, 8.507059e+37  ;;  %v984_v10 = vadd.f32 %v3495_v26, %v3375_v57  ;;  %vm1668_vm15 = vweird.f32 %v3550_v21 }
 0x14c   : > { %v2195_v53 = vmul.f32 %v2163_v11, %v2099_v33  ;;  %2942 = vlog2.f32 %v2099_v33  ;;  %v1651_v20 = vmul.f32 %v2937_v18, %v1650_v25  ;;  %v1463_v14 = vadd.f32 2.0, %v1431_v32  ;;  %v1213_v34 = vpop.f32.mrf.mxu0 }
 0x14d   : > { %2944 = vpow2.f32 %v2824_v15  ;;  %v1104_v45 = vpop.f32.mrf.mxu3  ;;  %v1327_v29 = vpop.f32.mrf.mxu1  ;;  %v2260_v11 = vmul.f32 0.6931472, %v2939_v43  ;;  %v1020_v43 = vadd.f32 %v3509_v47, %v984_v10 }
 0x14e   : > { %2228 = vst.msk [vmem:[%s3537_s12 + $0x8] sm:$0xff] %vm2226_vm5, %v2195_v53  ;;  %v1652_v62 = vadd.f32 %v2937_v18, %v1651_v20  ;;  %v1212_v9 = vadd.f32 %v1211_v19, %v1104_v45  ;;  %v2825_v17 = vmul.f32 -1.442695, %v1463_v14  ;;  %v2164_v19 = vadd.f32 %v2132_v4, %v1019_v56 }
 0x14f   : > { %v2941_v1 = vpop.eup %2940  ;;  %v2323_v14 = vsel %vm2226_vm5, %v2260_v11, 0.0  ;;  %v985_v11 = vadd.f32 %v3522_v58, %v3380_v0 }
 0x150   : > { %v1656_v31 = vsel %vm1655_vm12, %v2937_v18, %v1652_v62  ;;  %v1664_v60 = vmul.f32 %v2941_v1, %v3550_v21  ;;  %v1396_v44 = vadd.f32 %v1325_v40, %v1212_v9  ;;  %2946 = vpow2.f32 %v2825_v17  ;;  %v2891_v9 = vld [vmem:[%s3200_s16 + $0x70] sm:$0xff] }
 0x151   : > { %v1661_v33 = vsel %vm1658_vm13, %v1660_v7, %v1656_v31  ;;  %vm1669_vm14 = vweird.f32 %v2941_v1  ;;  %v1672_v18 = vand.u32 2147483647, %v3550_v21  ;;  %v1674_v40 = vand.u32 2147483648, %v3550_v21 }
 0x152   : > { %v2943_v39 = vpop.eup %2942  ;;  %v2100_v25 = vadd.f32 0.0001, %v1661_v33  ;;  %v1665_v15 = vsub.f32 1.0, %v1664_v60  ;;  %v1432_v32 = vadd.f32 %v3479_v2, %v1396_v44  ;;  %v3580_v26 = vpop.f32.mrf.mxu2  ;;  %v2133_v60 = vld [vmem:[%s3520_s9 + $0x18] sm:$0xff]  ;;  %vm1670_vm1 = vmor %vm1668_vm15, %vm1669_vm14 }
 0x153   : > { %v2945_v50 = vpop.eup %2944  ;;  %v2262_v53 = vmul.f32 0.6931472, %v2943_v39  ;;  %v1675_v44 = vor.u32 1.1754944e-38, %v1674_v40  ;;  %vm1673_vm2 = vcmp.eq.f32.partialorder %v1672_v18, 8.507059e+37  ;;  %v2134_v40 = vld [vmem:[%s3520_s9 + $0x20] sm:$0xff] }
 0x154   : > { %v2196_v13 = vmul.f32 %v2164_v19, %v2100_v25  ;;  %2948 = vlog2.f32 %v2100_v25  ;;  %v1666_v20 = vmul.f32 %v2941_v1, %v1665_v15  ;;  %v3578_v57 = vadd.f32 1.0, %v2945_v50  ;;  %v1216_v17 = vpop.f32.mrf.mxu0 }
 0x155   : > { %v2324_v45 = vsel %vm2226_vm5, %v2262_v53, 0.0  ;;  %v1464_v56 = vadd.f32 2.0, %v1432_v32  ;;  %v1106_v62 = vpop.f32.mrf.mxu3  ;;  %v1330_v10 = vpop.f32.mrf.mxu1  ;;  %v2165_v32 = vadd.f32 %v2133_v60, %v1020_v43  ;;  %v1021_v53 = vadd.f32 %v3509_v47, %v985_v11 }
 0x156   : > { %v2325_v4 = vadd.f32 %v2324_v45, %v2323_v14  ;;  %2229 = vst.msk [vmem:[%s3537_s12 + $0x10] sm:$0xff] %vm2226_vm5, %v2196_v13  ;;  %v1667_v7 = vadd.f32 %v2941_v1, %v1666_v20  ;;  %2950 = vrcp.f32 %v3578_v57  ;;  %v2947_v31 = vpop.eup %2946  ;;  %v1214_v25 = vadd.f32 %v1213_v34, %v1106_v62 }
 0x157   : > { %v2826_v33 = vmul.f32 -1.442695, %v1464_v56  ;;  %v3594_v19 = vadd.f32 1.0, %v2947_v31  ;;  %2720 = vmatmul.msk.bf16.gmra.mxu2 %vm454_vm0, %v2891_v9  ;;  %2782 = vmatmul.msk.bf16.gmra.mxu0 %vm454_vm0, %v3278_v22  ;;  %v1687_v20 = vand.u32 2147483647, %v3578_v57  ;;  %vm1683_vm4 = vweird.f32 %v3578_v57 }
 0x158   : > { %v1671_v39 = vsel %vm1670_vm1, %v2941_v1, %v1667_v7  ;;  %2816 = vmatmul.msk.bf16.gmra.mxu1 %vm454_vm0, %v2891_v9  ;;  %v1397_v58 = vadd.f32 %v1327_v29, %v1214_v25  ;;  %v1689_v29 = vand.u32 2147483648, %v3578_v57 }
 0x159   : > { %v1676_v15 = vsel %vm1673_vm2, %v1675_v44, %v1671_v39  ;;  %2952 = vpow2.f32 %v2826_v33  ;;  %v2166_v44 = vadd.f32 %v2134_v40, %v1021_v53  ;;  %vm3622_vm6 = vcmp.eq.f32.partialorder %v1687_v20, 8.507059e+37  ;;  %v2892_v20 = vld [vmem:[%s3200_s16 + $0x78] sm:$0xff] }
 0x15a   : > { %v2949_v21 = vpop.eup %2948  ;;  %v2101_v50 = vadd.f32 0.0001, %v1676_v15  ;;  %2954 = vrcp.f32 %v3594_v19  ;;  %2754 = vmatmul.msk.bf16.gmra.mxu3 %vm454_vm0, %v3301_v27  ;;  %v3604_v18 = vpop.f32.mrf.mxu2  ;;  %v1433_v43 = vadd.f32 %v3479_v2, %v1397_v58  ;;  %vm1698_vm9 = vweird.f32 %v3594_v19 }
 0x15b   : > { %v2264_v0 = vmul.f32 0.6931472, %v2949_v21 }
 0x15c   : > { %v2951_v34 = vpop.eup %2950  ;;  %v2197_v1 = vmul.f32 %v2165_v32, %v2101_v50  ;;  %2956 = vlog2.f32 %v2101_v50  ;;  %v1218_v62 = vpop.f32.mrf.mxu0  ;;  %v1465_v33 = vadd.f32 2.0, %v1433_v43  ;;  %v1690_v32 = vor.u32 1.1754944e-38, %v1689_v29 }
 0x15d   : > { %v2326_v22 = vsel %vm2226_vm5, %v2264_v0, 0.0  ;;  %v1679_v13 = vmul.f32 %v2951_v34, %v3578_v57  ;;  %v1109_v14 = vpop.f32.mrf.mxu3  ;;  %v3614_v31 = vpop.f32.mrf.mxu1  ;;  %vm1684_vm3 = vweird.f32 %v2951_v34 }
 0x15e   : > { %v2327_v45 = vadd.f32 %v2326_v22, %v2325_v4  ;;  %2230 = vst.msk [vmem:[%s3537_s12 + $0x18] sm:$0xff] %vm2226_vm5, %v2197_v1  ;;  %v1217_v56 = vadd.f32 %v1216_v17, %v1109_v14  ;;  %v986_v4 = vadd.f32 %v3541_v38, %v3390_v6  ;;  %v2827_v58 = vmul.f32 -1.442695, %v1465_v33  ;;  %vm1685_vm7 = vmor %vm1683_vm4, %vm1684_vm3 }
 0x15f   : > { %v2953_v9 = vpop.eup %2952  ;;  %v1680_v7 = vsub.f32 1.0, %v1679_v13  ;;  %v1702_v6 = vand.u32 2147483647, %v3594_v19  ;;  %v1704_v38 = vand.u32 2147483648, %v3594_v19 }
 0x160   : > { %v2955_v60 = vpop.eup %2954  ;;  %v3616_v11 = vadd.f32 1.0, %v2953_v9  ;;  %v1398_v39 = vadd.f32 %v1330_v10, %v1217_v56  ;;  %v1022_v43 = vadd.f32 %v3509_v47, %v986_v4 }
 0x161   : > { %v1681_v25 = vmul.f32 %v2951_v34, %v1680_v7  ;;  %v1694_v15 = vmul.f32 %v2955_v60, %v3594_v19  ;;  %vm1699_vm8 = vweird.f32 %v2955_v60  ;;  %vm1703_vm11 = vcmp.eq.f32.partialorder %v1702_v6, 8.507059e+37 }
 0x162   : > { %v2957_v21 = vpop.eup %2956  ;;  %2958 = vrcp.f32 %v3616_v11  ;;  %v1434_v57 = vadd.f32 %v3479_v2, %v1398_v39  ;;  %v3630_v1 = vpop.f32.mrf.mxu2  ;;  %vm1700_vm10 = vmor %vm1698_vm9, %vm1699_vm8  ;;  %vm1713_vm13 = vweird.f32 %v3616_v11 }
 0x163   : > { %v2266_v50 = vmul.f32 0.6931472, %v2957_v21  ;;  %v1682_v10 = vadd.f32 %v2951_v34, %v1681_v25  ;;  %v1695_v0 = vsub.f32 1.0, %v1694_v15  ;;  %2960 = vpow2.f32 %v2827_v58  ;;  %v2135_v15 = vld [vmem:[%s3520_s9 + $0x28] sm:$0xff] }
 0x164   : > { %v1466_v56 = vadd.f32 2.0, %v1434_v57  ;;  %v1221_v9 = vpop.f32.mrf.mxu0 }
 0x165   : > { %v2328_v53 = vsel %vm2226_vm5, %v2266_v50, 0.0  ;;  %v1686_v22 = vsel %vm1685_vm7, %v2951_v34, %v1682_v10  ;;  %v1696_v40 = vmul.f32 %v2955_v60, %v1695_v0  ;;  %v1111_v13 = vpop.f32.mrf.mxu3  ;;  %v1335_v34 = vpop.f32.mrf.mxu1 }
 0x166   : > { %v3634_v14 = vadd.f32 %v2328_v53, %v2327_v45  ;;  %v1691_v29 = vsel %vm3622_vm6, %v1690_v32, %v1686_v22  ;;  %v1219_v39 = vadd.f32 %v1218_v62, %v1111_v13  ;;  %v1705_v45 = vor.u32 1.1754944e-38, %v1704_v38 }
 0x167   : > { %v2102_v7 = vadd.f32 0.0001, %v1691_v29  ;;  %v1697_v33 = vadd.f32 %v2955_v60, %v1696_v40  ;;  %v2828_v21 = vmul.f32 -1.442695, %v1466_v56  ;;  %2721 = vmatmul.msk.bf16.gmra.mxu2 %vm454_vm0, %v2892_v20  ;;  %2783 = vmatmul.msk.bf16.gmra.mxu0 %vm454_vm0, %v3301_v27  ;;  %v987_v62 = vadd.f32 %v3565_v51, %v3395_v16  ;;  %v2136_v40 = vld [vmem:[%s3520_s9 + $0x30] sm:$0xff] }
 0x168   : > { %v2959_v25 = vpop.eup %2958  ;;  %2817 = vmatmul.msk.bf16.gmra.mxu1 %vm454_vm0, %v2892_v20  ;;  %v1399_v0 = vadd.f32 %v3614_v31, %v1219_v39  ;;  %v1717_v27 = vand.u32 2147483647, %v3616_v11  ;;  %v1719_v16 = vand.u32 2147483648, %v3616_v11 }
 0x169   : > { %v2198_v17 = vmul.f32 %v2166_v44, %v2102_v7  ;;  %2962 = vlog2.f32 %v2102_v7  ;;  %v1701_v32 = vsel %vm1700_vm10, %v2955_v60, %v1697_v33  ;;  %v1709_v4 = vmul.f32 %v2959_v25, %v3616_v11  ;;  %v2961_v44 = vpop.eup %2960 }
 0x16a   : > { %v1706_v19 = vsel %vm1703_vm11, %v1705_v45, %v1701_v32  ;;  %2964 = vpow2.f32 %v2828_v21  ;;  %2755 = vmatmul.msk.bf16.gmra.mxu3 %vm454_vm0, %v3318_v30  ;;  %v2167_v60 = vadd.f32 %v2135_v15, %v1022_v43  ;;  %vm1714_vm12 = vweird.f32 %v2959_v25  ;;  %v3658_v30 = vpop.f32.mrf.mxu2 }
 0x16b   : > { %2231 = vst.msk [vmem:[%s3537_s12 + $0x20] sm:$0xff] %vm2226_vm5, %v2198_v17  ;;  %v2103_v50 = vadd.f32 0.0001, %v1706_v19  ;;  %v1710_v10 = vsub.f32 1.0, %v1709_v4  ;;  %v3656_v51 = vadd.f32 1.0, %v2961_v44  ;;  %v1435_v38 = vadd.f32 %v3479_v2, %v1399_v0  ;;  %vm1715_vm14 = vmor %vm1713_vm13, %vm1714_vm12 }
 0x16c   : > { %v1023_v53 = vadd.f32 %v3509_v47, %v987_v62  ;;  %v1223_v31 = vpop.f32.mrf.mxu0  ;;  %v1720_v33 = vor.u32 1.1754944e-38, %v1719_v16  ;;  %vm1718_vm15 = vcmp.eq.f32.partialorder %v1717_v27, 8.507059e+37  ;;  %v2893_v27 = vld [vmem:[%s3200_s16 + $0x80] sm:$0xff] }
 0x16d   : > { %v2199_v58 = vmul.f32 %v2167_v60, %v2103_v50  ;;  %2966 = vlog2.f32 %v2103_v50  ;;  %v1711_v6 = vmul.f32 %v2959_v25, %v1710_v10  ;;  %v1114_v57 = vpop.f32.mrf.mxu3  ;;  %v1467_v20 = vadd.f32 2.0, %v1435_v38  ;;  %v1337_v43 = vpop.f32.mrf.mxu1 }
 0x16e   : > { %2968 = vrcp.f32 %v3656_v51  ;;  %v1222_v29 = vadd.f32 %v1221_v9, %v1114_v57  ;;  %v2168_v17 = vadd.f32 %v2136_v40, %v1023_v53  ;;  %v988_v50 = vadd.f32 %v3580_v26, %v3405_v28 }
 0x16f   : > { %v2963_v22 = vpop.eup %2962  ;;  %2232 = vst.msk [vmem:[%s3537_s12 + $0x28] sm:$0xff] %vm2226_vm5, %v2199_v58  ;;  %v1712_v13 = vadd.f32 %v2959_v25, %v1711_v6  ;;  %v2829_v45 = vmul.f32 -1.442695, %v1467_v20  ;;  %v1732_v6 = vand.u32 2147483647, %v3656_v51  ;;  %v1734_v28 = vand.u32 2147483648, %v3656_v51 }
 0x170   : > { %v2965_v56 = vpop.eup %2964  ;;  %v2268_v7 = vmul.f32 0.6931472, %v2963_v22  ;;  %v1400_v19 = vadd.f32 %v1335_v34, %v1222_v29  ;;  %v1024_v22 = vadd.f32 %v3509_v47, %v988_v50  ;;  %v3116_v20 = vld [vmem:[%s3200_s16 + $0x70] sm:$0xff]  ;;  %vm1728_vm2 = vweird.f32 %v3656_v51 }
 0x171   : > { %v1716_v39 = vsel %vm1715_vm14, %v2959_v25, %v1712_v13  ;;  %v3668_v15 = vadd.f32 1.0, %v2965_v56  ;;  %v989_v56 = vadd.f32 %v3604_v18, %v3410_v37  ;;  %vm3701_vm3 = vcmp.eq.f32.partialorder %v1732_v6, 8.507059e+37  ;;  %v2137_v18 = vld [vmem:[%s3520_s9 + $0x38] sm:$0xff] }
 0x172   : > { %v2330_v21 = vsel %vm2226_vm5, %v2268_v7, 0.0  ;;  %v1721_v32 = vsel %vm1718_vm15, %v1720_v33, %v1716_v39  ;;  %v3673_v25 = vpop.f32.mrf.mxu2  ;;  %v1436_v38 = vadd.f32 %v3479_v2, %v1400_v19  ;;  %v3696_v33 = vld [vmem:[%s3200_s16 + $0x78] sm:$0xff] }
 0x173   : > { %v2967_v4 = vpop.eup %2966  ;;  %v2331_v11 = vadd.f32 %v2330_v21, %v3634_v14  ;;  %v2104_v9 = vadd.f32 0.0001, %v1721_v32  ;;  %2970 = vrcp.f32 %v3668_v15  ;;  %v1747_v19 = vand.u32 2147483647, %v3668_v15 }
 0x174   : > { %v2969_v62 = vpop.eup %2968  ;;  %v2270_v44 = vmul.f32 0.6931472, %v2967_v4  ;;  %2972 = vpow2.f32 %v2829_v45  ;;  %v1226_v16 = vpop.f32.mrf.mxu0  ;;  %v1468_v13 = vadd.f32 2.0, %v1436_v38  ;;  %v1025_v38 = vadd.f32 %v3509_v47, %v989_v56 }
 0x175   : > { %v2200_v60 = vmul.f32 %v2168_v17, %v2104_v9  ;;  %2974 = vlog2.f32 %v2104_v9  ;;  %v1724_v10 = vmul.f32 %v2969_v62, %v3656_v51  ;;  %v1116_v0 = vpop.f32.mrf.mxu3  ;;  %v3684_v57 = vpop.f32.mrf.mxu1  ;;  %vm1729_vm1 = vweird.f32 %v2969_v62 }
 0x176   : > { %v2332_v14 = vsel %vm2226_vm5, %v2270_v44, 0.0  ;;  %v1224_v26 = vadd.f32 %v1223_v31, %v1116_v0  ;;  %v2830_v17 = vmul.f32 -1.442695, %v1468_v13  ;;  %vm1730_vm4 = vmor %vm1728_vm2, %vm1729_vm1  ;;  %v1749_v44 = vand.u32 2147483648, %v3668_v15  ;;  %v2138_v13 = vld [vmem:[%s3520_s9 + $0x40] sm:$0xff] }
 0x177   : > { %v2333_v58 = vadd.f32 %v2332_v14, %v2331_v11  ;;  %2233 = vst.msk [vmem:[%s3537_s12 + $0x30] sm:$0xff] %vm2226_vm5, %v2200_v60  ;;  %v1725_v34 = vsub.f32 1.0, %v1724_v10  ;;  %2722 = vmatmul.msk.bf16.gmra.mxu2 %vm454_vm0, %v2893_v27  ;;  %2784 = vmatmul.msk.bf16.gmra.mxu0 %vm454_vm0, %v3116_v20  ;;  %vm1743_vm7 = vweird.f32 %v3668_v15  ;;  %vm1748_vm9 = vcmp.eq.f32.partialorder %v1747_v19, 8.507059e+37 }
 0x178   : > { %v1401_v7 = vadd.f32 %v1337_v43, %v1224_v26  ;;  %2818 = vmatmul.msk.bf16.gmra.mxu1 %vm454_vm0, %v2893_v27  ;;  %v1735_v43 = vor.u32 1.1754944e-38, %v1734_v28  ;;  %v1750_v20 = vor.u32 1.1754944e-38, %v1749_v44 }
 0x179   : > { %v2971_v53 = vpop.eup %2970  ;;  %v1726_v40 = vmul.f32 %v2969_v62, %v1725_v34  ;;  %v2169_v34 = vadd.f32 %v2137_v18, %v1024_v22  ;;  %v2894_v18 = vld [vmem:[%s3200_s16 + $0x88] sm:$0xff] }
 0x17a   : > { %v2973_v29 = vpop.eup %2972  ;;  %v1739_v31 = vmul.f32 %v2971_v53, %v3668_v15  ;;  %2756 = vmatmul.msk.bf16.gmra.mxu3 %vm454_vm0, %v3696_v33  ;;  %v1437_v4 = vadd.f32 %v3479_v2, %v1401_v7  ;;  %v3710_v11 = vpop.f32.mrf.mxu2  ;;  %vm1744_vm6 = vweird.f32 %v2971_v53 }
 0x17b   : > { %v2975_v39 = vpop.eup %2974  ;;  %v1727_v45 = vadd.f32 %v2969_v62, %v1726_v40  ;;  %v3705_v51 = vadd.f32 1.0, %v2973_v29  ;;  %vm1745_vm8 = vmor %vm1743_vm7, %vm1744_vm6 }
 0x17c   : > { %v2272_v37 = vmul.f32 0.6931472, %v2975_v39  ;;  %v1740_v32 = vsub.f32 1.0, %v1739_v31  ;;  %v1228_v27 = vpop.f32.mrf.mxu0  ;;  %v1469_v26 = vadd.f32 2.0, %v1437_v4  ;;  %v2170_v39 = vadd.f32 %v2138_v13, %v1025_v38 }
 0x17d   : > { %v1731_v9 = vsel %vm1730_vm4, %v2969_v62, %v1727_v45  ;;  %2976 = vrcp.f32 %v3705_v51  ;;  %v1119_v60 = vpop.f32.mrf.mxu3  ;;  %v1342_v62 = vpop.f32.mrf.mxu1  ;;  %v1762_v19 = vand.u32 2147483647, %v3705_v51  ;;  %v1764_v44 = vand.u32 2147483648, %v3705_v51 }
 0x17e   : > { %v2334_v50 = vsel %vm2226_vm5, %v2272_v37, 0.0  ;;  %v1736_v10 = vsel %vm3701_vm3, %v1735_v43, %v1731_v9  ;;  %v1741_v0 = vmul.f32 %v2971_v53, %v1740_v32  ;;  %2978 = vpow2.f32 %v2830_v17 }
 0x17f   : > { %v2335_v14 = vadd.f32 %v2334_v50, %v2333_v58  ;;  %v2105_v6 = vadd.f32 0.0001, %v1736_v10  ;;  %v1227_v29 = vadd.f32 %v1226_v16, %v1119_v60  ;;  %v2831_v58 = vmul.f32 -1.442695, %v1469_v26 }
 0x180   : > { %v1742_v28 = vadd.f32 %v2971_v53, %v1741_v0  ;;  %v990_v16 = vadd.f32 %v3630_v1, %v3420_v46  ;;  %vm1758_vm11 = vweird.f32 %v3705_v51  ;;  %vm1763_vm13 = vcmp.eq.f32.partialorder %v1762_v19, 8.507059e+37 }
 0x181   : > { %v2201_v40 = vmul.f32 %v2169_v34, %v2105_v6  ;;  %2980 = vlog2.f32 %v2105_v6  ;;  %v1402_v56 = vadd.f32 %v3684_v57, %v1227_v29  ;;  %v991_v34 = vadd.f32 %v3658_v30, %v3425_v55  ;;  %v2139_v55 = vld [vmem:[%s3520_s9 + $0x48] sm:$0xff] }
 0x182   : > { %v1746_v31 = vsel %vm1745_vm8, %v2971_v53, %v1742_v28  ;;  %2982 = vpow2.f32 %v2831_v58  ;;  %v3725_v21 = vpop.f32.mrf.mxu2  ;;  %v1026_v0 = vadd.f32 %v3509_v47, %v990_v16  ;;  %v1765_v30 = vor.u32 1.1754944e-38, %v1764_v44  ;;  %v2140_v16 = vld [vmem:[%s3520_s9 + $0x50] sm:$0xff] }
 0x183   : > { %v2977_v22 = vpop.eup %2976  ;;  %2234 = vst.msk [vmem:[%s3537_s12 + $0x38] sm:$0xff] %vm2226_vm5, %v2201_v40  ;;  %v1751_v7 = vsel %vm1748_vm9, %v1750_v20, %v1746_v31  ;;  %v1438_v53 = vadd.f32 %v3479_v2, %v1402_v56  ;;  %v3118_v40 = vld [vmem:[%s3200_s16 + $0x80] sm:$0xff] }
 0x184   : > { %v2106_v45 = vadd.f32 0.0001, %v1751_v7  ;;  %v1754_v15 = vmul.f32 %v2977_v22, %v3705_v51  ;;  %v2979_v17 = vpop.eup %2978  ;;  %v1231_v4 = vpop.f32.mrf.mxu0  ;;  %vm1759_vm10 = vweird.f32 %v2977_v22  ;;  %v2171_v56 = vadd.f32 %v2139_v55, %v1026_v0 }
 0x185   : > { %v1121_v37 = vpop.f32.mrf.mxu3  ;;  %v3731_v57 = vadd.f32 1.0, %v2979_v17  ;;  %v1470_v60 = vadd.f32 2.0, %v1438_v53  ;;  %v3735_v10 = vpop.f32.mrf.mxu1  ;;  %vm1760_vm12 = vmor %vm1758_vm11, %vm1759_vm10 }
 0x186   : > { %v2202_v43 = vmul.f32 %v2170_v39, %v2106_v45  ;;  %2984 = vlog2.f32 %v2106_v45  ;;  %v1755_v32 = vsub.f32 1.0, %v1754_v15  ;;  %v1229_v50 = vadd.f32 %v1228_v27, %v1121_v37 }
 0x187   : > { %v2981_v9 = vpop.eup %2980  ;;  %2986 = vrcp.f32 %v3731_v57  ;;  %v2832_v6 = vmul.f32 -1.442695, %v1470_v60  ;;  %2723 = vmatmul.msk.bf16.gmra.mxu2 %vm454_vm0, %v2894_v18  ;;  %2785 = vmatmul.msk.bf16.gmra.mxu0 %vm454_vm0, %v3696_v33  ;;  %v1027_v45 = vadd.f32 %v3509_v47, %v991_v34  ;;  %v1777_v19 = vand.u32 2147483647, %v3731_v57 }
 0x188   : > { %v2274_v46 = vmul.f32 0.6931472, %v2981_v9  ;;  %2235 = vst.msk [vmem:[%s3537_s12 + $0x40] sm:$0xff] %vm2226_vm5, %v2202_v43  ;;  %v1756_v1 = vmul.f32 %v2977_v22, %v1755_v32  ;;  %v2983_v27 = vpop.eup %2982  ;;  %v1403_v26 = vadd.f32 %v1342_v62, %v1229_v50  ;;  %2819 = vmatmul.msk.bf16.gmra.mxu1 %vm454_vm0, %v2894_v18  ;;  %v992_v32 = vadd.f32 %v3673_v25, %v3435_v63 }
 0x189   : > { %v3753_v20 = vadd.f32 1.0, %v2983_v27  ;;  %2988 = vpow2.f32 %v2832_v6  ;;  %v2172_v50 = vadd.f32 %v2140_v16, %v1027_v45  ;;  %v993_v25 = vadd.f32 %v3710_v11, %v3440_v8 }
 0x18a   : > { %v2336_v38 = vsel %vm2226_vm5, %v2274_v46, 0.0  ;;  %v1757_v28 = vadd.f32 %v2977_v22, %v1756_v1  ;;  %2757 = vmatmul.msk.bf16.gmra.mxu3 %vm454_vm0, %v3118_v40  ;;  %v1439_v51 = vadd.f32 %v3479_v2, %v1403_v26  ;;  %v3756_v62 = vpop.f32.mrf.mxu2  ;;  %v1779_v46 = vand.u32 2147483648, %v3731_v57 }
 0x18b   : > { %v2337_v13 = vadd.f32 %v2336_v38, %v2335_v14  ;;  %2990 = vrcp.f32 %v3753_v20  ;;  %v1028_v27 = vadd.f32 %v3509_v47, %v992_v32  ;;  %vm1773_vm14 = vweird.f32 %v3731_v57 }
 0x18c   : > { %v2985_v33 = vpop.eup %2984  ;;  %v1761_v29 = vsel %vm1760_vm12, %v2977_v22, %v1757_v28  ;;  %v1471_v15 = vadd.f32 2.0, %v1439_v51  ;;  %v1233_v22 = vpop.f32.mrf.mxu0  ;;  %vm1778_vm15 = vcmp.eq.f32.partialorder %v1777_v19, 8.507059e+37  ;;  %vm1788_vm3 = vweird.f32 %v3753_v20 }
 0x18d   : > { %v2276_v31 = vmul.f32 0.6931472, %v2985_v33  ;;  %v1766_v58 = vsel %vm1763_vm13, %v1765_v30, %v1761_v29  ;;  %v1124_v14 = vpop.f32.mrf.mxu3  ;;  %v2987_v7 = vpop.eup %2986  ;;  %v1792_v30 = vand.u32 2147483647, %v3753_v20  ;;  %v1794_v29 = vand.u32 2147483648, %v3753_v20 }
 0x18e   : > { %v2107_v39 = vadd.f32 0.0001, %v1766_v58  ;;  %v1769_v53 = vmul.f32 %v2987_v7, %v3731_v57  ;;  %v1347_v37 = vpop.f32.mrf.mxu1  ;;  %v2833_v44 = vmul.f32 -1.442695, %v1471_v15  ;;  %v1232_v1 = vadd.f32 %v1231_v4, %v1124_v14 }
 0x18f   : > { %v2338_v17 = vsel %vm2226_vm5, %v2276_v31, 0.0  ;;  %v2989_v60 = vpop.eup %2988  ;;  %vm1774_vm0 = vweird.f32 %v2987_v7  ;;  %v1795_v32 = vor.u32 1.1754944e-38, %v1794_v29  ;;  %vm1793_vm6 = vcmp.eq.f32.partialorder %v1792_v30, 8.507059e+37 }
 0x190   : > { %v2339_v18 = vadd.f32 %v2338_v17, %v2337_v13  ;;  %v2203_v43 = vmul.f32 %v2171_v56, %v2107_v39  ;;  %2992 = vlog2.f32 %v2107_v39  ;;  %v1770_v9 = vsub.f32 1.0, %v1769_v53  ;;  %vm1775_vm1 = vmor %vm1773_vm14, %vm1774_vm0  ;;  %v2141_v17 = vld [vmem:[%s3520_s9 + $0x58] sm:$0xff] }
 0x191   : > { %v2991_v0 = vpop.eup %2990  ;;  %v3769_v6 = vadd.f32 1.0, %v2989_v60  ;;  %2994 = vpow2.f32 %v2833_v44  ;;  %v1404_v38 = vadd.f32 %v3735_v10, %v1232_v1  ;;  %v1780_v13 = vor.u32 1.1754944e-38, %v1779_v46 }
 0x192   : > { %2236 = vst.msk [vmem:[%s3537_s12 + $0x48] sm:$0xff] %vm2226_vm5, %v2203_v43  ;;  %v1771_v34 = vmul.f32 %v2987_v7, %v1770_v9  ;;  %v1784_v63 = vmul.f32 %v2991_v0, %v3753_v20  ;;  %v3776_v28 = vpop.f32.mrf.mxu2  ;;  %vm1789_vm2 = vweird.f32 %v2991_v0  ;;  %v3792_v9 = vld [vmem:[%s4171_s4] ss:$0 sm:$0xff]  ;;  %v2173_v19 = vadd.f32 %v2141_v17, %v1028_v27 }
 0x193   : > { %2996 = vrcp.f32 %v3769_v6  ;;  %v1440_v33 = vadd.f32 %v3479_v2, %v1404_v38  ;;  %vm1790_vm4 = vmor %vm1788_vm3, %vm1789_vm2  ;;  %v1029_v60 = vadd.f32 %v3509_v47, %v993_v25  ;;  %v1809_v27 = vand.u32 2147483648, %v3769_v6 }
 0x194   : > { %v1772_v26 = vadd.f32 %v2987_v7, %v1771_v34  ;;  %v1785_v55 = vsub.f32 1.0, %v1784_v63  ;;  %v1236_v8 = vpop.f32.mrf.mxu0  ;;  %vm1803_vm8 = vweird.f32 %v3769_v6 }
 0x195   : > { %v1126_v4 = vpop.f32.mrf.mxu3  ;;  %v1472_v14 = vadd.f32 2.0, %v1440_v33 }
 0x196   : > { %v2993_v40 = vpop.eup %2992  ;;  %v1776_v10 = vsel %vm1775_vm1, %v2987_v7, %v1772_v26  ;;  %v1234_v51 = vadd.f32 %v1233_v22, %v1126_v4  ;;  %v1350_v57 = vpop.f32.mrf.mxu1  ;;  %v1786_v58 = vmul.f32 %v2991_v0, %v1785_v55  ;;  %v1807_v26 = vand.u32 2147483647, %v3769_v6 }
 0x197   : > { %v2278_v11 = vmul.f32 0.6931472, %v2993_v40  ;;  %v1781_v31 = vsel %vm1778_vm15, %v1780_v13, %v1776_v10  ;;  %v2995_v56 = vpop.eup %2994  ;;  %v2834_v53 = vmul.f32 -1.442695, %v1472_v14  ;;  %v3819_v14 = vld [vmem:[%s4170_s3] ss:$0 sm:$0xff] }
 0x198   : > { %v2108_v45 = vadd.f32 0.0001, %v1781_v31  ;;  %v1405_v15 = vadd.f32 %v1347_v37, %v1234_v51  ;;  %v1787_v16 = vadd.f32 %v2991_v0, %v1786_v58  ;;  %v3786_v7 = vadd.f32 1.0, %v2995_v56 }
 0x199   : > { %v2340_v39 = vsel %vm2226_vm5, %v2278_v11, 0.0  ;;  %v2997_v22 = vpop.eup %2996  ;;  %vm1808_vm10 = vcmp.eq.f32.partialorder %v1807_v26, 8.507059e+37 }
 0x19a   : > { %v2341_v2 = vadd.f32 %v2340_v39, %v2339_v18  ;;  %v2204_v43 = vmul.f32 %v2172_v50, %v2108_v45  ;;  %2998 = vlog2.f32 %v2108_v45  ;;  %v1441_v20 = vadd.f32 %v3792_v9, %v1405_v15  ;;  %v3802_v63 = vpop.f32.mrf.mxu2 }
 0x19b   : > { %v1791_v37 = vsel %vm1790_vm4, %v2991_v0, %v1787_v16  ;;  %v1799_v18 = vmul.f32 %v2997_v22, %v3769_v6  ;;  %3000 = vrcp.f32 %v3786_v7  ;;  %v994_v50 = vadd.f32 %v3725_v21, %v3450_v24  ;;  %v2142_v24 = vld [vmem:[%s3520_s9 + $0x60] sm:$0xff] }
 0x19c   : > { %2237 = vst.msk [vmem:[%s3537_s12 + $0x50] sm:$0xff] %vm2226_vm5, %v2204_v43  ;;  %v1796_v44 = vsel %vm1793_vm6, %v1795_v32, %v1791_v37  ;;  %3002 = vpow2.f32 %v2834_v53  ;;  %v1473_v0 = vadd.f32 2.0, %v1441_v20  ;;  %v1238_v38 = vpop.f32.mrf.mxu0  ;;  %vm1804_vm7 = vweird.f32 %v2997_v22 }
 0x19d   : > { %v1129_v46 = vpop.f32.mrf.mxu3  ;;  %v2109_v1 = vadd.f32 0.0001, %v1796_v44  ;;  %v1800_v34 = vsub.f32 1.0, %v1799_v18  ;;  %v2174_v10 = vadd.f32 %v2142_v24, %v1029_v60  ;;  %vm1805_vm9 = vmor %vm1803_vm8, %vm1804_vm7  ;;  %v1030_v6 = vadd.f32 %v3819_v14, %v994_v50 }
 0x19e   : > { %v1237_v4 = vadd.f32 %v1236_v8, %v1129_v46  ;;  %v3806_v47 = vpop.f32.mrf.mxu1  ;;  %v2835_v40 = vmul.f32 -1.442695, %v1473_v0  ;;  %v1810_v8 = vor.u32 1.1754944e-38, %v1809_v27  ;;  %v1822_v43 = vand.u32 2147483647, %v3786_v7  ;;  %v2143_v27 = vld [vmem:[%s3520_s9 + $0x68] sm:$0xff] }
 0x19f   : > { %v2205_v25 = vmul.f32 %v2173_v19, %v2109_v1  ;;  %3004 = vlog2.f32 %v2109_v1  ;;  %v1801_v21 = vmul.f32 %v2997_v22, %v1800_v34  ;;  %vm1818_vm12 = vweird.f32 %v3786_v7 }
 0x1a0   : > { %v2999_v13 = vpop.eup %2998  ;;  %v1406_v55 = vadd.f32 %v1350_v57, %v1237_v4  ;;  %3006 = vpow2.f32 %v2835_v40  ;;  %vm1823_vm0 = vcmp.eq.f32.partialorder %v1822_v43, 8.507059e+37  ;;  %v2175_v24 = vadd.f32 %v2143_v27, %v1030_v6 }
 0x1a1   : > { %v3001_v30 = vpop.eup %3000  ;;  %v2280_v33 = vmul.f32 0.6931472, %v2999_v13  ;;  %2238 = vst.msk [vmem:[%s3537_s12 + $0x58] sm:$0xff] %vm2226_vm5, %v2205_v25  ;;  %v1802_v11 = vadd.f32 %v2997_v22, %v1801_v21  ;;  %v995_v40 = vadd.f32 %v3756_v62, %v3455_v36 }
 0x1a2   : > { %v1814_v29 = vmul.f32 %v3001_v30, %v3786_v7  ;;  %v1442_v51 = vadd.f32 %v3792_v9, %v1406_v55  ;;  %v3003_v31 = vpop.eup %3002  ;;  %vm1819_vm11 = vweird.f32 %v3001_v30  ;;  %v3828_v60 = vpop.f32.mrf.mxu2 }
 0x1a3   : > { %v2342_v58 = vsel %vm2226_vm5, %v2280_v33, 0.0  ;;  %v1806_v57 = vsel %vm1805_vm9, %v2997_v22, %v1802_v11  ;;  %v3822_v15 = vadd.f32 1.0, %v3003_v31  ;;  %v1824_v22 = vand.u32 2147483648, %v3786_v7  ;;  %vm1820_vm13 = vmor %vm1818_vm12, %vm1819_vm11 }
 0x1a4   : > { %v2343_v56 = vadd.f32 %v2342_v58, %v2341_v2  ;;  %v1811_v39 = vsel %vm1808_vm10, %v1810_v8, %v1806_v57  ;;  %v1815_v45 = vsub.f32 1.0, %v1814_v29  ;;  %v1474_v32 = vadd.f32 2.0, %v1442_v51  ;;  %v1241_v20 = vpop.f32.mrf.mxu0 }
 0x1a5   : > { %v1131_v17 = vpop.f32.mrf.mxu3  ;;  %v3005_v16 = vpop.eup %3004  ;;  %v2110_v53 = vadd.f32 0.0001, %v1811_v39  ;;  %3008 = vrcp.f32 %v3822_v15  ;;  %v1825_v4 = vor.u32 1.1754944e-38, %v1824_v22  ;;  %v1837_v57 = vand.u32 2147483647, %v3822_v15 }
 0x1a6   : > { %v2282_v37 = vmul.f32 0.6931472, %v3005_v16  ;;  %v1816_v18 = vmul.f32 %v3001_v30, %v1815_v45  ;;  %v1355_v2 = vpop.f32.mrf.mxu1  ;;  %v3007_v19 = vpop.eup %3006  ;;  %v1239_v50 = vadd.f32 %v1238_v38, %v1131_v17  ;;  %v2836_v0 = vmul.f32 -1.442695, %v1474_v32 }
 0x1a7   : > { %v2206_v44 = vmul.f32 %v2174_v10, %v2110_v53  ;;  %3010 = vlog2.f32 %v2110_v53  ;;  %v3831_v34 = vadd.f32 1.0, %v3007_v19  ;;  %v1839_v36 = vand.u32 2147483648, %v3822_v15 }
 0x1a8   : > { %v2344_v46 = vsel %vm2226_vm5, %v2282_v37, 0.0  ;;  %v1817_v1 = vadd.f32 %v3001_v30, %v1816_v18  ;;  %v1407_v13 = vadd.f32 %v3806_v47, %v1239_v50  ;;  %v996_v39 = vadd.f32 %v3776_v28, %v3465_v49  ;;  %v2144_v18 = vld [vmem:[%s3520_s9 + $0x70] sm:$0xff] }
 0x1a9   : > { %v2345_v26 = vadd.f32 %v2344_v46, %v2343_v56  ;;  %2239 = vst.msk [vmem:[%s3537_s12 + $0x60] sm:$0xff] %vm2226_vm5, %v2206_v44  ;;  %3012 = vrcp.f32 %v3831_v34  ;;  %v1031_v56 = vadd.f32 %v3819_v14, %v995_v40  ;;  %vm1833_vm15 = vweird.f32 %v3822_v15 }
 0x1aa   : > { %v1821_v25 = vsel %vm1820_vm13, %v3001_v30, %v1817_v1  ;;  %3014 = vpow2.f32 %v2836_v0  ;;  %v1443_v51 = vadd.f32 %v3792_v9, %v1407_v13  ;;  %v3852_v22 = vpop.f32.mrf.mxu2  ;;  %vm3859_vm1 = vcmp.eq.f32.partialorder %v1837_v57, 8.507059e+37 }
 0x1ab   : > { %v1826_v7 = vsel %vm1823_vm0, %v1825_v4, %v1821_v25  ;;  %v3009_v38 = vpop.eup %3008  ;;  %v1840_v28 = vor.u32 1.1754944e-38, %v1839_v36  ;;  %v1852_v50 = vand.u32 2147483647, %v3831_v34  ;;  %v2176_v4 = vadd.f32 %v2144_v18, %v1031_v56 }
 0x1ac   : > { %v2111_v21 = vadd.f32 0.0001, %v1826_v7  ;;  %v1829_v11 = vmul.f32 %v3009_v38, %v3822_v15  ;;  %v1243_v30 = vpop.f32.mrf.mxu0  ;;  %v1475_v45 = vadd.f32 2.0, %v1443_v51  ;;  %vm1834_vm14 = vweird.f32 %v3009_v38 }
 0x1ad   : > { %v1134_v55 = vpop.f32.mrf.mxu3  ;;  %v3011_v33 = vpop.eup %3010  ;;  %vm1835_vm2 = vmor %vm1833_vm15, %vm1834_vm14  ;;  %v1854_v15 = vand.u32 2147483648, %v3831_v34  ;;  %v1032_v7 = vadd.f32 %v3819_v14, %v996_v39  ;;  %vm1848_vm4 = vweird.f32 %v3831_v34  ;;  %vm1853_vm7 = vcmp.eq.f32.partialorder %v1852_v50, 8.507059e+37 }
 0x1ae   : > { %v1242_v10 = vadd.f32 %v1241_v20, %v1134_v55  ;;  %v2284_v8 = vmul.f32 0.6931472, %v3011_v33  ;;  %v2207_v29 = vmul.f32 %v2175_v24, %v2111_v21  ;;  %3016 = vlog2.f32 %v2111_v21  ;;  %v1357_v31 = vpop.f32.mrf.mxu1 }
 0x1af   : > { %v1830_v58 = vsub.f32 1.0, %v1829_v11  ;;  %v3013_v47 = vpop.eup %3012  ;;  %v2837_v20 = vmul.f32 -1.442695, %v1475_v45  ;;  %v1855_v11 = vor.u32 1.1754944e-38, %v1854_v15 }
 0x1b0   : > { %v1408_v62 = vadd.f32 %v1355_v2, %v1242_v10  ;;  %v2346_v6 = vsel %vm2226_vm5, %v2284_v8, 0.0  ;;  %2240 = vst.msk [vmem:[%s3537_s12 + $0x68] sm:$0xff] %vm2226_vm5, %v2207_v29  ;;  %v3015_v17 = vpop.eup %3014  ;;  %v1844_v43 = vmul.f32 %v3013_v47, %v3831_v34  ;;  %vm1849_vm3 = vweird.f32 %v3013_v47 }
 0x1b1   : > { %v2347_v16 = vadd.f32 %v2346_v6, %v2345_v26  ;;  %v1831_v53 = vmul.f32 %v3009_v38, %v1830_v58  ;;  %v3855_v32 = vadd.f32 1.0, %v3015_v17  ;;  %vm1850_vm6 = vmor %vm1848_vm4, %vm1849_vm3 }
 0x1b2   : > { %v1444_v37 = vadd.f32 %v3792_v9, %v1408_v62  ;;  %v1845_v19 = vsub.f32 1.0, %v1844_v43  ;;  %v3876_v39 = vpop.f32.mrf.mxu2 }
 0x1b3   : > { %v1832_v2 = vadd.f32 %v3009_v38, %v1831_v53  ;;  %3018 = vrcp.f32 %v3855_v32  ;;  %vm1863_vm9 = vweird.f32 %v3855_v32 }
 0x1b4   : > { %v3017_v44 = vpop.eup %3016  ;;  %v1846_v26 = vmul.f32 %v3013_v47, %v1845_v19  ;;  %3020 = vpow2.f32 %v2837_v20  ;;  %v1246_v27 = vpop.f32.mrf.mxu0  ;;  %v1476_v24 = vadd.f32 2.0, %v1444_v37  ;;  %v1867_v20 = vand.u32 2147483647, %v3855_v32 }
 0x1b5   : > { %v1136_v46 = vpop.f32.mrf.mxu3  ;;  %v2286_v1 = vmul.f32 0.6931472, %v3017_v44  ;;  %v1836_v0 = vsel %vm1835_vm2, %v3009_v38, %v1832_v2  ;;  %v2145_v38 = vld [vmem:[%s3520_s9 + $0x78] sm:$0xff]  ;;  %v1869_v37 = vand.u32 2147483648, %v3855_v32 }
 0x1b6   : > { %v1841_v25 = vsel %vm3859_vm1, %v1840_v28, %v1836_v0  ;;  %v1360_v21 = vpop.f32.mrf.mxu1  ;;  %v1847_v55 = vadd.f32 %v3013_v47, %v1846_v26  ;;  %v2838_v10 = vmul.f32 -1.442695, %v1476_v24  ;;  %v1244_v8 = vadd.f32 %v1243_v30, %v1136_v46  ;;  %v2146_v0 = vld [vmem:[%s3520_s9 + $0x80] sm:$0xff] }
 0x1b7   : > { %v2348_v40 = vsel %vm2226_vm5, %v2286_v1, 0.0  ;;  %v2112_v13 = vadd.f32 0.0001, %v1841_v25  ;;  %v2177_v34 = vadd.f32 %v2145_v38, %v1032_v7  ;;  %v997_v30 = vadd.f32 %v3802_v63, %v3358_v41 }
 0x1b8   : > { %v2349_v33 = vadd.f32 %v2348_v40, %v2347_v16  ;;  %v1851_v51 = vsel %vm1850_vm6, %v3013_v47, %v1847_v55  ;;  %v1409_v36 = vadd.f32 %v1357_v31, %v1244_v8  ;;  %v1870_v26 = vor.u32 1.1754944e-38, %v1869_v37 }
 0x1b9   : > { %v2208_v29 = vmul.f32 %v2176_v4, %v2112_v13  ;;  %3022 = vlog2.f32 %v2112_v13  ;;  %v3019_v58 = vpop.eup %3018  ;;  %v1856_v57 = vsel %vm1853_vm7, %v1855_v11, %v1851_v51  ;;  %v1033_v44 = vadd.f32 %v3819_v14, %v997_v30 }
 0x1ba   : > { %3024 = vpow2.f32 %v2838_v10  ;;  %v3021_v62 = vpop.eup %3020  ;;  %v2113_v6 = vadd.f32 0.0001, %v1856_v57  ;;  %v1859_v56 = vmul.f32 %v3019_v58, %v3855_v32  ;;  %v1445_v47 = vadd.f32 %v3792_v9, %v1409_v36  ;;  %v3899_v10 = vpop.f32.mrf.mxu2  ;;  %v2147_v36 = vld [vmem:[%s3520_s9 + $0x88] sm:$0xff] }
 0x1bb   : > { %2241 = vst.msk [vmem:[%s3537_s12 + $0x70] sm:$0xff] %vm2226_vm5, %v2208_v29  ;;  %v3880_v45 = vadd.f32 1.0, %v3021_v62  ;;  %vm1864_vm8 = vweird.f32 %v3019_v58  ;;  %vm1868_vm11 = vcmp.eq.f32.partialorder %v1867_v20, 8.507059e+37  ;;  %v2178_v55 = vadd.f32 %v2146_v0, %v1033_v44 }
 0x1bc   : > { %v2209_v16 = vmul.f32 %v2177_v34, %v2113_v6  ;;  %3026 = vlog2.f32 %v2113_v6  ;;  %v1860_v31 = vsub.f32 1.0, %v1859_v56  ;;  %v1248_v43 = vpop.f32.mrf.mxu0  ;;  %v1477_v63 = vadd.f32 2.0, %v1445_v47  ;;  %vm1865_vm10 = vmor %vm1863_vm9, %vm1864_vm8 }
 0x1bd   : > { %v1139_v17 = vpop.f32.mrf.mxu3  ;;  %3028 = vrcp.f32 %v3880_v45  ;;  %v1882_v8 = vand.u32 2147483647, %v3880_v45  ;;  %v1884_v34 = vand.u32 2147483648, %v3880_v45  ;;  %vm1878_vm13 = vweird.f32 %v3880_v45 }
 0x1be   : > { %v1247_v53 = vadd.f32 %v1246_v27, %v1139_v17  ;;  %v1362_v18 = vpop.f32.mrf.mxu1  ;;  %2242 = vst.msk [vmem:[%s3537_s12 + $0x78] sm:$0xff] %vm2226_vm5, %v2209_v16  ;;  %v1861_v41 = vmul.f32 %v3019_v58, %v1860_v31  ;;  %v2839_v46 = vmul.f32 -1.442695, %v1477_v63  ;;  %v998_v27 = vadd.f32 %v3828_v60, %v3363_v48 }
 0x1bf   : > { %v3023_v2 = vpop.eup %3022  ;;  %v999_v16 = vadd.f32 %v3852_v22, %v3373_v54  ;;  %vm1883_vm0 = vcmp.eq.f32.partialorder %v1882_v8, 8.507059e+37 }
 0x1c0   : > { %v1410_v49 = vadd.f32 %v1360_v21, %v1247_v53  ;;  %v3025_v28 = vpop.eup %3024  ;;  %v2288_v19 = vmul.f32 0.6931472, %v3023_v2  ;;  %v1862_v50 = vadd.f32 %v3019_v58, %v1861_v41 }
 0x1c1   : > { %v3890_v15 = vadd.f32 1.0, %v3025_v28  ;;  %v1035_v0 = vadd.f32 %v3819_v14, %v999_v16 }
 0x1c2   : > { %v2350_v1 = vsel %vm2226_vm5, %v2288_v19, 0.0  ;;  %v1446_v4 = vadd.f32 %v3792_v9, %v1410_v49  ;;  %v3027_v25 = vpop.eup %3026  ;;  %v1866_v24 = vsel %vm1865_vm10, %v3019_v58, %v1862_v50 }
 0x1c3   : > { %v2351_v7 = vadd.f32 %v2350_v1, %v2349_v33  ;;  %3030 = vrcp.f32 %v3890_v15  ;;  %v3029_v32 = vpop.eup %3028  ;;  %v2290_v21 = vmul.f32 0.6931472, %v3027_v25  ;;  %v1871_v40 = vsel %vm1868_vm11, %v1870_v26, %v1866_v24 }
 0x1c4   : > { %v2114_v38 = vadd.f32 0.0001, %v1871_v40  ;;  %v1874_v11 = vmul.f32 %v3029_v32, %v3880_v45  ;;  %3032 = vpow2.f32 %v2839_v46  ;;  %v1251_v48 = vpop.f32.mrf.mxu0  ;;  %v1034_v33 = vadd.f32 %v3819_v14, %v998_v27  ;;  %v3921_v27 = vpop.f32.mrf.mxu2 }
 0x1c5   : > { %v1141_v13 = vpop.f32.mrf.mxu3  ;;  %v2352_v60 = vsel %vm2226_vm5, %v2290_v21, 0.0  ;;  %v1478_v29 = vadd.f32 2.0, %v1446_v4  ;;  %vm1879_vm12 = vweird.f32 %v3029_v32  ;;  %v1897_v41 = vand.u32 2147483647, %v3890_v15 }
 0x1c6   : > { %v1365_v51 = vpop.f32.mrf.mxu1  ;;  %v2353_v58 = vadd.f32 %v2352_v60, %v2351_v7  ;;  %v2210_v57 = vmul.f32 %v2178_v55, %v2114_v38  ;;  %3034 = vlog2.f32 %v2114_v38  ;;  %v1875_v62 = vsub.f32 1.0, %v1874_v11  ;;  %vm1880_vm14 = vmor %vm1878_vm13, %vm1879_vm12 }
 0x1c7   : > { %v2840_v6 = vmul.f32 -1.442695, %v1478_v29  ;;  %v1249_v56 = vadd.f32 %v1248_v43, %v1141_v13  ;;  %v2179_v17 = vadd.f32 %v2147_v36, %v1034_v33  ;;  %v1885_v43 = vor.u32 1.1754944e-38, %v1884_v34  ;;  %v2148_v13 = vld [vmem:[%s3520_s9 + $0x90] sm:$0xff] }
 0x1c8   : > { %2243 = vst.msk [vmem:[%s3537_s12 + $0x80] sm:$0xff] %vm2226_vm5, %v2210_v57  ;;  %v1876_v47 = vmul.f32 %v3029_v32, %v1875_v62  ;;  %v1899_v54 = vand.u32 2147483648, %v3890_v15  ;;  %v1000_v26 = vadd.f32 %v3876_v39, %v3378_v61  ;;  %vm1893_vm1 = vweird.f32 %v3890_v15 }
 0x1c9   : > { %v3031_v30 = vpop.eup %3030  ;;  %3036 = vpow2.f32 %v2840_v6  ;;  %v1411_v37 = vadd.f32 %v1362_v18, %v1249_v56  ;;  %vm1898_vm3 = vcmp.eq.f32.partialorder %v1897_v41, 8.507059e+37  ;;  %v2149_v6 = vld [vmem:[%s3520_s9 + $0x98] sm:$0xff] }
 0x1ca   : > { %v1889_v31 = vmul.f32 %v3031_v30, %v3890_v15  ;;  %v3033_v53 = vpop.eup %3032  ;;  %v1877_v20 = vadd.f32 %v3029_v32, %v1876_v47  ;;  %vm1894_vm15 = vweird.f32 %v3031_v30  ;;  %v1900_v55 = vor.u32 1.1754944e-38, %v1899_v54 }
 0x1cb   : > { %v3913_v63 = vadd.f32 1.0, %v3033_v53  ;;  %v1447_v22 = vadd.f32 %v3792_v9, %v1411_v37  ;;  %vm1895_vm2 = vmor %vm1893_vm1, %vm1894_vm15  ;;  %v2180_v15 = vadd.f32 %v2148_v13, %v1035_v0  ;;  %v1036_v36 = vadd.f32 %v3819_v14, %v1000_v26 }
 0x1cc   : > { %v1890_v2 = vsub.f32 1.0, %v1889_v31  ;;  %v3035_v28 = vpop.eup %3034  ;;  %v1881_v19 = vsel %vm1880_vm14, %v3029_v32, %v1877_v20  ;;  %v1253_v44 = vpop.f32.mrf.mxu0 }
 0x1cd   : > { %v1144_v49 = vpop.f32.mrf.mxu3  ;;  %v2292_v50 = vmul.f32 0.6931472, %v3035_v28  ;;  %v1886_v45 = vsel %vm1883_vm0, %v1885_v43, %v1881_v19  ;;  %3038 = vrcp.f32 %v3913_v63  ;;  %v1479_v32 = vadd.f32 2.0, %v1447_v22  ;;  %v3942_v20 = vpop.f32.mrf.mxu2 }
 0x1ce   : > { %v1891_v46 = vmul.f32 %v3031_v30, %v1890_v2  ;;  %v1367_v18 = vpop.f32.mrf.mxu1  ;;  %v2115_v1 = vadd.f32 0.0001, %v1886_v45  ;;  %v1252_v4 = vadd.f32 %v1251_v48, %v1144_v49  ;;  %v1912_v53 = vand.u32 2147483647, %v3913_v63 }
 0x1cf   : > { %v3037_v25 = vpop.eup %3036  ;;  %v2354_v7 = vsel %vm2226_vm5, %v2292_v50, 0.0  ;;  %v2841_v39 = vmul.f32 -1.442695, %v1479_v32  ;;  %v2181_v41 = vadd.f32 %v2149_v6, %v1036_v36  ;;  %v1001_v49 = vadd.f32 %v3899_v10, %v3388_v3 }
 0x1d0   : > { %v1892_v24 = vadd.f32 %v3031_v30, %v1891_v46  ;;  %v2355_v21 = vadd.f32 %v2354_v7, %v2353_v58  ;;  %v2211_v40 = vmul.f32 %v2179_v17, %v2115_v1  ;;  %3040 = vlog2.f32 %v2115_v1 }
 0x1d1   : > { %v3927_v61 = vadd.f32 1.0, %v3037_v25  ;;  %v1412_v48 = vadd.f32 %v1365_v51, %v1252_v4  ;;  %v1914_v17 = vand.u32 2147483648, %v3913_v63  ;;  %vm1908_vm6 = vweird.f32 %v3913_v63 }
 0x1d2   : > { %v1896_v38 = vsel %vm1895_vm2, %v3031_v30, %v1892_v24  ;;  %2244 = vst.msk [vmem:[%s3537_s12 + $0x88] sm:$0xff] %vm2226_vm5, %v2211_v40  ;;  %vm1913_vm8 = vcmp.eq.f32.partialorder %v1912_v53, 8.507059e+37  ;;  %v1037_v13 = vadd.f32 %v3819_v14, %v1001_v49 }
 0x1d3   : > { %v1901_v11 = vsel %vm1898_vm3, %v1900_v55, %v1896_v38  ;;  %v3039_v60 = vpop.eup %3038  ;;  %3042 = vrcp.f32 %v3927_v61  ;;  %v1448_v62 = vadd.f32 %v3792_v9, %v1412_v48  ;;  %v1915_v45 = vor.u32 1.1754944e-38, %v1914_v17  ;;  %v2150_v48 = vld [vmem:[%s3520_s9 + $0xa0] sm:$0xff] }
 0x1d4   : > { %v2116_v33 = vadd.f32 0.0001, %v1901_v11  ;;  %v1904_v29 = vmul.f32 %v3039_v60, %v3913_v63  ;;  %3044 = vpow2.f32 %v2841_v39  ;;  %v1256_v58 = vpop.f32.mrf.mxu0  ;;  %vm1909_vm4 = vweird.f32 %v3039_v60 }
 0x1d5   : > { %v1146_v8 = vpop.f32.mrf.mxu3  ;;  %v1480_v16 = vadd.f32 2.0, %v1448_v62  ;;  %vm1910_vm7 = vmor %vm1908_vm6, %vm1909_vm4  ;;  %v1927_v63 = vand.u32 2147483647, %v3927_v61  ;;  %v1929_v25 = vand.u32 2147483648, %v3927_v61  ;;  %vm1923_vm10 = vweird.f32 %v3927_v61 }
 0x1d6   : > { %v2212_v57 = vmul.f32 %v2180_v15, %v2116_v33  ;;  %3046 = vlog2.f32 %v2116_v33  ;;  %v3935_v34 = vpop.f32.mrf.mxu1  ;;  %v3041_v51 = vpop.eup %3040  ;;  %v1905_v56 = vsub.f32 1.0, %v1904_v29  ;;  %v1254_v30 = vadd.f32 %v1253_v44, %v1146_v8 }
 0x1d7   : > { %v2294_v47 = vmul.f32 0.6931472, %v3041_v51  ;;  %v2842_v28 = vmul.f32 -1.442695, %v1480_v16  ;;  %vm1928_vm12 = vcmp.eq.f32.partialorder %v1927_v63, 8.507059e+37  ;;  %v2182_v6 = vadd.f32 %v2150_v48, %v1037_v13 }
 0x1d8   : > { %2245 = vst.msk [vmem:[%s3537_s12 + $0x90] sm:$0xff] %vm2226_vm5, %v2212_v57  ;;  %v1906_v31 = vmul.f32 %v3039_v60, %v1905_v56  ;;  %v1413_v37 = vadd.f32 %v1367_v18, %v1254_v30  ;;  %v3964_v57 = vpop.f32.mrf.mxu2 }
 0x1d9   : > { %v3043_v43 = vpop.eup %3042  ;;  %v2356_v2 = vsel %vm2226_vm5, %v2294_v47, 0.0  ;;  %3048 = vpow2.f32 %v2842_v28  ;;  %v1002_v47 = vadd.f32 %v3921_v27, %v3393_v12 }
 0x1da   : > { %v3045_v19 = vpop.eup %3044  ;;  %v2357_v54 = vadd.f32 %v2356_v2, %v2355_v21  ;;  %v1907_v22 = vadd.f32 %v3039_v60, %v1906_v31  ;;  %v1919_v44 = vmul.f32 %v3043_v43, %v3927_v61  ;;  %v1449_v18 = vadd.f32 %v3792_v9, %v1413_v37 }
 0x1db   : > { %v3950_v46 = vadd.f32 1.0, %v3045_v19  ;;  %vm1924_vm9 = vweird.f32 %v3043_v43  ;;  %v1038_v19 = vadd.f32 %v3819_v14, %v1002_v47 }
 0x1dc   : > { %v3047_v50 = vpop.eup %3046  ;;  %v1911_v3 = vsel %vm1910_vm7, %v3039_v60, %v1907_v22  ;;  %v1920_v10 = vsub.f32 1.0, %v1919_v44  ;;  %v1258_v26 = vpop.f32.mrf.mxu0  ;;  %v1481_v55 = vadd.f32 2.0, %v1449_v18  ;;  %vm1925_vm11 = vmor %vm1923_vm10, %vm1924_vm9  ;;  %v1930_v60 = vor.u32 1.1754944e-38, %v1929_v25 }
 0x1dd   : > { %v1149_v1 = vpop.f32.mrf.mxu3  ;;  %v2296_v0 = vmul.f32 0.6931472, %v3047_v50  ;;  %v1916_v4 = vsel %vm1913_vm8, %v1915_v45, %v1911_v3  ;;  %3050 = vrcp.f32 %v3950_v46  ;;  %v1942_v49 = vand.u32 2147483647, %v3950_v46  ;;  %v2151_v50 = vld [vmem:[%s3520_s9 + $0xa8] sm:$0xff] }
 0x1de   : > { %v1372_v7 = vpop.f32.mrf.mxu1  ;;  %v2117_v32 = vadd.f32 0.0001, %v1916_v4  ;;  %v1921_v21 = vmul.f32 %v3043_v43, %v1920_v10  ;;  %v2843_v15 = vmul.f32 -1.442695, %v1481_v55  ;;  %v1257_v33 = vadd.f32 %v1256_v58, %v1149_v1 }
 0x1df   : > { %v2358_v24 = vsel %vm2226_vm5, %v2296_v0, 0.0  ;;  %v3049_v11 = vpop.eup %3048  ;;  %vm1938_vm0 = vweird.f32 %v3950_v46  ;;  %vm1943_vm15 = vcmp.eq.f32.partialorder %v1942_v49, 8.507059e+37 }
 0x1e0   : > { %v2359_v40 = vadd.f32 %v2358_v24, %v2357_v54  ;;  %v2213_v38 = vmul.f32 %v2181_v41, %v2117_v32  ;;  %3052 = vlog2.f32 %v2117_v32  ;;  %v1922_v39 = vadd.f32 %v3043_v43, %v1921_v21  ;;  %v3986_v63 = vpop.f32.mrf.mxu2 }
 0x1e1   : > { %v3962_v29 = vadd.f32 1.0, %v3049_v11  ;;  %3054 = vpow2.f32 %v2843_v15  ;;  %v1414_v51 = vadd.f32 %v3935_v34, %v1257_v33  ;;  %v2183_v24 = vadd.f32 %v2151_v50, %v1038_v19  ;;  %v2153_v50 = vld [vmem:[%s3520_s9 + $0xb8] sm:$0xff] }
 0x1e2   : > { %2246 = vst.msk [vmem:[%s3537_s12 + $0x98] sm:$0xff] %vm2226_vm5, %v2213_v38  ;;  %v1926_v8 = vsel %vm1925_vm11, %v3043_v43, %v1922_v39  ;;  %v1944_v43 = vand.u32 2147483648, %v3950_v46 }
 0x1e3   : > { %v3051_v36 = vpop.eup %3050  ;;  %v1931_v62 = vsel %vm1928_vm12, %v1930_v60, %v1926_v8  ;;  %3056 = vrcp.f32 %v3962_v29  ;;  %v1450_v17 = vadd.f32 %v3792_v9, %v1414_v51  ;;  %v1959_v13 = vand.u32 2147483648, %v3962_v29 }
 0x1e4   : > { %v2118_v56 = vadd.f32 0.0001, %v1931_v62  ;;  %v1934_v30 = vmul.f32 %v3051_v36, %v3950_v46  ;;  %v1261_v58 = vpop.f32.mrf.mxu0  ;;  %vm1939_vm13 = vweird.f32 %v3051_v36  ;;  %v1945_v0 = vor.u32 1.1754944e-38, %v1944_v43 }
 0x1e5   : > { %v1151_v61 = vpop.f32.mrf.mxu3  ;;  %v1482_v2 = vadd.f32 2.0, %v1450_v17  ;;  %vm1940_vm14 = vmor %vm1938_vm0, %vm1939_vm13  ;;  %v1003_v46 = vadd.f32 %v3942_v20, %v3403_v23  ;;  %vm1953_vm2 = vweird.f32 %v3962_v29 }
 0x1e6   : > { %v3053_v16 = vpop.eup %3052  ;;  %v2214_v31 = vmul.f32 %v2182_v6, %v2118_v56  ;;  %3058 = vlog2.f32 %v2118_v56  ;;  %v1935_v53 = vsub.f32 1.0, %v1934_v30  ;;  %v1375_v37 = vpop.f32.mrf.mxu1  ;;  %v1259_v28 = vadd.f32 %v1258_v26, %v1151_v61 }
 0x1e7   : > { %v2298_v34 = vmul.f32 0.6931472, %v3053_v16  ;;  %v3055_v12 = vpop.eup %3054  ;;  %v2844_v54 = vmul.f32 -1.442695, %v1482_v2  ;;  %v1039_v60 = vadd.f32 %v3819_v14, %v1003_v46  ;;  %v1960_v6 = vor.u32 1.1754944e-38, %v1959_v13 }
 0x1e8   : > { %2247 = vst.msk [vmem:[%s3537_s12 + $0xa0] sm:$0xff] %vm2226_vm5, %v2214_v31  ;;  %v1936_v41 = vmul.f32 %v3051_v36, %v1935_v53  ;;  %v3980_v18 = vadd.f32 1.0, %v3055_v12  ;;  %v1415_v1 = vadd.f32 %v1372_v7, %v1259_v28  ;;  %v4012_v2 = vpop.f32.mrf.mxu2 }
 0x1e9   : > { %v2360_v27 = vsel %vm2226_vm5, %v2298_v34, 0.0  ;;  %v3057_v22 = vpop.eup %3056  ;;  %3060 = vpow2.f32 %v2844_v54 }
 0x1ea   : > { %v2361_v44 = vadd.f32 %v2360_v27, %v2359_v40  ;;  %v1937_v45 = vadd.f32 %v3051_v36, %v1936_v41  ;;  %v1949_v3 = vmul.f32 %v3057_v22, %v3962_v29  ;;  %3062 = vrcp.f32 %v3980_v18 }
 0x1eb   : > { %v1957_v40 = vand.u32 2147483647, %v3962_v29  ;;  %v1451_v55 = vadd.f32 %v3792_v9, %v1415_v1  ;;  %vm1954_vm1 = vweird.f32 %v3057_v22  ;;  %v1974_v43 = vand.u32 2147483648, %v3980_v18 }
 0x1ec   : > { %v3059_v26 = vpop.eup %3058  ;;  %v1941_v4 = vsel %vm1940_vm14, %v3051_v36, %v1937_v45  ;;  %v1950_v7 = vsub.f32 1.0, %v1949_v3  ;;  %v1263_v38 = vpop.f32.mrf.mxu0  ;;  %v2152_v36 = vld [vmem:[%s3520_s9 + $0xb0] sm:$0xff]  ;;  %vm1955_vm3 = vmor %vm1953_vm2, %vm1954_vm1  ;;  %v1972_v27 = vand.u32 2147483647, %v3980_v18  ;;  %vm1968_vm7 = vweird.f32 %v3980_v18 }
 0x1ed   : > { %v1154_v10 = vpop.f32.mrf.mxu3  ;;  %v2300_v25 = vmul.f32 0.6931472, %v3059_v26  ;;  %v1946_v32 = vsel %vm1943_vm15, %v1945_v0, %v1941_v4  ;;  %v1483_v15 = vadd.f32 2.0, %v1451_v55  ;;  %vm1958_vm4 = vcmp.eq.f32.partialorder %v1957_v40, 8.507059e+37 }
 0x1ee   : > { %v3988_v21 = vadd.f32 0.0001, %v1946_v32  ;;  %v1951_v20 = vmul.f32 %v3057_v22, %v1950_v7  ;;  %v1262_v39 = vadd.f32 %v1261_v58, %v1154_v10  ;;  %v1377_v33 = vpop.f32.mrf.mxu1  ;;  %v2184_v31 = vadd.f32 %v2152_v36, %v1039_v60 }
 0x1ef   : > { %v2362_v23 = vsel %vm2226_vm5, %v2300_v25, 0.0  ;;  %v3061_v8 = vpop.eup %3060  ;;  %v2845_v30 = vmul.f32 -1.442695, %v1483_v15  ;;  %v1975_v45 = vor.u32 1.1754944e-38, %v1974_v43  ;;  %vm1973_vm9 = vcmp.eq.f32.partialorder %v1972_v27, 8.507059e+37 }
 0x1f0   : > { %v3994_v11 = vadd.f32 %v2362_v23, %v2361_v44  ;;  %v2215_v48 = vmul.f32 %v2183_v24, %v3988_v21  ;;  %v1952_v62 = vadd.f32 %v3057_v22, %v1951_v20  ;;  %v1416_v51 = vadd.f32 %v1375_v37, %v1262_v39  ;;  %v3063_v61 = vpop.eup %3062 }
 0x1f1   : > { %v4002_v56 = vadd.f32 1.0, %v3061_v8  ;;  %v1964_v47 = vmul.f32 %v3063_v61, %v3980_v18  ;;  %v1004_v37 = vadd.f32 %v3964_v57, %v3408_v35  ;;  %vm1969_vm6 = vweird.f32 %v3063_v61 }
 0x1f2   : > { %2248 = vst.msk [vmem:[%s3537_s12 + $0xa8] sm:$0xff] %vm2226_vm5, %v2215_v48  ;;  %v1956_v58 = vsel %vm1955_vm3, %v3057_v22, %v1952_v62  ;;  %v1452_v17 = vadd.f32 %v3792_v9, %v1416_v51  ;;  %vm1970_vm8 = vmor %vm1968_vm7, %vm1969_vm6  ;;  %v1005_v7 = vadd.f32 %v3986_v63, %v3418_v42  ;;  %v966_v48 = vpop.f32.mrf.mxu2 }
 0x1f3   : > { %v1961_v53 = vsel %vm1958_vm4, %v1960_v6, %v1956_v58  ;;  %3064 = vrcp.f32 %v4002_v56  ;;  %v1965_v34 = vsub.f32 1.0, %v1964_v47  ;;  %v1040_v35 = vadd.f32 %v3819_v14, %v1004_v37 }
 0x1f4   : > { %v4007_v29 = vadd.f32 0.0001, %v1961_v53  ;;  %3066 = vpow2.f32 %v2845_v30  ;;  %v1484_v41 = vadd.f32 2.0, %v1452_v17  ;;  %v1266_v22 = vpop.f32.mrf.mxu0  ;;  %v1989_v13 = vand.u32 2147483648, %v4002_v56 }
 0x1f5   : > { %v1156_v16 = vpop.f32.mrf.mxu3  ;;  %v1966_v12 = vmul.f32 %v3063_v61, %v1965_v34  ;;  %v2185_v18 = vadd.f32 %v2153_v50, %v1040_v35  ;;  %v1987_v20 = vand.u32 2147483647, %v4002_v56  ;;  %v1041_v42 = vadd.f32 %v3819_v14, %v1005_v7 }
 0x1f6   : > { %v1264_v49 = vadd.f32 %v1263_v38, %v1156_v16  ;;  %v2216_v28 = vmul.f32 %v2184_v31, %v4007_v29  ;;  %v2846_v19 = vmul.f32 -1.442695, %v1484_v41  ;;  %v1380_v0 = vpop.f32.mrf.mxu1  ;;  %vm1983_vm11 = vweird.f32 %v4002_v56 }
 0x1f7   : > { %v1967_v57 = vadd.f32 %v3063_v61, %v1966_v12  ;;  %v1990_v8 = vor.u32 1.1754944e-38, %v1989_v13  ;;  %vm1988_vm13 = vcmp.eq.f32.partialorder %v1987_v20, 8.507059e+37  ;;  %v1006_v37 = vadd.f32 %v4012_v2, %v3423_v52 }
 0x1f8   : > { %v1417_v54 = vadd.f32 %v1377_v33, %v1264_v49  ;;  %2249 = vst.msk [vmem:[%s3537_s12 + $0xb0] sm:$0xff] %vm2226_vm5, %v2216_v28  ;;  %3068 = vpow2.f32 %v2846_v19  ;;  %v2154_v33 = vld [vmem:[%s3520_s9 + $0xc0] sm:$0xff] }
 0x1f9   : > { %v3065_v44 = vpop.eup %3064  ;;  %v1971_v10 = vsel %vm1970_vm8, %v3063_v61, %v1967_v57  ;;  %v1042_v2 = vadd.f32 %v3819_v14, %v1006_v37 }
 0x1fa   : > { %v1453_v1 = vadd.f32 %v3792_v9, %v1417_v54  ;;  %v3067_v3 = vpop.eup %3066  ;;  %v1979_v26 = vmul.f32 %v3065_v44, %v4002_v56  ;;  %v1976_v46 = vsel %vm1973_vm9, %v1975_v45, %v1971_v10  ;;  %vm1984_vm10 = vweird.f32 %v3065_v44  ;;  %v968_v52 = vpop.f32.mrf.mxu2 }
 0x1fb   : > { %v4023_v25 = vadd.f32 1.0, %v3067_v3  ;;  %v4025_v32 = vadd.f32 0.0001, %v1976_v46  ;;  %vm1985_vm12 = vmor %vm1983_vm11, %vm1984_vm10  ;;  %v2186_v56 = vadd.f32 %v2154_v33, %v1041_v42  ;;  %v1007_v45 = vadd.f32 %v966_v48, %v3433_v59  ;;  %v2156_v48 = vld [vmem:[%s3520_s9 + $0xd0] sm:$0xff] }
 0x1fc   : > { %v1485_v24 = vadd.f32 2.0, %v1453_v1  ;;  %v1980_v40 = vsub.f32 1.0, %v1979_v26  ;;  %v1268_v62 = vpop.f32.mrf.mxu0 }
 0x1fd   : > { %v1159_v4 = vpop.f32.mrf.mxu3  ;;  %3070 = vrcp.f32 %v4023_v25  ;;  %v2217_v38 = vmul.f32 %v2185_v18, %v4025_v32  ;;  %v2002_v49 = vand.u32 2147483647, %v4023_v25  ;;  %v2004_v28 = vand.u32 2147483648, %v4023_v25 }
 0x1fe   : > { %v1267_v55 = vadd.f32 %v1266_v22, %v1159_v4  ;;  %v1981_v23 = vmul.f32 %v3065_v44, %v1980_v40  ;;  %v3069_v39 = vpop.eup %3068  ;;  %v2847_v60 = vmul.f32 -1.442695, %v1485_v24  ;;  %v1382_v47 = vpop.f32.mrf.mxu1  ;;  %vm1998_vm14 = vweird.f32 %v4023_v25 }
 0x1ff   : > { %2250 = vst.msk [vmem:[%s3537_s12 + $0xb8] sm:$0xff] %vm2226_vm5, %v2217_v38  ;;  %v4037_v15 = vadd.f32 1.0, %v3069_v39  ;;  %v2005_v50 = vor.u32 1.1754944e-38, %v2004_v28  ;;  %vm2003_vm1 = vcmp.eq.f32.partialorder %v2002_v49, 8.507059e+37  ;;  %v1043_v38 = vadd.f32 %v3819_v14, %v1007_v45  ;;  %v4185_v45 = vld [vmem:[#allocation2_spill] sm:$0xff] }
 0x200   : > { %v1982_v63 = vadd.f32 %v3065_v44, %v1981_v23  ;;  %3072 = vpow2.f32 %v2847_v60  ;;  %v1418_v36 = vadd.f32 %v1380_v0, %v1267_v55  ;;  %v4063_v0 = vld [vmem:[%s4171_s4] ss:$0 sm:$0xff] }
 0x201   : > { %3074 = vrcp.f32 %v4037_v15  ;;  %v2019_v4 = vand.u32 2147483648, %v4037_v15  ;;  %v2017_v59 = vand.u32 2147483647, %v4037_v15  ;;  %vm2013_vm3 = vweird.f32 %v4037_v15 }
 0x202   : > { %v1986_v51 = vsel %vm1985_vm12, %v3065_v44, %v1982_v63  ;;  %v1454_v58 = vadd.f32 %v3792_v9, %v1418_v36  ;;  %v2155_v44 = vld [vmem:[%s3520_s9 + $0xc8] sm:$0xff] }
 0x203   : > { %v3071_v6 = vpop.eup %3070  ;;  %v1991_v30 = vsel %vm1988_vm13, %v1990_v8, %v1986_v51  ;;  %v2187_v7 = vadd.f32 %v2155_v44, %v1042_v2  ;;  %v2020_v60 = vor.u32 1.1754944e-38, %v2019_v4  ;;  %vm2018_vm6 = vcmp.eq.f32.partialorder %v2017_v59, 8.507059e+37 }
 0x204   : > { %v4042_v17 = vadd.f32 0.0001, %v1991_v30  ;;  %v1994_v16 = vmul.f32 %v3071_v6, %v4023_v25  ;;  %v1486_v31 = vadd.f32 2.0, %v1454_v58  ;;  %vm1999_vm0 = vweird.f32 %v3071_v6  ;;  %v1271_v10 = vpop.f32.mrf.mxu0 }
 0x205   : > { %v1161_v61 = vpop.f32.mrf.mxu3  ;;  %vm2000_vm15 = vmor %vm1998_vm14, %vm1999_vm0 }
 0x206   : > { %v2218_v53 = vmul.f32 %v2186_v56, %v4042_v17  ;;  %v1995_v34 = vsub.f32 1.0, %v1994_v16  ;;  %v1269_v43 = vadd.f32 %v1268_v62, %v1161_v61  ;;  %v3073_v41 = vpop.eup %3072  ;;  %v2848_v9 = vmul.f32 -1.442695, %v1486_v31  ;;  %v1385_v18 = vpop.f32.mrf.mxu1 }
 0x207   : > { %v3075_v12 = vpop.eup %3074  ;;  %v4052_v19 = vadd.f32 1.0, %v3073_v41  ;;  %v1008_v62 = vadd.f32 %v968_v52, %v3438_v5  ;;  %v2157_v41 = vld [vmem:[%s3520_s9 + $0xd8] sm:$0xff] }
 0x208   : > { %2251 = vst.msk [vmem:[%s3537_s12 + $0xc0] sm:$0xff] %vm2226_vm5, %v2218_v53  ;;  %v1996_v27 = vmul.f32 %v3071_v6, %v1995_v34  ;;  %v1419_v54 = vadd.f32 %v1382_v47, %v1269_v43  ;;  %v2009_v22 = vmul.f32 %v3075_v12, %v4037_v15  ;;  %3076 = vpow2.f32 %v2848_v9  ;;  %v4090_v53 = vld [vmem:[%s4170_s3] ss:$0 sm:$0xff] }
 0x209   : > { %3078 = vrcp.f32 %v4052_v19  ;;  %vm2014_vm2 = vweird.f32 %v3075_v12  ;;  %v2188_v15 = vadd.f32 %v2156_v48, %v1043_v38  ;;  %v2034_v58 = vand.u32 2147483648, %v4052_v19 }
 0x20a   : > { %v1997_v35 = vadd.f32 %v3071_v6, %v1996_v27  ;;  %v2010_v1 = vsub.f32 1.0, %v2009_v22  ;;  %v1455_v3 = vadd.f32 %v4063_v0, %v1419_v54  ;;  %vm2015_vm4 = vmor %vm2013_vm3, %vm2014_vm2  ;;  %v2032_v5 = vand.u32 2147483647, %v4052_v19 }
 0x20b   : > { %v1044_v37 = vadd.f32 %v4090_v53, %v1008_v62  ;;  %vm2028_vm8 = vweird.f32 %v4052_v19 }
 0x20c   : > { %v2001_v26 = vsel %vm2000_vm15, %v3071_v6, %v1997_v35  ;;  %v2011_v24 = vmul.f32 %v3075_v12, %v2010_v1  ;;  %v1487_v13 = vadd.f32 2.0, %v1455_v3  ;;  %v971_v6 = vpop.f32.mrf.mxu2  ;;  %v1273_v31 = vpop.f32.mrf.mxu0  ;;  %vm2033_vm10 = vcmp.eq.f32.partialorder %v2032_v5, 8.507059e+37  ;;  %v2159_v5 = vld [vmem:[%s3520_s9 + $0xe8] sm:$0xff] }
 0x20d   : > { %v1164_v57 = vpop.f32.mrf.mxu3  ;;  %v2006_v25 = vsel %vm2003_vm1, %v2005_v50, %v2001_v26  ;;  %v2189_v35 = vadd.f32 %v2157_v41, %v1044_v37 }
 0x20e   : > { %v1272_v46 = vadd.f32 %v1271_v10, %v1164_v57  ;;  %v4068_v40 = vadd.f32 0.0001, %v2006_v25  ;;  %v3077_v55 = vpop.eup %3076  ;;  %v2012_v23 = vadd.f32 %v3075_v12, %v2011_v24  ;;  %v2849_v36 = vmul.f32 -1.442695, %v1487_v13  ;;  %v1387_v28 = vpop.f32.mrf.mxu1 }
 0x20f   : > { %v3079_v20 = vpop.eup %3078  ;;  %v4074_v42 = vadd.f32 1.0, %v3077_v55 }
 0x210   : > { %v2219_v39 = vmul.f32 %v2187_v7, %v4068_v40  ;;  %v1420_v63 = vadd.f32 %v1385_v18, %v1272_v46  ;;  %v2016_v33 = vsel %vm2015_vm4, %v3075_v12, %v2012_v23  ;;  %v2024_v8 = vmul.f32 %v3079_v20, %v4052_v19  ;;  %v2158_v7 = vld [vmem:[%s3520_s9 + $0xe0] sm:$0xff] }
 0x211   : > { %v2021_v14 = vsel %vm2018_vm6, %v2020_v60, %v2016_v33  ;;  %3080 = vrcp.f32 %v4074_v42  ;;  %vm2029_vm7 = vweird.f32 %v3079_v20  ;;  %v2035_v12 = vor.u32 1.1754944e-38, %v2034_v58  ;;  %v4186_v33 = vld [vmem:[#allocation3_spill] sm:$0xff] }
 0x212   : > { %2252 = vst.msk [vmem:[%s3537_s12 + $0xc8] sm:$0xff] %vm2226_vm5, %v2219_v39  ;;  %v4081_v51 = vadd.f32 0.0001, %v2021_v14  ;;  %v2025_v61 = vsub.f32 1.0, %v2024_v8  ;;  %3082 = vpow2.f32 %v2849_v36  ;;  %v1456_v47 = vadd.f32 %v4063_v0, %v1420_v63  ;;  %vm2030_vm9 = vmor %vm2028_vm8, %vm2029_vm7 }
 0x213   : > { %v1009_v19 = vadd.f32 %v971_v6, %v4185_v45  ;;  %v2049_v10 = vand.u32 2147483648, %v4074_v42  ;;  %v2047_v46 = vand.u32 2147483647, %v4074_v42  ;;  %vm2043_vm12 = vweird.f32 %v4074_v42 }
 0x214   : > { %v2220_v56 = vmul.f32 %v2188_v15, %v4081_v51  ;;  %v2026_v16 = vmul.f32 %v3079_v20, %v2025_v61  ;;  %v1488_v34 = vadd.f32 2.0, %v1456_v47  ;;  %v973_v25 = vpop.f32.mrf.mxu2 }
 0x215   : > { %v1166_v30 = vpop.f32.mrf.mxu3  ;;  %v1045_v59 = vadd.f32 %v4090_v53, %v1009_v19  ;;  %v2050_v13 = vor.u32 1.1754944e-38, %v2049_v10  ;;  %vm2048_vm0 = vcmp.eq.f32.partialorder %v2047_v46, 8.507059e+37  ;;  %v1010_v8 = vadd.f32 %v973_v25, %v4186_v33 }
 0x216   : > { %v1274_v43 = vadd.f32 %v1273_v31, %v1166_v30  ;;  %2253 = vst.msk [vmem:[%s3537_s12 + $0xd0] sm:$0xff] %vm2226_vm5, %v2220_v56  ;;  %v2027_v49 = vadd.f32 %v3079_v20, %v2026_v16  ;;  %v2850_v27 = vmul.f32 -1.442695, %v1488_v34 }
 0x217   : > { %v3081_v9 = vpop.eup %3080  ;;  %v2190_v39 = vadd.f32 %v2158_v7, %v1045_v59  ;;  %v1046_v47 = vadd.f32 %v4090_v53, %v1010_v8 }
 0x218   : > { %v1421_v54 = vadd.f32 %v1387_v28, %v1274_v43  ;;  %v3083_v22 = vpop.eup %3082  ;;  %v2031_v52 = vsel %vm2030_vm9, %v3079_v20, %v2027_v49  ;;  %v2039_v2 = vmul.f32 %v3081_v9, %v4074_v42  ;;  %3084 = vpow2.f32 %v2850_v27  ;;  %v4187_v43 = vld [vmem:[#allocation4_spill] sm:$0xff] }
 0x219   : > { %v2036_v57 = vsel %vm2033_vm10, %v2035_v12, %v2031_v52  ;;  %v1615_v44 = vadd.f32 1.0, %v3083_v22  ;;  %vm2044_vm11 = vweird.f32 %v3081_v9 }
 0x21a   : > { %v4098_v50 = vadd.f32 0.0001, %v2036_v57  ;;  %v2040_v1 = vsub.f32 1.0, %v2039_v2  ;;  %v1457_v3 = vadd.f32 %v4063_v0, %v1421_v54  ;;  %vm2045_vm13 = vmor %vm2043_vm12, %vm2044_vm11  ;;  %vm2392_vm12 = vcmask 40960  }
 0x21b   : > { %3086 = vrcp.f32 %v1615_v44  ;;  %v2064_v14 = vand.u32 2147483648, %v1615_v44  ;;  %v2062_v15 = vand.u32 2147483647, %v1615_v44  ;;  %vm2058_vm15 = vweird.f32 %v1615_v44 }
 0x21c   : > { %v2221_v26 = vmul.f32 %v2189_v35, %v4098_v50  ;;  %v2041_v4 = vmul.f32 %v3081_v9, %v2040_v1  ;;  %v1489_v24 = vadd.f32 2.0, %v1457_v3  ;;  %3088 = vlog2.f32 %v3988_v21  ;;  %v976_v61 = vpop.f32.mrf.mxu2 }
 0x21d   : > { %3090 = vlog2.f32 %v4007_v29  ;;  %v2065_v31 = vor.u32 1.1754944e-38, %v2064_v14  ;;  %vm2063_vm2 = vcmp.eq.f32.partialorder %v2062_v15, 8.507059e+37  ;;  %v1011_v41 = vadd.f32 %v976_v61, %v4187_v43 }
 0x21e   : > { %2254 = vst.msk [vmem:[%s3537_s12 + $0xd8] sm:$0xff] %vm2226_vm5, %v2221_v26  ;;  %v2042_v18 = vadd.f32 %v3081_v9, %v2041_v4  ;;  %v3085_v0 = vpop.eup %3084  ;;  %v2851_v55 = vmul.f32 -1.442695, %v1489_v24 }
 0x21f   : > { %v4112_v23 = vadd.f32 1.0, %v3085_v0 }
 0x220   : > { %v2046_v38 = vsel %vm2045_vm13, %v3081_v9, %v2042_v18  ;;  %3092 = vpow2.f32 %v2851_v55 }
 0x221   : > { %v3087_v21 = vpop.eup %3086  ;;  %v2051_v20 = vsel %vm2048_vm0, %v2050_v13, %v2046_v38  ;;  %3094 = vrcp.f32 %v4112_v23  ;;  %v2079_v27 = vand.u32 2147483648, %v4112_v23  ;;  %v2077_v52 = vand.u32 2147483647, %v4112_v23 }
 0x222   : > { %v2126_v48 = vadd.f32 0.0001, %v2051_v20  ;;  %v2054_v60 = vmul.f32 %v3087_v21, %v1615_v44  ;;  %v3089_v42 = vpop.eup %3088  ;;  %vm2059_vm14 = vweird.f32 %v3087_v21  ;;  %3096 = vlog2.f32 %v4025_v32  ;;  %v2160_v44 = vld [vmem:[%s3520_s9 + $0xf0] sm:$0xff] }
 0x223   : > { %v3091_v29 = vpop.eup %3090  ;;  %v2302_v30 = vmul.f32 0.6931472, %v3089_v42  ;;  %3098 = vlog2.f32 %v4042_v17  ;;  %vm2060_vm1 = vmor %vm2058_vm15, %vm2059_vm14  ;;  %v2191_v17 = vadd.f32 %v2159_v5, %v1046_v47  ;;  %vm2073_vm4 = vweird.f32 %v4112_v23 }
 0x224   : > { %v2222_v63 = vmul.f32 %v2190_v39, %v2126_v48  ;;  %v2055_v36 = vsub.f32 1.0, %v2054_v60  ;;  %v2304_v32 = vmul.f32 0.6931472, %v3091_v29  ;;  %v2080_v3 = vor.u32 1.1754944e-38, %v2079_v27  ;;  %v978_v10 = vpop.f32.mrf.mxu2 }
 0x225   : > { %v2364_v9 = vsel %vm2226_vm5, %v2302_v30, 0.0  ;;  %vm2078_vm7 = vcmp.eq.f32.partialorder %v2077_v52, 8.507059e+37 }
 0x226   : > { %2255 = vst.msk [vmem:[%s3537_s12 + $0xe0] sm:$0xff] %vm2226_vm5, %v2222_v63  ;;  %v2056_v62 = vmul.f32 %v3087_v21, %v2055_v36  ;;  %v3093_v6 = vpop.eup %3092  ;;  %v2366_v57 = vsel %vm2226_vm5, %v2304_v32, 0.0  ;;  %v2365_v1 = vadd.f32 %v2364_v9, %v3994_v11  ;;  %v4188_v11 = vld [vmem:[#allocation5_spill] sm:$0xff] }
 0x227   : > { %v3095_v58 = vpop.eup %3094  ;;  %v4120_v16 = vadd.f32 1.0, %v3093_v6  ;;  %v1012_v7 = vadd.f32 %v978_v10, %v4188_v11 }
 0x228   : > { %v2057_v56 = vadd.f32 %v3087_v21, %v2056_v62  ;;  %v2069_v37 = vmul.f32 %v3095_v58, %v4112_v23  ;;  %v3097_v54 = vpop.eup %3096  ;;  %vm2074_vm3 = vweird.f32 %v3095_v58  ;;  %v2161_v62 = vld [vmem:[%s3520_s9 + $0xf8] sm:$0xff] }
 0x229   : > { %3100 = vrcp.f32 %v4120_v16  ;;  %v3099_v35 = vpop.eup %3098  ;;  %vm2075_vm6 = vmor %vm2073_vm4, %vm2074_vm3  ;;  %v2092_v23 = vand.u32 2147483647, %v4120_v16  ;;  %v1048_v8 = vadd.f32 %v4090_v53, %v1012_v7  ;;  %vm2088_vm9 = vweird.f32 %v4120_v16 }
 0x22a   : > { %v2061_v34 = vsel %vm2060_vm1, %v3087_v21, %v2057_v56  ;;  %3102 = vlog2.f32 %v4068_v40  ;;  %v2070_v28 = vsub.f32 1.0, %v2069_v37  ;;  %v1047_v40 = vadd.f32 %v4090_v53, %v1011_v41 }
 0x22b   : > { %v2066_v49 = vsel %vm2063_vm2, %v2065_v31, %v2061_v34  ;;  %3104 = vlog2.f32 %v4081_v51  ;;  %v2306_v51 = vmul.f32 0.6931472, %v3097_v54  ;;  %v2308_v25 = vmul.f32 0.6931472, %v3099_v35 }
 0x22c   : > { %v2127_v12 = vadd.f32 0.0001, %v2066_v49  ;;  %v2071_v22 = vmul.f32 %v3095_v58, %v2070_v28  ;;  %3106 = vlog2.f32 %v4098_v50  ;;  %v2367_v50 = vadd.f32 %v2366_v57, %v2365_v1 }
 0x22d   : > { %3108 = vlog2.f32 %v2126_v48  ;;  %v2192_v24 = vadd.f32 %v2160_v44, %v1047_v40  ;;  %v2368_v55 = vsel %vm2226_vm5, %v2306_v51, 0.0  ;;  %v2094_v21 = vand.u32 2147483648, %v4120_v16 }
 0x22e   : > { %v2223_v2 = vmul.f32 %v2191_v17, %v2127_v12  ;;  %v2072_v45 = vadd.f32 %v3095_v58, %v2071_v22  ;;  %3110 = vlog2.f32 %v2127_v12  ;;  %v2370_v60 = vsel %vm2226_vm5, %v2308_v25, 0.0 }
 0x22f   : > { %v3101_v19 = vpop.eup %3100  ;;  %v2369_v33 = vadd.f32 %v2368_v55, %v2367_v50  ;;  %v2095_v15 = vor.u32 1.1754944e-38, %v2094_v21  ;;  %vm2093_vm11 = vcmp.eq.f32.partialorder %v2092_v23, 8.507059e+37  ;;  %v2193_v31 = vadd.f32 %v2161_v62, %v1048_v8 }
 0x230   : > { %2256 = vst.msk [vmem:[%s3537_s12 + $0xe8] sm:$0xff] %vm2226_vm5, %v2223_v2  ;;  %v3103_v26 = vpop.eup %3102  ;;  %v2076_v4 = vsel %vm2075_vm6, %v3095_v58, %v2072_v45  ;;  %v2084_v46 = vmul.f32 %v3101_v19, %v4120_v16  ;;  %vm2089_vm8 = vweird.f32 %v3101_v19 }
 0x231   : > { %v2081_v59 = vsel %vm2078_vm7, %v2080_v3, %v2076_v4  ;;  %v3105_v18 = vpop.eup %3104  ;;  %v2310_v38 = vmul.f32 0.6931472, %v3103_v26  ;;  %vm2090_vm10 = vmor %vm2088_vm9, %vm2089_vm8  ;;  %v2371_v6 = vadd.f32 %v2370_v60, %v2369_v33 }
 0x232   : > { %v2128_v0 = vadd.f32 0.0001, %v2081_v59  ;;  %v2085_v13 = vsub.f32 1.0, %v2084_v46  ;;  %v3107_v20 = vpop.eup %3106  ;;  %v2312_v42 = vmul.f32 0.6931472, %v3105_v18 }
 0x233   : > { %v3109_v63 = vpop.eup %3108  ;;  %v2372_v14 = vsel %vm2226_vm5, %v2310_v38, 0.0  ;;  %v2314_v29 = vmul.f32 0.6931472, %v3107_v20 }
 0x234   : > { %v2224_v39 = vmul.f32 %v2192_v24, %v2128_v0  ;;  %3112 = vlog2.f32 %v2128_v0  ;;  %v2086_v48 = vmul.f32 %v3101_v19, %v2085_v13  ;;  %v3111_v61 = vpop.eup %3110  ;;  %v2374_v58 = vsel %vm2226_vm5, %v2312_v42, 0.0 }
 0x235   : > { %v2316_v47 = vmul.f32 0.6931472, %v3109_v63  ;;  %v2373_v53 = vadd.f32 %v2372_v14, %v2371_v6  ;;  %v2376_v16 = vsel %vm2226_vm5, %v2314_v29, 0.0  ;;  %v2318_v34 = vmul.f32 0.6931472, %v3111_v61 }
 0x236   : > { %2257 = vst.msk [vmem:[%s3537_s12 + $0xf0] sm:$0xff] %vm2226_vm5, %v2224_v39  ;;  %v2087_v36 = vadd.f32 %v3101_v19, %v2086_v48 }
 0x237   : > { %v2375_v43 = vadd.f32 %v2374_v58, %v2373_v53  ;;  %v2378_v32 = vsel %vm2226_vm5, %v2316_v47, 0.0  ;;  %v2380_v9 = vsel %vm2226_vm5, %v2318_v34, 0.0 }
 0x238   : > { %v2091_v30 = vsel %vm2090_vm10, %v3101_v19, %v2087_v36 }
 0x239   : > { %v2096_v56 = vsel %vm2093_vm11, %v2095_v15, %v2091_v30  ;;  %v2377_v28 = vadd.f32 %v2376_v16, %v2375_v43 }
 0x23a   : > { %v3113_v5 = vpop.eup %3112  ;;  %v2129_v37 = vadd.f32 0.0001, %v2096_v56 }
 0x23b   : > { %v2320_v49 = vmul.f32 0.6931472, %v3113_v5  ;;  %v2379_v17 = vadd.f32 %v2378_v32, %v2377_v28 }
 0x23c   : > { %v2225_v41 = vmul.f32 %v2193_v31, %v2129_v37  ;;  %3114 = vlog2.f32 %v2129_v37 }
 0x23d   : > { %v2382_v12 = vsel %vm2226_vm5, %v2320_v49, 0.0  ;;  %v2381_v54 = vadd.f32 %v2380_v9, %v2379_v17 }
 0x23e   : > { %2258 = vst.msk [vmem:[%s3537_s12 + $0xf8] sm:$0xff] %vm2226_vm5, %v2225_v41 }
 0x23f   : > { %v2383_v52 = vadd.f32 %v2382_v12, %v2381_v54 }
 0x242   : > { %v3115_v27 = vpop.eup %3114 }
 0x243   : > { %v2322_v22 = vmul.f32 0.6931472, %v3115_v27 }
 0x245   : > { %v2384_v2 = vsel %vm2226_vm5, %v2322_v22, 0.0 }
 0x246   : > { %v2385_v40 = vadd.f32 %v2384_v2, %v2383_v52 }
 0x248   : > { %v2386_v35 = vrot.slane %v2385_v40, 4 }
 0x24a   : > { %v2387_v57 = vadd.f32 %v2386_v35, %v2385_v40 }
 0x24c   : > { %v2388_v44 = vrot.slane %v2387_v57, 2 }
 0x24e   : > { %v2389_v45 = vadd.f32 %v2388_v44, %v2387_v57 }
 0x250   : > { %v2390_v19 = vrot.slane %v2389_v45, 1 }
 0x252   : > { %v2391_v1 = vadd.f32 %v2390_v19, %v2389_v45 }
 0x254   : > { %2393 = vst.msk [vmem:[%s307_s23] sm:$0x1] %vm2392_vm12, %v2391_v1 }
 0x255 PF: > { %s18_s24 = sadd.s32 1, %s3129_s24  }
 0x256   : > { %p15_p4 = scmp.ge.s32.totalorder %s18_s24, 4  }
 0x258   :  { %17 = sbr.rel (!%p15_p4) target bundleno = 1 (0x1), region = 93 }

// kernel: srflownet_normal_flow.28
= control target key start
LH: loop header
LB: loop body
LE: loop exit
PB: predicated region body
PF: predicated region fallthrough
CT: control target
= control target key end

     0   :  { %s606_s18 = smov 0   ;;  %s676_s0 = inlined_call_operand.vmem [shape: bf16[2,64,72], index: 0, kind: input, shape index: {}]   ;;  %s677_s1 = inlined_call_operand.vmem [shape: bf16[72,16], index: 1, kind: input, shape index: {}]   ;;  %s678_s2 = inlined_call_operand.vmem [shape: f32[1,16], index: 2, kind: input, shape index: {}]   ;;  %s679_s3 = inlined_call_operand.vmem [shape: bf16[16,16], index: 3, kind: input, shape index: {}]   ;;  %s680_s4 = inlined_call_operand.vmem [shape: f32[1,16], index: 4, kind: input, shape index: {}]   ;;  %s681_s5 = inlined_call_operand.vmem [shape: bf16[2,64,16], index: 5, kind: output, shape index: {}]  }
   0x1 LB: > { %s486_s19 = sadd.s32 4294967295, %s574_s18   ;;  %p490_p0 = scmp.ge.s32.totalorder %s574_s18, 1  ;;  %s574_s18 = sphi %s606_s18, %s15_s18  }
   0x2   : > { %p187_p1 = scmp.lt.s32.totalorder %s574_s18, 3 }
   0x4   : > { %p188_p2 = pnand %p490_p0, %p187_p1 }
   0x5   : > { %p215_p3 = scmp.lt.s32.totalorder (!%p188_p2), %s486_s19, 1 }
   0x6   : > { %191 = sbr.rel (%p188_p2) target bundleno = 371 (0x173), region = 40 }
   0xb   : > { %v242_v0 = vld [vmem:[%s677_s1 + $0x20] sm:$0xf]  ;;  %vm307_vm0 = vcmask 1043456   ;;  %v550_v4 = vld [vmem:[%s677_s1 + $0x18] sm:$0xff]  ;;  %v549_v5 = vld [vmem:[%s677_s1 + $0x10] sm:$0xff]  ;;  %s683_s19 = smov (!%p215_p3, %s486_s19), 1 }
   0xc   : > { %v284_v1 = vunpack.c.l.b16 %v242_v0  ;;  %v548_v6 = vld [vmem:[%s677_s1 + $0x8] sm:$0xff]  ;;  %s541_s28 = sshll.u32 %s683_s19, 5  ;;  %v547_v7 = vld [vmem:[%s677_s1] sm:$0xff]  ;;  %vm294_vm1 = vcmask 588800   ;;  %vm364_vm2 = vcmask 130048   ;;  %vm422_vm3 = vcmask 125952  }
   0xd   : > { %s219_s8 = scalar_lea.vmem %s676_s0, %s541_s28  ;;  %v551_v12 = vld [vmem:[%s679_s3] sm:$0xff]  ;;  %s655_s17 = scalar_lea.vmem %s681_s5, %s541_s28 }
   0xe   : > { %v289_v2 = vpack.c.b16 %v284_v1, %v284_v1  ;;  %v543_v8 = vld [vmem:[%s219_s8] sm:$0xff]  ;;  %v545_v9 = vld [vmem:[%s219_s8 + $0x10] sm:$0xff]  ;;  %v544_v10 = vld [vmem:[%s219_s8 + $0x8] sm:$0xff]  ;;  %384 = vmatpush.bf16.msra.mxu1 %v551_v12  ;;  %557 = vmatpush.bf16.msra.mxu3 %v551_v12 }
   0xf   : > { %v546_v11 = vld [vmem:[%s219_s8 + $0x18] sm:$0xff]  ;;  %v566_v14 = vld [vmem:[%s678_s2] ss:$0 sm:$0xff] }
  0x10   : > { %v309_v3 = vsel %vm307_vm0, %v289_v2, 0  ;;  %v567_v42 = vld [vmem:[%s680_s4] ss:$0 sm:$0xff] }
  0x11   : > { %314 = vmatpush.bf16.msra.mxu0 %v309_v3  ;;  %552 = vmatpush.bf16.msra.mxu2 %v309_v3 }
  0x15   : > { %315 = vmatpush.bf16.msra.mxu0 %v550_v4  ;;  %553 = vmatpush.bf16.msra.mxu2 %v550_v4 }
  0x19   : > { %316 = vmatpush.bf16.msra.mxu0 %v549_v5  ;;  %554 = vmatpush.bf16.msra.mxu2 %v549_v5 }
  0x1d   : > { %317 = vmatpush.bf16.msra.mxu0 %v548_v6  ;;  %555 = vmatpush.bf16.msra.mxu2 %v548_v6 }
  0x21   : > { %318 = vmatpush.bf16.msra.mxu0 %v547_v7  ;;  %556 = vmatpush.bf16.msra.mxu2 %v547_v7 }
  0x24   : > { %527 = vmatmul.msk.bf16.vlgmr.msra.gmra.mxu0 %vm294_vm1, %v543_v8  ;;  %529 = vmatmul.msk.bf16.vlgmr.msra.gmra.mxu2 %vm294_vm1, %v545_v9 }
  0x34   : > { %528 = vmatmul.msk.bf16.gmra.mxu0 %vm294_vm1, %v544_v10  ;;  %530 = vmatmul.msk.bf16.gmra.mxu2 %vm294_vm1, %v546_v11 }
  0xa1   : > { %v320_v13 = vpop.f32.mrf.mxu0 }
  0xa2   : > { %v321_v15 = vadd.f32 %v566_v14, %v320_v13 }
  0xa4   : > { %v340_v18 = vmax.f32 %v321_v15, 0.0 }
  0xa7   : > { %v330_v22 = vpop.f32.mrf.mxu2 }
  0xa8   : > { %v331_v30 = vadd.f32 %v566_v14, %v330_v22 }
  0xa9   : > { %v322_v16 = vpop.f32.mrf.mxu0 }
  0xaa   : > { %v323_v17 = vadd.f32 %v566_v14, %v322_v16  ;;  %v344_v33 = vmax.f32 %v331_v30, 0.0 }
  0xac   : > { %v341_v19 = vmax.f32 %v323_v17, 0.0 }
  0xae   : > { %v348_v20 = vpack.c.bf16 %v341_v19, %v340_v18 }
  0xaf   : > { %v332_v29 = vpop.f32.mrf.mxu2 }
  0xb0   : > { %535 = vmatmul.msk.bf16.vlgmr.msra.gmra.mxu1 %vm364_vm2, %v348_v20  ;;  %v333_v31 = vadd.f32 %v566_v14, %v332_v29 }
  0xb1   : > { %v325_v21 = vpop.f32.mrf.mxu0 }
  0xb2   : > { %v326_v23 = vadd.f32 %v566_v14, %v325_v21  ;;  %v345_v34 = vmax.f32 %v333_v31, 0.0 }
  0xb4   : > { %v342_v26 = vmax.f32 %v326_v23, 0.0  ;;  %v350_v35 = vpack.c.bf16 %v345_v34, %v344_v33 }
  0xb7   : > { %v335_v32 = vpop.f32.mrf.mxu2 }
  0xb8   : > { %v336_v37 = vadd.f32 %v566_v14, %v335_v32 }
  0xb9   : > { %v327_v24 = vpop.f32.mrf.mxu0 }
  0xba   : > { %v328_v25 = vadd.f32 %v566_v14, %v327_v24  ;;  %v346_v39 = vmax.f32 %v336_v37, 0.0 }
  0xbc   : > { %v343_v27 = vmax.f32 %v328_v25, 0.0 }
  0xbe   : > { %v349_v28 = vpack.c.bf16 %v343_v27, %v342_v26 }
  0xbf   : > { %v337_v36 = vpop.f32.mrf.mxu2 }
  0xc0   : > { %536 = vmatmul.msk.bf16.vlgmr.msra.gmra.mxu3 %vm364_vm2, %v349_v28  ;;  %v338_v38 = vadd.f32 %v566_v14, %v337_v36 }
  0xc2   : > { %v347_v40 = vmax.f32 %v338_v38, 0.0 }
  0xc4   : > { %v351_v41 = vpack.c.bf16 %v347_v40, %v346_v39 }
  0xd0   : > { %537 = vmatmul.msk.bf16.gmra.mxu3 %vm364_vm2, %v350_v35 }
  0xe0   : > { %538 = vmatmul.msk.bf16.gmra.mxu3 %vm364_vm2, %v351_v41 }
 0x12d   : > { %v386_v43 = vpop.f32.mrf.mxu1 }
 0x12e   : > { %v387_v44 = vadd.f32 %v567_v42, %v386_v43 }
 0x130   : > { %v406_v45 = vmax.f32 %v387_v44, 0.0 }
 0x132   : > { %v414_v46 = vpack.c.bf16 %v406_v45, %v406_v45 }
 0x134   : > { %423 = vst.msk [vmem:[%s655_s17] sm:$0xf] %vm422_vm3, %v414_v46 }
 0x135   : > { %v388_v47 = vpop.f32.mrf.mxu1 }
 0x136   : > { %v389_v48 = vadd.f32 %v567_v42, %v388_v47 }
 0x138   : > { %v407_v49 = vmax.f32 %v389_v48, 0.0 }
 0x13a   : > { %v415_v50 = vpack.c.bf16 %v407_v49, %v407_v49 }
 0x13c   : > { %424 = vst.msk [vmem:[%s655_s17 + $0x4] sm:$0xf] %vm422_vm3, %v415_v50 }
 0x143   : > { %v391_v51 = vpop.f32.mrf.mxu3 }
 0x144   : > { %v392_v52 = vadd.f32 %v567_v42, %v391_v51 }
 0x146   : > { %v408_v53 = vmax.f32 %v392_v52, 0.0 }
 0x148   : > { %v416_v54 = vpack.c.bf16 %v408_v53, %v408_v53 }
 0x14a   : > { %425 = vst.msk [vmem:[%s655_s17 + $0x8] sm:$0xf] %vm422_vm3, %v416_v54 }
 0x14b   : > { %v393_v55 = vpop.f32.mrf.mxu3 }
 0x14c   : > { %v394_v56 = vadd.f32 %v567_v42, %v393_v55 }
 0x14e   : > { %v409_v57 = vmax.f32 %v394_v56, 0.0 }
 0x150   : > { %v417_v58 = vpack.c.bf16 %v409_v57, %v409_v57 }
 0x152   : > { %426 = vst.msk [vmem:[%s655_s17 + $0xc] sm:$0xf] %vm422_vm3, %v417_v58 }
 0x153   : > { %v396_v59 = vpop.f32.mrf.mxu3 }
 0x154   : > { %v397_v60 = vadd.f32 %v567_v42, %v396_v59 }
 0x156   : > { %v410_v61 = vmax.f32 %v397_v60, 0.0 }
 0x158   : > { %v418_v62 = vpack.c.bf16 %v410_v61, %v410_v61 }
 0x15a   : > { %427 = vst.msk [vmem:[%s655_s17 + $0x10] sm:$0xf] %vm422_vm3, %v418_v62 }
 0x15b   : > { %v398_v63 = vpop.f32.mrf.mxu3 }
 0x15c   : > { %v399_v0 = vadd.f32 %v567_v42, %v398_v63 }
 0x15e   : > { %v411_v1 = vmax.f32 %v399_v0, 0.0 }
 0x160   : > { %v419_v2 = vpack.c.bf16 %v411_v1, %v411_v1 }
 0x162   : > { %428 = vst.msk [vmem:[%s655_s17 + $0x14] sm:$0xf] %vm422_vm3, %v419_v2 }
 0x163   : > { %v401_v3 = vpop.f32.mrf.mxu3 }
 0x164   : > { %v402_v4 = vadd.f32 %v567_v42, %v401_v3 }
 0x166   : > { %v412_v5 = vmax.f32 %v402_v4, 0.0 }
 0x168   : > { %v420_v6 = vpack.c.bf16 %v412_v5, %v412_v5 }
 0x16a   : > { %429 = vst.msk [vmem:[%s655_s17 + $0x18] sm:$0xf] %vm422_vm3, %v420_v6 }
 0x16b   : > { %v403_v7 = vpop.f32.mrf.mxu3 }
 0x16c   : > { %v404_v8 = vadd.f32 %v567_v42, %v403_v7 }
 0x16e   : > { %v413_v9 = vmax.f32 %v404_v8, 0.0 }
 0x170   : > { %v421_v10 = vpack.c.bf16 %v413_v9, %v413_v9 }
 0x172   : > { %430 = vst.msk [vmem:[%s655_s17 + $0x1c] sm:$0xf] %vm422_vm3, %v421_v10 }
 0x173 PF: > { %s15_s18 = sadd.s32 1, %s574_s18  }
 0x174   : > { %p12_p4 = scmp.ge.s32.totalorder %s15_s18, 4  }
 0x176   :  { %14 = sbr.rel (!%p12_p4) target bundleno = 1 (0x1), region = 70 }

// kernel: srflownet_normal_flow.38
= control target key start
LH: loop header
LB: loop body
LE: loop exit
PB: predicated region body
PF: predicated region fallthrough
CT: control target
= control target key end

     0   :  { %s1392_s30 = smov 0   ;;  %s1654_s0 = inlined_call_operand.vmem [shape: bf16[2,64,144], index: 0, kind: input, shape index: {}]   ;;  %s1655_s1 = inlined_call_operand.vmem [shape: bf16[144,48], index: 1, kind: input, shape index: {}]   ;;  %s1656_s2 = inlined_call_operand.vmem [shape: bf16[144,48], index: 2, kind: input, shape index: {}]   ;;  %s1657_s3 = inlined_call_operand.vmem [shape: f32[1,48], index: 3, kind: input, shape index: {}]   ;;  %s1658_s4 = inlined_call_operand.vmem [shape: f32[1,48], index: 4, kind: input, shape index: {}]   ;;  %s1659_s5 = inlined_call_operand.vmem [shape: f32[2,64,48], index: 5, kind: input, shape index: {}]   ;;  %s1660_s6 = inlined_call_operand.vmem [shape: bf16[48,48], index: 6, kind: input, shape index: {}]   ;;  %s1661_s7 = inlined_call_operand.vmem [shape: f32[1,48], index: 7, kind: input, shape index: {}]   ;;  %s1662_s8 = inlined_call_operand.vmem [shape: f32[2,64,48], index: 8, kind: output, shape index: {0}]   ;;  %s1663_s9 = inlined_call_operand.vmem [shape: f32[2,1,48], index: 9, kind: output, shape index: {1}]  }
   0x1 LB: > { %s1093_s10 = sadd.s32 4294967295, %s1340_s30   ;;  %p1097_p0 = scmp.ge.s32.totalorder %s1340_s30, 1  ;;  %s1340_s30 = sphi %s1392_s30, %s20_s30  }
   0x2   : > { %p300_p1 = scmp.lt.s32.totalorder %s1340_s30, 3 }
   0x4   : > { %p301_p2 = pnand %p1097_p0, %p300_p1 }
   0x5   : > { %p344_p3 = scmp.lt.s32.totalorder (!%p301_p2), %s1093_s10, 1 }
   0x6   : > { %304 = sbr.rel (%p301_p2) target bundleno = 299 (0x12b), region = 52 }
   0xb   : > { %v1260_v0 = vld [vmem:[%s1655_s1 + $0x38] sm:$0xff]  ;;  %v1261_v2 = vld [vmem:[%s1655_s1 + $0x40] sm:$0xff]  ;;  %v1259_v4 = vld [vmem:[%s1655_s1 + $0x30] sm:$0xff]  ;;  %s1665_s10 = smov (!%p344_p3, %s1093_s10), 1  ;;  %vm483_vm0 = vcmask 130048   ;;  %vm728_vm1 = vcmask 392192  }
   0xc   : > { %v1269_v1 = vld [vmem:[%s1656_s2 + $0x38] sm:$0xff]  ;;  %v1270_v3 = vld [vmem:[%s1656_s2 + $0x40] sm:$0xff]  ;;  %496 = vmatpush.bf16.msra.mxu0 %v1260_v0  ;;  %v1268_v5 = vld [vmem:[%s1656_s2 + $0x30] sm:$0xff]  ;;  %532 = vmatpush.bf16.msra.mxu1 %v1261_v2  ;;  %s1421_s23 = sshll.u32 %s1665_s10, 6  ;;  %s361_s16 = scalar_lea.vmem %s1663_s9, %s1665_s10 }
   0xd   : > { %630 = vmatpush.bf16.msra.mxu2 %v1269_v1  ;;  %1274 = vmatpush.bf16.msra.mxu3 %v1261_v2  ;;  %s1427_s26 = scalar_lea.vmem %s1654_s0, %s1421_s23  ;;  %v1258_v6 = vld [vmem:[%s1655_s1 + $0x28] sm:$0xff]  ;;  %v1273_v7 = vld [vmem:[%s1660_s6 + $0x10] sm:$0xff]  ;;  %v1257_v16 = vld [vmem:[%s1655_s1 + $0x20] sm:$0xff]  ;;  %s1495_s24 = scalar_lea.vmem %s1659_s5, %s1421_s23 }
   0xe   : > { %v1245_v8 = vld [vmem:[%s1427_s26 + $0x4] sm:$0xf]  ;;  %v1108_v9 = vld [vmem:[%s1427_s26 + $0x8] sm:$0xf0]  ;;  %v1256_v19 = vld [vmem:[%s1655_s1 + $0x18] sm:$0xff]  ;;  %s1570_s14 = scalar_lea.vmem %s1662_s8, %s1421_s23 }
   0xf   : > { %v1249_v10 = vld [vmem:[%s1427_s26 + $0x24] sm:$0xf]  ;;  %v1111_v11 = vor.u32 %v1245_v8, %v1108_v9  ;;  %v1124_v12 = vld [vmem:[%s1427_s26 + $0x28] sm:$0xf0]  ;;  %v1265_v20 = vld [vmem:[%s1656_s2 + $0x18] sm:$0xff] }
  0x10   : > { %497 = vmatpush.bf16.msra.mxu0 %v1259_v4  ;;  %v1267_v13 = vld [vmem:[%s1656_s2 + $0x28] sm:$0xff]  ;;  %746 = vmatpush.bf16.msrb.mxu1 %v1273_v7  ;;  %v1442_v14 = vor.u32 %v1249_v10, %v1124_v12  ;;  %v1266_v17 = vld [vmem:[%s1656_s2 + $0x20] sm:$0xff]  ;;  %v1255_v21 = vld [vmem:[%s1655_s1 + $0x10] sm:$0xff] }
  0x11   : > { %666 = vmatpush.bf16.msrb.mxu3 %v1270_v3  ;;  %631 = vmatpush.bf16.msra.mxu2 %v1268_v5  ;;  %v1272_v15 = vld [vmem:[%s1660_s6 + $0x8] sm:$0xff]  ;;  %v1271_v18 = vld [vmem:[%s1660_s6] sm:$0xff]  ;;  %v1247_v22 = vld [vmem:[%s1427_s26 + $0x14] sm:$0xf] }
  0x12   : > { %1172 = vmatmul.msk.bf16.vlgmr.msra.gmra.mxu1 %vm483_vm0, %v1111_v11  ;;  %1174 = vmatmul.msk.bf16.vlgmr.msra.gmra.mxu3 %vm483_vm0, %v1442_v14  ;;  %v1116_v23 = vld [vmem:[%s1427_s26 + $0x18] sm:$0xf0]  ;;  %v1264_v24 = vld [vmem:[%s1656_s2 + $0x10] sm:$0xff]  ;;  %v1254_v29 = vld [vmem:[%s1655_s1 + $0x8] sm:$0xff] }
  0x13   : > { %v1251_v25 = vld [vmem:[%s1427_s26 + $0x34] sm:$0xf]  ;;  %v1132_v26 = vld [vmem:[%s1427_s26 + $0x38] sm:$0xf0]  ;;  %v1119_v27 = vor.u32 %v1247_v22, %v1116_v23  ;;  %v1263_v30 = vld [vmem:[%s1656_s2 + $0x8] sm:$0xff] }
  0x14   : > { %498 = vmatpush.bf16.msra.mxu0 %v1258_v6  ;;  %747 = vmatpush.bf16.msrb.mxu1 %v1272_v15  ;;  %v1135_v28 = vor.u32 %v1251_v25, %v1132_v26  ;;  %v1253_v31 = vld [vmem:[%s1655_s1] sm:$0xff]  ;;  %v1246_v33 = vld [vmem:[%s1427_s26 + $0x4] sm:$0xf0]  ;;  %v1114_v39 = vld [vmem:[%s1427_s26 + $0x10] sm:$0xf] }
  0x15   : > { %632 = vmatpush.bf16.msra.mxu2 %v1267_v13  ;;  %v1106_v32 = vld [vmem:[%s1427_s26] sm:$0xf]  ;;  %v689_v37 = vld [vmem:[%s1495_s24 + $0x8] sm:$0xff]  ;;  %v1248_v40 = vld [vmem:[%s1427_s26 + $0x14] sm:$0xf0] }
  0x16   : > { %v1262_v34 = vld [vmem:[%s1656_s2] sm:$0xff]  ;;  %v1107_v35 = vor.u32 %v1246_v33, %v1106_v32  ;;  %v1115_v41 = vor.u32 %v1248_v40, %v1114_v39  ;;  %v690_v42 = vld [vmem:[%s1495_s24 + $0x10] sm:$0xff]  ;;  %v691_v43 = vld [vmem:[%s1495_s24 + $0x18] sm:$0xff] }
  0x17   : > { %v688_v36 = vld [vmem:[%s1495_s24] sm:$0xff]  ;;  %v697_v44 = vpack.c.bf16 %v691_v43, %v690_v42  ;;  %v1250_v46 = vld [vmem:[%s1427_s26 + $0x24] sm:$0xf0]  ;;  %v1130_v51 = vld [vmem:[%s1427_s26 + $0x30] sm:$0xf] }
  0x18   : > { %499 = vmatpush.bf16.msra.mxu0 %v1257_v16  ;;  %748 = vmatpush.bf16.msrb.mxu1 %v1271_v18  ;;  %v696_v38 = vpack.c.bf16 %v689_v37, %v688_v36  ;;  %v1122_v45 = vld [vmem:[%s1427_s26 + $0x20] sm:$0xf]  ;;  %v693_v49 = vld [vmem:[%s1495_s24 + $0x28] sm:$0xff]  ;;  %v1252_v52 = vld [vmem:[%s1427_s26 + $0x34] sm:$0xf0] }
  0x19   : > { %633 = vmatpush.bf16.msra.mxu2 %v1266_v17  ;;  %v1123_v47 = vor.u32 %v1250_v46, %v1122_v45  ;;  %v692_v48 = vld [vmem:[%s1495_s24 + $0x20] sm:$0xff]  ;;  %v1131_v53 = vor.u32 %v1252_v52, %v1130_v51  ;;  %v694_v54 = vld [vmem:[%s1495_s24 + $0x30] sm:$0xff]  ;;  %v695_v55 = vld [vmem:[%s1495_s24 + $0x38] sm:$0xff] }
  0x1a   : > { %v698_v50 = vpack.c.bf16 %v693_v49, %v692_v48  ;;  %v699_v56 = vpack.c.bf16 %v695_v55, %v694_v54  ;;  %v1533_v0 = vld [vmem:[%s1658_s4] ss:$0 sm:$0xff] }
  0x1b   : > { %v1554_v33 = vld [vmem:[%s1661_s7] ss:$0 sm:$0xff] }
  0x1c   : > { %500 = vmatpush.bf16.msra.mxu0 %v1256_v19 }
  0x1d   : > { %634 = vmatpush.bf16.msra.mxu2 %v1265_v20 }
  0x20   : > { %501 = vmatpush.bf16.msra.mxu0 %v1255_v21 }
  0x21   : > { %635 = vmatpush.bf16.msra.mxu2 %v1264_v24  ;;  %v1545_v24 = vld [vmem:[%s1657_s3] ss:$0 sm:$0xff] }
  0x22   : > { %1173 = vmatmul.msk.bf16.gmra.mxu1 %vm483_vm0, %v1119_v27  ;;  %1175 = vmatmul.msk.bf16.gmra.mxu3 %vm483_vm0, %v1135_v28 }
  0x24   : > { %502 = vmatpush.bf16.msra.mxu0 %v1254_v29 }
  0x25   : > { %636 = vmatpush.bf16.msra.mxu2 %v1263_v30 }
  0x28   : > { %503 = vmatpush.bf16.msra.mxu0 %v1253_v31 }
  0x29   : > { %637 = vmatpush.bf16.msra.mxu2 %v1262_v34 }
  0x2b   : > { %504 = vmatmul.bf16.vlgmr.msra.gmra.mxu0 %v1107_v35 }
  0x2c   : > { %638 = vmatmul.bf16.vlgmr.msra.gmra.mxu2 %v1107_v35 }
  0x32   : > { %1228 = vmatmul.msk.bf16.vlgmr.msrb.gmra.mxu1 %vm728_vm1, %v696_v38  ;;  %1212 = vmatmul.msk.bf16.vlgmr.msrb.gmra.mxu3 %vm483_vm0, %v1111_v11 }
  0x3b   : > { %509 = vmatmul.bf16.gmra.mxu0 %v1115_v41 }
  0x3c   : > { %643 = vmatmul.bf16.gmra.mxu2 %v1115_v41 }
  0x42   : > { %1229 = vmatmul.msk.bf16.gmra.mxu1 %vm728_vm1, %v697_v44  ;;  %1213 = vmatmul.msk.bf16.gmra.mxu3 %vm483_vm0, %v1119_v27 }
  0x4b   : > { %514 = vmatmul.bf16.gmra.mxu0 %v1123_v47 }
  0x4c   : > { %648 = vmatmul.bf16.gmra.mxu2 %v1123_v47 }
  0x52   : > { %1230 = vmatmul.msk.bf16.gmra.mxu1 %vm728_vm1, %v698_v50  ;;  %1214 = vmatmul.msk.bf16.gmra.mxu3 %vm483_vm0, %v1442_v14 }
  0x5b   : > { %519 = vmatmul.bf16.gmra.mxu0 %v1131_v53 }
  0x5c   : > { %653 = vmatmul.bf16.gmra.mxu2 %v1131_v53 }
  0x62   : > { %1231 = vmatmul.msk.bf16.gmra.mxu1 %vm728_vm1, %v699_v56  ;;  %1215 = vmatmul.msk.bf16.gmra.mxu3 %vm483_vm0, %v1135_v28 }
  0x8f   : > { %v534_v58 = vpop.f32.mrf.mxu1 }
  0x95   : > { %v1520_v57 = vpop.f32.mrf.mxu3 }
  0x97   : > { %v1526_v61 = vpop.f32.mrf.mxu1 }
  0x9d   : > { %v1522_v59 = vpop.f32.mrf.mxu3 }
  0x9f   : > { %v1535_v1 = vpop.f32.mrf.mxu1 }
  0xa5   : > { %v1524_v60 = vpop.f32.mrf.mxu3 }
  0xa7   : > { %v1538_v7 = vpop.f32.mrf.mxu1 }
  0xa8   : > { %v505_v14 = vpop.f32.mrf.mxu0 }
  0xa9   : > { %v506_v32 = vadd.f32 %v1545_v24, %v505_v14 }
  0xab   : > { %v535_v43 = vadd.f32 %v534_v58, %v506_v32 }
  0xad   : > { %v1528_v62 = vpop.f32.mrf.mxu3 }
  0xaf   : > { %v639_v63 = vpop.f32.mrf.mxu2  ;;  %v750_v19 = vpop.f32.mrf.mxu1 }
  0xb0   : > { %v640_v2 = vadd.f32 %v1533_v0, %v639_v63  ;;  %v507_v28 = vpop.f32.mrf.mxu0  ;;  %v751_v44 = vadd.f32 %v1554_v33, %v750_v19 }
  0xb1   : > { %v508_v54 = vadd.f32 %v1545_v24, %v507_v28 }
  0xb2   : > { %v938_v63 = vadd.f32 %v751_v44, %v535_v43 }
  0xb3   : > { %v537_v14 = vadd.f32 %v1526_v61, %v508_v54 }
  0xb5   : > { %v668_v3 = vpop.f32.mrf.mxu3 }
  0xb6   : > { %v669_v5 = vadd.f32 %v668_v3, %v640_v2 }
  0xb7   : > { %v641_v4 = vpop.f32.mrf.mxu2  ;;  %v752_v37 = vpop.f32.mrf.mxu1 }
  0xb8   : > { %v770_v6 = vadd.f32 2.0, %v669_v5  ;;  %v642_v9 = vadd.f32 %v1533_v0, %v641_v4  ;;  %v510_v56 = vpop.f32.mrf.mxu0 }
  0xba   : > { %v1232_v8 = vmul.f32 -1.442695, %v770_v6 }
  0xbc   : > { %1286 = vpow2.f32 %v1232_v8 }
  0xbd   : > { %v670_v10 = vpop.f32.mrf.mxu3 }
  0xbe   : > { %v671_v12 = vadd.f32 %v670_v10, %v642_v9 }
  0xbf   : > { %v644_v11 = vpop.f32.mrf.mxu2 }
  0xc0   : > { %v771_v13 = vadd.f32 2.0, %v671_v12  ;;  %v645_v17 = vadd.f32 %v1533_v0, %v644_v11  ;;  %v755_v11 = vpop.f32.mrf.mxu1 }
  0xc2   : > { %v1287_v15 = vpop.eup %1286  ;;  %v1233_v16 = vmul.f32 -1.442695, %v771_v13 }
  0xc3   : > { %v802_v18 = vadd.f32 1.0, %v1287_v15  ;;  %v753_v15 = vadd.f32 %v1554_v33, %v752_v37 }
  0xc4   : > { %1288 = vpow2.f32 %v1233_v16 }
  0xc5   : > { %1290 = vrcp.f32 %v802_v18  ;;  %v673_v20 = vpop.f32.mrf.mxu3  ;;  %v821_v39 = vand.u32 2147483648, %v802_v18  ;;  %v819_v41 = vand.u32 2147483647, %v802_v18  ;;  %vm815_vm3 = vweird.f32 %v802_v18 }
  0xc6   : > { %v674_v22 = vadd.f32 %v673_v20, %v645_v17 }
  0xc7   : > { %v646_v21 = vpop.f32.mrf.mxu2  ;;  %v822_v50 = vor.u32 1.1754944e-38, %v821_v39  ;;  %vm820_vm5 = vcmp.eq.f32.partialorder %v819_v41, 8.507059e+37 }
  0xc8   : > { %v772_v23 = vadd.f32 2.0, %v674_v22  ;;  %v647_v31 = vadd.f32 %v1533_v0, %v646_v21 }
  0xca   : > { %v1289_v25 = vpop.eup %1288  ;;  %v1234_v26 = vmul.f32 -1.442695, %v772_v23  ;;  %v511_v23 = vadd.f32 %v1545_v24, %v510_v56 }
  0xcb   : > { %v1291_v27 = vpop.eup %1290  ;;  %v1547_v29 = vadd.f32 1.0, %v1289_v25 }
  0xcc   : > { %v811_v30 = vmul.f32 %v1291_v27, %v802_v18  ;;  %1292 = vpow2.f32 %v1234_v26  ;;  %vm816_vm2 = vweird.f32 %v1291_v27  ;;  %v540_v37 = vadd.f32 %v1535_v1, %v511_v23 }
  0xcd   : > { %1294 = vrcp.f32 %v1547_v29  ;;  %v675_v34 = vpop.f32.mrf.mxu3  ;;  %vm817_vm4 = vmor %vm815_vm3, %vm816_vm2  ;;  %v836_v5 = vand.u32 2147483648, %v1547_v29  ;;  %v834_v10 = vand.u32 2147483647, %v1547_v29  ;;  %vm830_vm7 = vweird.f32 %v1547_v29 }
  0xce   : > { %v812_v36 = vsub.f32 1.0, %v811_v30  ;;  %v676_v38 = vadd.f32 %v675_v34, %v647_v31  ;;  %v512_v30 = vpop.f32.mrf.mxu0 }
  0xcf   : > { %v649_v35 = vpop.f32.mrf.mxu2  ;;  %v837_v18 = vor.u32 1.1754944e-38, %v836_v5  ;;  %vm835_vm9 = vcmp.eq.f32.partialorder %v834_v10, 8.507059e+37 }
  0xd0   : > { %v813_v40 = vmul.f32 %v1291_v27, %v812_v36  ;;  %v773_v42 = vadd.f32 2.0, %v676_v38  ;;  %v650_v48 = vadd.f32 %v1533_v0, %v649_v35 }
  0xd2   : > { %v1293_v45 = vpop.eup %1292  ;;  %v814_v46 = vadd.f32 %v1291_v27, %v813_v40  ;;  %v1235_v47 = vmul.f32 -1.442695, %v773_v42  ;;  %v756_v40 = vadd.f32 %v1554_v33, %v755_v11  ;;  %v757_v42 = vpop.f32.mrf.mxu1 }
  0xd3   : > { %v1295_v49 = vpop.eup %1294  ;;  %v1559_v51 = vadd.f32 1.0, %v1293_v45 }
  0xd4   : > { %v818_v52 = vsel %vm817_vm4, %v1291_v27, %v814_v46  ;;  %v826_v53 = vmul.f32 %v1295_v49, %v1547_v29  ;;  %1296 = vpow2.f32 %v1235_v47  ;;  %vm831_vm6 = vweird.f32 %v1295_v49 }
  0xd5   : > { %v823_v55 = vsel %vm820_vm5, %v822_v50, %v818_v52  ;;  %1298 = vrcp.f32 %v1559_v51  ;;  %v678_v58 = vpop.f32.mrf.mxu3  ;;  %vm832_vm8 = vmor %vm830_vm7, %vm831_vm6  ;;  %v939_v27 = vadd.f32 %v753_v15, %v537_v14  ;;  %v851_v31 = vand.u32 2147483648, %v1559_v51 }
  0xd6   : > { %v1564_v2 = vadd.f32 0.0001, %v823_v55  ;;  %v827_v3 = vsub.f32 1.0, %v826_v53  ;;  %v679_v4 = vadd.f32 %v678_v58, %v650_v48  ;;  %v849_v36 = vand.u32 2147483647, %v1559_v51 }
  0xd7   : > { %v651_v6 = vpop.f32.mrf.mxu2  ;;  %vm845_vm11 = vweird.f32 %v1559_v51  ;;  %v852_v45 = vor.u32 1.1754944e-38, %v851_v31 }
  0xd8   : > { %v946_v8 = vmul.f32 %v938_v63, %v1564_v2  ;;  %v828_v9 = vmul.f32 %v1295_v49, %v827_v3  ;;  %v774_v12 = vadd.f32 2.0, %v679_v4  ;;  %v652_v25 = vadd.f32 %v1533_v0, %v651_v6 }
  0xd9   : > { %vm850_vm13 = vcmp.eq.f32.partialorder %v849_v36, 8.507059e+37  ;;  %v758_v6 = vadd.f32 %v1554_v33, %v757_v42 }
  0xda   : > { %v1297_v13 = vpop.eup %1296  ;;  %954 = vst.msk [vmem:[%s1570_s14] sm:$0xff] %vm728_vm1, %v946_v8  ;;  %v829_v16 = vadd.f32 %v1295_v49, %v828_v9  ;;  %v1236_v20 = vmul.f32 -1.442695, %v774_v12  ;;  %v515_v8 = vpop.f32.mrf.mxu0 }
  0xdb   : > { %v1299_v17 = vpop.eup %1298  ;;  %v1580_v19 = vadd.f32 1.0, %v1297_v13 }
  0xdc   : > { %v833_v21 = vsel %vm832_vm8, %v1295_v49, %v829_v16  ;;  %v841_v22 = vmul.f32 %v1299_v17, %v1559_v51  ;;  %vm846_vm10 = vweird.f32 %v1299_v17  ;;  %v513_v49 = vadd.f32 %v1545_v24, %v512_v30  ;;  %v760_v16 = vpop.f32.mrf.mxu1 }
  0xdd   : > { %v838_v61 = vsel %vm835_vm9, %v837_v18, %v833_v21  ;;  %1300 = vrcp.f32 %v1580_v19  ;;  %v680_v26 = vpop.f32.mrf.mxu3  ;;  %vm847_vm12 = vmor %vm845_vm11, %vm846_vm10  ;;  %v940_v51 = vadd.f32 %v756_v40, %v540_v37  ;;  %v866_v58 = vand.u32 2147483648, %v1580_v19 }
  0xde   : > { %v1586_v28 = vadd.f32 0.0001, %v838_v61  ;;  %v842_v29 = vsub.f32 1.0, %v841_v22  ;;  %1302 = vpow2.f32 %v1236_v20  ;;  %v681_v32 = vadd.f32 %v680_v26, %v652_v25 }
  0xdf   : > { %v654_v39 = vpop.f32.mrf.mxu2  ;;  %v864_v4 = vand.u32 2147483647, %v1580_v19  ;;  %v542_v5 = vadd.f32 %v1538_v7, %v513_v49  ;;  %vm860_vm15 = vweird.f32 %v1580_v19  ;;  %v867_v12 = vor.u32 1.1754944e-38, %v866_v58 }
  0xe0   : > { %v947_v34 = vmul.f32 %v939_v27, %v1586_v28  ;;  %v843_v35 = vmul.f32 %v1299_v17, %v842_v29  ;;  %v775_v38 = vadd.f32 2.0, %v681_v32  ;;  %v655_v43 = vadd.f32 %v1533_v0, %v654_v39 }
  0xe1   : > { %vm865_vm2 = vcmp.eq.f32.partialorder %v864_v4, 8.507059e+37  ;;  %v941_v18 = vadd.f32 %v758_v6, %v542_v5  ;;  %v516_v27 = vadd.f32 %v1545_v24, %v515_v8 }
  0xe2   : > { %955 = vst.msk [vmem:[%s1570_s14 + $0x8] sm:$0xff] %vm728_vm1, %v947_v34  ;;  %v844_v41 = vadd.f32 %v1299_v17, %v843_v35  ;;  %v1237_v46 = vmul.f32 -1.442695, %v775_v38  ;;  %v761_v35 = vadd.f32 %v1554_v33, %v760_v16  ;;  %v517_v36 = vpop.f32.mrf.mxu0 }
  0xe3   : > { %v1301_v44 = vpop.eup %1300  ;;  %v545_v42 = vadd.f32 %v1520_v57, %v516_v27  ;;  %v518_v49 = vadd.f32 %v1545_v24, %v517_v36 }
  0xe4   : > { %v1303_v47 = vpop.eup %1302  ;;  %v848_v48 = vsel %vm847_vm12, %v1299_v17, %v844_v41  ;;  %v856_v1 = vmul.f32 %v1301_v44, %v1580_v19  ;;  %1304 = vpow2.f32 %v1237_v46  ;;  %vm861_vm14 = vweird.f32 %v1301_v44 }
  0xe5   : > { %v853_v50 = vsel %vm850_vm13, %v852_v45, %v848_v48  ;;  %v806_v52 = vadd.f32 1.0, %v1303_v47  ;;  %v683_v53 = vpop.f32.mrf.mxu3  ;;  %vm862_vm0 = vmor %vm860_vm15, %vm861_vm14  ;;  %v942_v47 = vadd.f32 %v761_v35, %v545_v42  ;;  %v547_v58 = vadd.f32 %v1522_v59, %v518_v49 }
  0xe6   : > { %v1599_v54 = vadd.f32 0.0001, %v853_v50  ;;  %v857_v55 = vsub.f32 1.0, %v856_v1  ;;  %v684_v56 = vadd.f32 %v683_v53, %v655_v43 }
  0xe7   : > { %1306 = vrcp.f32 %v806_v52  ;;  %v656_v14 = vpop.f32.mrf.mxu2  ;;  %v881_v29 = vand.u32 2147483648, %v806_v52  ;;  %v879_v31 = vand.u32 2147483647, %v806_v52  ;;  %vm875_vm4 = vweird.f32 %v806_v52 }
  0xe8   : > { %v948_v63 = vmul.f32 %v940_v51, %v1599_v54  ;;  %v858_v3 = vmul.f32 %v1301_v44, %v857_v55  ;;  %v776_v9 = vadd.f32 2.0, %v684_v56  ;;  %v657_v19 = vadd.f32 %v1533_v0, %v656_v14 }
  0xe9   : > { %v882_v40 = vor.u32 1.1754944e-38, %v881_v29  ;;  %vm880_vm6 = vcmp.eq.f32.partialorder %v879_v31, 8.507059e+37 }
  0xea   : > { %956 = vst.msk [vmem:[%s1570_s14 + $0x10] sm:$0xff] %vm728_vm1, %v948_v63  ;;  %v859_v10 = vadd.f32 %v1301_v44, %v858_v3  ;;  %v1305_v11 = vpop.eup %1304  ;;  %v1238_v13 = vmul.f32 -1.442695, %v776_v9  ;;  %v520_v63 = vpop.f32.mrf.mxu0 }
  0xeb   : > { %v807_v17 = vadd.f32 1.0, %v1305_v11 }
  0xec   : > { %v863_v15 = vsel %vm862_vm0, %v1301_v44, %v859_v10  ;;  %1308 = vpow2.f32 %v1238_v13  ;;  %v762_v44 = vpop.f32.mrf.mxu1 }
  0xed   : > { %v1307_v7 = vpop.eup %1306  ;;  %v868_v20 = vsel %vm865_vm2, %v867_v12, %v863_v15  ;;  %v685_v21 = vpop.f32.mrf.mxu3  ;;  %1310 = vrcp.f32 %v807_v17  ;;  %v896_v1 = vand.u32 2147483648, %v807_v17  ;;  %v763_v51 = vadd.f32 %v1554_v33, %v762_v44 }
  0xee   : > { %v1609_v22 = vadd.f32 0.0001, %v868_v20  ;;  %v871_v23 = vmul.f32 %v1307_v7, %v806_v52  ;;  %v686_v26 = vadd.f32 %v685_v21, %v657_v19  ;;  %vm876_vm3 = vweird.f32 %v1307_v7 }
  0xef   : > { %vm877_vm5 = vmor %vm875_vm4, %vm876_vm3  ;;  %v894_v52 = vand.u32 2147483647, %v807_v17  ;;  %vm890_vm8 = vweird.f32 %v807_v17  ;;  %v897_v56 = vor.u32 1.1754944e-38, %v896_v1  ;;  %v943_v8 = vadd.f32 %v763_v51, %v547_v58 }
  0xf0   : > { %v949_v61 = vmul.f32 %v941_v18, %v1609_v22  ;;  %v872_v25 = vsub.f32 1.0, %v871_v23  ;;  %v777_v32 = vadd.f32 2.0, %v686_v26  ;;  %v521_v12 = vadd.f32 %v1545_v24, %v520_v63 }
  0xf1   : > { %vm895_vm10 = vcmp.eq.f32.partialorder %v894_v52, 8.507059e+37  ;;  %vm999_vm4 = vcmask 385024  }
  0xf2   : > { %957 = vst.msk [vmem:[%s1570_s14 + $0x18] sm:$0xff] %vm728_vm1, %v949_v61  ;;  %v873_v30 = vmul.f32 %v1307_v7, %v872_v25  ;;  %v1309_v34 = vpop.eup %1308  ;;  %v1239_v39 = vmul.f32 -1.442695, %v777_v32  ;;  %v550_v20 = vadd.f32 %v1524_v60, %v521_v12  ;;  %v522_v26 = vpop.f32.mrf.mxu0 }
  0xf3   : > { %v1311_v37 = vpop.eup %1310  ;;  %v808_v0 = vadd.f32 1.0, %v1309_v34  ;;  %v523_v31 = vadd.f32 %v1545_v24, %v522_v26 }
  0xf4   : > { %v874_v38 = vadd.f32 %v1307_v7, %v873_v30  ;;  %v886_v41 = vmul.f32 %v1311_v37, %v807_v17  ;;  %vm891_vm7 = vweird.f32 %v1311_v37  ;;  %v765_v13 = vpop.f32.mrf.mxu1 }
  0xf5   : > { %1312 = vrcp.f32 %v808_v0  ;;  %vm892_vm9 = vmor %vm890_vm8, %vm891_vm7  ;;  %v911_v14 = vand.u32 2147483648, %v808_v0  ;;  %v909_v17 = vand.u32 2147483647, %v808_v0  ;;  %v766_v59 = vadd.f32 %v1554_v33, %v765_v13 }
  0xf6   : > { %v878_v43 = vsel %vm877_vm5, %v1307_v7, %v874_v38  ;;  %v887_v46 = vsub.f32 1.0, %v886_v41  ;;  %1314 = vpow2.f32 %v1239_v39  ;;  %vm905_vm12 = vweird.f32 %v808_v0 }
  0xf7   : > { %v883_v45 = vsel %vm880_vm6, %v882_v40, %v878_v43  ;;  %v912_v18 = vor.u32 1.1754944e-38, %v911_v14  ;;  %vm910_vm14 = vcmp.eq.f32.partialorder %v909_v17, 8.507059e+37  ;;  %v552_v44 = vadd.f32 %v1528_v62, %v523_v31 }
  0xf8   : > { %v934_v48 = vadd.f32 0.0001, %v883_v45  ;;  %v888_v50 = vmul.f32 %v1311_v37, %v887_v46 }
  0xfa   : > { %v950_v53 = vmul.f32 %v942_v47, %v934_v48  ;;  %v889_v57 = vadd.f32 %v1311_v37, %v888_v50 }
  0xfb   : > { %v1313_v55 = vpop.eup %1312 }
  0xfc   : > { %958 = vst.msk [vmem:[%s1570_s14 + $0x20] sm:$0xff] %vm728_vm1, %v950_v53  ;;  %v893_v3 = vsel %vm892_vm9, %v1311_v37, %v889_v57  ;;  %v901_v4 = vmul.f32 %v1313_v55, %v808_v0  ;;  %v1315_v5 = vpop.eup %1314  ;;  %vm906_vm11 = vweird.f32 %v1313_v55  ;;  %v767_v32 = vpop.f32.mrf.mxu1 }
  0xfd   : > { %v898_v6 = vsel %vm895_vm10, %v897_v56, %v893_v3  ;;  %v809_v11 = vadd.f32 1.0, %v1315_v5  ;;  %vm907_vm13 = vmor %vm905_vm12, %vm906_vm11  ;;  %v768_v39 = vadd.f32 %v1554_v33, %v767_v32 }
  0xfe   : > { %v935_v9 = vadd.f32 0.0001, %v898_v6  ;;  %v902_v10 = vsub.f32 1.0, %v901_v4 }
  0xff   : > { %1316 = vrcp.f32 %v809_v11  ;;  %v926_v34 = vand.u32 2147483648, %v809_v11  ;;  %v924_v36 = vand.u32 2147483647, %v809_v11  ;;  %vm920_vm0 = vweird.f32 %v809_v11 }
 0x100   : > { %v951_v15 = vmul.f32 %v943_v8, %v935_v9  ;;  %v903_v16 = vmul.f32 %v1313_v55, %v902_v10  ;;  %1318 = vlog2.f32 %v1586_v28  ;;  %v944_v28 = vadd.f32 %v766_v59, %v550_v20 }
 0x101   : > { %1320 = vlog2.f32 %v1564_v2  ;;  %v927_v43 = vor.u32 1.1754944e-38, %v926_v34  ;;  %vm925_vm3 = vcmp.eq.f32.partialorder %v924_v36, 8.507059e+37  ;;  %v945_v50 = vadd.f32 %v768_v39, %v552_v44 }
 0x102   : > { %959 = vst.msk [vmem:[%s1570_s14 + $0x28] sm:$0xff] %vm728_vm1, %v951_v15  ;;  %v904_v7 = vadd.f32 %v1313_v55, %v903_v16  ;;  %1322 = vlog2.f32 %v1599_v54 }
 0x103   : > { %1324 = vlog2.f32 %v1609_v22 }
 0x104   : > { %v908_v21 = vsel %vm907_vm13, %v1313_v55, %v904_v7  ;;  %1326 = vlog2.f32 %v934_v48 }
 0x105   : > { %v913_v23 = vsel %vm910_vm14, %v912_v18, %v908_v21  ;;  %v1317_v61 = vpop.eup %1316  ;;  %1328 = vlog2.f32 %v935_v9 }
 0x106   : > { %v936_v19 = vadd.f32 0.0001, %v913_v23  ;;  %v1319_v25 = vpop.eup %1318  ;;  %v916_v2 = vmul.f32 %v1317_v61, %v809_v11  ;;  %vm921_vm15 = vweird.f32 %v1317_v61 }
 0x107   : > { %v1321_v29 = vpop.eup %1320  ;;  %v965_v54 = vmul.f32 0.6931472, %v1319_v25  ;;  %vm922_vm2 = vmor %vm920_vm0, %vm921_vm15 }
 0x108   : > { %v952_v27 = vmul.f32 %v944_v28, %v936_v19  ;;  %v1323_v30 = vpop.eup %1322  ;;  %v917_v60 = vsub.f32 1.0, %v916_v2  ;;  %1330 = vlog2.f32 %v936_v19  ;;  %v963_v37 = vmul.f32 0.6931472, %v1321_v29 }
 0x109   : > { %v1325_v22 = vpop.eup %1324  ;;  %v967_v38 = vmul.f32 0.6931472, %v1323_v30  ;;  %v979_v41 = vsel %vm728_vm1, %v965_v54, 0.0 }
 0x10a   : > { %960 = vst.msk [vmem:[%s1570_s14 + $0x30] sm:$0xff] %vm728_vm1, %v952_v27  ;;  %v918_v35 = vmul.f32 %v1317_v61, %v917_v60  ;;  %v1327_v0 = vpop.eup %1326  ;;  %v969_v42 = vmul.f32 0.6931472, %v1325_v22  ;;  %v978_v46 = vsel %vm728_vm1, %v963_v37, 0.0 }
 0x10b   : > { %v1329_v24 = vpop.eup %1328  ;;  %v981_v47 = vsel %vm728_vm1, %v967_v38, 0.0  ;;  %v971_v48 = vmul.f32 0.6931472, %v1327_v0  ;;  %v980_v49 = vadd.f32 %v979_v41, %v978_v46 }
 0x10c   : > { %v919_v40 = vadd.f32 %v1317_v61, %v918_v35  ;;  %v983_v53 = vsel %vm728_vm1, %v969_v42, 0.0  ;;  %v973_v51 = vmul.f32 0.6931472, %v1329_v24 }
 0x10d   : > { %v982_v57 = vadd.f32 %v981_v47, %v980_v49  ;;  %v985_v62 = vsel %vm728_vm1, %v971_v48, 0.0 }
 0x10e   : > { %v923_v45 = vsel %vm922_vm2, %v1317_v61, %v919_v40  ;;  %v1331_v33 = vpop.eup %1330  ;;  %v987_v63 = vsel %vm728_vm1, %v973_v51, 0.0 }
 0x10f   : > { %v928_v1 = vsel %vm925_vm3, %v927_v43, %v923_v45  ;;  %v975_v56 = vmul.f32 0.6931472, %v1331_v33  ;;  %v984_v58 = vadd.f32 %v983_v53, %v982_v57 }
 0x110   : > { %v937_v52 = vadd.f32 0.0001, %v928_v1 }
 0x111   : > { %v986_v3 = vadd.f32 %v985_v62, %v984_v58  ;;  %v989_v4 = vsel %vm728_vm1, %v975_v56, 0.0 }
 0x112   : > { %v953_v55 = vmul.f32 %v945_v50, %v937_v52  ;;  %1332 = vlog2.f32 %v937_v52 }
 0x113   : > { %v988_v6 = vadd.f32 %v987_v63, %v986_v3 }
 0x114   : > { %961 = vst.msk [vmem:[%s1570_s14 + $0x38] sm:$0xff] %vm728_vm1, %v953_v55 }
 0x115   : > { %v990_v9 = vadd.f32 %v989_v4, %v988_v6 }
 0x118   : > { %v1333_v5 = vpop.eup %1332 }
 0x119   : > { %v977_v8 = vmul.f32 0.6931472, %v1333_v5 }
 0x11b   : > { %v991_v10 = vsel %vm728_vm1, %v977_v8, 0.0 }
 0x11c   : > { %v992_v11 = vadd.f32 %v991_v10, %v990_v9 }
 0x11e   : > { %v993_v12 = vrot.slane %v992_v11, 4 }
 0x120   : > { %v994_v13 = vadd.f32 %v993_v12, %v992_v11 }
 0x122   : > { %v995_v14 = vrot.slane %v994_v13, 2 }
 0x124   : > { %v996_v15 = vadd.f32 %v995_v14, %v994_v13 }
 0x126   : > { %v997_v16 = vrot.slane %v996_v15, 1 }
 0x128   : > { %v998_v17 = vadd.f32 %v997_v16, %v996_v15 }
 0x12a   : > { %1000 = vst.msk [vmem:[%s361_s16] sm:$0x1] %vm999_vm4, %v998_v17 }
 0x12b PF: > { %s20_s30 = sadd.s32 1, %s1340_s30  }
 0x12c   : > { %p17_p4 = scmp.ge.s32.totalorder %s20_s30, 4  }
 0x12e   :  { %19 = sbr.rel (!%p17_p4) target bundleno = 1 (0x1), region = 97 }

// kernel: srflownet_normal_flow.39
= control target key start
LH: loop header
LB: loop body
LE: loop exit
PB: predicated region body
PF: predicated region fallthrough
CT: control target
= control target key end

     0   :  { %s919_s18 = smov 0   ;;  %s1055_s0 = inlined_call_operand.vmem [shape: bf16[2,64,288], index: 0, kind: input, shape index: {}]   ;;  %s1056_s1 = inlined_call_operand.vmem [shape: bf16[288,16], index: 1, kind: input, shape index: {}]   ;;  %s1057_s2 = inlined_call_operand.vmem [shape: f32[1,16], index: 2, kind: input, shape index: {}]   ;;  %s1058_s3 = inlined_call_operand.vmem [shape: bf16[16,16], index: 3, kind: input, shape index: {}]   ;;  %s1059_s4 = inlined_call_operand.vmem [shape: f32[1,16], index: 4, kind: input, shape index: {}]   ;;  %s1060_s5 = inlined_call_operand.vmem [shape: bf16[2,64,16], index: 5, kind: output, shape index: {}]  }
   0x1 LB: > { %s696_s19 = sadd.s32 4294967295, %s887_s18   ;;  %p700_p0 = scmp.ge.s32.totalorder %s887_s18, 1  ;;  %s887_s18 = sphi %s919_s18, %s15_s18  }
   0x2   : > { %p187_p1 = scmp.lt.s32.totalorder %s887_s18, 3 }
   0x4   : > { %p188_p2 = pnand %p700_p0, %p187_p1 }
   0x5   : > { %p215_p3 = scmp.lt.s32.totalorder (!%p188_p2), %s696_s19, 1 }
   0x6   : > { %191 = sbr.rel (%p188_p2) target bundleno = 382 (0x17e), region = 40 }
   0xb   : > { %v858_v0 = vld [vmem:[%s1056_s1 + $0x38] sm:$0xff]  ;;  %v857_v2 = vld [vmem:[%s1056_s1 + $0x30] sm:$0xff]  ;;  %v868_v4 = vld [vmem:[%s1056_s1 + $0x88] sm:$0xff]  ;;  %s1062_s19 = smov (!%p215_p3, %s696_s19), 1  ;;  %vm450_vm0 = vcmask 261120   ;;  %vm574_vm1 = vcmask 130048  }
   0xc   : > { %v866_v1 = vld [vmem:[%s1056_s1 + $0x78] sm:$0xff]  ;;  %463 = vmatpush.bf16.msra.mxu0 %v858_v0  ;;  %v865_v3 = vld [vmem:[%s1056_s1 + $0x70] sm:$0xff]  ;;  %527 = vmatpush.bf16.msra.mxu2 %v868_v4  ;;  %v867_v5 = vld [vmem:[%s1056_s1 + $0x80] sm:$0xff]  ;;  %s870_s7 = smul.u32 96, %s1062_s19  ;;  %s838_s20 = sshll.u32 %s1062_s19, 5  ;;  %vm632_vm2 = vcmask 125952  }
   0xd   : > { %492 = vmatpush.bf16.msra.mxu1 %v866_v1  ;;  %v856_v6 = vld [vmem:[%s1056_s1 + $0x28] sm:$0xff]  ;;  %v855_v11 = vld [vmem:[%s1056_s1 + $0x20] sm:$0xff]  ;;  %v854_v13 = vld [vmem:[%s1056_s1 + $0x18] sm:$0xff]  ;;  %s1034_s23 = scalar_lea.vmem %s1060_s5, %s838_s20 }
   0xe   : > { %v864_v7 = vld [vmem:[%s1056_s1 + $0x68] sm:$0xff]  ;;  %s957_s14 = scalar_lea.vmem %s1055_s0, %s870_s7  ;;  %v863_v12 = vld [vmem:[%s1056_s1 + $0x60] sm:$0xff]  ;;  %v862_v14 = vld [vmem:[%s1056_s1 + $0x58] sm:$0xff] }
   0xf   : > { %v714_v8 = vld [vmem:[%s957_s14 + $0x8] sm:$0xf]  ;;  %v841_v9 = vld [vmem:[%s957_s14 + $0x10] sm:$0xf0]  ;;  %v726_v17 = vld [vmem:[%s957_s14 + $0x20] sm:$0xf] }
  0x10   : > { %464 = vmatpush.bf16.msra.mxu0 %v857_v2  ;;  %528 = vmatpush.bf16.msra.mxu2 %v867_v5  ;;  %v715_v10 = vor.u32 %v841_v9, %v714_v8  ;;  %v853_v15 = vld [vmem:[%s1056_s1 + $0x10] sm:$0xff]  ;;  %v844_v18 = vld [vmem:[%s957_s14 + $0x28] sm:$0xf0]  ;;  %v851_v22 = vld [vmem:[%s1056_s1] sm:$0xff] }
  0x11   : > { %493 = vmatpush.bf16.msra.mxu1 %v865_v3  ;;  %v861_v16 = vld [vmem:[%s1056_s1 + $0x50] sm:$0xff]  ;;  %v852_v19 = vld [vmem:[%s1056_s1 + $0x8] sm:$0xff]  ;;  %v727_v21 = vor.u32 %v844_v18, %v726_v17  ;;  %v859_v23 = vld [vmem:[%s1056_s1 + $0x40] sm:$0xff] }
  0x12   : > { %v860_v20 = vld [vmem:[%s1056_s1 + $0x48] sm:$0xff]  ;;  %v706_v24 = vld [vmem:[%s957_s14] sm:$0xf]  ;;  %v839_v26 = vld [vmem:[%s957_s14 + $0x4] sm:$0xf] }
  0x13   : > { %824 = vmatmul.msk.bf16.vlgmr.msra.gmra.mxu2 %vm450_vm0, %v715_v10  ;;  %v840_v25 = vld [vmem:[%s957_s14 + $0x8] sm:$0xf0]  ;;  %v708_v27 = vld [vmem:[%s957_s14 + $0xc] sm:$0xf0]  ;;  %v738_v30 = vld [vmem:[%s957_s14 + $0x38] sm:$0xf] }
  0x14   : > { %465 = vmatpush.bf16.msra.mxu0 %v856_v6  ;;  %v707_v28 = vor.u32 %v840_v25, %v706_v24  ;;  %v711_v29 = vor.u32 %v839_v26, %v708_v27  ;;  %v847_v31 = vld [vmem:[%s957_s14 + $0x40] sm:$0xf0]  ;;  %v718_v33 = vld [vmem:[%s957_s14 + $0x18] sm:$0xf]  ;;  %v842_v35 = vld [vmem:[%s957_s14 + $0x1c] sm:$0xf] }
  0x15   : > { %494 = vmatpush.bf16.msra.mxu1 %v864_v7  ;;  %v739_v32 = vor.u32 %v847_v31, %v738_v30  ;;  %v843_v34 = vld [vmem:[%s957_s14 + $0x20] sm:$0xf0]  ;;  %v720_v36 = vld [vmem:[%s957_s14 + $0x24] sm:$0xf0]  ;;  %v750_v39 = vld [vmem:[%s957_s14 + $0x50] sm:$0xf] }
  0x16   : > { %v719_v37 = vor.u32 %v843_v34, %v718_v33  ;;  %v723_v38 = vor.u32 %v842_v35, %v720_v36  ;;  %v850_v40 = vld [vmem:[%s957_s14 + $0x58] sm:$0xf0]  ;;  %v730_v42 = vld [vmem:[%s957_s14 + $0x30] sm:$0xf]  ;;  %v845_v44 = vld [vmem:[%s957_s14 + $0x34] sm:$0xf] }
  0x17   : > { %v751_v41 = vor.u32 %v850_v40, %v750_v39  ;;  %v846_v43 = vld [vmem:[%s957_s14 + $0x38] sm:$0xf0]  ;;  %v732_v45 = vld [vmem:[%s957_s14 + $0x3c] sm:$0xf0]  ;;  %v742_v48 = vld [vmem:[%s957_s14 + $0x48] sm:$0xf] }
  0x18   : > { %466 = vmatpush.bf16.msra.mxu0 %v855_v11  ;;  %v731_v46 = vor.u32 %v846_v43, %v730_v42  ;;  %v735_v47 = vor.u32 %v845_v44, %v732_v45  ;;  %v849_v49 = vld [vmem:[%s957_s14 + $0x50] sm:$0xf0]  ;;  %v848_v50 = vld [vmem:[%s957_s14 + $0x4c] sm:$0xf]  ;;  %v744_v51 = vld [vmem:[%s957_s14 + $0x54] sm:$0xf0] }
  0x19   : > { %495 = vmatpush.bf16.msra.mxu1 %v863_v12  ;;  %v743_v52 = vor.u32 %v849_v49, %v742_v48  ;;  %v747_v53 = vor.u32 %v848_v50, %v744_v51  ;;  %v869_v54 = vld [vmem:[%s1058_s3] sm:$0xff] }
  0x1a   : > { %594 = vmatpush.bf16.msra.mxu3 %v869_v54  ;;  %v879_v56 = vld [vmem:[%s1057_s2] ss:$0 sm:$0xff] }
  0x1c   : > { %467 = vmatpush.bf16.msra.mxu0 %v854_v13 }
  0x1d   : > { %496 = vmatpush.bf16.msra.mxu1 %v862_v14 }
  0x20   : > { %468 = vmatpush.bf16.msra.mxu0 %v853_v15 }
  0x21   : > { %497 = vmatpush.bf16.msra.mxu1 %v861_v16 }
  0x23   : > { %825 = vmatmul.msk.bf16.gmra.mxu2 %vm450_vm0, %v727_v21 }
  0x24   : > { %469 = vmatpush.bf16.msra.mxu0 %v852_v19 }
  0x25   : > { %498 = vmatpush.bf16.msra.mxu1 %v860_v20 }
  0x28   : > { %470 = vmatpush.bf16.msra.mxu0 %v851_v22 }
  0x29   : > { %499 = vmatpush.bf16.msra.mxu1 %v859_v23 }
  0x2b   : > { %471 = vmatmul.bf16.vlgmr.msra.gmra.mxu0 %v707_v28 }
  0x2c   : > { %500 = vmatmul.bf16.vlgmr.msra.gmra.mxu1 %v711_v29 }
  0x33   : > { %826 = vmatmul.msk.bf16.gmra.mxu2 %vm450_vm0, %v739_v32 }
  0x3b   : > { %476 = vmatmul.bf16.gmra.mxu0 %v719_v37 }
  0x3c   : > { %505 = vmatmul.bf16.gmra.mxu1 %v723_v38 }
  0x43   : > { %827 = vmatmul.msk.bf16.gmra.mxu2 %vm450_vm0, %v751_v41 }
  0x4b   : > { %481 = vmatmul.bf16.gmra.mxu0 %v731_v46 }
  0x4c   : > { %510 = vmatmul.bf16.gmra.mxu1 %v735_v47 }
  0x5b   : > { %486 = vmatmul.bf16.gmra.mxu0 %v743_v52  ;;  %v880_v52 = vld [vmem:[%s1059_s4] ss:$0 sm:$0xff] }
  0x5c   : > { %515 = vmatmul.bf16.gmra.mxu1 %v747_v53 }
  0x96   : > { %v530_v55 = vpop.f32.mrf.mxu2 }
  0x9e   : > { %v532_v57 = vpop.f32.mrf.mxu2 }
  0xa6   : > { %v535_v1 = vpop.f32.mrf.mxu2 }
  0xa8   : > { %v472_v58 = vpop.f32.mrf.mxu0 }
  0xa9   : > { %v501_v59 = vpop.f32.mrf.mxu1  ;;  %v473_v60 = vadd.f32 %v879_v56, %v472_v58 }
  0xab   : > { %v502_v61 = vadd.f32 %v501_v59, %v473_v60 }
  0xad   : > { %v531_v2 = vadd.f32 %v530_v55, %v502_v61 }
  0xae   : > { %v537_v11 = vpop.f32.mrf.mxu2 }
  0xaf   : > { %v550_v5 = vmax.f32 %v531_v2, 0.0 }
  0xb0   : > { %v474_v62 = vpop.f32.mrf.mxu0 }
  0xb1   : > { %v503_v63 = vpop.f32.mrf.mxu1  ;;  %v475_v0 = vadd.f32 %v879_v56, %v474_v62 }
  0xb3   : > { %v504_v3 = vadd.f32 %v503_v63, %v475_v0 }
  0xb5   : > { %v533_v4 = vadd.f32 %v532_v57, %v504_v3 }
  0xb6   : > { %v540_v19 = vpop.f32.mrf.mxu2 }
  0xb7   : > { %v551_v6 = vmax.f32 %v533_v4, 0.0 }
  0xb8   : > { %v477_v7 = vpop.f32.mrf.mxu0 }
  0xb9   : > { %v506_v8 = vpop.f32.mrf.mxu1  ;;  %v558_v9 = vpack.c.bf16 %v551_v6, %v550_v5  ;;  %v478_v10 = vadd.f32 %v879_v56, %v477_v7 }
  0xbb   : > { %832 = vmatmul.msk.bf16.vlgmr.msra.gmra.mxu3 %vm574_vm1, %v558_v9  ;;  %v507_v12 = vadd.f32 %v506_v8, %v478_v10 }
  0xbd   : > { %v536_v16 = vadd.f32 %v535_v1, %v507_v12 }
  0xbe   : > { %v542_v27 = vpop.f32.mrf.mxu2 }
  0xbf   : > { %v552_v20 = vmax.f32 %v536_v16, 0.0 }
  0xc0   : > { %v479_v13 = vpop.f32.mrf.mxu0 }
  0xc1   : > { %v508_v14 = vpop.f32.mrf.mxu1  ;;  %v480_v15 = vadd.f32 %v879_v56, %v479_v13 }
  0xc3   : > { %v509_v17 = vadd.f32 %v508_v14, %v480_v15 }
  0xc5   : > { %v538_v18 = vadd.f32 %v537_v11, %v509_v17 }
  0xc6   : > { %v545_v39 = vpop.f32.mrf.mxu2 }
  0xc7   : > { %v553_v21 = vmax.f32 %v538_v18, 0.0 }
  0xc8   : > { %v482_v22 = vpop.f32.mrf.mxu0 }
  0xc9   : > { %v511_v23 = vpop.f32.mrf.mxu1  ;;  %v559_v24 = vpack.c.bf16 %v553_v21, %v552_v20  ;;  %v483_v25 = vadd.f32 %v879_v56, %v482_v22 }
  0xcb   : > { %833 = vmatmul.msk.bf16.gmra.mxu3 %vm574_vm1, %v559_v24  ;;  %v512_v26 = vadd.f32 %v511_v23, %v483_v25 }
  0xcd   : > { %v541_v31 = vadd.f32 %v540_v19, %v512_v26 }
  0xce   : > { %v547_v47 = vpop.f32.mrf.mxu2 }
  0xcf   : > { %v554_v34 = vmax.f32 %v541_v31, 0.0 }
  0xd0   : > { %v484_v28 = vpop.f32.mrf.mxu0 }
  0xd1   : > { %v513_v29 = vpop.f32.mrf.mxu1  ;;  %v485_v30 = vadd.f32 %v879_v56, %v484_v28 }
  0xd3   : > { %v514_v32 = vadd.f32 %v513_v29, %v485_v30 }
  0xd5   : > { %v543_v33 = vadd.f32 %v542_v27, %v514_v32 }
  0xd7   : > { %v555_v35 = vmax.f32 %v543_v33, 0.0 }
  0xd8   : > { %v487_v36 = vpop.f32.mrf.mxu0 }
  0xd9   : > { %v516_v37 = vpop.f32.mrf.mxu1  ;;  %v560_v38 = vpack.c.bf16 %v555_v35, %v554_v34  ;;  %v488_v40 = vadd.f32 %v879_v56, %v487_v36 }
  0xdb   : > { %834 = vmatmul.msk.bf16.gmra.mxu3 %vm574_vm1, %v560_v38  ;;  %v517_v41 = vadd.f32 %v516_v37, %v488_v40 }
  0xdd   : > { %v546_v45 = vadd.f32 %v545_v39, %v517_v41 }
  0xdf   : > { %v556_v49 = vmax.f32 %v546_v45, 0.0 }
  0xe0   : > { %v489_v42 = vpop.f32.mrf.mxu0 }
  0xe1   : > { %v490_v43 = vadd.f32 %v879_v56, %v489_v42  ;;  %v518_v44 = vpop.f32.mrf.mxu1 }
  0xe3   : > { %v519_v46 = vadd.f32 %v518_v44, %v490_v43 }
  0xe5   : > { %v548_v48 = vadd.f32 %v547_v47, %v519_v46 }
  0xe7   : > { %v557_v50 = vmax.f32 %v548_v48, 0.0 }
  0xe9   : > { %v561_v51 = vpack.c.bf16 %v557_v50, %v556_v49 }
  0xeb   : > { %835 = vmatmul.msk.bf16.gmra.mxu3 %vm574_vm1, %v561_v51 }
 0x13e   : > { %v596_v53 = vpop.f32.mrf.mxu3 }
 0x13f   : > { %v597_v54 = vadd.f32 %v880_v52, %v596_v53 }
 0x141   : > { %v616_v55 = vmax.f32 %v597_v54, 0.0 }
 0x143   : > { %v624_v56 = vpack.c.bf16 %v616_v55, %v616_v55 }
 0x145   : > { %633 = vst.msk [vmem:[%s1034_s23] sm:$0xf] %vm632_vm2, %v624_v56 }
 0x146   : > { %v598_v57 = vpop.f32.mrf.mxu3 }
 0x147   : > { %v599_v58 = vadd.f32 %v880_v52, %v598_v57 }
 0x149   : > { %v617_v59 = vmax.f32 %v599_v58, 0.0 }
 0x14b   : > { %v625_v60 = vpack.c.bf16 %v617_v59, %v617_v59 }
 0x14d   : > { %634 = vst.msk [vmem:[%s1034_s23 + $0x4] sm:$0xf] %vm632_vm2, %v625_v60 }
 0x14e   : > { %v601_v61 = vpop.f32.mrf.mxu3 }
 0x14f   : > { %v602_v62 = vadd.f32 %v880_v52, %v601_v61 }
 0x151   : > { %v618_v63 = vmax.f32 %v602_v62, 0.0 }
 0x153   : > { %v626_v0 = vpack.c.bf16 %v618_v63, %v618_v63 }
 0x155   : > { %635 = vst.msk [vmem:[%s1034_s23 + $0x8] sm:$0xf] %vm632_vm2, %v626_v0 }
 0x156   : > { %v603_v1 = vpop.f32.mrf.mxu3 }
 0x157   : > { %v604_v2 = vadd.f32 %v880_v52, %v603_v1 }
 0x159   : > { %v619_v3 = vmax.f32 %v604_v2, 0.0 }
 0x15b   : > { %v627_v4 = vpack.c.bf16 %v619_v3, %v619_v3 }
 0x15d   : > { %636 = vst.msk [vmem:[%s1034_s23 + $0xc] sm:$0xf] %vm632_vm2, %v627_v4 }
 0x15e   : > { %v606_v5 = vpop.f32.mrf.mxu3 }
 0x15f   : > { %v607_v6 = vadd.f32 %v880_v52, %v606_v5 }
 0x161   : > { %v620_v7 = vmax.f32 %v607_v6, 0.0 }
 0x163   : > { %v628_v8 = vpack.c.bf16 %v620_v7, %v620_v7 }
 0x165   : > { %637 = vst.msk [vmem:[%s1034_s23 + $0x10] sm:$0xf] %vm632_vm2, %v628_v8 }
 0x166   : > { %v608_v9 = vpop.f32.mrf.mxu3 }
 0x167   : > { %v609_v10 = vadd.f32 %v880_v52, %v608_v9 }
 0x169   : > { %v621_v11 = vmax.f32 %v609_v10, 0.0 }
 0x16b   : > { %v629_v12 = vpack.c.bf16 %v621_v11, %v621_v11 }
 0x16d   : > { %638 = vst.msk [vmem:[%s1034_s23 + $0x14] sm:$0xf] %vm632_vm2, %v629_v12 }
 0x16e   : > { %v611_v13 = vpop.f32.mrf.mxu3 }
 0x16f   : > { %v612_v14 = vadd.f32 %v880_v52, %v611_v13 }
 0x171   : > { %v622_v15 = vmax.f32 %v612_v14, 0.0 }
 0x173   : > { %v630_v16 = vpack.c.bf16 %v622_v15, %v622_v15 }
 0x175   : > { %639 = vst.msk [vmem:[%s1034_s23 + $0x18] sm:$0xf] %vm632_vm2, %v630_v16 }
 0x176   : > { %v613_v17 = vpop.f32.mrf.mxu3 }
 0x177   : > { %v614_v18 = vadd.f32 %v880_v52, %v613_v17 }
 0x179   : > { %v623_v19 = vmax.f32 %v614_v18, 0.0 }
 0x17b   : > { %v631_v20 = vpack.c.bf16 %v623_v19, %v623_v19 }
 0x17d   : > { %640 = vst.msk [vmem:[%s1034_s23 + $0x1c] sm:$0xf] %vm632_vm2, %v631_v20 }
 0x17e PF: > { %s15_s18 = sadd.s32 1, %s887_s18  }
 0x17f   : > { %p12_p4 = scmp.ge.s32.totalorder %s15_s18, 4  }
 0x181   :  { %14 = sbr.rel (!%p12_p4) target bundleno = 1 (0x1), region = 70 }

// kernel: srflownet_normal_flow.40
= control target key start
LH: loop header
LB: loop body
LE: loop exit
PB: predicated region body
PF: predicated region fallthrough
CT: control target
= control target key end

     0   :  { %s1234_s24 = smov 0   ;;  %s1473_s0 = inlined_call_operand.vmem [shape: bf16[2,64,144], index: 0, kind: input, shape index: {}]   ;;  %s1474_s1 = inlined_call_operand.vmem [shape: bf16[144,24], index: 1, kind: input, shape index: {}]   ;;  %s1475_s2 = inlined_call_operand.vmem [shape: bf16[144,24], index: 2, kind: input, shape index: {}]   ;;  %s1476_s3 = inlined_call_operand.vmem [shape: f32[1,24], index: 3, kind: input, shape index: {}]   ;;  %s1477_s4 = inlined_call_operand.vmem [shape: f32[1,24], index: 4, kind: input, shape index: {}]   ;;  %s1478_s5 = inlined_call_operand.vmem [shape: f32[2,64,24], index: 5, kind: input, shape index: {}]   ;;  %s1479_s6 = inlined_call_operand.vmem [shape: f32[2,64,24], index: 6, kind: output, shape index: {0}]   ;;  %s1480_s7 = inlined_call_operand.vmem [shape: f32[2,1,24], index: 7, kind: output, shape index: {1}]  }
   0x1 LB: > { %s966_s25 = sadd.s32 4294967295, %s1192_s24   ;;  %p970_p0 = scmp.ge.s32.totalorder %s1192_s24, 1  ;;  %s1192_s24 = sphi %s1234_s24, %s18_s24  }
   0x2   : > { %p250_p1 = scmp.lt.s32.totalorder %s1192_s24, 3 }
   0x4   : > { %p251_p2 = pnand %p970_p0, %p250_p1 }
   0x5   : > { %p290_p3 = scmp.lt.s32.totalorder (!%p251_p2), %s966_s25, 1 }
   0x6   : > { %254 = sbr.rel (%p251_p2) target bundleno = 292 (0x124), region = 44 }
   0xb   : > { %v1126_v0 = vld [vmem:[%s1475_s2 + $0x38] sm:$0xff]  ;;  %v1125_v1 = vld [vmem:[%s1475_s2 + $0x30] sm:$0xff]  ;;  %v1127_v2 = vld [vmem:[%s1475_s2 + $0x40] sm:$0xff]  ;;  %s1482_s25 = smov (!%p290_p3, %s966_s25), 1  ;;  %vm429_vm0 = vcmask 130048   ;;  %vm826_vm5 = vcmask 195584  }
   0xc   : > { %576 = vmatpush.bf16.msra.mxu2 %v1126_v0  ;;  %v1117_v3 = vld [vmem:[%s1474_s1 + $0x38] sm:$0xff]  ;;  %612 = vmatpush.bf16.msra.mxu3 %v1127_v2  ;;  %s1257_s11 = sshll.u32 %s1482_s25, 6  ;;  %v1116_v4 = vld [vmem:[%s1474_s1 + $0x30] sm:$0xff]  ;;  %v1124_v5 = vld [vmem:[%s1475_s2 + $0x28] sm:$0xff]  ;;  %s307_s15 = scalar_lea.vmem %s1480_s7, %s1482_s25 }
   0xd   : > { %s1263_s14 = scalar_lea.vmem %s1473_s0, %s1257_s11  ;;  %442 = vmatpush.bf16.msra.mxu0 %v1117_v3  ;;  %v1115_v9 = vld [vmem:[%s1474_s1 + $0x28] sm:$0xff]  ;;  %v1123_v10 = vld [vmem:[%s1475_s2 + $0x20] sm:$0xff]  ;;  %v1122_v11 = vld [vmem:[%s1475_s2 + $0x18] sm:$0xff]  ;;  %s1353_s8 = scalar_lea.vmem %s1478_s5, %s1257_s11 }
   0xe   : > { %v1102_v6 = vld [vmem:[%s1263_s14 + $0x4] sm:$0xf]  ;;  %v981_v7 = vld [vmem:[%s1263_s14 + $0x8] sm:$0xf0]  ;;  %v1121_v13 = vld [vmem:[%s1475_s2 + $0x10] sm:$0xff]  ;;  %s1368_s12 = scalar_lea.vmem %s1479_s6, %s1257_s11 }
   0xf   : > { %v984_v8 = vor.u32 %v1102_v6, %v981_v7  ;;  %v1114_v12 = vld [vmem:[%s1474_s1 + $0x20] sm:$0xff]  ;;  %v1104_v14 = vld [vmem:[%s1263_s14 + $0x14] sm:$0xf]  ;;  %v989_v15 = vld [vmem:[%s1263_s14 + $0x18] sm:$0xf0] }
  0x10   : > { %577 = vmatpush.bf16.msra.mxu2 %v1125_v1  ;;  %v1113_v16 = vld [vmem:[%s1474_s1 + $0x18] sm:$0xff]  ;;  %v992_v17 = vor.u32 %v1104_v14, %v989_v15  ;;  %v1120_v18 = vld [vmem:[%s1475_s2 + $0x8] sm:$0xff]  ;;  %v1112_v19 = vld [vmem:[%s1474_s1 + $0x10] sm:$0xff] }
  0x11   : > { %1085 = vmatmul.msk.bf16.vlgmr.msra.gmra.mxu3 %vm429_vm0, %v984_v8  ;;  %443 = vmatpush.bf16.msra.mxu0 %v1116_v4  ;;  %v1119_v20 = vld [vmem:[%s1475_s2] sm:$0xff]  ;;  %v1103_v22 = vld [vmem:[%s1263_s14 + $0x4] sm:$0xf0]  ;;  %v997_v28 = vld [vmem:[%s1263_s14 + $0x28] sm:$0xf0] }
  0x12   : > { %v979_v21 = vld [vmem:[%s1263_s14] sm:$0xf]  ;;  %v1111_v23 = vld [vmem:[%s1474_s1 + $0x8] sm:$0xff]  ;;  %v1106_v27 = vld [vmem:[%s1263_s14 + $0x24] sm:$0xf] }
  0x13   : > { %v980_v24 = vor.u32 %v1103_v22, %v979_v21  ;;  %v1110_v25 = vld [vmem:[%s1474_s1] sm:$0xff]  ;;  %v1000_v29 = vor.u32 %v1106_v27, %v997_v28  ;;  %v987_v30 = vld [vmem:[%s1263_s14 + $0x10] sm:$0xf]  ;;  %v1105_v31 = vld [vmem:[%s1263_s14 + $0x14] sm:$0xf0] }
  0x14   : > { %578 = vmatpush.bf16.msra.mxu2 %v1124_v5  ;;  %v1118_v26 = vld [vmem:[%s1474_s1 + $0x40] sm:$0xff]  ;;  %v988_v32 = vor.u32 %v1105_v31, %v987_v30  ;;  %v1108_v33 = vld [vmem:[%s1263_s14 + $0x34] sm:$0xf]  ;;  %v1005_v34 = vld [vmem:[%s1263_s14 + $0x38] sm:$0xf0] }
  0x15   : > { %444 = vmatpush.bf16.msra.mxu0 %v1115_v9  ;;  %478 = vmatpush.bf16.msra.mxu1 %v1118_v26  ;;  %v1008_v35 = vor.u32 %v1108_v33, %v1005_v34  ;;  %v995_v36 = vld [vmem:[%s1263_s14 + $0x20] sm:$0xf]  ;;  %v1107_v37 = vld [vmem:[%s1263_s14 + $0x24] sm:$0xf0]  ;;  %v1003_v39 = vld [vmem:[%s1263_s14 + $0x30] sm:$0xf] }
  0x16   : > { %v996_v38 = vor.u32 %v1107_v37, %v995_v36  ;;  %v1109_v40 = vld [vmem:[%s1263_s14 + $0x34] sm:$0xf0]  ;;  %v1334_v43 = vld [vmem:[%s1477_s4] ss:$0 sm:$0xff] }
  0x17   : > { %v1004_v41 = vor.u32 %v1109_v40, %v1003_v39  ;;  %v1342_v1 = vld [vmem:[%s1476_s3] ss:$0 sm:$0xff] }
  0x18   : > { %579 = vmatpush.bf16.msra.mxu2 %v1123_v10  ;;  %1045 = vmatmul.msk.bf16.vlgmr.msra.gmra.mxu1 %vm429_vm0, %v984_v8  ;;  %v802_v21 = vld [vmem:[%s1353_s8] sm:$0xff] }
  0x19   : > { %445 = vmatpush.bf16.msra.mxu0 %v1114_v12 }
  0x1c   : > { %580 = vmatpush.bf16.msra.mxu2 %v1122_v11 }
  0x1d   : > { %446 = vmatpush.bf16.msra.mxu0 %v1113_v16 }
  0x20   : > { %581 = vmatpush.bf16.msra.mxu2 %v1121_v13 }
  0x21   : > { %1086 = vmatmul.msk.bf16.gmra.mxu3 %vm429_vm0, %v992_v17  ;;  %447 = vmatpush.bf16.msra.mxu0 %v1112_v19 }
  0x24   : > { %582 = vmatpush.bf16.msra.mxu2 %v1120_v18 }
  0x25   : > { %448 = vmatpush.bf16.msra.mxu0 %v1111_v23 }
  0x28   : > { %583 = vmatpush.bf16.msra.mxu2 %v1119_v20  ;;  %1046 = vmatmul.msk.bf16.gmra.mxu1 %vm429_vm0, %v992_v17 }
  0x29   : > { %449 = vmatpush.bf16.msra.mxu0 %v1110_v25 }
  0x2b   : > { %584 = vmatmul.bf16.vlgmr.msra.gmra.mxu2 %v980_v24 }
  0x2c   : > { %450 = vmatmul.bf16.vlgmr.msra.gmra.mxu0 %v980_v24 }
  0x31   : > { %1087 = vmatmul.msk.bf16.gmra.mxu3 %vm429_vm0, %v1000_v29 }
  0x38   : > { %1047 = vmatmul.msk.bf16.gmra.mxu1 %vm429_vm0, %v1000_v29 }
  0x3b   : > { %589 = vmatmul.bf16.gmra.mxu2 %v988_v32 }
  0x3c   : > { %455 = vmatmul.bf16.gmra.mxu0 %v988_v32 }
  0x41   : > { %1088 = vmatmul.msk.bf16.gmra.mxu3 %vm429_vm0, %v1008_v35 }
  0x48   : > { %1048 = vmatmul.msk.bf16.gmra.mxu1 %vm429_vm0, %v1008_v35 }
  0x4b   : > { %594 = vmatmul.bf16.gmra.mxu2 %v996_v38 }
  0x4c   : > { %460 = vmatmul.bf16.gmra.mxu0 %v996_v38 }
  0x5b   : > { %599 = vmatmul.bf16.gmra.mxu2 %v1004_v41 }
  0x5c   : > { %465 = vmatmul.bf16.gmra.mxu0 %v1004_v41 }
  0x94   : > { %v614_v42 = vpop.f32.mrf.mxu3 }
  0x95   : > { %v480_v55 = vpop.f32.mrf.mxu1 }
  0x9c   : > { %v616_v44 = vpop.f32.mrf.mxu3 }
  0x9d   : > { %v482_v3 = vpop.f32.mrf.mxu1 }
  0xa4   : > { %v619_v52 = vpop.f32.mrf.mxu3 }
  0xa5   : > { %v485_v26 = vpop.f32.mrf.mxu1 }
  0xa9   : > { %v451_v50 = vpop.f32.mrf.mxu0 }
  0xaa   : > { %v452_v9 = vadd.f32 %v1342_v1, %v451_v50 }
  0xac   : > { %v621_v63 = vpop.f32.mrf.mxu3  ;;  %v481_v16 = vadd.f32 %v480_v55, %v452_v9  ;;  %v804_v9 = vld [vmem:[%s1353_s8 + $0x10] sm:$0xff] }
  0xae   : > { %v585_v45 = vpop.f32.mrf.mxu2  ;;  %v810_v30 = vadd.f32 %v802_v21, %v481_v16 }
  0xaf   : > { %v586_v46 = vadd.f32 %v1334_v43, %v585_v45 }
  0xb1   : > { %v615_v47 = vadd.f32 %v614_v42, %v586_v46  ;;  %v453_v62 = vpop.f32.mrf.mxu0  ;;  %v803_v42 = vld [vmem:[%s1353_s8 + $0x8] sm:$0xff] }
  0xb2   : > { %v454_v25 = vadd.f32 %v1342_v1, %v453_v62 }
  0xb3   : > { %v634_v48 = vadd.f32 2.0, %v615_v47 }
  0xb4   : > { %v624_v15 = vpop.f32.mrf.mxu3  ;;  %v483_v38 = vadd.f32 %v482_v3, %v454_v25 }
  0xb5   : > { %v1089_v49 = vmul.f32 -1.442695, %v634_v48 }
  0xb6   : > { %v587_v51 = vpop.f32.mrf.mxu2 }
  0xb7   : > { %1138 = vpow2.f32 %v1089_v49  ;;  %v588_v53 = vadd.f32 %v1334_v43, %v587_v51 }
  0xb9   : > { %v617_v54 = vadd.f32 %v616_v44, %v588_v53  ;;  %v456_v14 = vpop.f32.mrf.mxu0 }
  0xbb   : > { %v635_v56 = vadd.f32 2.0, %v617_v54 }
  0xbc   : > { %v626_v48 = vpop.f32.mrf.mxu3 }
  0xbd   : > { %v1139_v57 = vpop.eup %1138  ;;  %v1090_v58 = vmul.f32 -1.442695, %v635_v56 }
  0xbe   : > { %v666_v59 = vadd.f32 1.0, %v1139_v57  ;;  %v590_v60 = vpop.f32.mrf.mxu2  ;;  %v457_v57 = vadd.f32 %v1342_v1, %v456_v14 }
  0xbf   : > { %1140 = vpow2.f32 %v1090_v58  ;;  %v591_v61 = vadd.f32 %v1334_v43, %v590_v60 }
  0xc0   : > { %1142 = vrcp.f32 %v666_v59  ;;  %v683_v17 = vand.u32 2147483647, %v666_v59  ;;  %v685_v18 = vand.u32 2147483648, %v666_v59  ;;  %vm679_vm2 = vweird.f32 %v666_v59 }
  0xc1   : > { %v620_v0 = vadd.f32 %v619_v52, %v591_v61  ;;  %v458_v47 = vpop.f32.mrf.mxu0  ;;  %v811_v52 = vadd.f32 %v803_v42, %v483_v38  ;;  %v487_v61 = vpop.f32.mrf.mxu1  ;;  %v486_v3 = vadd.f32 %v485_v26, %v457_v57 }
  0xc2   : > { %vm684_vm4 = vcmp.eq.f32.partialorder %v683_v17, 8.507059e+37  ;;  %v686_v29 = vor.u32 1.1754944e-38, %v685_v18 }
  0xc3   : > { %v636_v2 = vadd.f32 2.0, %v620_v0 }
  0xc4   : > { %v629_v17 = vpop.f32.mrf.mxu3 }
  0xc5   : > { %v1141_v4 = vpop.eup %1140  ;;  %v1091_v5 = vmul.f32 -1.442695, %v636_v2 }
  0xc6   : > { %v1143_v6 = vpop.eup %1142  ;;  %v1344_v7 = vadd.f32 1.0, %v1141_v4  ;;  %v592_v8 = vpop.f32.mrf.mxu2 }
  0xc7   : > { %1144 = vpow2.f32 %v1091_v5  ;;  %v593_v10 = vadd.f32 %v1334_v43, %v592_v8  ;;  %v675_v11 = vmul.f32 %v1143_v6, %v666_v59  ;;  %vm680_vm1 = vweird.f32 %v1143_v6 }
  0xc8   : > { %1146 = vrcp.f32 %v1344_v7  ;;  %vm681_vm3 = vmor %vm679_vm2, %vm680_vm1  ;;  %v698_v40 = vand.u32 2147483647, %v1344_v7  ;;  %v700_v41 = vand.u32 2147483648, %v1344_v7  ;;  %vm694_vm7 = vweird.f32 %v1344_v7 }
  0xc9   : > { %v622_v12 = vadd.f32 %v621_v63, %v593_v10  ;;  %v676_v13 = vsub.f32 1.0, %v675_v11  ;;  %v461_v14 = vpop.f32.mrf.mxu0 }
  0xca   : > { %vm699_vm9 = vcmp.eq.f32.partialorder %v698_v40, 8.507059e+37  ;;  %v701_v55 = vor.u32 1.1754944e-38, %v700_v41 }
  0xcb   : > { %v637_v19 = vadd.f32 2.0, %v622_v12  ;;  %v677_v20 = vmul.f32 %v1143_v6, %v676_v13  ;;  %v459_v13 = vadd.f32 %v1342_v1, %v458_v47 }
  0xcd   : > { %v1145_v22 = vpop.eup %1144  ;;  %v1092_v23 = vmul.f32 -1.442695, %v637_v19  ;;  %v678_v24 = vadd.f32 %v1143_v6, %v677_v20  ;;  %v812_v19 = vadd.f32 %v804_v9, %v486_v3 }
  0xce   : > { %v1147_v27 = vpop.eup %1146  ;;  %v1357_v28 = vadd.f32 1.0, %v1145_v22  ;;  %v595_v31 = vpop.f32.mrf.mxu2 }
  0xcf   : > { %1148 = vpow2.f32 %v1092_v23  ;;  %v682_v32 = vsel %vm681_vm3, %v1143_v6, %v678_v24  ;;  %v596_v33 = vadd.f32 %v1334_v43, %v595_v31  ;;  %v690_v34 = vmul.f32 %v1147_v27, %v1344_v7 }
  0xd0   : > { %1150 = vrcp.f32 %v1357_v28  ;;  %v687_v35 = vsel %vm684_vm4, %v686_v29, %v682_v32  ;;  %vm695_vm6 = vweird.f32 %v1147_v27  ;;  %v713_v4 = vand.u32 2147483647, %v1357_v28  ;;  %v490_v29 = vpop.f32.mrf.mxu1  ;;  %v805_v32 = vld [vmem:[%s1353_s8 + $0x18] sm:$0xff] }
  0xd1   : > { %v1362_v36 = vadd.f32 0.0001, %v687_v35  ;;  %v625_v37 = vadd.f32 %v624_v15, %v596_v33  ;;  %v691_v39 = vsub.f32 1.0, %v690_v34  ;;  %vm696_vm8 = vmor %vm694_vm7, %vm695_vm6  ;;  %v715_v5 = vand.u32 2147483648, %v1357_v28 }
  0xd2   : > { %vm709_vm11 = vweird.f32 %v1357_v28  ;;  %vm714_vm13 = vcmp.eq.f32.partialorder %v713_v4, 8.507059e+37 }
  0xd3   : > { %v818_v44 = vmul.f32 %v810_v30, %v1362_v36  ;;  %v638_v45 = vadd.f32 2.0, %v625_v37  ;;  %v692_v46 = vmul.f32 %v1147_v27, %v691_v39  ;;  %v716_v18 = vor.u32 1.1754944e-38, %v715_v5 }
  0xd5   : > { %v1149_v49 = vpop.eup %1148  ;;  %827 = vst.msk [vmem:[%s1368_s12] sm:$0xff] %vm826_vm5, %v818_v44  ;;  %v1093_v50 = vmul.f32 -1.442695, %v638_v45  ;;  %v693_v51 = vadd.f32 %v1147_v27, %v692_v46  ;;  %v462_v46 = vadd.f32 %v1342_v1, %v461_v14 }
  0xd6   : > { %v1151_v53 = vpop.eup %1150  ;;  %v1377_v54 = vadd.f32 1.0, %v1149_v49  ;;  %v597_v56 = vpop.f32.mrf.mxu2 }
  0xd7   : > { %1152 = vpow2.f32 %v1093_v50  ;;  %v697_v58 = vsel %vm696_vm8, %v1147_v27, %v693_v51  ;;  %v598_v59 = vadd.f32 %v1334_v43, %v597_v56  ;;  %v705_v60 = vmul.f32 %v1151_v53, %v1357_v28  ;;  %v463_v50 = vpop.f32.mrf.mxu0  ;;  %v631_v51 = vpop.f32.mrf.mxu3 }
  0xd8   : > { %1154 = vrcp.f32 %v1377_v54  ;;  %v702_v62 = vsel %vm699_vm9, %v701_v55, %v697_v58  ;;  %vm710_vm10 = vweird.f32 %v1151_v53  ;;  %v488_v27 = vadd.f32 %v487_v61, %v459_v13  ;;  %v806_v61 = vld [vmem:[%s1353_s8 + $0x20] sm:$0xff] }
  0xd9   : > { %v1383_v63 = vadd.f32 0.0001, %v702_v62  ;;  %v627_v0 = vadd.f32 %v626_v48, %v598_v59  ;;  %v706_v2 = vsub.f32 1.0, %v705_v60  ;;  %vm711_vm12 = vmor %vm709_vm11, %vm710_vm10  ;;  %v728_v30 = vand.u32 2147483647, %v1377_v54  ;;  %v492_v62 = vpop.f32.mrf.mxu1 }
  0xda   : > { %v730_v31 = vand.u32 2147483648, %v1377_v54  ;;  %vm724_vm15 = vweird.f32 %v1377_v54  ;;  %v813_v40 = vadd.f32 %v805_v32, %v488_v27  ;;  %v491_v56 = vadd.f32 %v490_v29, %v462_v46 }
  0xdb   : > { %v819_v6 = vmul.f32 %v811_v52, %v1383_v63  ;;  %v639_v7 = vadd.f32 2.0, %v627_v0  ;;  %v707_v8 = vmul.f32 %v1151_v53, %v706_v2  ;;  %vm729_vm1 = vcmp.eq.f32.partialorder %v728_v30, 8.507059e+37 }
  0xdc   : > { %v731_v44 = vor.u32 1.1754944e-38, %v730_v31 }
  0xdd   : > { %v1153_v10 = vpop.eup %1152  ;;  %828 = vst.msk [vmem:[%s1368_s12 + $0x8] sm:$0xff] %vm826_vm5, %v819_v6  ;;  %v1094_v11 = vmul.f32 -1.442695, %v639_v7  ;;  %v708_v12 = vadd.f32 %v1151_v53, %v707_v8  ;;  %v814_v7 = vadd.f32 %v806_v61, %v491_v56  ;;  %v464_v8 = vadd.f32 %v1342_v1, %v463_v50 }
  0xde   : > { %v1155_v15 = vpop.eup %1154  ;;  %v1393_v16 = vadd.f32 1.0, %v1153_v10  ;;  %v600_v20 = vpop.f32.mrf.mxu2 }
  0xdf   : > { %1156 = vpow2.f32 %v1094_v11  ;;  %v712_v21 = vsel %vm711_vm12, %v1151_v53, %v708_v12  ;;  %v601_v22 = vadd.f32 %v1334_v43, %v600_v20  ;;  %v720_v23 = vmul.f32 %v1155_v15, %v1377_v54  ;;  %v466_v14 = vpop.f32.mrf.mxu0  ;;  %v807_v20 = vld [vmem:[%s1353_s8 + $0x28] sm:$0xff] }
  0xe0   : > { %1158 = vrcp.f32 %v1393_v16  ;;  %v717_v24 = vsel %vm714_vm13, %v716_v18, %v712_v21  ;;  %vm725_vm14 = vweird.f32 %v1155_v15  ;;  %v743_v57 = vand.u32 2147483647, %v1393_v16 }
  0xe1   : > { %v1398_v25 = vadd.f32 0.0001, %v717_v24  ;;  %v630_v26 = vadd.f32 %v629_v17, %v601_v22  ;;  %v721_v28 = vsub.f32 1.0, %v720_v23  ;;  %vm726_vm0 = vmor %vm724_vm15, %vm725_vm14  ;;  %v745_v58 = vand.u32 2147483648, %v1393_v16  ;;  %v495_v23 = vpop.f32.mrf.mxu1 }
  0xe2   : > { %vm739_vm3 = vweird.f32 %v1393_v16  ;;  %vm744_vm6 = vcmp.eq.f32.partialorder %v743_v57, 8.507059e+37 }
  0xe3   : > { %v820_v33 = vmul.f32 %v812_v19, %v1398_v25  ;;  %v640_v34 = vadd.f32 2.0, %v630_v26  ;;  %v722_v35 = vmul.f32 %v1155_v15, %v721_v28  ;;  %v746_v6 = vor.u32 1.1754944e-38, %v745_v58 }
  0xe4   : > { %v467_v28 = vadd.f32 %v1342_v1, %v466_v14 }
  0xe5   : > { %v1157_v37 = vpop.eup %1156  ;;  %829 = vst.msk [vmem:[%s1368_s12 + $0x10] sm:$0xff] %vm826_vm5, %v820_v33  ;;  %v1095_v38 = vmul.f32 -1.442695, %v640_v34  ;;  %v723_v39 = vadd.f32 %v1155_v15, %v722_v35 }
  0xe6   : > { %v1159_v41 = vpop.eup %1158  ;;  %v1407_v42 = vadd.f32 1.0, %v1157_v37  ;;  %v602_v45 = vpop.f32.mrf.mxu2  ;;  %v496_v34 = vadd.f32 %v495_v23, %v467_v28 }
  0xe7   : > { %1160 = vpow2.f32 %v1095_v38  ;;  %v727_v47 = vsel %vm726_vm0, %v1155_v15, %v723_v39  ;;  %v603_v48 = vadd.f32 %v1334_v43, %v602_v45  ;;  %v735_v49 = vmul.f32 %v1159_v41, %v1393_v16 }
  0xe8   : > { %1162 = vrcp.f32 %v1407_v42  ;;  %v732_v52 = vsel %vm729_vm1, %v731_v44, %v727_v47  ;;  %vm740_vm2 = vweird.f32 %v1159_v41  ;;  %v493_v15 = vadd.f32 %v492_v62, %v464_v8  ;;  %v809_v62 = vld [vmem:[%s1353_s8 + $0x38] sm:$0xff] }
  0xe9   : > { %v1413_v53 = vadd.f32 0.0001, %v732_v52  ;;  %v632_v54 = vadd.f32 %v631_v51, %v603_v48  ;;  %v736_v55 = vsub.f32 1.0, %v735_v49  ;;  %vm741_vm4 = vmor %vm739_vm3, %vm740_vm2  ;;  %v760_v16 = vand.u32 2147483648, %v1407_v42  ;;  %v497_v49 = vpop.f32.mrf.mxu1 }
  0xea   : > { %v758_v19 = vand.u32 2147483647, %v1407_v42  ;;  %vm754_vm8 = vweird.f32 %v1407_v42  ;;  %v815_v30 = vadd.f32 %v807_v20, %v493_v15  ;;  %vm872_vm3 = vcmask 188416  }
  0xeb   : > { %v821_v43 = vmul.f32 %v813_v40, %v1413_v53  ;;  %v641_v59 = vadd.f32 2.0, %v632_v54  ;;  %v737_v60 = vmul.f32 %v1159_v41, %v736_v55  ;;  %v761_v27 = vor.u32 1.1754944e-38, %v760_v16  ;;  %v808_v40 = vld [vmem:[%s1353_s8 + $0x30] sm:$0xff] }
  0xec   : > { %vm759_vm10 = vcmp.eq.f32.partialorder %v758_v19, 8.507059e+37  ;;  %v816_v45 = vadd.f32 %v808_v40, %v496_v34 }
  0xed   : > { %v1161_v0 = vpop.eup %1160  ;;  %830 = vst.msk [vmem:[%s1368_s12 + $0x18] sm:$0xff] %vm826_vm5, %v821_v43  ;;  %v1096_v2 = vmul.f32 -1.442695, %v641_v59  ;;  %v738_v3 = vadd.f32 %v1159_v41, %v737_v60 }
  0xee   : > { %v1163_v4 = vpop.eup %1162  ;;  %v1422_v5 = vadd.f32 1.0, %v1161_v0 }
  0xef   : > { %1164 = vpow2.f32 %v1096_v2  ;;  %v742_v9 = vsel %vm741_vm4, %v1159_v41, %v738_v3  ;;  %v750_v10 = vmul.f32 %v1163_v4, %v1407_v42  ;;  %vm755_vm7 = vweird.f32 %v1163_v4  ;;  %v468_v41 = vpop.f32.mrf.mxu0 }
  0xf0   : > { %1166 = vrcp.f32 %v1422_v5  ;;  %v747_v11 = vsel %vm744_vm6, %v746_v6, %v742_v9  ;;  %vm756_vm9 = vmor %vm754_vm8, %vm755_vm7  ;;  %v775_v35 = vand.u32 2147483648, %v1422_v5  ;;  %v773_v39 = vand.u32 2147483647, %v1422_v5 }
  0xf1   : > { %v798_v12 = vadd.f32 0.0001, %v747_v11  ;;  %v751_v13 = vsub.f32 1.0, %v750_v10  ;;  %1168 = vlog2.f32 %v1362_v36  ;;  %vm769_vm12 = vweird.f32 %v1422_v5 }
  0xf2   : > { %v469_v46 = vadd.f32 %v1342_v1, %v468_v41  ;;  %vm774_vm14 = vcmp.eq.f32.partialorder %v773_v39, 8.507059e+37 }
  0xf3   : > { %v822_v17 = vmul.f32 %v814_v7, %v798_v12  ;;  %v752_v18 = vmul.f32 %v1163_v4, %v751_v13 }
  0xf4   : > { %v498_v56 = vadd.f32 %v497_v49, %v469_v46 }
  0xf5   : > { %v1165_v21 = vpop.eup %1164  ;;  %831 = vst.msk [vmem:[%s1368_s12 + $0x20] sm:$0xff] %vm826_vm5, %v822_v17  ;;  %v753_v22 = vadd.f32 %v1163_v4, %v752_v18 }
  0xf6   : > { %v1167_v24 = vpop.eup %1166  ;;  %v1434_v26 = vadd.f32 1.0, %v1165_v21  ;;  %v817_v8 = vadd.f32 %v809_v62, %v498_v56 }
  0xf7   : > { %v757_v29 = vsel %vm756_vm9, %v1163_v4, %v753_v22  ;;  %v765_v31 = vmul.f32 %v1167_v24, %v1422_v5  ;;  %vm770_vm11 = vweird.f32 %v1167_v24  ;;  %v1169_v42 = vpop.eup %1168 }
  0xf8   : > { %1170 = vrcp.f32 %v1434_v26  ;;  %v762_v32 = vsel %vm759_vm10, %v761_v27, %v757_v29  ;;  %vm771_vm13 = vmor %vm769_vm12, %vm770_vm11  ;;  %v788_v57 = vand.u32 2147483647, %v1434_v26  ;;  %v790_v1 = vand.u32 2147483648, %v1434_v26 }
  0xf9   : > { %1172 = vlog2.f32 %v1383_v63  ;;  %v799_v33 = vadd.f32 0.0001, %v762_v32  ;;  %v766_v36 = vsub.f32 1.0, %v765_v31  ;;  %v836_v60 = vmul.f32 0.6931472, %v1169_v42 }
  0xfa   : > { %1174 = vlog2.f32 %v1398_v25  ;;  %v776_v25 = vor.u32 1.1754944e-38, %v775_v35  ;;  %vm784_vm0 = vweird.f32 %v1434_v26  ;;  %v791_v5 = vor.u32 1.1754944e-38, %v790_v1 }
  0xfb   : > { %v823_v37 = vmul.f32 %v815_v30, %v799_v33  ;;  %v767_v38 = vmul.f32 %v1167_v24, %v766_v36  ;;  %1176 = vlog2.f32 %v1413_v53  ;;  %vm789_vm2 = vcmp.eq.f32.partialorder %v788_v57, 8.507059e+37 }
  0xfc   : > { %1178 = vlog2.f32 %v798_v12  ;;  %v851_v9 = vsel %vm826_vm5, %v836_v60, 0.0 }
  0xfd   : > { %832 = vst.msk [vmem:[%s1368_s12 + $0x28] sm:$0xff] %vm826_vm5, %v823_v37  ;;  %v768_v63 = vadd.f32 %v1167_v24, %v767_v38  ;;  %1180 = vlog2.f32 %v799_v33 }
  0xfe   : > { %v1171_v44 = vpop.eup %1170 }
  0xff   : > { %v1173_v47 = vpop.eup %1172  ;;  %v772_v48 = vsel %vm771_vm13, %v1167_v24, %v768_v63  ;;  %v780_v50 = vmul.f32 %v1171_v44, %v1434_v26  ;;  %vm785_vm15 = vweird.f32 %v1171_v44 }
 0x100   : > { %v1175_v51 = vpop.eup %1174  ;;  %v777_v52 = vsel %vm774_vm14, %v776_v25, %v772_v48  ;;  %v838_v55 = vmul.f32 0.6931472, %v1173_v47  ;;  %vm786_vm1 = vmor %vm784_vm0, %vm785_vm15 }
 0x101   : > { %v800_v53 = vadd.f32 0.0001, %v777_v52  ;;  %v781_v54 = vsub.f32 1.0, %v780_v50  ;;  %v1177_v58 = vpop.eup %1176  ;;  %v840_v61 = vmul.f32 0.6931472, %v1175_v51 }
 0x102   : > { %v1179_v0 = vpop.eup %1178  ;;  %v852_v3 = vsel %vm826_vm5, %v838_v55, 0.0  ;;  %v842_v4 = vmul.f32 0.6931472, %v1177_v58 }
 0x103   : > { %v824_v43 = vmul.f32 %v816_v45, %v800_v53  ;;  %1182 = vlog2.f32 %v800_v53  ;;  %v782_v59 = vmul.f32 %v1171_v44, %v781_v54  ;;  %v1181_v6 = vpop.eup %1180  ;;  %v854_v10 = vsel %vm826_vm5, %v840_v61, 0.0 }
 0x104   : > { %v844_v11 = vmul.f32 0.6931472, %v1179_v0  ;;  %v853_v14 = vadd.f32 %v852_v3, %v851_v9  ;;  %v856_v16 = vsel %vm826_vm5, %v842_v4, 0.0  ;;  %v846_v17 = vmul.f32 0.6931472, %v1181_v6 }
 0x105   : > { %833 = vst.msk [vmem:[%s1368_s12 + $0x30] sm:$0xff] %vm826_vm5, %v824_v43  ;;  %v783_v2 = vadd.f32 %v1171_v44, %v782_v59 }
 0x106   : > { %v855_v18 = vadd.f32 %v854_v10, %v853_v14  ;;  %v858_v20 = vsel %vm826_vm5, %v844_v11, 0.0  ;;  %v860_v23 = vsel %vm826_vm5, %v846_v17, 0.0 }
 0x107   : > { %v787_v7 = vsel %vm786_vm1, %v1171_v44, %v783_v2 }
 0x108   : > { %v792_v12 = vsel %vm789_vm2, %v791_v5, %v787_v7  ;;  %v857_v22 = vadd.f32 %v856_v16, %v855_v18 }
 0x109   : > { %v1183_v13 = vpop.eup %1182  ;;  %v801_v15 = vadd.f32 0.0001, %v792_v12 }
 0x10a   : > { %v848_v21 = vmul.f32 0.6931472, %v1183_v13  ;;  %v859_v24 = vadd.f32 %v858_v20, %v857_v22 }
 0x10b   : > { %v825_v19 = vmul.f32 %v817_v8, %v801_v15  ;;  %1184 = vlog2.f32 %v801_v15 }
 0x10c   : > { %v862_v26 = vsel %vm826_vm5, %v848_v21, 0.0  ;;  %v861_v28 = vadd.f32 %v860_v23, %v859_v24 }
 0x10d   : > { %834 = vst.msk [vmem:[%s1368_s12 + $0x38] sm:$0xff] %vm826_vm5, %v825_v19 }
 0x10e   : > { %v863_v30 = vadd.f32 %v862_v26, %v861_v28 }
 0x111   : > { %v1185_v27 = vpop.eup %1184 }
 0x112   : > { %v850_v29 = vmul.f32 0.6931472, %v1185_v27 }
 0x114   : > { %v864_v31 = vsel %vm826_vm5, %v850_v29, 0.0 }
 0x115   : > { %v865_v32 = vadd.f32 %v864_v31, %v863_v30 }
 0x117   : > { %v866_v33 = vrot.slane %v865_v32, 4 }
 0x119   : > { %v867_v36 = vadd.f32 %v866_v33, %v865_v32 }
 0x11b   : > { %v868_v34 = vrot.slane %v867_v36, 2 }
 0x11d   : > { %v869_v35 = vadd.f32 %v868_v34, %v867_v36 }
 0x11f   : > { %v870_v37 = vrot.slane %v869_v35, 1 }
 0x121   : > { %v871_v38 = vadd.f32 %v870_v37, %v869_v35 }
 0x123   : > { %873 = vst.msk [vmem:[%s307_s15] sm:$0x1] %vm872_vm3, %v871_v38 }
 0x124 PF: > { %s18_s24 = sadd.s32 1, %s1192_s24  }
 0x125   : > { %p15_p4 = scmp.ge.s32.totalorder %s18_s24, 4  }
 0x127   :  { %17 = sbr.rel (!%p15_p4) target bundleno = 1 (0x1), region = 89 }

</bundles_post_ra>
